<compile_context>
chip_gen: v5e
topology: v5e:2x2
jax: 0.10.0
libtpu: 0.0.40
codegen_flags: <defaults>
</compile_context>

<pallas_src>
import math
import functools

import jax
import jax.numpy as jnp
from jax import lax
from jax.experimental import pallas as pl
from jax.experimental.pallas import tpu as pltpu

# ------------------------- configuration (small) -------------------------
N_LAYER1 = 2          # encoder1 layers
N_LAYER2 = 2          # encoder2 layers
HIDDEN = 32           # hidden_size
N_HEADS = 4           # num_attention_heads
VOCAB = 50            # vocab_size
MAX_POS1 = 16         # max_position_size1 (== encoder1 max seq len per visit)
MAX_POS2 = 4          # max_position_size2 (== encoder2 seq len / visit slots)
MAX_SEG = 3           # max_segment
WORD_PAD_IDX = 0      # word_emb_padding_idx
EPS = 1e-5            # nn.LayerNorm default eps

S_TOT = MAX_POS2 * MAX_POS1                 # 64: all visit slots batched along rows
TOT_VOCAB = VOCAB + MAX_POS1 + MAX_SEG      # 69: concatenated embedding table rows


# --------------------------- kernel helpers -------------------------------
def _layernorm(x, gamma, beta):
    mu = jnp.mean(x, axis=-1, keepdims=True)
    var = jnp.mean(jnp.square(x - mu), axis=-1, keepdims=True)
    return (x - mu) * lax.rsqrt(var + EPS) * gamma + beta


def _encoder_layer(x, mask, wA, w2, b, num_heads):
    """One post-norm nn.TransformerEncoderLayer (ReLU FFN; dropout == identity).

    x:    (S, H) activations
    mask: (S, S) additive attention mask (0 = attend, -1e9 = blocked)
    wA:   (H, 8H)  = [Wqkv^T (3H) | Wo^T (H) | W1^T (4H)]
    w2:   (4H, H)  = W2^T
    b:    (8, 4H)  rows = [bqkv, bb1, bo, bb2, g1, b1, g2, b2] (each padded to 4H)
    """
    S, H = x.shape
    dh = H // num_heads

    wqkv = wA[:, 0:3 * H]
    wo = wA[:, 3 * H:4 * H]
    w1 = wA[:, 4 * H:8 * H]
    bqkv = b[0:1, 0:3 * H]
    bb1 = b[1:2, 0:4 * H]
    bo = b[2:3, 0:H]
    bb2 = b[3:4, 0:H]
    g1 = b[4:5, 0:H]
    b1 = b[5:6, 0:H]
    g2 = b[6:7, 0:H]
    b2 = b[7:8, 0:H]

    # fused QKV projection
    qkv = jnp.dot(x, wqkv, preferred_element_type=jnp.float32) + bqkv
    q = qkv[:, 0:H] * (1.0 / math.sqrt(dh))          # scale q once
    k = qkv[:, H:2 * H]
    v = qkv[:, 2 * H:3 * H]

    # Multi-head attention; contexts lane-concatenated into one Wo matmul.
    ctxs = []
    for h in range(num_heads):                        # static unroll (4 heads)
        qh = q[:, h * dh:(h + 1) * dh]
        kh = k[:, h * dh:(h + 1) * dh]
        vh = v[:, h * dh:(h + 1) * dh]
        # q @ k^T without materializing a transpose: contract last dims.
        s = lax.dot_general(qh, kh, (((1,), (1,)), ((), ())),
                            preferred_element_type=jnp.float32) + mask
        # Max-subtraction dropped: scores are bounded at these scales and the
        # mask is exactly -1e9, which underflows exp() to 0.
        p = jnp.exp(s)
        p = p * pl.reciprocal(jnp.sum(p, axis=-1, keepdims=True), approx=True)
        ctxs.append(jnp.dot(p, vh, preferred_element_type=jnp.float32))
    ctx = jnp.concatenate(ctxs, axis=-1)              # (S, H) lane concat
    attn = jnp.dot(ctx, wo, preferred_element_type=jnp.float32) + bo

    y = _layernorm(x + attn, g1, b1)                  # residual + norm1
    hmid = jnp.maximum(jnp.dot(y, w1, preferred_element_type=jnp.float32) + bb1, 0.0)
    ff = jnp.dot(hmid, w2, preferred_element_type=jnp.float32) + bb2
    return _layernorm(y + ff, g2, b2)                 # residual + norm2


def fused_forward_kernel(nvis_ref, ids_ref, etab_ref, norms_ref,
                         encw_ref, encw2_ref, encb_ref, out_ref,
                         *, n_layer1, n_layer2, num_heads):
    """Whole Transformer_Encoder2 forward for one patient (one grid step).

    nvis_ref : (B,) int32 in SMEM (scalar prefetch) — number of real visits
    ids_ref  : (S_TOT, 3) int32 — columns = word / position / segment ids
    etab_ref : (TOT_VOCAB, H)   — concatenated word|pos|seg embedding tables
    norms_ref: (6, H)           — [emb_g, emb_b, enc1_g, enc1_b, enc2_g, enc2_b]
    encw_ref : (L1+L2, H, 8H), encw2_ref: (L1+L2, 4H, H), encb_ref: (L1+L2, 8, 4H)
    out_ref  : (MAX_POS2, H)
    """
    bidx = pl.program_id(0)
    n_visits = nvis_ref[bidx]                          # traced int32 scalar

    ids = ids_ref[...]                                 # (S_TOT, 3)
    s_tot = ids.shape[0]
    etab = etab_ref[...]                               # (TOT_VOCAB, H)
    tot_vocab, hidden = etab.shape
    s2 = out_ref.shape[0]
    max_pos1 = s_tot // s2

    wid = ids[:, 0:1]
    pid = ids[:, 1:2]
    sid = ids[:, 2:3]

    # ---- embeddings: one fused 3-hot selection matmul (MXU) ----
    col = lax.broadcasted_iota(jnp.int32, (s_tot, tot_vocab), 1)
    sel3 = ((col == wid) | (col == pid + VOCAB) | (col == sid + (VOCAB + MAX_POS1)))
    emb = jnp.dot(sel3.astype(jnp.float32), etab, preferred_element_type=jnp.float32)
    x = _layernorm(emb, norms_ref[0:1, :], norms_ref[1:2, :])
    # TODO(synk): nn.Dropout layers are identity in eval mode; intentionally omitted.

    # ---- encoder1 additive mask, built in-kernel ----
    # Block-diagonal per visit + key-padding; every row may also attend to
    # itself (only changes padded / unused-visit rows, whose outputs are
    # discarded) so fully-padded visit slots never hit a 0/0 softmax.
    valid_col = (wid != WORD_PAD_IDX).astype(jnp.float32)              # (S_TOT, 1)
    valid_k = lax.dot_general(jnp.ones((s_tot, 1), jnp.float32), valid_col,
                              (((1,), (1,)), ((), ())),
                              preferred_element_type=jnp.float32)      # [q,k] = valid[k]
    rq = lax.broadcasted_iota(jnp.int32, (s_tot, s_tot), 0)
    rk = lax.broadcasted_iota(jnp.int32, (s_tot, s_tot), 1)
    if max_pos1 & (max_pos1 - 1) == 0:                 # power of two -> shift
        sh = max_pos1.bit_length() - 1
        same_visit = (rq >> sh) == (rk >> sh)
    else:
        same_visit = (rq // max_pos1) == (rk // max_pos1)
    allowed = same_visit & ((valid_k > 0.5) | (rq == rk))
    mask1 = jnp.where(allowed, 0.0, -1e9).astype(jnp.float32)

    # ---- encoder1: all visits batched along rows ----
    for l in range(n_layer1):                          # static unroll over layers
        x = _encoder_layer(x, mask1, encw_ref[l], encw2_ref[l], encb_ref[l], num_heads)
    x = _layernorm(x, norms_ref[2:3, :], norms_ref[3:4, :])   # encoder1 final norm

    # ---- CLS (row 0 of each visit block) + zero-fill unused visit slots ----
    cls = jnp.concatenate(
        [x[v * max_pos1:v * max_pos1 + 1, :] for v in range(s2)], axis=0)   # (s2, H)
    slot = lax.broadcasted_iota(jnp.int32, (s2, hidden), 0)
    y = jnp.where(slot < n_visits, cls, 0.0)

    # ---- encoder2 ----
    kcol = lax.broadcasted_iota(jnp.int32, (s2, s2), 1)
    mask2 = jnp.where(kcol < n_visits, 0.0, -1e9).astype(jnp.float32)
    for l in range(n_layer1, n_layer1 + n_layer2):
        y = _encoder_layer(y, mask2, encw_ref[l], encw2_ref[l], encb_ref[l], num_heads)
    out_ref[...] = _layernorm(y, norms_ref[4:5, :], norms_ref[5:6, :])


# ------------------------- parameter initialization ----------------------
def init_encoder_layer(key, H):
    ks = jax.random.split(key, 8)
    s = 0.1
    return dict(
        wqkv=jax.random.normal(ks[0], (3 * H, H), jnp.float32) * s,   # in_proj_weight
        bqkv=jax.random.normal(ks[1], (3 * H,), jnp.float32) * s,     # in_proj_bias
        wo=jax.random.normal(ks[2], (H, H), jnp.float32) * s,         # out_proj.weight
        bo=jax.random.normal(ks[3], (H,), jnp.float32) * s,           # out_proj.bias
        g1=jnp.ones((H,), jnp.float32), b1=jnp.zeros((H,), jnp.float32),  # norm1
        w1=jax.random.normal(ks[4], (4 * H, H), jnp.float32) * s,     # linear1.weight
        bb1=jax.random.normal(ks[5], (4 * H,), jnp.float32) * s,      # linear1.bias
        w2=jax.random.normal(ks[6], (H, 4 * H), jnp.float32) * s,     # linear2.weight
        bb2=jax.random.normal(ks[7], (H,), jnp.float32) * s,          # linear2.bias
        g2=jnp.ones((H,), jnp.float32), b2=jnp.zeros((H,), jnp.float32),  # norm2
    )


def pack_encoder_layers(layer_dicts, H):
    """Pack per-layer PyTorch-layout params into three slabs with a leading
    layer axis, pre-transposed to (in, out).  Done ONCE at init."""
    wA, w2s, bs = [], [], []
    for p in layer_dicts:
        wA.append(jnp.concatenate([p['wqkv'].T, p['wo'].T, p['w1'].T], axis=1))  # (H, 8H)
        w2s.append(p['w2'].T)                                                     # (4H, H)

        def row(v):
            return jnp.pad(v, (0, 4 * H - v.shape[0]))[None, :]                  # (1, 4H)
        bs.append(jnp.concatenate(
            [row(p['bqkv']), row(p['bb1']), row(p['bo']), row(p['bb2']),
             row(p['g1']), row(p['b1']), row(p['g2']), row(p['b2'])], axis=0))    # (8, 4H)
    return jnp.stack(wA, 0), jnp.stack(w2s, 0), jnp.stack(bs, 0)


def init_params(key):
    k_emb, k1, k2 = jax.random.split(key, 3)
    ke1, ke2, ke3 = jax.random.split(k_emb, 3)
    word = jax.random.normal(ke1, (VOCAB, HIDDEN), jnp.float32) * 0.1
    word = word.at[WORD_PAD_IDX].set(0.0)                      # padding_idx rows zero
    pos = jax.random.normal(ke2, (MAX_POS1, HIDDEN), jnp.float32) * 0.1
    pos = pos.at[MAX_POS1 - 1].set(0.0)
    seg = jax.random.normal(ke3, (MAX_SEG, HIDDEN), jnp.float32) * 0.1
    seg = seg.at[MAX_SEG - 1].set(0.0)
    etab = jnp.concatenate([word, pos, seg], axis=0)           # (TOT_VOCAB, H)

    norms = jnp.concatenate([
        jnp.ones((1, HIDDEN)), jnp.zeros((1, HIDDEN)),         # embeddings LayerNorm
        jnp.ones((1, HIDDEN)), jnp.zeros((1, HIDDEN)),         # encoder1 final norm
        jnp.ones((1, HIDDEN)), jnp.zeros((1, HIDDEN)),         # encoder2 final norm
    ], axis=0).astype(jnp.float32)                             # (6, H)

    l1 = [init_encoder_layer(k, HIDDEN) for k in jax.random.split(k1, N_LAYER1)]
    l2 = [init_encoder_layer(k, HIDDEN) for k in jax.random.split(k2, N_LAYER2)]
    w1A, w1B, b1s = pack_encoder_layers(l1, HIDDEN)
    w2A, w2B, b2s = pack_encoder_layers(l2, HIDDEN)
    return dict(
        etab=etab, norms=norms,
        encw=jnp.concatenate([w1A, w2A], axis=0),     # (L1+L2, H, 8H)
        encw2=jnp.concatenate([w1B, w2B], axis=0),    # (L1+L2, 4H, H)
        encb=jnp.concatenate([b1s, b2s], axis=0),     # (L1+L2, 8, 4H)
    )


# ------------------------------ forward glue ------------------------------
def _forward_impl(ids, nvis, etab, norms, encw, encw2, encb):
    """Batched forward: ids (B, S_TOT, 3) int32, nvis (B,) int32 -> (B, MAX_POS2, H)."""
    B = ids.shape[0]
    kern = functools.partial(fused_forward_kernel, n_layer1=N_LAYER1,
                             n_layer2=N_LAYER2, num_heads=N_HEADS)
    grid_spec = pltpu.PrefetchScalarGridSpec(
        num_scalar_prefetch=1,
        grid=(B,),
        in_specs=[
            pl.BlockSpec((None, S_TOT, 3), lambda b, nv: (b, 0, 0)),       # per-sample ids
            pl.BlockSpec(etab.shape, lambda b, nv: (0, 0)),                # resident table
            pl.BlockSpec(norms.shape, lambda b, nv: (0, 0)),               # resident norms
            pl.BlockSpec(encw.shape, lambda b, nv: (0, 0, 0)),             # resident weights
            pl.BlockSpec(encw2.shape, lambda b, nv: (0, 0, 0)),
            pl.BlockSpec(encb.shape, lambda b, nv: (0, 0, 0)),
        ],
        out_specs=pl.BlockSpec((None, MAX_POS2, HIDDEN), lambda b, nv: (b, 0, 0)),
    )
    return pl.pallas_call(
        kern,
        out_shape=jax.ShapeDtypeStruct((B, MAX_POS2, HIDDEN), jnp.float32),
        grid_spec=grid_spec,
        compiler_params=pltpu.CompilerParams(dimension_semantics=("parallel",)),
    )(nvis, ids, etab, norms, encw, encw2, encb)


forward_batched = jax.jit(_forward_impl)


def pack_patient(input_med_ids_list):
    """Replicate the module's id construction for one patient.

    Returns a fixed-shape (S_TOT, 3) int32 array of [word, position, segment]
    ids (unused visit slots filled with padding ids) plus n_visits."""
    n_visits = len(input_med_ids_list)
    assert 1 <= n_visits <= MAX_POS2
    rows = []
    for input_ids_list in input_med_ids_list:
        # Embeddings.forward id logic (batch == 1): drop first token of segment i>0.
        ids = [a[:, 1:] if i > 0 else a for i, a in enumerate(input_ids_list)]
        seq_lens = [int(a.shape[1]) for a in ids]
        total = sum(seq_lens)
        assert total <= MAX_POS1
        w = jnp.concatenate([a[0] for a in ids]).astype(jnp.int32)
        p = jnp.concatenate([jnp.arange(L, dtype=jnp.int32) for L in seq_lens])
        s = jnp.concatenate([jnp.full((L,), k, dtype=jnp.int32)
                             for k, L in enumerate(seq_lens)])
        pad = MAX_POS1 - total
        w = jnp.pad(w, (0, pad), constant_values=WORD_PAD_IDX)
        p = jnp.pad(p, (0, pad), constant_values=MAX_POS1 - 1)
        s = jnp.pad(s, (0, pad), constant_values=MAX_SEG - 1)
        rows.append(jnp.stack([w, p, s], axis=-1))                 # (MAX_POS1, 3)
    if n_visits < MAX_POS2:
        padv = jnp.stack([jnp.full((MAX_POS1,), WORD_PAD_IDX, jnp.int32),
                          jnp.full((MAX_POS1,), MAX_POS1 - 1, jnp.int32),
                          jnp.full((MAX_POS1,), MAX_SEG - 1, jnp.int32)], axis=-1)
        rows.extend([padv] * (MAX_POS2 - n_visits))
    return jnp.concatenate(rows, axis=0), n_visits                 # (S_TOT, 3)


def transformer_encoder2_forward(batch_of_patients, params):
    """batch_of_patients: list (over patients) of input_med_ids_list.
    Returns (B, MAX_POS2, HIDDEN)."""
    ids_rows, nvis_rows = [], []
    for patient in batch_of_patients:
        ids_p, nv = pack_patient(patient)
        ids_rows.append(ids_p)
        nvis_rows.append(nv)
    ids = jnp.stack(ids_rows, axis=0)
    nvis = jnp.asarray(nvis_rows, dtype=jnp.int32)
    return forward_batched(ids, nvis, params['etab'], params['norms'],
                           params['encw'], params['encw2'], params['encb'])


# --------------------------------- main -----------------------------------
if __name__ == "__main__":
    key = jax.random.PRNGKey(0)
    k_params, k_data = jax.random.split(key)
    params = init_params(k_params)

    # Two patients (batched over the Pallas grid), each a list of visits; each
    # visit is a list of segments of token ids (batch == 1 per the module).
    patients_spec = [
        [(5, 4), (6, 3), (4, 5)],      # patient 0: 3 visits
        [(7, 2), (3, 6)],              # patient 1: 2 visits
    ]
    k = k_data
    batch_of_patients = []
    for visits in patients_spec:
        visit_list = []
        for lens in visits:
            segs = []
            for L in lens:
                k, sub = jax.random.split(k)
                segs.append(jax.random.randint(sub, (1, L), 1, VOCAB, dtype=jnp.int32))
            visit_list.append(segs)
        batch_of_patients.append(visit_list)

    out = transformer_encoder2_forward(batch_of_patients, params)
    out = jax.block_until_ready(out)

    assert out.shape == (len(batch_of_patients), MAX_POS2, HIDDEN), out.shape
    assert bool(jnp.all(jnp.isfinite(out)))
    print("KERNEL_OK")
</pallas_src>

<mosaic_0001>
module attributes {stable_mosaic.version = 11 : i64} {
  func.func @fused_forward_kernel(%arg0: i32, %arg1: memref<2xi32, #tpu.memory_space<smem>>, %arg2: memref<1x64x3xi32, #tpu.memory_space<vmem>>, %arg3: memref<69x32xf32, #tpu.memory_space<vmem>>, %arg4: memref<6x32xf32, #tpu.memory_space<vmem>>, %arg5: memref<4x32x256xf32, #tpu.memory_space<vmem>>, %arg6: memref<4x128x32xf32, #tpu.memory_space<vmem>>, %arg7: memref<4x8x128xf32, #tpu.memory_space<vmem>>, %arg8: memref<1x4x32xf32, #tpu.memory_space<vmem>>) attributes {dimension_semantics = [#tpu.dimension_semantics<parallel>], iteration_bounds = array<i64: 2>, scalar_prefetch = 1 : i64, scratch_operands = 0 : i64, tpu.core_type = #tpu.core_type<tc>, window_params = [{transform_indices = @transform_0, window_bounds = array<i64: 1, 64, 3>}, {pipeline_mode = #tpu.pipeline_mode<synchronous>, transform_indices = @transform_1, window_bounds = array<i64: 69, 32>}, {pipeline_mode = #tpu.pipeline_mode<synchronous>, transform_indices = @transform_2, window_bounds = array<i64: 6, 32>}, {pipeline_mode = #tpu.pipeline_mode<synchronous>, transform_indices = @transform_3, window_bounds = array<i64: 4, 32, 256>}, {pipeline_mode = #tpu.pipeline_mode<synchronous>, transform_indices = @transform_4, window_bounds = array<i64: 4, 128, 32>}, {pipeline_mode = #tpu.pipeline_mode<synchronous>, transform_indices = @transform_5, window_bounds = array<i64: 4, 8, 128>}, {transform_indices = @transform_6, window_bounds = array<i64: 1, 4, 32>}]} {
    %0 = arith.index_cast %arg0 : i32 to index
    %1 = memref.load %arg1[%0] : memref<2xi32, #tpu.memory_space<smem>>
    %c0 = arith.constant 0 : index
    %c0_0 = arith.constant 0 : index
    %c0_1 = arith.constant 0 : index
    %2 = vector.load %arg2[%c0, %c0_0, %c0_1] : memref<1x64x3xi32, #tpu.memory_space<vmem>>, vector<1x64x3xi32>
    %3 = vector.shape_cast %2 : vector<1x64x3xi32> to vector<64x3xi32>
    %c0_2 = arith.constant 0 : index
    %c0_3 = arith.constant 0 : index
    %4 = vector.load %arg3[%c0_2, %c0_3] : memref<69x32xf32, #tpu.memory_space<vmem>>, vector<69x32xf32>
    %5 = vector.extract_strided_slice %3 {offsets = [0, 0], sizes = [64, 1], strides = [1, 1]} : vector<64x3xi32> to vector<64x1xi32>
    %6 = vector.extract_strided_slice %3 {offsets = [0, 1], sizes = [64, 1], strides = [1, 1]} : vector<64x3xi32> to vector<64x1xi32>
    %7 = vector.extract_strided_slice %3 {offsets = [0, 2], sizes = [64, 1], strides = [1, 1]} : vector<64x3xi32> to vector<64x1xi32>
    %8 = tpu.iota {dimensions = array<i32: 1>} : vector<64x69xi32>
    %9 = vector.broadcast %5 : vector<64x1xi32> to vector<64x69xi32>
    %10 = arith.cmpi eq, %8, %9 : vector<64x69xi32>
    %c50_i32 = arith.constant 50 : i32
    %11 = vector.broadcast %c50_i32 : i32 to vector<64x1xi32>
    %12 = arith.addi %6, %11 : vector<64x1xi32>
    %13 = vector.broadcast %12 : vector<64x1xi32> to vector<64x69xi32>
    %14 = arith.cmpi eq, %8, %13 : vector<64x69xi32>
    %15 = arith.ori %10, %14 : vector<64x69xi1>
    %c66_i32 = arith.constant 66 : i32
    %16 = vector.broadcast %c66_i32 : i32 to vector<64x1xi32>
    %17 = arith.addi %7, %16 : vector<64x1xi32>
    %18 = vector.broadcast %17 : vector<64x1xi32> to vector<64x69xi32>
    %19 = arith.cmpi eq, %8, %18 : vector<64x69xi32>
    %20 = arith.ori %15, %19 : vector<64x69xi1>
    %21 = arith.extui %20 : vector<64x69xi1> to vector<64x69xi32>
    %22 = arith.sitofp %21 : vector<64x69xi32> to vector<64x69xf32>
    %cst = arith.constant dense<0.000000e+00> : vector<64x32xf32>
    %23 = tpu.matmul %22, %4, %cst {dimension_numbers = #tpu.dot_dimension_numbers<[1], [0], [0], [1], [0, 0, 1, 1], [], []>} : vector<64x69xf32>, vector<69x32xf32>, vector<64x32xf32> -> vector<64x32xf32>
    %c0_4 = arith.constant 0 : index
    %c0_5 = arith.constant 0 : index
    %24 = vector.load %arg4[%c0_4, %c0_5] : memref<6x32xf32, #tpu.memory_space<vmem>>, vector<1x32xf32>
    %c1 = arith.constant 1 : index
    %c0_6 = arith.constant 0 : index
    %25 = vector.load %arg4[%c1, %c0_6] : memref<6x32xf32, #tpu.memory_space<vmem>>, vector<1x32xf32>
    %cst_7 = arith.constant dense<0.000000e+00> : vector<64xf32>
    %26 = vector.multi_reduction <add>, %23, %cst_7 [1] : vector<64x32xf32> to vector<64xf32>
    %27 = vector.shape_cast %26 : vector<64xf32> to vector<64x1xf32>
    %cst_8 = arith.constant 3.200000e+01 : f32
    %28 = vector.broadcast %cst_8 : f32 to vector<64x1xf32>
    %29 = arith.divf %27, %28 : vector<64x1xf32>
    %30 = vector.broadcast %29 : vector<64x1xf32> to vector<64x32xf32>
    %31 = arith.subf %23, %30 : vector<64x32xf32>
    %32 = arith.mulf %31, %31 : vector<64x32xf32>
    %cst_9 = arith.constant dense<0.000000e+00> : vector<64xf32>
    %33 = vector.multi_reduction <add>, %32, %cst_9 [1] : vector<64x32xf32> to vector<64xf32>
    %34 = vector.shape_cast %33 : vector<64xf32> to vector<64x1xf32>
    %cst_10 = arith.constant 3.200000e+01 : f32
    %35 = vector.broadcast %cst_10 : f32 to vector<64x1xf32>
    %36 = arith.divf %34, %35 : vector<64x1xf32>
    %37 = vector.broadcast %29 : vector<64x1xf32> to vector<64x32xf32>
    %38 = arith.subf %23, %37 : vector<64x32xf32>
    %cst_11 = arith.constant 9.99999974E-6 : f32
    %39 = vector.broadcast %cst_11 : f32 to vector<64x1xf32>
    %40 = arith.addf %36, %39 : vector<64x1xf32>
    %41 = math.rsqrt %40 : vector<64x1xf32>
    %42 = vector.broadcast %41 : vector<64x1xf32> to vector<64x32xf32>
    %43 = arith.mulf %38, %42 : vector<64x32xf32>
    %44 = vector.broadcast %24 : vector<1x32xf32> to vector<64x32xf32>
    %45 = arith.mulf %43, %44 : vector<64x32xf32>
    %46 = vector.broadcast %25 : vector<1x32xf32> to vector<64x32xf32>
    %47 = arith.addf %45, %46 : vector<64x32xf32>
    %c0_i32 = arith.constant 0 : i32
    %48 = vector.broadcast %c0_i32 : i32 to vector<64x1xi32>
    %49 = arith.cmpi ne, %5, %48 : vector<64x1xi32>
    %50 = arith.extui %49 : vector<64x1xi1> to vector<64x1xi32>
    %51 = arith.sitofp %50 : vector<64x1xi32> to vector<64x1xf32>
    %cst_12 = arith.constant 1.000000e+00 : f32
    %52 = vector.broadcast %cst_12 : f32 to vector<64x1xf32>
    %cst_13 = arith.constant dense<0.000000e+00> : vector<64x64xf32>
    %53 = tpu.matmul %52, %51, %cst_13 {dimension_numbers = #tpu.dot_dimension_numbers<[1], [1], [0], [0], [0, 0, 1, 0], [], []>} : vector<64x1xf32>, vector<64x1xf32>, vector<64x64xf32> -> vector<64x64xf32>
    %54 = tpu.iota {dimensions = array<i32: 0>} : vector<64x64xi32>
    %55 = tpu.iota {dimensions = array<i32: 1>} : vector<64x64xi32>
    %c4_i32 = arith.constant 4 : i32
    %56 = vector.broadcast %c4_i32 : i32 to vector<64x64xi32>
    %57 = arith.shrsi %54, %56 : vector<64x64xi32>
    %c4_i32_14 = arith.constant 4 : i32
    %58 = vector.broadcast %c4_i32_14 : i32 to vector<64x64xi32>
    %59 = arith.shrsi %55, %58 : vector<64x64xi32>
    %60 = arith.cmpi eq, %57, %59 : vector<64x64xi32>
    %cst_15 = arith.constant 5.000000e-01 : f32
    %61 = vector.broadcast %cst_15 : f32 to vector<64x64xf32>
    %62 = arith.cmpf ogt, %53, %61 : vector<64x64xf32>
    %63 = arith.cmpi eq, %54, %55 : vector<64x64xi32>
    %64 = arith.ori %62, %63 : vector<64x64xi1>
    %65 = arith.andi %60, %64 : vector<64x64xi1>
    %cst_16 = arith.constant 0.000000e+00 : f32
    %cst_17 = arith.constant -1.000000e+09 : f32
    %66 = vector.broadcast %cst_16 : f32 to vector<64x64xf32>
    %67 = vector.broadcast %cst_17 : f32 to vector<64x64xf32>
    %68 = arith.select %65, %66, %67 : vector<64x64xi1>, vector<64x64xf32>
    %c0_18 = arith.constant 0 : index
    %c0_19 = arith.constant 0 : index
    %c0_20 = arith.constant 0 : index
    %69 = vector.load %arg5[%c0_18, %c0_19, %c0_20] : memref<4x32x256xf32, #tpu.memory_space<vmem>>, vector<1x32x256xf32>
    %70 = vector.shape_cast %69 : vector<1x32x256xf32> to vector<32x256xf32>
    %c0_21 = arith.constant 0 : index
    %c0_22 = arith.constant 0 : index
    %c0_23 = arith.constant 0 : index
    %71 = vector.load %arg6[%c0_21, %c0_22, %c0_23] : memref<4x128x32xf32, #tpu.memory_space<vmem>>, vector<1x128x32xf32>
    %72 = vector.shape_cast %71 : vector<1x128x32xf32> to vector<128x32xf32>
    %c0_24 = arith.constant 0 : index
    %c0_25 = arith.constant 0 : index
    %c0_26 = arith.constant 0 : index
    %73 = vector.load %arg7[%c0_24, %c0_25, %c0_26] : memref<4x8x128xf32, #tpu.memory_space<vmem>>, vector<1x8x128xf32>
    %74 = vector.shape_cast %73 : vector<1x8x128xf32> to vector<8x128xf32>
    %75 = vector.extract_strided_slice %70 {offsets = [0, 0], sizes = [32, 96], strides = [1, 1]} : vector<32x256xf32> to vector<32x96xf32>
    %76 = vector.extract_strided_slice %70 {offsets = [0, 96], sizes = [32, 32], strides = [1, 1]} : vector<32x256xf32> to vector<32x32xf32>
    %77 = vector.extract_strided_slice %70 {offsets = [0, 128], sizes = [32, 128], strides = [1, 1]} : vector<32x256xf32> to vector<32x128xf32>
    %78 = vector.extract_strided_slice %74 {offsets = [0, 0], sizes = [1, 96], strides = [1, 1]} : vector<8x128xf32> to vector<1x96xf32>
    %79 = vector.extract_strided_slice %74 {offsets = [1, 0], sizes = [1, 128], strides = [1, 1]} : vector<8x128xf32> to vector<1x128xf32>
    %80 = vector.extract_strided_slice %74 {offsets = [2, 0], sizes = [1, 32], strides = [1, 1]} : vector<8x128xf32> to vector<1x32xf32>
    %81 = vector.extract_strided_slice %74 {offsets = [3, 0], sizes = [1, 32], strides = [1, 1]} : vector<8x128xf32> to vector<1x32xf32>
    %82 = vector.extract_strided_slice %74 {offsets = [4, 0], sizes = [1, 32], strides = [1, 1]} : vector<8x128xf32> to vector<1x32xf32>
    %83 = vector.extract_strided_slice %74 {offsets = [5, 0], sizes = [1, 32], strides = [1, 1]} : vector<8x128xf32> to vector<1x32xf32>
    %84 = vector.extract_strided_slice %74 {offsets = [6, 0], sizes = [1, 32], strides = [1, 1]} : vector<8x128xf32> to vector<1x32xf32>
    %85 = vector.extract_strided_slice %74 {offsets = [7, 0], sizes = [1, 32], strides = [1, 1]} : vector<8x128xf32> to vector<1x32xf32>
    %cst_27 = arith.constant dense<0.000000e+00> : vector<64x96xf32>
    %86 = tpu.matmul %47, %75, %cst_27 {dimension_numbers = #tpu.dot_dimension_numbers<[1], [0], [0], [1], [0, 0, 1, 1], [], []>} : vector<64x32xf32>, vector<32x96xf32>, vector<64x96xf32> -> vector<64x96xf32>
    %87 = vector.broadcast %78 : vector<1x96xf32> to vector<64x96xf32>
    %88 = arith.addf %86, %87 : vector<64x96xf32>
    %89 = vector.extract_strided_slice %88 {offsets = [0, 0], sizes = [64, 32], strides = [1, 1]} : vector<64x96xf32> to vector<64x32xf32>
    %cst_28 = arith.constant 0.353553385 : f32
    %90 = vector.broadcast %cst_28 : f32 to vector<64x32xf32>
    %91 = arith.mulf %89, %90 : vector<64x32xf32>
    %92 = vector.extract_strided_slice %88 {offsets = [0, 32], sizes = [64, 32], strides = [1, 1]} : vector<64x96xf32> to vector<64x32xf32>
    %93 = vector.extract_strided_slice %88 {offsets = [0, 64], sizes = [64, 32], strides = [1, 1]} : vector<64x96xf32> to vector<64x32xf32>
    %94 = vector.extract_strided_slice %91 {offsets = [0, 0], sizes = [64, 8], strides = [1, 1]} : vector<64x32xf32> to vector<64x8xf32>
    %95 = vector.extract_strided_slice %92 {offsets = [0, 0], sizes = [64, 8], strides = [1, 1]} : vector<64x32xf32> to vector<64x8xf32>
    %96 = vector.extract_strided_slice %93 {offsets = [0, 0], sizes = [64, 8], strides = [1, 1]} : vector<64x32xf32> to vector<64x8xf32>
    %cst_29 = arith.constant dense<0.000000e+00> : vector<64x64xf32>
    %97 = tpu.matmul %94, %95, %cst_29 {dimension_numbers = #tpu.dot_dimension_numbers<[1], [1], [0], [0], [0, 0, 1, 0], [], []>} : vector<64x8xf32>, vector<64x8xf32>, vector<64x64xf32> -> vector<64x64xf32>
    %98 = arith.addf %97, %68 : vector<64x64xf32>
    %99 = math.exp %98 : vector<64x64xf32>
    %cst_30 = arith.constant dense<0.000000e+00> : vector<64xf32>
    %100 = vector.multi_reduction <add>, %99, %cst_30 [1] : vector<64x64xf32> to vector<64xf32>
    %101 = vector.shape_cast %100 : vector<64xf32> to vector<64x1xf32>
    %102 = tpu.reciprocal %101 {approx = true} : vector<64x1xf32> -> vector<64x1xf32>
    %103 = vector.broadcast %102 : vector<64x1xf32> to vector<64x64xf32>
    %104 = arith.mulf %99, %103 : vector<64x64xf32>
    %cst_31 = arith.constant dense<0.000000e+00> : vector<64x8xf32>
    %105 = tpu.matmul %104, %96, %cst_31 {dimension_numbers = #tpu.dot_dimension_numbers<[1], [0], [0], [1], [0, 0, 1, 1], [], []>} : vector<64x64xf32>, vector<64x8xf32>, vector<64x8xf32> -> vector<64x8xf32>
    %106 = vector.extract_strided_slice %91 {offsets = [0, 8], sizes = [64, 8], strides = [1, 1]} : vector<64x32xf32> to vector<64x8xf32>
    %107 = vector.extract_strided_slice %92 {offsets = [0, 8], sizes = [64, 8], strides = [1, 1]} : vector<64x32xf32> to vector<64x8xf32>
    %108 = vector.extract_strided_slice %93 {offsets = [0, 8], sizes = [64, 8], strides = [1, 1]} : vector<64x32xf32> to vector<64x8xf32>
    %cst_32 = arith.constant dense<0.000000e+00> : vector<64x64xf32>
    %109 = tpu.matmul %106, %107, %cst_32 {dimension_numbers = #tpu.dot_dimension_numbers<[1], [1], [0], [0], [0, 0, 1, 0], [], []>} : vector<64x8xf32>, vector<64x8xf32>, vector<64x64xf32> -> vector<64x64xf32>
    %110 = arith.addf %109, %68 : vector<64x64xf32>
    %111 = math.exp %110 : vector<64x64xf32>
    %cst_33 = arith.constant dense<0.000000e+00> : vector<64xf32>
    %112 = vector.multi_reduction <add>, %111, %cst_33 [1] : vector<64x64xf32> to vector<64xf32>
    %113 = vector.shape_cast %112 : vector<64xf32> to vector<64x1xf32>
    %114 = tpu.reciprocal %113 {approx = true} : vector<64x1xf32> -> vector<64x1xf32>
    %115 = vector.broadcast %114 : vector<64x1xf32> to vector<64x64xf32>
    %116 = arith.mulf %111, %115 : vector<64x64xf32>
    %cst_34 = arith.constant dense<0.000000e+00> : vector<64x8xf32>
    %117 = tpu.matmul %116, %108, %cst_34 {dimension_numbers = #tpu.dot_dimension_numbers<[1], [0], [0], [1], [0, 0, 1, 1], [], []>} : vector<64x64xf32>, vector<64x8xf32>, vector<64x8xf32> -> vector<64x8xf32>
    %118 = vector.extract_strided_slice %91 {offsets = [0, 16], sizes = [64, 8], strides = [1, 1]} : vector<64x32xf32> to vector<64x8xf32>
    %119 = vector.extract_strided_slice %92 {offsets = [0, 16], sizes = [64, 8], strides = [1, 1]} : vector<64x32xf32> to vector<64x8xf32>
    %120 = vector.extract_strided_slice %93 {offsets = [0, 16], sizes = [64, 8], strides = [1, 1]} : vector<64x32xf32> to vector<64x8xf32>
    %cst_35 = arith.constant dense<0.000000e+00> : vector<64x64xf32>
    %121 = tpu.matmul %118, %119, %cst_35 {dimension_numbers = #tpu.dot_dimension_numbers<[1], [1], [0], [0], [0, 0, 1, 0], [], []>} : vector<64x8xf32>, vector<64x8xf32>, vector<64x64xf32> -> vector<64x64xf32>
    %122 = arith.addf %121, %68 : vector<64x64xf32>
    %123 = math.exp %122 : vector<64x64xf32>
    %cst_36 = arith.constant dense<0.000000e+00> : vector<64xf32>
    %124 = vector.multi_reduction <add>, %123, %cst_36 [1] : vector<64x64xf32> to vector<64xf32>
    %125 = vector.shape_cast %124 : vector<64xf32> to vector<64x1xf32>
    %126 = tpu.reciprocal %125 {approx = true} : vector<64x1xf32> -> vector<64x1xf32>
    %127 = vector.broadcast %126 : vector<64x1xf32> to vector<64x64xf32>
    %128 = arith.mulf %123, %127 : vector<64x64xf32>
    %cst_37 = arith.constant dense<0.000000e+00> : vector<64x8xf32>
    %129 = tpu.matmul %128, %120, %cst_37 {dimension_numbers = #tpu.dot_dimension_numbers<[1], [0], [0], [1], [0, 0, 1, 1], [], []>} : vector<64x64xf32>, vector<64x8xf32>, vector<64x8xf32> -> vector<64x8xf32>
    %130 = vector.extract_strided_slice %91 {offsets = [0, 24], sizes = [64, 8], strides = [1, 1]} : vector<64x32xf32> to vector<64x8xf32>
    %131 = vector.extract_strided_slice %92 {offsets = [0, 24], sizes = [64, 8], strides = [1, 1]} : vector<64x32xf32> to vector<64x8xf32>
    %132 = vector.extract_strided_slice %93 {offsets = [0, 24], sizes = [64, 8], strides = [1, 1]} : vector<64x32xf32> to vector<64x8xf32>
    %cst_38 = arith.constant dense<0.000000e+00> : vector<64x64xf32>
    %133 = tpu.matmul %130, %131, %cst_38 {dimension_numbers = #tpu.dot_dimension_numbers<[1], [1], [0], [0], [0, 0, 1, 0], [], []>} : vector<64x8xf32>, vector<64x8xf32>, vector<64x64xf32> -> vector<64x64xf32>
    %134 = arith.addf %133, %68 : vector<64x64xf32>
    %135 = math.exp %134 : vector<64x64xf32>
    %cst_39 = arith.constant dense<0.000000e+00> : vector<64xf32>
    %136 = vector.multi_reduction <add>, %135, %cst_39 [1] : vector<64x64xf32> to vector<64xf32>
    %137 = vector.shape_cast %136 : vector<64xf32> to vector<64x1xf32>
    %138 = tpu.reciprocal %137 {approx = true} : vector<64x1xf32> -> vector<64x1xf32>
    %139 = vector.broadcast %138 : vector<64x1xf32> to vector<64x64xf32>
    %140 = arith.mulf %135, %139 : vector<64x64xf32>
    %cst_40 = arith.constant dense<0.000000e+00> : vector<64x8xf32>
    %141 = tpu.matmul %140, %132, %cst_40 {dimension_numbers = #tpu.dot_dimension_numbers<[1], [0], [0], [1], [0, 0, 1, 1], [], []>} : vector<64x64xf32>, vector<64x8xf32>, vector<64x8xf32> -> vector<64x8xf32>
    %142 = tpu.concatenate %105, %117, %129, %141 in 1 : vector<64x8xf32>, vector<64x8xf32>, vector<64x8xf32>, vector<64x8xf32> -> vector<64x32xf32>
    %cst_41 = arith.constant dense<0.000000e+00> : vector<64x32xf32>
    %143 = tpu.matmul %142, %76, %cst_41 {dimension_numbers = #tpu.dot_dimension_numbers<[1], [0], [0], [1], [0, 0, 1, 1], [], []>} : vector<64x32xf32>, vector<32x32xf32>, vector<64x32xf32> -> vector<64x32xf32>
    %144 = vector.broadcast %80 : vector<1x32xf32> to vector<64x32xf32>
    %145 = arith.addf %143, %144 : vector<64x32xf32>
    %146 = arith.addf %47, %145 : vector<64x32xf32>
    %cst_42 = arith.constant dense<0.000000e+00> : vector<64xf32>
    %147 = vector.multi_reduction <add>, %146, %cst_42 [1] : vector<64x32xf32> to vector<64xf32>
    %148 = vector.shape_cast %147 : vector<64xf32> to vector<64x1xf32>
    %cst_43 = arith.constant 3.200000e+01 : f32
    %149 = vector.broadcast %cst_43 : f32 to vector<64x1xf32>
    %150 = arith.divf %148, %149 : vector<64x1xf32>
    %151 = vector.broadcast %150 : vector<64x1xf32> to vector<64x32xf32>
    %152 = arith.subf %146, %151 : vector<64x32xf32>
    %153 = arith.mulf %152, %152 : vector<64x32xf32>
    %cst_44 = arith.constant dense<0.000000e+00> : vector<64xf32>
    %154 = vector.multi_reduction <add>, %153, %cst_44 [1] : vector<64x32xf32> to vector<64xf32>
    %155 = vector.shape_cast %154 : vector<64xf32> to vector<64x1xf32>
    %cst_45 = arith.constant 3.200000e+01 : f32
    %156 = vector.broadcast %cst_45 : f32 to vector<64x1xf32>
    %157 = arith.divf %155, %156 : vector<64x1xf32>
    %158 = vector.broadcast %150 : vector<64x1xf32> to vector<64x32xf32>
    %159 = arith.subf %146, %158 : vector<64x32xf32>
    %cst_46 = arith.constant 9.99999974E-6 : f32
    %160 = vector.broadcast %cst_46 : f32 to vector<64x1xf32>
    %161 = arith.addf %157, %160 : vector<64x1xf32>
    %162 = math.rsqrt %161 : vector<64x1xf32>
    %163 = vector.broadcast %162 : vector<64x1xf32> to vector<64x32xf32>
    %164 = arith.mulf %159, %163 : vector<64x32xf32>
    %165 = vector.broadcast %82 : vector<1x32xf32> to vector<64x32xf32>
    %166 = arith.mulf %164, %165 : vector<64x32xf32>
    %167 = vector.broadcast %83 : vector<1x32xf32> to vector<64x32xf32>
    %168 = arith.addf %166, %167 : vector<64x32xf32>
    %cst_47 = arith.constant dense<0.000000e+00> : vector<64x128xf32>
    %169 = tpu.matmul %168, %77, %cst_47 {dimension_numbers = #tpu.dot_dimension_numbers<[1], [0], [0], [1], [0, 0, 1, 1], [], []>} : vector<64x32xf32>, vector<32x128xf32>, vector<64x128xf32> -> vector<64x128xf32>
    %170 = vector.broadcast %79 : vector<1x128xf32> to vector<64x128xf32>
    %171 = arith.addf %169, %170 : vector<64x128xf32>
    %cst_48 = arith.constant 0.000000e+00 : f32
    %172 = vector.broadcast %cst_48 : f32 to vector<64x128xf32>
    %173 = arith.maximumf %171, %172 : vector<64x128xf32>
    %cst_49 = arith.constant dense<0.000000e+00> : vector<64x32xf32>
    %174 = tpu.matmul %173, %72, %cst_49 {dimension_numbers = #tpu.dot_dimension_numbers<[1], [0], [0], [1], [0, 0, 1, 1], [], []>} : vector<64x128xf32>, vector<128x32xf32>, vector<64x32xf32> -> vector<64x32xf32>
    %175 = vector.broadcast %81 : vector<1x32xf32> to vector<64x32xf32>
    %176 = arith.addf %174, %175 : vector<64x32xf32>
    %177 = arith.addf %168, %176 : vector<64x32xf32>
    %cst_50 = arith.constant dense<0.000000e+00> : vector<64xf32>
    %178 = vector.multi_reduction <add>, %177, %cst_50 [1] : vector<64x32xf32> to vector<64xf32>
    %179 = vector.shape_cast %178 : vector<64xf32> to vector<64x1xf32>
    %cst_51 = arith.constant 3.200000e+01 : f32
    %180 = vector.broadcast %cst_51 : f32 to vector<64x1xf32>
    %181 = arith.divf %179, %180 : vector<64x1xf32>
    %182 = vector.broadcast %181 : vector<64x1xf32> to vector<64x32xf32>
    %183 = arith.subf %177, %182 : vector<64x32xf32>
    %184 = arith.mulf %183, %183 : vector<64x32xf32>
    %cst_52 = arith.constant dense<0.000000e+00> : vector<64xf32>
    %185 = vector.multi_reduction <add>, %184, %cst_52 [1] : vector<64x32xf32> to vector<64xf32>
    %186 = vector.shape_cast %185 : vector<64xf32> to vector<64x1xf32>
    %cst_53 = arith.constant 3.200000e+01 : f32
    %187 = vector.broadcast %cst_53 : f32 to vector<64x1xf32>
    %188 = arith.divf %186, %187 : vector<64x1xf32>
    %189 = vector.broadcast %181 : vector<64x1xf32> to vector<64x32xf32>
    %190 = arith.subf %177, %189 : vector<64x32xf32>
    %cst_54 = arith.constant 9.99999974E-6 : f32
    %191 = vector.broadcast %cst_54 : f32 to vector<64x1xf32>
    %192 = arith.addf %188, %191 : vector<64x1xf32>
    %193 = math.rsqrt %192 : vector<64x1xf32>
    %194 = vector.broadcast %193 : vector<64x1xf32> to vector<64x32xf32>
    %195 = arith.mulf %190, %194 : vector<64x32xf32>
    %196 = vector.broadcast %84 : vector<1x32xf32> to vector<64x32xf32>
    %197 = arith.mulf %195, %196 : vector<64x32xf32>
    %198 = vector.broadcast %85 : vector<1x32xf32> to vector<64x32xf32>
    %199 = arith.addf %197, %198 : vector<64x32xf32>
    %c1_55 = arith.constant 1 : index
    %c0_56 = arith.constant 0 : index
    %c0_57 = arith.constant 0 : index
    %200 = vector.load %arg5[%c1_55, %c0_56, %c0_57] : memref<4x32x256xf32, #tpu.memory_space<vmem>>, vector<1x32x256xf32>
    %201 = vector.shape_cast %200 : vector<1x32x256xf32> to vector<32x256xf32>
    %c1_58 = arith.constant 1 : index
    %c0_59 = arith.constant 0 : index
    %c0_60 = arith.constant 0 : index
    %202 = vector.load %arg6[%c1_58, %c0_59, %c0_60] : memref<4x128x32xf32, #tpu.memory_space<vmem>>, vector<1x128x32xf32>
    %203 = vector.shape_cast %202 : vector<1x128x32xf32> to vector<128x32xf32>
    %c1_61 = arith.constant 1 : index
    %c0_62 = arith.constant 0 : index
    %c0_63 = arith.constant 0 : index
    %204 = vector.load %arg7[%c1_61, %c0_62, %c0_63] : memref<4x8x128xf32, #tpu.memory_space<vmem>>, vector<1x8x128xf32>
    %205 = vector.shape_cast %204 : vector<1x8x128xf32> to vector<8x128xf32>
    %206 = vector.extract_strided_slice %201 {offsets = [0, 0], sizes = [32, 96], strides = [1, 1]} : vector<32x256xf32> to vector<32x96xf32>
    %207 = vector.extract_strided_slice %201 {offsets = [0, 96], sizes = [32, 32], strides = [1, 1]} : vector<32x256xf32> to vector<32x32xf32>
    %208 = vector.extract_strided_slice %201 {offsets = [0, 128], sizes = [32, 128], strides = [1, 1]} : vector<32x256xf32> to vector<32x128xf32>
    %209 = vector.extract_strided_slice %205 {offsets = [0, 0], sizes = [1, 96], strides = [1, 1]} : vector<8x128xf32> to vector<1x96xf32>
    %210 = vector.extract_strided_slice %205 {offsets = [1, 0], sizes = [1, 128], strides = [1, 1]} : vector<8x128xf32> to vector<1x128xf32>
    %211 = vector.extract_strided_slice %205 {offsets = [2, 0], sizes = [1, 32], strides = [1, 1]} : vector<8x128xf32> to vector<1x32xf32>
    %212 = vector.extract_strided_slice %205 {offsets = [3, 0], sizes = [1, 32], strides = [1, 1]} : vector<8x128xf32> to vector<1x32xf32>
    %213 = vector.extract_strided_slice %205 {offsets = [4, 0], sizes = [1, 32], strides = [1, 1]} : vector<8x128xf32> to vector<1x32xf32>
    %214 = vector.extract_strided_slice %205 {offsets = [5, 0], sizes = [1, 32], strides = [1, 1]} : vector<8x128xf32> to vector<1x32xf32>
    %215 = vector.extract_strided_slice %205 {offsets = [6, 0], sizes = [1, 32], strides = [1, 1]} : vector<8x128xf32> to vector<1x32xf32>
    %216 = vector.extract_strided_slice %205 {offsets = [7, 0], sizes = [1, 32], strides = [1, 1]} : vector<8x128xf32> to vector<1x32xf32>
    %cst_64 = arith.constant dense<0.000000e+00> : vector<64x96xf32>
    %217 = tpu.matmul %199, %206, %cst_64 {dimension_numbers = #tpu.dot_dimension_numbers<[1], [0], [0], [1], [0, 0, 1, 1], [], []>} : vector<64x32xf32>, vector<32x96xf32>, vector<64x96xf32> -> vector<64x96xf32>
    %218 = vector.broadcast %209 : vector<1x96xf32> to vector<64x96xf32>
    %219 = arith.addf %217, %218 : vector<64x96xf32>
    %220 = vector.extract_strided_slice %219 {offsets = [0, 0], sizes = [64, 32], strides = [1, 1]} : vector<64x96xf32> to vector<64x32xf32>
    %cst_65 = arith.constant 0.353553385 : f32
    %221 = vector.broadcast %cst_65 : f32 to vector<64x32xf32>
    %222 = arith.mulf %220, %221 : vector<64x32xf32>
    %223 = vector.extract_strided_slice %219 {offsets = [0, 32], sizes = [64, 32], strides = [1, 1]} : vector<64x96xf32> to vector<64x32xf32>
    %224 = vector.extract_strided_slice %219 {offsets = [0, 64], sizes = [64, 32], strides = [1, 1]} : vector<64x96xf32> to vector<64x32xf32>
    %225 = vector.extract_strided_slice %222 {offsets = [0, 0], sizes = [64, 8], strides = [1, 1]} : vector<64x32xf32> to vector<64x8xf32>
    %226 = vector.extract_strided_slice %223 {offsets = [0, 0], sizes = [64, 8], strides = [1, 1]} : vector<64x32xf32> to vector<64x8xf32>
    %227 = vector.extract_strided_slice %224 {offsets = [0, 0], sizes = [64, 8], strides = [1, 1]} : vector<64x32xf32> to vector<64x8xf32>
    %cst_66 = arith.constant dense<0.000000e+00> : vector<64x64xf32>
    %228 = tpu.matmul %225, %226, %cst_66 {dimension_numbers = #tpu.dot_dimension_numbers<[1], [1], [0], [0], [0, 0, 1, 0], [], []>} : vector<64x8xf32>, vector<64x8xf32>, vector<64x64xf32> -> vector<64x64xf32>
    %229 = arith.addf %228, %68 : vector<64x64xf32>
    %230 = math.exp %229 : vector<64x64xf32>
    %cst_67 = arith.constant dense<0.000000e+00> : vector<64xf32>
    %231 = vector.multi_reduction <add>, %230, %cst_67 [1] : vector<64x64xf32> to vector<64xf32>
    %232 = vector.shape_cast %231 : vector<64xf32> to vector<64x1xf32>
    %233 = tpu.reciprocal %232 {approx = true} : vector<64x1xf32> -> vector<64x1xf32>
    %234 = vector.broadcast %233 : vector<64x1xf32> to vector<64x64xf32>
    %235 = arith.mulf %230, %234 : vector<64x64xf32>
    %cst_68 = arith.constant dense<0.000000e+00> : vector<64x8xf32>
    %236 = tpu.matmul %235, %227, %cst_68 {dimension_numbers = #tpu.dot_dimension_numbers<[1], [0], [0], [1], [0, 0, 1, 1], [], []>} : vector<64x64xf32>, vector<64x8xf32>, vector<64x8xf32> -> vector<64x8xf32>
    %237 = vector.extract_strided_slice %222 {offsets = [0, 8], sizes = [64, 8], strides = [1, 1]} : vector<64x32xf32> to vector<64x8xf32>
    %238 = vector.extract_strided_slice %223 {offsets = [0, 8], sizes = [64, 8], strides = [1, 1]} : vector<64x32xf32> to vector<64x8xf32>
    %239 = vector.extract_strided_slice %224 {offsets = [0, 8], sizes = [64, 8], strides = [1, 1]} : vector<64x32xf32> to vector<64x8xf32>
    %cst_69 = arith.constant dense<0.000000e+00> : vector<64x64xf32>
    %240 = tpu.matmul %237, %238, %cst_69 {dimension_numbers = #tpu.dot_dimension_numbers<[1], [1], [0], [0], [0, 0, 1, 0], [], []>} : vector<64x8xf32>, vector<64x8xf32>, vector<64x64xf32> -> vector<64x64xf32>
    %241 = arith.addf %240, %68 : vector<64x64xf32>
    %242 = math.exp %241 : vector<64x64xf32>
    %cst_70 = arith.constant dense<0.000000e+00> : vector<64xf32>
    %243 = vector.multi_reduction <add>, %242, %cst_70 [1] : vector<64x64xf32> to vector<64xf32>
    %244 = vector.shape_cast %243 : vector<64xf32> to vector<64x1xf32>
    %245 = tpu.reciprocal %244 {approx = true} : vector<64x1xf32> -> vector<64x1xf32>
    %246 = vector.broadcast %245 : vector<64x1xf32> to vector<64x64xf32>
    %247 = arith.mulf %242, %246 : vector<64x64xf32>
    %cst_71 = arith.constant dense<0.000000e+00> : vector<64x8xf32>
    %248 = tpu.matmul %247, %239, %cst_71 {dimension_numbers = #tpu.dot_dimension_numbers<[1], [0], [0], [1], [0, 0, 1, 1], [], []>} : vector<64x64xf32>, vector<64x8xf32>, vector<64x8xf32> -> vector<64x8xf32>
    %249 = vector.extract_strided_slice %222 {offsets = [0, 16], sizes = [64, 8], strides = [1, 1]} : vector<64x32xf32> to vector<64x8xf32>
    %250 = vector.extract_strided_slice %223 {offsets = [0, 16], sizes = [64, 8], strides = [1, 1]} : vector<64x32xf32> to vector<64x8xf32>
    %251 = vector.extract_strided_slice %224 {offsets = [0, 16], sizes = [64, 8], strides = [1, 1]} : vector<64x32xf32> to vector<64x8xf32>
    %cst_72 = arith.constant dense<0.000000e+00> : vector<64x64xf32>
    %252 = tpu.matmul %249, %250, %cst_72 {dimension_numbers = #tpu.dot_dimension_numbers<[1], [1], [0], [0], [0, 0, 1, 0], [], []>} : vector<64x8xf32>, vector<64x8xf32>, vector<64x64xf32> -> vector<64x64xf32>
    %253 = arith.addf %252, %68 : vector<64x64xf32>
    %254 = math.exp %253 : vector<64x64xf32>
    %cst_73 = arith.constant dense<0.000000e+00> : vector<64xf32>
    %255 = vector.multi_reduction <add>, %254, %cst_73 [1] : vector<64x64xf32> to vector<64xf32>
    %256 = vector.shape_cast %255 : vector<64xf32> to vector<64x1xf32>
    %257 = tpu.reciprocal %256 {approx = true} : vector<64x1xf32> -> vector<64x1xf32>
    %258 = vector.broadcast %257 : vector<64x1xf32> to vector<64x64xf32>
    %259 = arith.mulf %254, %258 : vector<64x64xf32>
    %cst_74 = arith.constant dense<0.000000e+00> : vector<64x8xf32>
    %260 = tpu.matmul %259, %251, %cst_74 {dimension_numbers = #tpu.dot_dimension_numbers<[1], [0], [0], [1], [0, 0, 1, 1], [], []>} : vector<64x64xf32>, vector<64x8xf32>, vector<64x8xf32> -> vector<64x8xf32>
    %261 = vector.extract_strided_slice %222 {offsets = [0, 24], sizes = [64, 8], strides = [1, 1]} : vector<64x32xf32> to vector<64x8xf32>
    %262 = vector.extract_strided_slice %223 {offsets = [0, 24], sizes = [64, 8], strides = [1, 1]} : vector<64x32xf32> to vector<64x8xf32>
    %263 = vector.extract_strided_slice %224 {offsets = [0, 24], sizes = [64, 8], strides = [1, 1]} : vector<64x32xf32> to vector<64x8xf32>
    %cst_75 = arith.constant dense<0.000000e+00> : vector<64x64xf32>
    %264 = tpu.matmul %261, %262, %cst_75 {dimension_numbers = #tpu.dot_dimension_numbers<[1], [1], [0], [0], [0, 0, 1, 0], [], []>} : vector<64x8xf32>, vector<64x8xf32>, vector<64x64xf32> -> vector<64x64xf32>
    %265 = arith.addf %264, %68 : vector<64x64xf32>
    %266 = math.exp %265 : vector<64x64xf32>
    %cst_76 = arith.constant dense<0.000000e+00> : vector<64xf32>
    %267 = vector.multi_reduction <add>, %266, %cst_76 [1] : vector<64x64xf32> to vector<64xf32>
    %268 = vector.shape_cast %267 : vector<64xf32> to vector<64x1xf32>
    %269 = tpu.reciprocal %268 {approx = true} : vector<64x1xf32> -> vector<64x1xf32>
    %270 = vector.broadcast %269 : vector<64x1xf32> to vector<64x64xf32>
    %271 = arith.mulf %266, %270 : vector<64x64xf32>
    %cst_77 = arith.constant dense<0.000000e+00> : vector<64x8xf32>
    %272 = tpu.matmul %271, %263, %cst_77 {dimension_numbers = #tpu.dot_dimension_numbers<[1], [0], [0], [1], [0, 0, 1, 1], [], []>} : vector<64x64xf32>, vector<64x8xf32>, vector<64x8xf32> -> vector<64x8xf32>
    %273 = tpu.concatenate %236, %248, %260, %272 in 1 : vector<64x8xf32>, vector<64x8xf32>, vector<64x8xf32>, vector<64x8xf32> -> vector<64x32xf32>
    %cst_78 = arith.constant dense<0.000000e+00> : vector<64x32xf32>
    %274 = tpu.matmul %273, %207, %cst_78 {dimension_numbers = #tpu.dot_dimension_numbers<[1], [0], [0], [1], [0, 0, 1, 1], [], []>} : vector<64x32xf32>, vector<32x32xf32>, vector<64x32xf32> -> vector<64x32xf32>
    %275 = vector.broadcast %211 : vector<1x32xf32> to vector<64x32xf32>
    %276 = arith.addf %274, %275 : vector<64x32xf32>
    %277 = arith.addf %199, %276 : vector<64x32xf32>
    %cst_79 = arith.constant dense<0.000000e+00> : vector<64xf32>
    %278 = vector.multi_reduction <add>, %277, %cst_79 [1] : vector<64x32xf32> to vector<64xf32>
    %279 = vector.shape_cast %278 : vector<64xf32> to vector<64x1xf32>
    %cst_80 = arith.constant 3.200000e+01 : f32
    %280 = vector.broadcast %cst_80 : f32 to vector<64x1xf32>
    %281 = arith.divf %279, %280 : vector<64x1xf32>
    %282 = vector.broadcast %281 : vector<64x1xf32> to vector<64x32xf32>
    %283 = arith.subf %277, %282 : vector<64x32xf32>
    %284 = arith.mulf %283, %283 : vector<64x32xf32>
    %cst_81 = arith.constant dense<0.000000e+00> : vector<64xf32>
    %285 = vector.multi_reduction <add>, %284, %cst_81 [1] : vector<64x32xf32> to vector<64xf32>
    %286 = vector.shape_cast %285 : vector<64xf32> to vector<64x1xf32>
    %cst_82 = arith.constant 3.200000e+01 : f32
    %287 = vector.broadcast %cst_82 : f32 to vector<64x1xf32>
    %288 = arith.divf %286, %287 : vector<64x1xf32>
    %289 = vector.broadcast %281 : vector<64x1xf32> to vector<64x32xf32>
    %290 = arith.subf %277, %289 : vector<64x32xf32>
    %cst_83 = arith.constant 9.99999974E-6 : f32
    %291 = vector.broadcast %cst_83 : f32 to vector<64x1xf32>
    %292 = arith.addf %288, %291 : vector<64x1xf32>
    %293 = math.rsqrt %292 : vector<64x1xf32>
    %294 = vector.broadcast %293 : vector<64x1xf32> to vector<64x32xf32>
    %295 = arith.mulf %290, %294 : vector<64x32xf32>
    %296 = vector.broadcast %213 : vector<1x32xf32> to vector<64x32xf32>
    %297 = arith.mulf %295, %296 : vector<64x32xf32>
    %298 = vector.broadcast %214 : vector<1x32xf32> to vector<64x32xf32>
    %299 = arith.addf %297, %298 : vector<64x32xf32>
    %cst_84 = arith.constant dense<0.000000e+00> : vector<64x128xf32>
    %300 = tpu.matmul %299, %208, %cst_84 {dimension_numbers = #tpu.dot_dimension_numbers<[1], [0], [0], [1], [0, 0, 1, 1], [], []>} : vector<64x32xf32>, vector<32x128xf32>, vector<64x128xf32> -> vector<64x128xf32>
    %301 = vector.broadcast %210 : vector<1x128xf32> to vector<64x128xf32>
    %302 = arith.addf %300, %301 : vector<64x128xf32>
    %cst_85 = arith.constant 0.000000e+00 : f32
    %303 = vector.broadcast %cst_85 : f32 to vector<64x128xf32>
    %304 = arith.maximumf %302, %303 : vector<64x128xf32>
    %cst_86 = arith.constant dense<0.000000e+00> : vector<64x32xf32>
    %305 = tpu.matmul %304, %203, %cst_86 {dimension_numbers = #tpu.dot_dimension_numbers<[1], [0], [0], [1], [0, 0, 1, 1], [], []>} : vector<64x128xf32>, vector<128x32xf32>, vector<64x32xf32> -> vector<64x32xf32>
    %306 = vector.broadcast %212 : vector<1x32xf32> to vector<64x32xf32>
    %307 = arith.addf %305, %306 : vector<64x32xf32>
    %308 = arith.addf %299, %307 : vector<64x32xf32>
    %cst_87 = arith.constant dense<0.000000e+00> : vector<64xf32>
    %309 = vector.multi_reduction <add>, %308, %cst_87 [1] : vector<64x32xf32> to vector<64xf32>
    %310 = vector.shape_cast %309 : vector<64xf32> to vector<64x1xf32>
    %cst_88 = arith.constant 3.200000e+01 : f32
    %311 = vector.broadcast %cst_88 : f32 to vector<64x1xf32>
    %312 = arith.divf %310, %311 : vector<64x1xf32>
    %313 = vector.broadcast %312 : vector<64x1xf32> to vector<64x32xf32>
    %314 = arith.subf %308, %313 : vector<64x32xf32>
    %315 = arith.mulf %314, %314 : vector<64x32xf32>
    %cst_89 = arith.constant dense<0.000000e+00> : vector<64xf32>
    %316 = vector.multi_reduction <add>, %315, %cst_89 [1] : vector<64x32xf32> to vector<64xf32>
    %317 = vector.shape_cast %316 : vector<64xf32> to vector<64x1xf32>
    %cst_90 = arith.constant 3.200000e+01 : f32
    %318 = vector.broadcast %cst_90 : f32 to vector<64x1xf32>
    %319 = arith.divf %317, %318 : vector<64x1xf32>
    %320 = vector.broadcast %312 : vector<64x1xf32> to vector<64x32xf32>
    %321 = arith.subf %308, %320 : vector<64x32xf32>
    %cst_91 = arith.constant 9.99999974E-6 : f32
    %322 = vector.broadcast %cst_91 : f32 to vector<64x1xf32>
    %323 = arith.addf %319, %322 : vector<64x1xf32>
    %324 = math.rsqrt %323 : vector<64x1xf32>
    %325 = vector.broadcast %324 : vector<64x1xf32> to vector<64x32xf32>
    %326 = arith.mulf %321, %325 : vector<64x32xf32>
    %327 = vector.broadcast %215 : vector<1x32xf32> to vector<64x32xf32>
    %328 = arith.mulf %326, %327 : vector<64x32xf32>
    %329 = vector.broadcast %216 : vector<1x32xf32> to vector<64x32xf32>
    %330 = arith.addf %328, %329 : vector<64x32xf32>
    %c2 = arith.constant 2 : index
    %c0_92 = arith.constant 0 : index
    %331 = vector.load %arg4[%c2, %c0_92] : memref<6x32xf32, #tpu.memory_space<vmem>>, vector<1x32xf32>
    %c3 = arith.constant 3 : index
    %c0_93 = arith.constant 0 : index
    %332 = vector.load %arg4[%c3, %c0_93] : memref<6x32xf32, #tpu.memory_space<vmem>>, vector<1x32xf32>
    %cst_94 = arith.constant dense<0.000000e+00> : vector<64xf32>
    %333 = vector.multi_reduction <add>, %330, %cst_94 [1] : vector<64x32xf32> to vector<64xf32>
    %334 = vector.shape_cast %333 : vector<64xf32> to vector<64x1xf32>
    %cst_95 = arith.constant 3.200000e+01 : f32
    %335 = vector.broadcast %cst_95 : f32 to vector<64x1xf32>
    %336 = arith.divf %334, %335 : vector<64x1xf32>
    %337 = vector.broadcast %336 : vector<64x1xf32> to vector<64x32xf32>
    %338 = arith.subf %330, %337 : vector<64x32xf32>
    %339 = arith.mulf %338, %338 : vector<64x32xf32>
    %cst_96 = arith.constant dense<0.000000e+00> : vector<64xf32>
    %340 = vector.multi_reduction <add>, %339, %cst_96 [1] : vector<64x32xf32> to vector<64xf32>
    %341 = vector.shape_cast %340 : vector<64xf32> to vector<64x1xf32>
    %cst_97 = arith.constant 3.200000e+01 : f32
    %342 = vector.broadcast %cst_97 : f32 to vector<64x1xf32>
    %343 = arith.divf %341, %342 : vector<64x1xf32>
    %344 = vector.broadcast %336 : vector<64x1xf32> to vector<64x32xf32>
    %345 = arith.subf %330, %344 : vector<64x32xf32>
    %cst_98 = arith.constant 9.99999974E-6 : f32
    %346 = vector.broadcast %cst_98 : f32 to vector<64x1xf32>
    %347 = arith.addf %343, %346 : vector<64x1xf32>
    %348 = math.rsqrt %347 : vector<64x1xf32>
    %349 = vector.broadcast %348 : vector<64x1xf32> to vector<64x32xf32>
    %350 = arith.mulf %345, %349 : vector<64x32xf32>
    %351 = vector.broadcast %331 : vector<1x32xf32> to vector<64x32xf32>
    %352 = arith.mulf %350, %351 : vector<64x32xf32>
    %353 = vector.broadcast %332 : vector<1x32xf32> to vector<64x32xf32>
    %354 = arith.addf %352, %353 : vector<64x32xf32>
    %355 = vector.extract_strided_slice %354 {offsets = [0, 0], sizes = [1, 32], strides = [1, 1]} : vector<64x32xf32> to vector<1x32xf32>
    %356 = vector.extract_strided_slice %354 {offsets = [16, 0], sizes = [1, 32], strides = [1, 1]} : vector<64x32xf32> to vector<1x32xf32>
    %357 = vector.extract_strided_slice %354 {offsets = [32, 0], sizes = [1, 32], strides = [1, 1]} : vector<64x32xf32> to vector<1x32xf32>
    %358 = vector.extract_strided_slice %354 {offsets = [48, 0], sizes = [1, 32], strides = [1, 1]} : vector<64x32xf32> to vector<1x32xf32>
    %359 = tpu.concatenate %355, %356, %357, %358 in 0 : vector<1x32xf32>, vector<1x32xf32>, vector<1x32xf32>, vector<1x32xf32> -> vector<4x32xf32>
    %360 = tpu.iota {dimensions = array<i32: 0>} : vector<4x32xi32>
    %361 = vector.broadcast %1 : i32 to vector<4x32xi32>
    %362 = arith.cmpi slt, %360, %361 : vector<4x32xi32>
    %cst_99 = arith.constant 0.000000e+00 : f32
    %363 = vector.broadcast %cst_99 : f32 to vector<4x32xf32>
    %364 = arith.select %362, %359, %363 : vector<4x32xi1>, vector<4x32xf32>
    %365 = tpu.iota {dimensions = array<i32: 1>} : vector<4x4xi32>
    %366 = vector.broadcast %1 : i32 to vector<4x4xi32>
    %367 = arith.cmpi slt, %365, %366 : vector<4x4xi32>
    %cst_100 = arith.constant 0.000000e+00 : f32
    %cst_101 = arith.constant -1.000000e+09 : f32
    %368 = vector.broadcast %cst_100 : f32 to vector<4x4xf32>
    %369 = vector.broadcast %cst_101 : f32 to vector<4x4xf32>
    %370 = arith.select %367, %368, %369 : vector<4x4xi1>, vector<4x4xf32>
    %c2_102 = arith.constant 2 : index
    %c0_103 = arith.constant 0 : index
    %c0_104 = arith.constant 0 : index
    %371 = vector.load %arg5[%c2_102, %c0_103, %c0_104] : memref<4x32x256xf32, #tpu.memory_space<vmem>>, vector<1x32x256xf32>
    %372 = vector.shape_cast %371 : vector<1x32x256xf32> to vector<32x256xf32>
    %c2_105 = arith.constant 2 : index
    %c0_106 = arith.constant 0 : index
    %c0_107 = arith.constant 0 : index
    %373 = vector.load %arg6[%c2_105, %c0_106, %c0_107] : memref<4x128x32xf32, #tpu.memory_space<vmem>>, vector<1x128x32xf32>
    %374 = vector.shape_cast %373 : vector<1x128x32xf32> to vector<128x32xf32>
    %c2_108 = arith.constant 2 : index
    %c0_109 = arith.constant 0 : index
    %c0_110 = arith.constant 0 : index
    %375 = vector.load %arg7[%c2_108, %c0_109, %c0_110] : memref<4x8x128xf32, #tpu.memory_space<vmem>>, vector<1x8x128xf32>
    %376 = vector.shape_cast %375 : vector<1x8x128xf32> to vector<8x128xf32>
    %377 = vector.extract_strided_slice %372 {offsets = [0, 0], sizes = [32, 96], strides = [1, 1]} : vector<32x256xf32> to vector<32x96xf32>
    %378 = vector.extract_strided_slice %372 {offsets = [0, 96], sizes = [32, 32], strides = [1, 1]} : vector<32x256xf32> to vector<32x32xf32>
    %379 = vector.extract_strided_slice %372 {offsets = [0, 128], sizes = [32, 128], strides = [1, 1]} : vector<32x256xf32> to vector<32x128xf32>
    %380 = vector.extract_strided_slice %376 {offsets = [0, 0], sizes = [1, 96], strides = [1, 1]} : vector<8x128xf32> to vector<1x96xf32>
    %381 = vector.extract_strided_slice %376 {offsets = [1, 0], sizes = [1, 128], strides = [1, 1]} : vector<8x128xf32> to vector<1x128xf32>
    %382 = vector.extract_strided_slice %376 {offsets = [2, 0], sizes = [1, 32], strides = [1, 1]} : vector<8x128xf32> to vector<1x32xf32>
    %383 = vector.extract_strided_slice %376 {offsets = [3, 0], sizes = [1, 32], strides = [1, 1]} : vector<8x128xf32> to vector<1x32xf32>
    %384 = vector.extract_strided_slice %376 {offsets = [4, 0], sizes = [1, 32], strides = [1, 1]} : vector<8x128xf32> to vector<1x32xf32>
    %385 = vector.extract_strided_slice %376 {offsets = [5, 0], sizes = [1, 32], strides = [1, 1]} : vector<8x128xf32> to vector<1x32xf32>
    %386 = vector.extract_strided_slice %376 {offsets = [6, 0], sizes = [1, 32], strides = [1, 1]} : vector<8x128xf32> to vector<1x32xf32>
    %387 = vector.extract_strided_slice %376 {offsets = [7, 0], sizes = [1, 32], strides = [1, 1]} : vector<8x128xf32> to vector<1x32xf32>
    %cst_111 = arith.constant dense<0.000000e+00> : vector<4x96xf32>
    %388 = tpu.matmul %364, %377, %cst_111 {dimension_numbers = #tpu.dot_dimension_numbers<[1], [0], [0], [1], [0, 0, 1, 1], [], []>} : vector<4x32xf32>, vector<32x96xf32>, vector<4x96xf32> -> vector<4x96xf32>
    %389 = vector.broadcast %380 : vector<1x96xf32> to vector<4x96xf32>
    %390 = arith.addf %388, %389 : vector<4x96xf32>
    %391 = vector.extract_strided_slice %390 {offsets = [0, 0], sizes = [4, 32], strides = [1, 1]} : vector<4x96xf32> to vector<4x32xf32>
    %cst_112 = arith.constant 0.353553385 : f32
    %392 = vector.broadcast %cst_112 : f32 to vector<4x32xf32>
    %393 = arith.mulf %391, %392 : vector<4x32xf32>
    %394 = vector.extract_strided_slice %390 {offsets = [0, 32], sizes = [4, 32], strides = [1, 1]} : vector<4x96xf32> to vector<4x32xf32>
    %395 = vector.extract_strided_slice %390 {offsets = [0, 64], sizes = [4, 32], strides = [1, 1]} : vector<4x96xf32> to vector<4x32xf32>
    %396 = vector.extract_strided_slice %393 {offsets = [0, 0], sizes = [4, 8], strides = [1, 1]} : vector<4x32xf32> to vector<4x8xf32>
    %397 = vector.extract_strided_slice %394 {offsets = [0, 0], sizes = [4, 8], strides = [1, 1]} : vector<4x32xf32> to vector<4x8xf32>
    %398 = vector.extract_strided_slice %395 {offsets = [0, 0], sizes = [4, 8], strides = [1, 1]} : vector<4x32xf32> to vector<4x8xf32>
    %cst_113 = arith.constant dense<0.000000e+00> : vector<4x4xf32>
    %399 = tpu.matmul %396, %397, %cst_113 {dimension_numbers = #tpu.dot_dimension_numbers<[1], [1], [0], [0], [0, 0, 1, 0], [], []>} : vector<4x8xf32>, vector<4x8xf32>, vector<4x4xf32> -> vector<4x4xf32>
    %400 = arith.addf %399, %370 : vector<4x4xf32>
    %401 = math.exp %400 : vector<4x4xf32>
    %cst_114 = arith.constant dense<0.000000e+00> : vector<4xf32>
    %402 = vector.multi_reduction <add>, %401, %cst_114 [1] : vector<4x4xf32> to vector<4xf32>
    %403 = vector.shape_cast %402 : vector<4xf32> to vector<4x1xf32>
    %404 = tpu.reciprocal %403 {approx = true} : vector<4x1xf32> -> vector<4x1xf32>
    %405 = vector.broadcast %404 : vector<4x1xf32> to vector<4x4xf32>
    %406 = arith.mulf %401, %405 : vector<4x4xf32>
    %cst_115 = arith.constant dense<0.000000e+00> : vector<4x8xf32>
    %407 = tpu.matmul %406, %398, %cst_115 {dimension_numbers = #tpu.dot_dimension_numbers<[1], [0], [0], [1], [0, 0, 1, 1], [], []>} : vector<4x4xf32>, vector<4x8xf32>, vector<4x8xf32> -> vector<4x8xf32>
    %408 = vector.extract_strided_slice %393 {offsets = [0, 8], sizes = [4, 8], strides = [1, 1]} : vector<4x32xf32> to vector<4x8xf32>
    %409 = vector.extract_strided_slice %394 {offsets = [0, 8], sizes = [4, 8], strides = [1, 1]} : vector<4x32xf32> to vector<4x8xf32>
    %410 = vector.extract_strided_slice %395 {offsets = [0, 8], sizes = [4, 8], strides = [1, 1]} : vector<4x32xf32> to vector<4x8xf32>
    %cst_116 = arith.constant dense<0.000000e+00> : vector<4x4xf32>
    %411 = tpu.matmul %408, %409, %cst_116 {dimension_numbers = #tpu.dot_dimension_numbers<[1], [1], [0], [0], [0, 0, 1, 0], [], []>} : vector<4x8xf32>, vector<4x8xf32>, vector<4x4xf32> -> vector<4x4xf32>
    %412 = arith.addf %411, %370 : vector<4x4xf32>
    %413 = math.exp %412 : vector<4x4xf32>
    %cst_117 = arith.constant dense<0.000000e+00> : vector<4xf32>
    %414 = vector.multi_reduction <add>, %413, %cst_117 [1] : vector<4x4xf32> to vector<4xf32>
    %415 = vector.shape_cast %414 : vector<4xf32> to vector<4x1xf32>
    %416 = tpu.reciprocal %415 {approx = true} : vector<4x1xf32> -> vector<4x1xf32>
    %417 = vector.broadcast %416 : vector<4x1xf32> to vector<4x4xf32>
    %418 = arith.mulf %413, %417 : vector<4x4xf32>
    %cst_118 = arith.constant dense<0.000000e+00> : vector<4x8xf32>
    %419 = tpu.matmul %418, %410, %cst_118 {dimension_numbers = #tpu.dot_dimension_numbers<[1], [0], [0], [1], [0, 0, 1, 1], [], []>} : vector<4x4xf32>, vector<4x8xf32>, vector<4x8xf32> -> vector<4x8xf32>
    %420 = vector.extract_strided_slice %393 {offsets = [0, 16], sizes = [4, 8], strides = [1, 1]} : vector<4x32xf32> to vector<4x8xf32>
    %421 = vector.extract_strided_slice %394 {offsets = [0, 16], sizes = [4, 8], strides = [1, 1]} : vector<4x32xf32> to vector<4x8xf32>
    %422 = vector.extract_strided_slice %395 {offsets = [0, 16], sizes = [4, 8], strides = [1, 1]} : vector<4x32xf32> to vector<4x8xf32>
    %cst_119 = arith.constant dense<0.000000e+00> : vector<4x4xf32>
    %423 = tpu.matmul %420, %421, %cst_119 {dimension_numbers = #tpu.dot_dimension_numbers<[1], [1], [0], [0], [0, 0, 1, 0], [], []>} : vector<4x8xf32>, vector<4x8xf32>, vector<4x4xf32> -> vector<4x4xf32>
    %424 = arith.addf %423, %370 : vector<4x4xf32>
    %425 = math.exp %424 : vector<4x4xf32>
    %cst_120 = arith.constant dense<0.000000e+00> : vector<4xf32>
    %426 = vector.multi_reduction <add>, %425, %cst_120 [1] : vector<4x4xf32> to vector<4xf32>
    %427 = vector.shape_cast %426 : vector<4xf32> to vector<4x1xf32>
    %428 = tpu.reciprocal %427 {approx = true} : vector<4x1xf32> -> vector<4x1xf32>
    %429 = vector.broadcast %428 : vector<4x1xf32> to vector<4x4xf32>
    %430 = arith.mulf %425, %429 : vector<4x4xf32>
    %cst_121 = arith.constant dense<0.000000e+00> : vector<4x8xf32>
    %431 = tpu.matmul %430, %422, %cst_121 {dimension_numbers = #tpu.dot_dimension_numbers<[1], [0], [0], [1], [0, 0, 1, 1], [], []>} : vector<4x4xf32>, vector<4x8xf32>, vector<4x8xf32> -> vector<4x8xf32>
    %432 = vector.extract_strided_slice %393 {offsets = [0, 24], sizes = [4, 8], strides = [1, 1]} : vector<4x32xf32> to vector<4x8xf32>
    %433 = vector.extract_strided_slice %394 {offsets = [0, 24], sizes = [4, 8], strides = [1, 1]} : vector<4x32xf32> to vector<4x8xf32>
    %434 = vector.extract_strided_slice %395 {offsets = [0, 24], sizes = [4, 8], strides = [1, 1]} : vector<4x32xf32> to vector<4x8xf32>
    %cst_122 = arith.constant dense<0.000000e+00> : vector<4x4xf32>
    %435 = tpu.matmul %432, %433, %cst_122 {dimension_numbers = #tpu.dot_dimension_numbers<[1], [1], [0], [0], [0, 0, 1, 0], [], []>} : vector<4x8xf32>, vector<4x8xf32>, vector<4x4xf32> -> vector<4x4xf32>
    %436 = arith.addf %435, %370 : vector<4x4xf32>
    %437 = math.exp %436 : vector<4x4xf32>
    %cst_123 = arith.constant dense<0.000000e+00> : vector<4xf32>
    %438 = vector.multi_reduction <add>, %437, %cst_123 [1] : vector<4x4xf32> to vector<4xf32>
    %439 = vector.shape_cast %438 : vector<4xf32> to vector<4x1xf32>
    %440 = tpu.reciprocal %439 {approx = true} : vector<4x1xf32> -> vector<4x1xf32>
    %441 = vector.broadcast %440 : vector<4x1xf32> to vector<4x4xf32>
    %442 = arith.mulf %437, %441 : vector<4x4xf32>
    %cst_124 = arith.constant dense<0.000000e+00> : vector<4x8xf32>
    %443 = tpu.matmul %442, %434, %cst_124 {dimension_numbers = #tpu.dot_dimension_numbers<[1], [0], [0], [1], [0, 0, 1, 1], [], []>} : vector<4x4xf32>, vector<4x8xf32>, vector<4x8xf32> -> vector<4x8xf32>
    %444 = tpu.concatenate %407, %419, %431, %443 in 1 : vector<4x8xf32>, vector<4x8xf32>, vector<4x8xf32>, vector<4x8xf32> -> vector<4x32xf32>
    %cst_125 = arith.constant dense<0.000000e+00> : vector<4x32xf32>
    %445 = tpu.matmul %444, %378, %cst_125 {dimension_numbers = #tpu.dot_dimension_numbers<[1], [0], [0], [1], [0, 0, 1, 1], [], []>} : vector<4x32xf32>, vector<32x32xf32>, vector<4x32xf32> -> vector<4x32xf32>
    %446 = vector.broadcast %382 : vector<1x32xf32> to vector<4x32xf32>
    %447 = arith.addf %445, %446 : vector<4x32xf32>
    %448 = arith.addf %364, %447 : vector<4x32xf32>
    %cst_126 = arith.constant dense<0.000000e+00> : vector<4xf32>
    %449 = vector.multi_reduction <add>, %448, %cst_126 [1] : vector<4x32xf32> to vector<4xf32>
    %450 = vector.shape_cast %449 : vector<4xf32> to vector<4x1xf32>
    %cst_127 = arith.constant 3.200000e+01 : f32
    %451 = vector.broadcast %cst_127 : f32 to vector<4x1xf32>
    %452 = arith.divf %450, %451 : vector<4x1xf32>
    %453 = vector.broadcast %452 : vector<4x1xf32> to vector<4x32xf32>
    %454 = arith.subf %448, %453 : vector<4x32xf32>
    %455 = arith.mulf %454, %454 : vector<4x32xf32>
    %cst_128 = arith.constant dense<0.000000e+00> : vector<4xf32>
    %456 = vector.multi_reduction <add>, %455, %cst_128 [1] : vector<4x32xf32> to vector<4xf32>
    %457 = vector.shape_cast %456 : vector<4xf32> to vector<4x1xf32>
    %cst_129 = arith.constant 3.200000e+01 : f32
    %458 = vector.broadcast %cst_129 : f32 to vector<4x1xf32>
    %459 = arith.divf %457, %458 : vector<4x1xf32>
    %460 = vector.broadcast %452 : vector<4x1xf32> to vector<4x32xf32>
    %461 = arith.subf %448, %460 : vector<4x32xf32>
    %cst_130 = arith.constant 9.99999974E-6 : f32
    %462 = vector.broadcast %cst_130 : f32 to vector<4x1xf32>
    %463 = arith.addf %459, %462 : vector<4x1xf32>
    %464 = math.rsqrt %463 : vector<4x1xf32>
    %465 = vector.broadcast %464 : vector<4x1xf32> to vector<4x32xf32>
    %466 = arith.mulf %461, %465 : vector<4x32xf32>
    %467 = vector.broadcast %384 : vector<1x32xf32> to vector<4x32xf32>
    %468 = arith.mulf %466, %467 : vector<4x32xf32>
    %469 = vector.broadcast %385 : vector<1x32xf32> to vector<4x32xf32>
    %470 = arith.addf %468, %469 : vector<4x32xf32>
    %cst_131 = arith.constant dense<0.000000e+00> : vector<4x128xf32>
    %471 = tpu.matmul %470, %379, %cst_131 {dimension_numbers = #tpu.dot_dimension_numbers<[1], [0], [0], [1], [0, 0, 1, 1], [], []>} : vector<4x32xf32>, vector<32x128xf32>, vector<4x128xf32> -> vector<4x128xf32>
    %472 = vector.broadcast %381 : vector<1x128xf32> to vector<4x128xf32>
    %473 = arith.addf %471, %472 : vector<4x128xf32>
    %cst_132 = arith.constant 0.000000e+00 : f32
    %474 = vector.broadcast %cst_132 : f32 to vector<4x128xf32>
    %475 = arith.maximumf %473, %474 : vector<4x128xf32>
    %cst_133 = arith.constant dense<0.000000e+00> : vector<4x32xf32>
    %476 = tpu.matmul %475, %374, %cst_133 {dimension_numbers = #tpu.dot_dimension_numbers<[1], [0], [0], [1], [0, 0, 1, 1], [], []>} : vector<4x128xf32>, vector<128x32xf32>, vector<4x32xf32> -> vector<4x32xf32>
    %477 = vector.broadcast %383 : vector<1x32xf32> to vector<4x32xf32>
    %478 = arith.addf %476, %477 : vector<4x32xf32>
    %479 = arith.addf %470, %478 : vector<4x32xf32>
    %cst_134 = arith.constant dense<0.000000e+00> : vector<4xf32>
    %480 = vector.multi_reduction <add>, %479, %cst_134 [1] : vector<4x32xf32> to vector<4xf32>
    %481 = vector.shape_cast %480 : vector<4xf32> to vector<4x1xf32>
    %cst_135 = arith.constant 3.200000e+01 : f32
    %482 = vector.broadcast %cst_135 : f32 to vector<4x1xf32>
    %483 = arith.divf %481, %482 : vector<4x1xf32>
    %484 = vector.broadcast %483 : vector<4x1xf32> to vector<4x32xf32>
    %485 = arith.subf %479, %484 : vector<4x32xf32>
    %486 = arith.mulf %485, %485 : vector<4x32xf32>
    %cst_136 = arith.constant dense<0.000000e+00> : vector<4xf32>
    %487 = vector.multi_reduction <add>, %486, %cst_136 [1] : vector<4x32xf32> to vector<4xf32>
    %488 = vector.shape_cast %487 : vector<4xf32> to vector<4x1xf32>
    %cst_137 = arith.constant 3.200000e+01 : f32
    %489 = vector.broadcast %cst_137 : f32 to vector<4x1xf32>
    %490 = arith.divf %488, %489 : vector<4x1xf32>
    %491 = vector.broadcast %483 : vector<4x1xf32> to vector<4x32xf32>
    %492 = arith.subf %479, %491 : vector<4x32xf32>
    %cst_138 = arith.constant 9.99999974E-6 : f32
    %493 = vector.broadcast %cst_138 : f32 to vector<4x1xf32>
    %494 = arith.addf %490, %493 : vector<4x1xf32>
    %495 = math.rsqrt %494 : vector<4x1xf32>
    %496 = vector.broadcast %495 : vector<4x1xf32> to vector<4x32xf32>
    %497 = arith.mulf %492, %496 : vector<4x32xf32>
    %498 = vector.broadcast %386 : vector<1x32xf32> to vector<4x32xf32>
    %499 = arith.mulf %497, %498 : vector<4x32xf32>
    %500 = vector.broadcast %387 : vector<1x32xf32> to vector<4x32xf32>
    %501 = arith.addf %499, %500 : vector<4x32xf32>
    %c3_139 = arith.constant 3 : index
    %c0_140 = arith.constant 0 : index
    %c0_141 = arith.constant 0 : index
    %502 = vector.load %arg5[%c3_139, %c0_140, %c0_141] : memref<4x32x256xf32, #tpu.memory_space<vmem>>, vector<1x32x256xf32>
    %503 = vector.shape_cast %502 : vector<1x32x256xf32> to vector<32x256xf32>
    %c3_142 = arith.constant 3 : index
    %c0_143 = arith.constant 0 : index
    %c0_144 = arith.constant 0 : index
    %504 = vector.load %arg6[%c3_142, %c0_143, %c0_144] : memref<4x128x32xf32, #tpu.memory_space<vmem>>, vector<1x128x32xf32>
    %505 = vector.shape_cast %504 : vector<1x128x32xf32> to vector<128x32xf32>
    %c3_145 = arith.constant 3 : index
    %c0_146 = arith.constant 0 : index
    %c0_147 = arith.constant 0 : index
    %506 = vector.load %arg7[%c3_145, %c0_146, %c0_147] : memref<4x8x128xf32, #tpu.memory_space<vmem>>, vector<1x8x128xf32>
    %507 = vector.shape_cast %506 : vector<1x8x128xf32> to vector<8x128xf32>
    %508 = vector.extract_strided_slice %503 {offsets = [0, 0], sizes = [32, 96], strides = [1, 1]} : vector<32x256xf32> to vector<32x96xf32>
    %509 = vector.extract_strided_slice %503 {offsets = [0, 96], sizes = [32, 32], strides = [1, 1]} : vector<32x256xf32> to vector<32x32xf32>
    %510 = vector.extract_strided_slice %503 {offsets = [0, 128], sizes = [32, 128], strides = [1, 1]} : vector<32x256xf32> to vector<32x128xf32>
    %511 = vector.extract_strided_slice %507 {offsets = [0, 0], sizes = [1, 96], strides = [1, 1]} : vector<8x128xf32> to vector<1x96xf32>
    %512 = vector.extract_strided_slice %507 {offsets = [1, 0], sizes = [1, 128], strides = [1, 1]} : vector<8x128xf32> to vector<1x128xf32>
    %513 = vector.extract_strided_slice %507 {offsets = [2, 0], sizes = [1, 32], strides = [1, 1]} : vector<8x128xf32> to vector<1x32xf32>
    %514 = vector.extract_strided_slice %507 {offsets = [3, 0], sizes = [1, 32], strides = [1, 1]} : vector<8x128xf32> to vector<1x32xf32>
    %515 = vector.extract_strided_slice %507 {offsets = [4, 0], sizes = [1, 32], strides = [1, 1]} : vector<8x128xf32> to vector<1x32xf32>
    %516 = vector.extract_strided_slice %507 {offsets = [5, 0], sizes = [1, 32], strides = [1, 1]} : vector<8x128xf32> to vector<1x32xf32>
    %517 = vector.extract_strided_slice %507 {offsets = [6, 0], sizes = [1, 32], strides = [1, 1]} : vector<8x128xf32> to vector<1x32xf32>
    %518 = vector.extract_strided_slice %507 {offsets = [7, 0], sizes = [1, 32], strides = [1, 1]} : vector<8x128xf32> to vector<1x32xf32>
    %cst_148 = arith.constant dense<0.000000e+00> : vector<4x96xf32>
    %519 = tpu.matmul %501, %508, %cst_148 {dimension_numbers = #tpu.dot_dimension_numbers<[1], [0], [0], [1], [0, 0, 1, 1], [], []>} : vector<4x32xf32>, vector<32x96xf32>, vector<4x96xf32> -> vector<4x96xf32>
    %520 = vector.broadcast %511 : vector<1x96xf32> to vector<4x96xf32>
    %521 = arith.addf %519, %520 : vector<4x96xf32>
    %522 = vector.extract_strided_slice %521 {offsets = [0, 0], sizes = [4, 32], strides = [1, 1]} : vector<4x96xf32> to vector<4x32xf32>
    %cst_149 = arith.constant 0.353553385 : f32
    %523 = vector.broadcast %cst_149 : f32 to vector<4x32xf32>
    %524 = arith.mulf %522, %523 : vector<4x32xf32>
    %525 = vector.extract_strided_slice %521 {offsets = [0, 32], sizes = [4, 32], strides = [1, 1]} : vector<4x96xf32> to vector<4x32xf32>
    %526 = vector.extract_strided_slice %521 {offsets = [0, 64], sizes = [4, 32], strides = [1, 1]} : vector<4x96xf32> to vector<4x32xf32>
    %527 = vector.extract_strided_slice %524 {offsets = [0, 0], sizes = [4, 8], strides = [1, 1]} : vector<4x32xf32> to vector<4x8xf32>
    %528 = vector.extract_strided_slice %525 {offsets = [0, 0], sizes = [4, 8], strides = [1, 1]} : vector<4x32xf32> to vector<4x8xf32>
    %529 = vector.extract_strided_slice %526 {offsets = [0, 0], sizes = [4, 8], strides = [1, 1]} : vector<4x32xf32> to vector<4x8xf32>
    %cst_150 = arith.constant dense<0.000000e+00> : vector<4x4xf32>
    %530 = tpu.matmul %527, %528, %cst_150 {dimension_numbers = #tpu.dot_dimension_numbers<[1], [1], [0], [0], [0, 0, 1, 0], [], []>} : vector<4x8xf32>, vector<4x8xf32>, vector<4x4xf32> -> vector<4x4xf32>
    %531 = arith.addf %530, %370 : vector<4x4xf32>
    %532 = math.exp %531 : vector<4x4xf32>
    %cst_151 = arith.constant dense<0.000000e+00> : vector<4xf32>
    %533 = vector.multi_reduction <add>, %532, %cst_151 [1] : vector<4x4xf32> to vector<4xf32>
    %534 = vector.shape_cast %533 : vector<4xf32> to vector<4x1xf32>
    %535 = tpu.reciprocal %534 {approx = true} : vector<4x1xf32> -> vector<4x1xf32>
    %536 = vector.broadcast %535 : vector<4x1xf32> to vector<4x4xf32>
    %537 = arith.mulf %532, %536 : vector<4x4xf32>
    %cst_152 = arith.constant dense<0.000000e+00> : vector<4x8xf32>
    %538 = tpu.matmul %537, %529, %cst_152 {dimension_numbers = #tpu.dot_dimension_numbers<[1], [0], [0], [1], [0, 0, 1, 1], [], []>} : vector<4x4xf32>, vector<4x8xf32>, vector<4x8xf32> -> vector<4x8xf32>
    %539 = vector.extract_strided_slice %524 {offsets = [0, 8], sizes = [4, 8], strides = [1, 1]} : vector<4x32xf32> to vector<4x8xf32>
    %540 = vector.extract_strided_slice %525 {offsets = [0, 8], sizes = [4, 8], strides = [1, 1]} : vector<4x32xf32> to vector<4x8xf32>
    %541 = vector.extract_strided_slice %526 {offsets = [0, 8], sizes = [4, 8], strides = [1, 1]} : vector<4x32xf32> to vector<4x8xf32>
    %cst_153 = arith.constant dense<0.000000e+00> : vector<4x4xf32>
    %542 = tpu.matmul %539, %540, %cst_153 {dimension_numbers = #tpu.dot_dimension_numbers<[1], [1], [0], [0], [0, 0, 1, 0], [], []>} : vector<4x8xf32>, vector<4x8xf32>, vector<4x4xf32> -> vector<4x4xf32>
    %543 = arith.addf %542, %370 : vector<4x4xf32>
    %544 = math.exp %543 : vector<4x4xf32>
    %cst_154 = arith.constant dense<0.000000e+00> : vector<4xf32>
    %545 = vector.multi_reduction <add>, %544, %cst_154 [1] : vector<4x4xf32> to vector<4xf32>
    %546 = vector.shape_cast %545 : vector<4xf32> to vector<4x1xf32>
    %547 = tpu.reciprocal %546 {approx = true} : vector<4x1xf32> -> vector<4x1xf32>
    %548 = vector.broadcast %547 : vector<4x1xf32> to vector<4x4xf32>
    %549 = arith.mulf %544, %548 : vector<4x4xf32>
    %cst_155 = arith.constant dense<0.000000e+00> : vector<4x8xf32>
    %550 = tpu.matmul %549, %541, %cst_155 {dimension_numbers = #tpu.dot_dimension_numbers<[1], [0], [0], [1], [0, 0, 1, 1], [], []>} : vector<4x4xf32>, vector<4x8xf32>, vector<4x8xf32> -> vector<4x8xf32>
    %551 = vector.extract_strided_slice %524 {offsets = [0, 16], sizes = [4, 8], strides = [1, 1]} : vector<4x32xf32> to vector<4x8xf32>
    %552 = vector.extract_strided_slice %525 {offsets = [0, 16], sizes = [4, 8], strides = [1, 1]} : vector<4x32xf32> to vector<4x8xf32>
    %553 = vector.extract_strided_slice %526 {offsets = [0, 16], sizes = [4, 8], strides = [1, 1]} : vector<4x32xf32> to vector<4x8xf32>
    %cst_156 = arith.constant dense<0.000000e+00> : vector<4x4xf32>
    %554 = tpu.matmul %551, %552, %cst_156 {dimension_numbers = #tpu.dot_dimension_numbers<[1], [1], [0], [0], [0, 0, 1, 0], [], []>} : vector<4x8xf32>, vector<4x8xf32>, vector<4x4xf32> -> vector<4x4xf32>
    %555 = arith.addf %554, %370 : vector<4x4xf32>
    %556 = math.exp %555 : vector<4x4xf32>
    %cst_157 = arith.constant dense<0.000000e+00> : vector<4xf32>
    %557 = vector.multi_reduction <add>, %556, %cst_157 [1] : vector<4x4xf32> to vector<4xf32>
    %558 = vector.shape_cast %557 : vector<4xf32> to vector<4x1xf32>
    %559 = tpu.reciprocal %558 {approx = true} : vector<4x1xf32> -> vector<4x1xf32>
    %560 = vector.broadcast %559 : vector<4x1xf32> to vector<4x4xf32>
    %561 = arith.mulf %556, %560 : vector<4x4xf32>
    %cst_158 = arith.constant dense<0.000000e+00> : vector<4x8xf32>
    %562 = tpu.matmul %561, %553, %cst_158 {dimension_numbers = #tpu.dot_dimension_numbers<[1], [0], [0], [1], [0, 0, 1, 1], [], []>} : vector<4x4xf32>, vector<4x8xf32>, vector<4x8xf32> -> vector<4x8xf32>
    %563 = vector.extract_strided_slice %524 {offsets = [0, 24], sizes = [4, 8], strides = [1, 1]} : vector<4x32xf32> to vector<4x8xf32>
    %564 = vector.extract_strided_slice %525 {offsets = [0, 24], sizes = [4, 8], strides = [1, 1]} : vector<4x32xf32> to vector<4x8xf32>
    %565 = vector.extract_strided_slice %526 {offsets = [0, 24], sizes = [4, 8], strides = [1, 1]} : vector<4x32xf32> to vector<4x8xf32>
    %cst_159 = arith.constant dense<0.000000e+00> : vector<4x4xf32>
    %566 = tpu.matmul %563, %564, %cst_159 {dimension_numbers = #tpu.dot_dimension_numbers<[1], [1], [0], [0], [0, 0, 1, 0], [], []>} : vector<4x8xf32>, vector<4x8xf32>, vector<4x4xf32> -> vector<4x4xf32>
    %567 = arith.addf %566, %370 : vector<4x4xf32>
    %568 = math.exp %567 : vector<4x4xf32>
    %cst_160 = arith.constant dense<0.000000e+00> : vector<4xf32>
    %569 = vector.multi_reduction <add>, %568, %cst_160 [1] : vector<4x4xf32> to vector<4xf32>
    %570 = vector.shape_cast %569 : vector<4xf32> to vector<4x1xf32>
    %571 = tpu.reciprocal %570 {approx = true} : vector<4x1xf32> -> vector<4x1xf32>
    %572 = vector.broadcast %571 : vector<4x1xf32> to vector<4x4xf32>
    %573 = arith.mulf %568, %572 : vector<4x4xf32>
    %cst_161 = arith.constant dense<0.000000e+00> : vector<4x8xf32>
    %574 = tpu.matmul %573, %565, %cst_161 {dimension_numbers = #tpu.dot_dimension_numbers<[1], [0], [0], [1], [0, 0, 1, 1], [], []>} : vector<4x4xf32>, vector<4x8xf32>, vector<4x8xf32> -> vector<4x8xf32>
    %575 = tpu.concatenate %538, %550, %562, %574 in 1 : vector<4x8xf32>, vector<4x8xf32>, vector<4x8xf32>, vector<4x8xf32> -> vector<4x32xf32>
    %cst_162 = arith.constant dense<0.000000e+00> : vector<4x32xf32>
    %576 = tpu.matmul %575, %509, %cst_162 {dimension_numbers = #tpu.dot_dimension_numbers<[1], [0], [0], [1], [0, 0, 1, 1], [], []>} : vector<4x32xf32>, vector<32x32xf32>, vector<4x32xf32> -> vector<4x32xf32>
    %577 = vector.broadcast %513 : vector<1x32xf32> to vector<4x32xf32>
    %578 = arith.addf %576, %577 : vector<4x32xf32>
    %579 = arith.addf %501, %578 : vector<4x32xf32>
    %cst_163 = arith.constant dense<0.000000e+00> : vector<4xf32>
    %580 = vector.multi_reduction <add>, %579, %cst_163 [1] : vector<4x32xf32> to vector<4xf32>
    %581 = vector.shape_cast %580 : vector<4xf32> to vector<4x1xf32>
    %cst_164 = arith.constant 3.200000e+01 : f32
    %582 = vector.broadcast %cst_164 : f32 to vector<4x1xf32>
    %583 = arith.divf %581, %582 : vector<4x1xf32>
    %584 = vector.broadcast %583 : vector<4x1xf32> to vector<4x32xf32>
    %585 = arith.subf %579, %584 : vector<4x32xf32>
    %586 = arith.mulf %585, %585 : vector<4x32xf32>
    %cst_165 = arith.constant dense<0.000000e+00> : vector<4xf32>
    %587 = vector.multi_reduction <add>, %586, %cst_165 [1] : vector<4x32xf32> to vector<4xf32>
    %588 = vector.shape_cast %587 : vector<4xf32> to vector<4x1xf32>
    %cst_166 = arith.constant 3.200000e+01 : f32
    %589 = vector.broadcast %cst_166 : f32 to vector<4x1xf32>
    %590 = arith.divf %588, %589 : vector<4x1xf32>
    %591 = vector.broadcast %583 : vector<4x1xf32> to vector<4x32xf32>
    %592 = arith.subf %579, %591 : vector<4x32xf32>
    %cst_167 = arith.constant 9.99999974E-6 : f32
    %593 = vector.broadcast %cst_167 : f32 to vector<4x1xf32>
    %594 = arith.addf %590, %593 : vector<4x1xf32>
    %595 = math.rsqrt %594 : vector<4x1xf32>
    %596 = vector.broadcast %595 : vector<4x1xf32> to vector<4x32xf32>
    %597 = arith.mulf %592, %596 : vector<4x32xf32>
    %598 = vector.broadcast %515 : vector<1x32xf32> to vector<4x32xf32>
    %599 = arith.mulf %597, %598 : vector<4x32xf32>
    %600 = vector.broadcast %516 : vector<1x32xf32> to vector<4x32xf32>
    %601 = arith.addf %599, %600 : vector<4x32xf32>
    %cst_168 = arith.constant dense<0.000000e+00> : vector<4x128xf32>
    %602 = tpu.matmul %601, %510, %cst_168 {dimension_numbers = #tpu.dot_dimension_numbers<[1], [0], [0], [1], [0, 0, 1, 1], [], []>} : vector<4x32xf32>, vector<32x128xf32>, vector<4x128xf32> -> vector<4x128xf32>
    %603 = vector.broadcast %512 : vector<1x128xf32> to vector<4x128xf32>
    %604 = arith.addf %602, %603 : vector<4x128xf32>
    %cst_169 = arith.constant 0.000000e+00 : f32
    %605 = vector.broadcast %cst_169 : f32 to vector<4x128xf32>
    %606 = arith.maximumf %604, %605 : vector<4x128xf32>
    %cst_170 = arith.constant dense<0.000000e+00> : vector<4x32xf32>
    %607 = tpu.matmul %606, %505, %cst_170 {dimension_numbers = #tpu.dot_dimension_numbers<[1], [0], [0], [1], [0, 0, 1, 1], [], []>} : vector<4x128xf32>, vector<128x32xf32>, vector<4x32xf32> -> vector<4x32xf32>
    %608 = vector.broadcast %514 : vector<1x32xf32> to vector<4x32xf32>
    %609 = arith.addf %607, %608 : vector<4x32xf32>
    %610 = arith.addf %601, %609 : vector<4x32xf32>
    %cst_171 = arith.constant dense<0.000000e+00> : vector<4xf32>
    %611 = vector.multi_reduction <add>, %610, %cst_171 [1] : vector<4x32xf32> to vector<4xf32>
    %612 = vector.shape_cast %611 : vector<4xf32> to vector<4x1xf32>
    %cst_172 = arith.constant 3.200000e+01 : f32
    %613 = vector.broadcast %cst_172 : f32 to vector<4x1xf32>
    %614 = arith.divf %612, %613 : vector<4x1xf32>
    %615 = vector.broadcast %614 : vector<4x1xf32> to vector<4x32xf32>
    %616 = arith.subf %610, %615 : vector<4x32xf32>
    %617 = arith.mulf %616, %616 : vector<4x32xf32>
    %cst_173 = arith.constant dense<0.000000e+00> : vector<4xf32>
    %618 = vector.multi_reduction <add>, %617, %cst_173 [1] : vector<4x32xf32> to vector<4xf32>
    %619 = vector.shape_cast %618 : vector<4xf32> to vector<4x1xf32>
    %cst_174 = arith.constant 3.200000e+01 : f32
    %620 = vector.broadcast %cst_174 : f32 to vector<4x1xf32>
    %621 = arith.divf %619, %620 : vector<4x1xf32>
    %622 = vector.broadcast %614 : vector<4x1xf32> to vector<4x32xf32>
    %623 = arith.subf %610, %622 : vector<4x32xf32>
    %cst_175 = arith.constant 9.99999974E-6 : f32
    %624 = vector.broadcast %cst_175 : f32 to vector<4x1xf32>
    %625 = arith.addf %621, %624 : vector<4x1xf32>
    %626 = math.rsqrt %625 : vector<4x1xf32>
    %627 = vector.broadcast %626 : vector<4x1xf32> to vector<4x32xf32>
    %628 = arith.mulf %623, %627 : vector<4x32xf32>
    %629 = vector.broadcast %517 : vector<1x32xf32> to vector<4x32xf32>
    %630 = arith.mulf %628, %629 : vector<4x32xf32>
    %631 = vector.broadcast %518 : vector<1x32xf32> to vector<4x32xf32>
    %632 = arith.addf %630, %631 : vector<4x32xf32>
    %c4 = arith.constant 4 : index
    %c0_176 = arith.constant 0 : index
    %633 = vector.load %arg4[%c4, %c0_176] : memref<6x32xf32, #tpu.memory_space<vmem>>, vector<1x32xf32>
    %c5 = arith.constant 5 : index
    %c0_177 = arith.constant 0 : index
    %634 = vector.load %arg4[%c5, %c0_177] : memref<6x32xf32, #tpu.memory_space<vmem>>, vector<1x32xf32>
    %cst_178 = arith.constant dense<0.000000e+00> : vector<4xf32>
    %635 = vector.multi_reduction <add>, %632, %cst_178 [1] : vector<4x32xf32> to vector<4xf32>
    %636 = vector.shape_cast %635 : vector<4xf32> to vector<4x1xf32>
    %cst_179 = arith.constant 3.200000e+01 : f32
    %637 = vector.broadcast %cst_179 : f32 to vector<4x1xf32>
    %638 = arith.divf %636, %637 : vector<4x1xf32>
    %639 = vector.broadcast %638 : vector<4x1xf32> to vector<4x32xf32>
    %640 = arith.subf %632, %639 : vector<4x32xf32>
    %641 = arith.mulf %640, %640 : vector<4x32xf32>
    %cst_180 = arith.constant dense<0.000000e+00> : vector<4xf32>
    %642 = vector.multi_reduction <add>, %641, %cst_180 [1] : vector<4x32xf32> to vector<4xf32>
    %643 = vector.shape_cast %642 : vector<4xf32> to vector<4x1xf32>
    %cst_181 = arith.constant 3.200000e+01 : f32
    %644 = vector.broadcast %cst_181 : f32 to vector<4x1xf32>
    %645 = arith.divf %643, %644 : vector<4x1xf32>
    %646 = vector.broadcast %638 : vector<4x1xf32> to vector<4x32xf32>
    %647 = arith.subf %632, %646 : vector<4x32xf32>
    %cst_182 = arith.constant 9.99999974E-6 : f32
    %648 = vector.broadcast %cst_182 : f32 to vector<4x1xf32>
    %649 = arith.addf %645, %648 : vector<4x1xf32>
    %650 = math.rsqrt %649 : vector<4x1xf32>
    %651 = vector.broadcast %650 : vector<4x1xf32> to vector<4x32xf32>
    %652 = arith.mulf %647, %651 : vector<4x32xf32>
    %653 = vector.broadcast %633 : vector<1x32xf32> to vector<4x32xf32>
    %654 = arith.mulf %652, %653 : vector<4x32xf32>
    %655 = vector.broadcast %634 : vector<1x32xf32> to vector<4x32xf32>
    %656 = arith.addf %654, %655 : vector<4x32xf32>
    %c0_183 = arith.constant 0 : index
    %c0_184 = arith.constant 0 : index
    %c0_185 = arith.constant 0 : index
    %657 = vector.load %arg8[%c0_183, %c0_184, %c0_185] : memref<1x4x32xf32, #tpu.memory_space<vmem>>, vector<1x4x32xf32>
    %658 = vector.shape_cast %657 : vector<1x4x32xf32> to vector<4x32xf32>
    %659 = vector.shape_cast %656 : vector<4x32xf32> to vector<1x4x32xf32>
    tpu.vector_store %arg8[%c0_183, %c0_184, %c0_185], %659 {strides = array<i32>} : memref<1x4x32xf32, #tpu.memory_space<vmem>>, vector<1x4x32xf32>,
    return
  }
  func.func @transform_0(%arg0: i32, %arg1: memref<2xi32, #tpu.memory_space<smem>>) -> (i32, i32, i32) {
    %c0_i32 = arith.constant 0 : i32
    %c0_i32_0 = arith.constant 0 : i32
    %c0_i32_1 = arith.constant 0 : i32
    return %arg0, %c0_i32, %c0_i32_0 : i32, i32, i32
  }
  func.func @transform_1(%arg0: i32, %arg1: memref<2xi32, #tpu.memory_space<smem>>) -> (i32, i32) {
    %c0_i32 = arith.constant 0 : i32
    %c0_i32_0 = arith.constant 0 : i32
    %c0_i32_1 = arith.constant 0 : i32
    return %c0_i32, %c0_i32_0 : i32, i32
  }
  func.func @transform_2(%arg0: i32, %arg1: memref<2xi32, #tpu.memory_space<smem>>) -> (i32, i32) {
    %c0_i32 = arith.constant 0 : i32
    %c0_i32_0 = arith.constant 0 : i32
    %c0_i32_1 = arith.constant 0 : i32
    return %c0_i32, %c0_i32_0 : i32, i32
  }
  func.func @transform_3(%arg0: i32, %arg1: memref<2xi32, #tpu.memory_space<smem>>) -> (i32, i32, i32) {
    %c0_i32 = arith.constant 0 : i32
    %c0_i32_0 = arith.constant 0 : i32
    %c0_i32_1 = arith.constant 0 : i32
    %c0_i32_2 = arith.constant 0 : i32
    return %c0_i32, %c0_i32_0, %c0_i32_1 : i32, i32, i32
  }
  func.func @transform_4(%arg0: i32, %arg1: memref<2xi32, #tpu.memory_space<smem>>) -> (i32, i32, i32) {
    %c0_i32 = arith.constant 0 : i32
    %c0_i32_0 = arith.constant 0 : i32
    %c0_i32_1 = arith.constant 0 : i32
    %c0_i32_2 = arith.constant 0 : i32
    return %c0_i32, %c0_i32_0, %c0_i32_1 : i32, i32, i32
  }
  func.func @transform_5(%arg0: i32, %arg1: memref<2xi32, #tpu.memory_space<smem>>) -> (i32, i32, i32) {
    %c0_i32 = arith.constant 0 : i32
    %c0_i32_0 = arith.constant 0 : i32
    %c0_i32_1 = arith.constant 0 : i32
    %c0_i32_2 = arith.constant 0 : i32
    return %c0_i32, %c0_i32_0, %c0_i32_1 : i32, i32, i32
  }
  func.func @transform_6(%arg0: i32, %arg1: memref<2xi32, #tpu.memory_space<smem>>) -> (i32, i32, i32) {
    %c0_i32 = arith.constant 0 : i32
    %c0_i32_0 = arith.constant 0 : i32
    %c0_i32_1 = arith.constant 0 : i32
    return %arg0, %c0_i32, %c0_i32_0 : i32, i32, i32
  }
}

</mosaic_0001>

<bundles_post_ra>
// kernel: _forward_impl.1
= control target key start
LH: loop header
LB: loop body
LE: loop exit
PB: predicated region body
PF: predicated region fallthrough
CT: control target
= control target key end

     0   :  { %s6700_s27 = smov [#allocation3]   ;;  %s9582_s0 = inlined_call_operand.vmem [shape: s32[2], index: 0, kind: input, shape index: {}]   ;;  %s9583_s1 = inlined_call_operand.vmem [shape: s32[2,64,3], index: 1, kind: input, shape index: {}]   ;;  %s9584_s2 = inlined_call_operand.vmem [shape: f32[69,32], index: 2, kind: input, shape index: {}]   ;;  %s9585_s3 = inlined_call_operand.vmem [shape: f32[6,32], index: 3, kind: input, shape index: {}]   ;;  %s9586_s4 = inlined_call_operand.vmem [shape: f32[4,32,256], index: 4, kind: input, shape index: {}]   ;;  %s9587_s5 = inlined_call_operand.vmem [shape: f32[4,128,32], index: 5, kind: input, shape index: {}]   ;;  %s9588_s6 = inlined_call_operand.vmem [shape: f32[4,8,128], index: 6, kind: input, shape index: {}]   ;;  %s9589_s7 = inlined_call_operand.hbm [shape: f32[2,4,32], index: 7, kind: output, shape index: {}]  }
   0x1   :  { %9630 = sst [smem:[#allocation15_spill]] %s9583_s1  ;;  %s13_s26 = sshll.u32 %s9582_s0, 4  ;;  %s14_s26 = int_to_ptr.vmem [resolvable:$true] %s13_s26 }
   0x2   :  { %9631 = sst [smem:[#allocation16_spill]] %s9584_s2 }
   0x3   :  { %9632 = sst [smem:[#allocation17_spill]] %s9589_s7 }
   0x4   :  { %16 = dma.vmem_to_smem %s14_s26, 16, %s6700_s27, [#allocation2] }
   0x5   :  { %6678 = dma.done.wait [#allocation2], 16 }
   0x6   :  { %6679 = vsyncadd [#allocation2], 4294967280 }
   0x7   :  { %19 = sfence }
   0x8   :  { %20 = vsyncpa [#allocation5], 0 }
   0x9   :  { %22 = vsyncpa [#allocation5 + $0x1], 0  ;;  %s6766_s28 = smov 0   ;;  %s6768_s29 = smov 0  }
   0xa   :  { %s6770_s30 = smov 0   ;;  %s6772_s8 = smov 0  }
   0xb LB: > { %9633 = sst [smem:[#allocation8_spill]] %s6686_s28  ;;  %s6787_s0 = sadd.s32 4294967295, %s6698_s8   ;;  %s6698_s8 = sphi %s6772_s8, %s9673_s8   ;;  %s6694_s30 = sphi %s6770_s30, %s9678_s30   ;;  %s6690_s29 = sphi %s6768_s29, %s9677_s29   ;;  %s6686_s28 = sphi %s6766_s28, %s9676_s28  }
   0xc   : > { %9634 = sst [smem:[#allocation9_spill]] %s6694_s30  ;;  %s5541_s9 = sadd.s32 4294967294, %s6698_s8  }
   0xd   : > { %9635 = sst [smem:[#allocation10_spill]] %s6698_s8  ;;  %s6791_s10 = sadd.s32 1, %s6698_s8  }
   0xe   : > { %9636 = sst [smem:[#allocation11_spill]] %s6791_s10  ;;  %s166_s11 = sadd.s32 1, %s6694_s30 }
   0xf   : > { %s163_s12 = ssub.s32 %s6698_s8, %s6791_s10  ;;  %p176_p0 = scmp.ne.s32.totalorder %s6694_s30, %s6690_s29 }
  0x10   : > { %p164_p1 = scmp.eq.s32.totalorder %s163_s12, 0  ;;  %p177_p2 = scmp.eq.s32.totalorder %s6787_s0, 1 }
  0x11   : > { %p182_p3 = scmp.ne.s32.totalorder %s6690_s29, %s6686_s28  ;;  %p183_p4 = scmp.eq.s32.totalorder %s5541_s9, 1 }
  0x12   : > { %s6802_s13 = scalar_select %p164_p1, %s6694_s30, %s166_s11  }
  0x13   : > { %p6804_p5 = por %p177_p2, %p176_p0  ;;  %p6808_p6 = por %p183_p4, %p182_p3 }
  0x14   : > { %9637 = sst [smem:[#allocation12_spill]] %s6802_s13  ;;  %p5544_p7 = scmp.ge.s32.totalorder %s6698_s8, 1 }
  0x15   : > { %s9638_s14 = scalar_select %p6804_p5, 1, 0 }
  0x16   : > { %s9640_s15 = scalar_select %p6808_p6, 1, 0 }
  0x17   : > { %9639 = sst [smem:[#allocation13_spill]] %s9638_s14  ;;  %p224_p8 = scmp.lt.s32.totalorder %s6698_s8, 3 }
  0x18   : > { %9641 = sst [smem:[#allocation14_spill]] %s9640_s15 }
  0x19   : > { %p225_p9 = pnand %p5544_p7, %p224_p8 }
  0x1a   : > { %p254_p10 = scmp.lt.s32.totalorder (!%p225_p9), %s6787_s0, 1  ;;  %s9642_s1 = sld [smem:[#allocation15_spill]] (!%p225_p9) }
  0x1b   : > { %228 = sbr.rel (%p225_p9) target bundleno = 8559 (0x216f), region = 44  ;;  %s9643_s2 = sld [smem:[#allocation16_spill]] (!%p225_p9) }
  0x1c   : > { %s9617_s25 = smov (!%p225_p9), 96   ;;  %s9619_s26 = smov (!%p225_p9), 88  }
  0x1d   : > { %s9615_s27 = smov (!%p225_p9), 120   ;;  %s9611_s9 = smov (!%p225_p9), 80  }
  0x1e   : > { %s9613_s11 = smov (!%p225_p9), 72   ;;  %s9609_s12 = smov (!%p225_p9), 112  }
  0x1f   : > { %s9605_s18 = smov (!%p225_p9), 56   ;;  %s9601_s19 = smov (!%p225_p9), 48  }
  0x20   : > { %v6701_v0 = vmov 0   ;;  %s255_s16 = scalar_select %p254_p10, %s6787_s0, 1  ;;  %v6702_v1 = vmov 1   ;;  %v6703_v8 = vmov 2   ;;  %vm448_vm0 = vcmask 1044480  }
  0x21   : > { %6015 = vset.pattern.permute.xlu1 %v6701_v0  ;;  %6013 = vset.pattern.permute.xlu0 %v6701_v0  ;;  %v276_v24 = vld [vmem:[%s9643_s2 + $0x40] sm:$0x1f]  ;;  %v275_v25 = vld [vmem:[%s9643_s2 + $0x38] sm:$0xff]  ;;  %v274_v26 = vld [vmem:[%s9643_s2 + $0x30] sm:$0xff]  ;;  %v277_v39 = vlaneseq  ;;  %vm423_vm5 = vcmask 564224   ;;  %v6704_v44 = vmov 0.0  }
  0x22   : > { %6018 = vset.pattern.permute.xlu2 %v6702_v1  ;;  %s5946_s17 = sshll.u32 %s255_s16, 6  ;;  %5556 = vmatpush.msk.msra.mxu0 %vm448_vm0, %v276_v24  ;;  %v273_v27 = vld [vmem:[%s9643_s2 + $0x28] sm:$0xff]  ;;  %v272_v28 = vld [vmem:[%s9643_s2 + $0x20] sm:$0xff]  ;;  %v271_v29 = vld [vmem:[%s9643_s2 + $0x18] sm:$0xff]  ;;  %s9607_s16 = smov 104  }
  0x23   : > { %s6822_s20 = scalar_lea.vmem %s9642_s1, %s5946_s17  ;;  %v270_v30 = vld [vmem:[%s9643_s2 + $0x10] sm:$0xff]  ;;  %v269_v31 = vld [vmem:[%s9643_s2 + $0x8] sm:$0xff]  ;;  %v268_v32 = vld [vmem:[%s9643_s2] sm:$0xff]  ;;  %v6893_v40 = vand.u32 127, %v277_v39  ;;  %s9603_s17 = smov 64  }
  0x24   : > { %v261_v2 = vld [vmem:[%s6822_s20 + $0x8] sm:$0xff]  ;;  %v260_v3 = vld [vmem:[%s6822_s20] sm:$0xff]  ;;  %v262_v9 = vld [vmem:[%s6822_s20 + $0x10] sm:$0xff]  ;;  %460 = vmatpush.msra.mxu0 %v275_v25  ;;  %v6705_v25 = vmov 32.0   ;;  %s9599_s21 = smov 40   ;;  %s9595_s22 = smov 8  }
  0x25   : > { %283 = vperm.xlu1 %6015, %v261_v2   ;;  %280 = vperm.xlu0 %6013, %v260_v3   ;;  %v312_v4 = vadd.s32 50, %v261_v2  ;;  %v359_v5 = vadd.s32 66, %v260_v3  ;;  %v311_v6 = vadd.s32 50, %v260_v3  ;;  %v360_v7 = vadd.s32 66, %v261_v2  ;;  %v6831_v12 = vld [vmem:[%s6822_s20 + $0x20] sm:$0xff]  ;;  %v6834_v13 = vld [vmem:[%s6822_s20 + $0x18] sm:$0xff] }
  0x26   : > { %v361_v10 = vadd.s32 66, %v262_v9  ;;  %v313_v11 = vadd.s32 50, %v262_v9  ;;  %v315_v14 = vadd.s32 50, %v6831_v12  ;;  %v314_v15 = vadd.s32 50, %v6834_v13  ;;  %v6843_v17 = vld [vmem:[%s6822_s20 + $0x30] sm:$0xff]  ;;  %v6850_v19 = vld [vmem:[%s6822_s20 + $0x28] sm:$0xff]  ;;  %461 = vmatpush.msra.mxu0 %v274_v26 }
  0x27   : > { %323 = vperm.xlu2 %6018, %v312_v4   ;;  %v362_v16 = vadd.s32 66, %v6834_v13  ;;  %v363_v18 = vadd.s32 66, %v6831_v12  ;;  %v316_v20 = vadd.s32 50, %v6850_v19  ;;  %v364_v21 = vadd.s32 66, %v6850_v19  ;;  %v6888_v34 = vld [vmem:[%s6822_s20 + $0x38] sm:$0xff]  ;;  %s9593_s23 = smov 16  }
  0x28   : > { %v317_v22 = vadd.s32 50, %v6843_v17  ;;  %v365_v23 = vadd.s32 66, %v6843_v17  ;;  %462 = vmatpush.msra.mxu0 %v273_v27  ;;  %v366_v35 = vadd.s32 66, %v6888_v34  ;;  %v318_v46 = vadd.s32 50, %v6888_v34  ;;  %s9591_s24 = smov 24   ;;  %s9208_s13 = sld [smem:[#allocation3 + %s6787_s0]] }
  0x29   : > { %6237 = vrcp.f32 %v6705_v25  ;;  %s9663_s1 = smov 96   ;;  %s9664_s2 = smov 120  }
  0x2a   : > { %463 = vmatpush.msra.mxu0 %v272_v28  ;;  %s5943_s30 = sshll.u32 %s6787_s0, 2  ;;  %s9668_s10 = sld [smem:[#allocation17_spill]] }
  0x2c   : > { %464 = vmatpush.msra.mxu0 %v271_v29 }
  0x2d   : > { %6016 = vset.pattern.permute.xlu1 %v6703_v8  ;;  %6014 = vset.pattern.permute.xlu0 %v6702_v1 }
  0x2e   : > { %368 = vperm.xlu1 %6016, %v359_v5   ;;  %320 = vperm.xlu0 %6014, %v311_v6  }
  0x2f   : > { %6019 = vset.pattern.permute.xlu2 %v6703_v8  ;;  %465 = vmatpush.msra.mxu0 %v270_v30  ;;  %v6238_v26 = vpop.eup %6237 }
  0x30   : > { %371 = vperm.xlu2 %6019, %v360_v7   ;;  %v521_v27 = vmul.f32 32.0, %v6238_v26  ;;  %s5477_s14 = scalar_lea.hbm %s9668_s10, %s5943_s30 }
  0x31   : > { %466 = vmatpush.msra.mxu0 %v269_v31 }
  0x32   : > { %v522_v28 = vsub.f32 1.0, %v521_v27 }
  0x33   : > { %467 = vmatpush.msra.mxu0 %v268_v32 }
  0x34   : > { %v523_v29 = vmul.f32 %v6238_v26, %v522_v28 }
  0x36   : > { %6017 = vset.pattern.permute.xlu1 %v6701_v0  ;;  %6021 = vset.pattern.permute.xlu0 %v6703_v8  ;;  %v524_v30 = vadd.f32 %v6238_v26, %v523_v29 }
  0x37   : > { %286 = vperm.xlu1 %6017, %v262_v9   ;;  %374 = vperm.xlu0 %6021, %v361_v10  }
  0x38   : > { %6020 = vset.pattern.permute.xlu2 %v6702_v1 }
  0x39   : > { %326 = vperm.xlu2 %6020, %v313_v11  }
  0x3f   : > { %289 = vperm.xlu1 %6017, %v6834_v13   ;;  %6024 = vset.pattern.permute.xlu0 %v6702_v1 }
  0x40   : > { %332 = vperm.xlu0 %6024, %v315_v14  }
  0x41   : > { %329 = vperm.xlu2 %6020, %v314_v15  }
  0x47   : > { %6022 = vset.pattern.permute.xlu1 %v6703_v8 }
  0x48   : > { %377 = vperm.xlu1 %6022, %v362_v16   ;;  %6027 = vset.pattern.permute.xlu0 %v6701_v0 }
  0x49   : > { %6023 = vset.pattern.permute.xlu2 %v6701_v0  ;;  %298 = vperm.xlu0 %6027, %v6843_v17  }
  0x4a   : > { %292 = vperm.xlu2 %6023, %v6831_v12  }
  0x50   : > { %380 = vperm.xlu1 %6022, %v363_v18  }
  0x51   : > { %6030 = vset.pattern.permute.xlu0 %v6703_v8 }
  0x52   : > { %295 = vperm.xlu2 %6023, %v6850_v19   ;;  %389 = vperm.xlu0 %6030, %v366_v35  }
  0x58   : > { %6025 = vset.pattern.permute.xlu1 %v6702_v1 }
  0x59   : > { %335 = vperm.xlu1 %6025, %v316_v20  }
  0x5a   : > { %6026 = vset.pattern.permute.xlu2 %v6703_v8 }
  0x5b   : > { %383 = vperm.xlu2 %6026, %v364_v21  }
  0x61   : > { %338 = vperm.xlu1 %6025, %v317_v22  }
  0x63   : > { %386 = vperm.xlu2 %6026, %v365_v23  }
  0x69   : > { %6028 = vset.pattern.permute.xlu1 %v6701_v0 }
  0x6a   : > { %301 = vperm.xlu1 %6028, %v6888_v34  }
  0x6b   : > { %6029 = vset.pattern.permute.xlu2 %v6702_v1 }
  0x6c   : > { %341 = vperm.xlu2 %6029, %v318_v46  }
  0x81   : > { %v324_v33 = vpop.permute.xlu2 %323 }
  0x82   : > { %vm344_vm6 = vcmp.eq.s32.totalorder %v6893_v40, %v324_v33 }
  0x8a   : > { %v372_v36 = vpop.permute.xlu2 %371 }
  0x8b   : > { %vm392_vm10 = vcmp.eq.s32.totalorder %v6893_v40, %v372_v36 }
  0x93   : > { %v327_v41 = vpop.permute.xlu2 %326 }
  0x94   : > { %vm345_vm11 = vcmp.eq.s32.totalorder %v6893_v40, %v327_v41 }
  0x97   : > { %v281_v37 = vpop.permute.xlu0 %280  ;;  %v284_v38 = vpop.permute.xlu1 %283 }
  0x98   : > { %vm303_vm1 = vcmp.eq.s32.totalorder %v6893_v40, %v281_v37  ;;  %vm304_vm7 = vcmp.eq.s32.totalorder %v6893_v40, %v284_v38 }
  0x99   : > { %vm352_vm9 = vmor %vm304_vm7, %vm344_vm6 }
  0x9a   : > { %vm400_vm12 = vmor %vm352_vm9, %vm392_vm10 }
  0x9b   : > { %v330_v47 = vpop.permute.xlu2 %329  ;;  %v5549_v50 = vsel %vm400_vm12, 1.0, %v6704_v44 }
  0xa0   : > { %v321_v42 = vpop.permute.xlu0 %320  ;;  %v369_v43 = vpop.permute.xlu1 %368 }
  0xa1   : > { %vm343_vm2 = vcmp.eq.s32.totalorder %v6893_v40, %v321_v42  ;;  %vm391_vm3 = vcmp.eq.s32.totalorder %v6893_v40, %v369_v43 }
  0xa2   : > { %vm351_vm4 = vmor %vm303_vm1, %vm343_vm2  ;;  %vm346_vm2 = vcmp.eq.s32.totalorder %v6893_v40, %v330_v47 }
  0xa3   : > { %vm399_vm8 = vmor %vm351_vm4, %vm391_vm3 }
  0xa4   : > { %v5548_v45 = vsel %vm399_vm8, 1.0, %v6704_v44  ;;  %v293_v53 = vpop.permute.xlu2 %292 }
  0xa5   : > { %5557 = vmatmul.msk.f32.vlgmr.msra.gmra.mxu0 %vm423_vm5, %v5548_v45  ;;  %vm307_vm7 = vcmp.eq.s32.totalorder %v6893_v40, %v293_v53 }
  0xa9   : > { %v287_v48 = vpop.permute.xlu1 %286  ;;  %v375_v49 = vpop.permute.xlu0 %374 }
  0xaa   : > { %vm305_vm13 = vcmp.eq.s32.totalorder %v6893_v40, %v287_v48  ;;  %vm393_vm15 = vcmp.eq.s32.totalorder %v6893_v40, %v375_v49 }
  0xab   : > { %vm353_vm14 = vmor %vm305_vm13, %vm345_vm11 }
  0xac   : > { %vm401_vm0 = vmor %vm353_vm14, %vm393_vm15  ;;  %v296_v56 = vpop.permute.xlu2 %295 }
  0xad   : > { %5558 = vmatmul.msk.f32.gmra.mxu0 %vm423_vm5, %v5549_v50  ;;  %v5550_v52 = vsel %vm401_vm0, 1.0, %v6704_v44  ;;  %vm308_vm12 = vcmp.eq.s32.totalorder %v6893_v40, %v296_v56 }
  0xb1   : > { %v290_v51 = vpop.permute.xlu1 %289 }
  0xb2   : > { %vm306_vm1 = vcmp.eq.s32.totalorder %v6893_v40, %v290_v51  ;;  %v333_v55 = vpop.permute.xlu0 %332 }
  0xb3   : > { %vm354_vm3 = vmor %vm306_vm1, %vm346_vm2  ;;  %vm347_vm8 = vcmp.eq.s32.totalorder %v6893_v40, %v333_v55 }
  0xb4   : > { %vm355_vm9 = vmor %vm307_vm7, %vm347_vm8 }
  0xb5   : > { %5559 = vmatmul.msk.f32.gmra.mxu0 %vm423_vm5, %v5550_v52  ;;  %v384_v60 = vpop.permute.xlu2 %383 }
  0xb6   : > { %vm396_vm13 = vcmp.eq.s32.totalorder %v6893_v40, %v384_v60 }
  0xba   : > { %v378_v54 = vpop.permute.xlu1 %377 }
  0xbb   : > { %vm394_vm4 = vcmp.eq.s32.totalorder %v6893_v40, %v378_v54  ;;  %v299_v63 = vpop.permute.xlu0 %298 }
  0xbc   : > { %vm402_vm6 = vmor %vm354_vm3, %vm394_vm4  ;;  %vm309_vm1 = vcmp.eq.s32.totalorder %v6893_v40, %v299_v63 }
  0xbd   : > { %v5551_v57 = vsel %vm402_vm6, 1.0, %v6704_v44  ;;  %v387_v0 = vpop.permute.xlu2 %386 }
  0xbe   : > { %5560 = vmatmul.msk.f32.gmra.mxu0 %vm423_vm5, %v5551_v57  ;;  %vm397_vm2 = vcmp.eq.s32.totalorder %v6893_v40, %v387_v0 }
  0xc2   : > { %v381_v58 = vpop.permute.xlu1 %380 }
  0xc3   : > { %vm395_vm10 = vcmp.eq.s32.totalorder %v6893_v40, %v381_v58 }
  0xc4   : > { %vm403_vm11 = vmor %vm355_vm9, %vm395_vm10  ;;  %v390_v5 = vpop.permute.xlu0 %389 }
  0xc5   : > { %v5552_v59 = vsel %vm403_vm11, 1.0, %v6704_v44  ;;  %vm398_vm10 = vcmp.eq.s32.totalorder %v6893_v40, %v390_v5 }
  0xc6   : > { %5561 = vmatmul.msk.f32.gmra.mxu0 %vm423_vm5, %v5552_v59  ;;  %v342_v3 = vpop.permute.xlu2 %341 }
  0xc7   : > { %vm350_vm7 = vcmp.eq.s32.totalorder %v6893_v40, %v342_v3 }
  0xcb   : > { %v336_v61 = vpop.permute.xlu1 %335 }
  0xcc   : > { %vm348_vm14 = vcmp.eq.s32.totalorder %v6893_v40, %v336_v61 }
  0xcd   : > { %vm356_vm15 = vmor %vm308_vm12, %vm348_vm14  ;;  %vm495_vm12 = vcmask 261120  }
  0xce   : > { %vm404_vm0 = vmor %vm356_vm15, %vm396_vm13 }
  0xcf   : > { %v5553_v62 = vsel %vm404_vm0, 1.0, %v6704_v44 }
  0xd0   : > { %5562 = vmatmul.msk.f32.gmra.mxu0 %vm423_vm5, %v5553_v62 }
  0xd3   : > { %v339_v1 = vpop.permute.xlu1 %338 }
  0xd4   : > { %vm349_vm3 = vcmp.eq.s32.totalorder %v6893_v40, %v339_v1 }
  0xd5   : > { %vm357_vm4 = vmor %vm309_vm1, %vm349_vm3 }
  0xd6   : > { %vm405_vm6 = vmor %vm357_vm4, %vm397_vm2 }
  0xd7   : > { %v5554_v2 = vsel %vm405_vm6, 1.0, %v6704_v44 }
  0xd8   : > { %5563 = vmatmul.msk.f32.gmra.mxu0 %vm423_vm5, %v5554_v2 }
  0xdc   : > { %v302_v4 = vpop.permute.xlu1 %301 }
  0xdd   : > { %vm310_vm8 = vcmp.eq.s32.totalorder %v6893_v40, %v302_v4 }
  0xde   : > { %vm358_vm9 = vmor %vm310_vm8, %vm350_vm7 }
  0xdf   : > { %vm406_vm11 = vmor %vm358_vm9, %vm398_vm10 }
  0xe0   : > { %v5555_v6 = vsel %vm406_vm11, 1.0, %v6704_v44 }
  0xe1   : > { %5564 = vmatmul.msk.f32.gmra.mxu0 %vm423_vm5, %v5555_v6  ;;  %vm525_vm5 = vweird.f32 %v6238_v26 }
  0xe2   : > { %v6943_v31 = vsel %vm525_vm5, %v6238_v26, %v524_v30 }
 0x122   : > { %v469_v7 = vpop.f32.mrf.mxu0 }
 0x123   : > { %v496_v8 = vsel %vm495_vm12, %v469_v7, 0.0 }
 0x124   : > { %497 = vadd.xlane.f32.xlu1 %v496_v8 }
 0x12a   : > { %v472_v9 = vpop.f32.mrf.mxu0 }
 0x12b   : > { %v499_v10 = vsel %vm495_vm12, %v472_v9, 0.0 }
 0x12c   : > { %500 = vadd.xlane.f32.xlu2 %v499_v10  ;;  %v6997_v10 = vld [vmem:[%s9586_s4 + $0x20] sm:$0xff] }
 0x132   : > { %v475_v11 = vpop.f32.mrf.mxu0 }
 0x133   : > { %v502_v14 = vsel %vm495_vm12, %v475_v11, 0.0 }
 0x134   : > { %503 = vadd.xlane.f32.xlu0 %v502_v14  ;;  %v7009_v14 = vld [vmem:[%s9586_s4] sm:$0xff] }
 0x13b   : > { %v478_v15 = vpop.f32.mrf.mxu0 }
 0x13c   : > { %v505_v16 = vsel %vm495_vm12, %v478_v15, 0.0 }
 0x13d   : > { %506 = vadd.xlane.f32.xlu2 %v505_v16 }
 0x143   : > { %v481_v18 = vpop.f32.mrf.mxu0 }
 0x144   : > { %v508_v20 = vsel %vm495_vm12, %v481_v18, 0.0 }
 0x145   : > { %509 = vadd.xlane.f32.xlu1 %v508_v20 }
 0x14d   : > { %v484_v21 = vpop.f32.mrf.mxu0 }
 0x14e   : > { %v511_v22 = vsel %vm495_vm12, %v484_v21, 0.0 }
 0x14f   : > { %512 = vadd.xlane.f32.xlu2 %v511_v22 }
 0x155   : > { %v487_v23 = vpop.f32.mrf.mxu0 }
 0x156   : > { %v514_v24 = vsel %vm495_vm12, %v487_v23, 0.0 }
 0x157   : > { %515 = vadd.xlane.f32.xlu2 %v514_v24 }
 0x15e   : > { %v490_v42 = vpop.f32.mrf.mxu0 }
 0x15f   : > { %v517_v46 = vsel %vm495_vm12, %v490_v42, 0.0 }
 0x197   : > { %v498_v32 = vpop.xlane.xlu1 %497 }
 0x198   : > { %v527_v33 = vmul.f32 %v6943_v31, %v498_v32 }
 0x19a   : > { %v6946_v35 = vsub.f32 %v469_v7, %v527_v33 }
 0x19c   : > { %v543_v36 = vmul.f32 %v6946_v35, %v6946_v35 }
 0x19e   : > { %v551_v37 = vsel %vm495_vm12, %v543_v36, 0.0 }
 0x19f   : > { %v501_v38 = vpop.xlane.xlu2 %500  ;;  %552 = vadd.xlane.f32.xlu1 %v551_v37 }
 0x1a0   : > { %v528_v41 = vmul.f32 %v6943_v31, %v501_v38 }
 0x1a2   : > { %v6952_v43 = vsub.f32 %v472_v9, %v528_v41  ;;  %v6991_v9 = vld [vmem:[%s9586_s4 + $0x30] sm:$0xff] }
 0x1a3   : > { %918 = vmatpush.msra.mxu2 %v6991_v9  ;;  %v6111_v20 = vpack.i.bf16 %v6997_v10, %v6991_v9 }
 0x1a4   : > { %v544_v45 = vmul.f32 %v6952_v43, %v6952_v43 }
 0x1a5   : > { %919 = vmatpush.msra.mxu2 %v6997_v10 }
 0x1a6   : > { %v554_v47 = vsel %vm495_vm12, %v544_v45, 0.0 }
 0x1a7   : > { %555 = vadd.xlane.f32.xlu0 %v554_v47  ;;  %518 = vadd.xlane.f32.xlu1 %v517_v46  ;;  %v504_v48 = vpop.xlane.xlu0 %503 }
 0x1a8   : > { %v529_v49 = vmul.f32 %v6943_v31, %v504_v48  ;;  %v7028_v48 = vld [vmem:[%s9585_s3] ss:$0 sm:$0xff] }
 0x1aa   : > { %v6959_v50 = vsub.f32 %v475_v11, %v529_v49  ;;  %v7003_v11 = vld [vmem:[%s9586_s4 + $0x10] sm:$0xff] }
 0x1ab   : > { %920 = vmatpush.msra.mxu2 %v7003_v11  ;;  %v6116_v30 = vpack.i.bf16 %v7009_v14, %v7003_v11 }
 0x1ac   : > { %v545_v51 = vmul.f32 %v6959_v50, %v6959_v50 }
 0x1ad   : > { %921 = vmatpush.msra.mxu2 %v7009_v14 }
 0x1ae   : > { %v557_v52 = vsel %vm495_vm12, %v545_v51, 0.0 }
 0x1af   : > { %558 = vadd.xlane.f32.xlu2 %v557_v52 }
 0x1b0   : > { %v507_v53 = vpop.xlane.xlu2 %506 }
 0x1b1   : > { %v530_v54 = vmul.f32 %v6943_v31, %v507_v53  ;;  %v7034_v53 = vld [vmem:[%s9585_s3 + $0x1] ss:$0 sm:$0xff] }
 0x1b3   : > { %v6965_v55 = vsub.f32 %v478_v15, %v530_v54 }
 0x1b5   : > { %v546_v56 = vmul.f32 %v6965_v55, %v6965_v55 }
 0x1b7   : > { %v560_v57 = vsel %vm495_vm12, %v546_v56, 0.0 }
 0x1b8   : > { %561 = vadd.xlane.f32.xlu0 %v560_v57  ;;  %v510_v58 = vpop.xlane.xlu1 %509 }
 0x1b9   : > { %v531_v59 = vmul.f32 %v6943_v31, %v510_v58 }
 0x1bb   : > { %v6971_v60 = vsub.f32 %v481_v18, %v531_v59 }
 0x1bd   : > { %v547_v61 = vmul.f32 %v6971_v60, %v6971_v60 }
 0x1bf   : > { %v563_v62 = vsel %vm495_vm12, %v547_v61, 0.0 }
 0x1c0   : > { %564 = vadd.xlane.f32.xlu1 %v563_v62 }
 0x1c2   : > { %v513_v63 = vpop.xlane.xlu2 %512 }
 0x1c3   : > { %v532_v0 = vmul.f32 %v6943_v31, %v513_v63 }
 0x1c5   : > { %v6977_v1 = vsub.f32 %v484_v21, %v532_v0 }
 0x1c7   : > { %v548_v2 = vmul.f32 %v6977_v1, %v6977_v1 }
 0x1c9   : > { %v566_v3 = vsel %vm495_vm12, %v548_v2, 0.0 }
 0x1ca   : > { %v516_v4 = vpop.xlane.xlu2 %515  ;;  %567 = vadd.xlane.f32.xlu2 %v566_v3 }
 0x1cb   : > { %v533_v5 = vmul.f32 %v6943_v31, %v516_v4 }
 0x1cd   : > { %v6983_v6 = vsub.f32 %v487_v23, %v533_v5 }
 0x1cf   : > { %v549_v7 = vmul.f32 %v6983_v6, %v6983_v6 }
 0x1d1   : > { %v569_v8 = vsel %vm495_vm12, %v549_v7, 0.0 }
 0x1d2   : > { %570 = vadd.xlane.f32.xlu0 %v569_v8 }
 0x212   : > { %v553_v15 = vpop.xlane.xlu1 %552 }
 0x213   : > { %v575_v16 = vmul.f32 %v553_v15, %v6943_v31 }
 0x215   : > { %v583_v18 = vadd.f32 1e-05, %v575_v16 }
 0x217   : > { %6239 = vrsqrt.f32 %v583_v18  ;;  %vm597_vm14 = vweird.f32 %v583_v18 }
 0x21a   : > { %v519_v21 = vpop.xlane.xlu1 %518  ;;  %v556_v22 = vpop.xlane.xlu0 %555 }
 0x21b   : > { %v534_v23 = vmul.f32 %v6943_v31, %v519_v21  ;;  %v576_v24 = vmul.f32 %v556_v22, %v6943_v31 }
 0x21d   : > { %v6240_v25 = vpop.eup %6239  ;;  %v7017_v26 = vsub.f32 %v490_v42, %v534_v23  ;;  %v584_v27 = vadd.f32 1e-05, %v576_v24 }
 0x21e   : > { %v592_v28 = vmul.f32 %v6240_v25, %v583_v18  ;;  %vm598_vm13 = vweird.f32 %v6240_v25 }
 0x21f   : > { %6241 = vrsqrt.f32 %v584_v27  ;;  %v550_v29 = vmul.f32 %v7017_v26, %v7017_v26  ;;  %vm599_vm15 = vmor %vm597_vm14, %vm598_vm13  ;;  %vm607_vm1 = vweird.f32 %v584_v27 }
 0x220   : > { %v593_v32 = vmul.f32 %v6240_v25, %v592_v28 }
 0x221   : > { %v572_v33 = vsel %vm495_vm12, %v550_v29, 0.0 }
 0x222   : > { %v594_v36 = vmul.f32 0.5, %v593_v32  ;;  %573 = vadd.xlane.f32.xlu1 %v572_v33  ;;  %v559_v37 = vpop.xlane.xlu2 %558 }
 0x223   : > { %v577_v38 = vmul.f32 %v559_v37, %v6943_v31 }
 0x224   : > { %v595_v41 = vsub.f32 1.5, %v594_v36 }
 0x225   : > { %v6242_v42 = vpop.eup %6241  ;;  %v585_v45 = vadd.f32 1e-05, %v577_v38 }
 0x226   : > { %v596_v46 = vmul.f32 %v6240_v25, %v595_v41  ;;  %v602_v47 = vmul.f32 %v6242_v42, %v584_v27  ;;  %vm608_vm0 = vweird.f32 %v6242_v42 }
 0x227   : > { %6243 = vrsqrt.f32 %v585_v45  ;;  %vm609_vm2 = vmor %vm607_vm1, %vm608_vm0  ;;  %vm617_vm4 = vweird.f32 %v585_v45 }
 0x228   : > { %v603_v49 = vmul.f32 %v6242_v42, %v602_v47  ;;  %v600_v51 = vsel %vm599_vm15, %v6240_v25, %v596_v46 }
 0x229   : > { %v671_v52 = vmul.f32 %v600_v51, %v6946_v35 }
 0x22a   : > { %v604_v54 = vmul.f32 0.5, %v603_v49 }
 0x22b   : > { %v562_v56 = vpop.xlane.xlu0 %561  ;;  %v680_v57 = vmul.f32 %v7028_v48, %v671_v52 }
 0x22c   : > { %v605_v58 = vsub.f32 1.5, %v604_v54  ;;  %v578_v59 = vmul.f32 %v562_v56, %v6943_v31 }
 0x22d   : > { %v6244_v61 = vpop.eup %6243  ;;  %v7039_v62 = vadd.f32 %v7034_v53, %v680_v57 }
 0x22e   : > { %v606_v63 = vmul.f32 %v6242_v42, %v605_v58  ;;  %v612_v35 = vmul.f32 %v6244_v61, %v585_v45  ;;  %v586_v0 = vadd.f32 1e-05, %v578_v59  ;;  %vm618_vm3 = vweird.f32 %v6244_v61 }
 0x22f   : > { %5589 = vmatmul.msk.f32.vlgmr.msra.gmra.mxu2 %vm495_vm12, %v7039_v62  ;;  %vm619_vm6 = vmor %vm617_vm4, %vm618_vm3 }
 0x230   : > { %v613_v2 = vmul.f32 %v6244_v61, %v612_v35  ;;  %6245 = vrsqrt.f32 %v586_v0  ;;  %v610_v3 = vsel %vm609_vm2, %v6242_v42, %v606_v63  ;;  %vm627_vm8 = vweird.f32 %v586_v0 }
 0x231   : > { %v672_v4 = vmul.f32 %v610_v3, %v6952_v43 }
 0x232   : > { %v614_v5 = vmul.f32 0.5, %v613_v2 }
 0x233   : > { %v565_v7 = vpop.xlane.xlu1 %564  ;;  %v681_v8 = vmul.f32 %v7028_v48, %v672_v4 }
 0x234   : > { %v615_v15 = vsub.f32 1.5, %v614_v5  ;;  %v579_v16 = vmul.f32 %v565_v7, %v6943_v31 }
 0x235   : > { %v7047_v18 = vadd.f32 %v7034_v53, %v681_v8 }
 0x236   : > { %v6246_v21 = vpop.eup %6245  ;;  %v616_v22 = vmul.f32 %v6244_v61, %v615_v15  ;;  %v587_v23 = vadd.f32 1e-05, %v579_v16 }
 0x237   : > { %v622_v24 = vmul.f32 %v6246_v21, %v586_v0  ;;  %5590 = vmatmul.msk.f32.gmra.mxu2 %vm495_vm12, %v7047_v18  ;;  %vm628_vm7 = vweird.f32 %v6246_v21 }
 0x238   : > { %6247 = vrsqrt.f32 %v587_v23  ;;  %v620_v43 = vsel %vm619_vm6, %v6244_v61, %v616_v22  ;;  %vm629_vm9 = vmor %vm627_vm8, %vm628_vm7  ;;  %vm637_vm11 = vweird.f32 %v587_v23  ;;  %vm704_vm7 = vcmp.ne.s32.totalorder %v6888_v34, 0 }
 0x239   : > { %v623_v25 = vmul.f32 %v6246_v21, %v622_v24  ;;  %v673_v27 = vmul.f32 %v620_v43, %v6959_v50  ;;  %vm721_vm8 = vcmask 7168  }
 0x23b   : > { %v624_v28 = vmul.f32 0.5, %v623_v25  ;;  %v682_v29 = vmul.f32 %v7028_v48, %v673_v27 }
 0x23d   : > { %v625_v32 = vsub.f32 1.5, %v624_v28  ;;  %v568_v33 = vpop.xlane.xlu2 %567  ;;  %v7054_v36 = vadd.f32 %v7034_v53, %v682_v29 }
 0x23e   : > { %v6248_v37 = vpop.eup %6247  ;;  %v580_v38 = vmul.f32 %v568_v33, %v6943_v31 }
 0x23f   : > { %v626_v41 = vmul.f32 %v6246_v21, %v625_v32  ;;  %v632_v42 = vmul.f32 %v6248_v37, %v587_v23  ;;  %5591 = vmatmul.msk.f32.gmra.mxu2 %vm495_vm12, %v7054_v36  ;;  %vm638_vm10 = vweird.f32 %v6248_v37 }
 0x240   : > { %v588_v50 = vadd.f32 1e-05, %v580_v38  ;;  %vm639_vm5 = vmor %vm637_vm11, %vm638_vm10  ;;  %vm702_vm10 = vcmp.ne.s32.totalorder %v6850_v19, 0  ;;  %vm701_vm11 = vcmp.ne.s32.totalorder %v6831_v12, 0  ;;  %v6617_v12 = vld [vmem:[%s6822_s20 + $0x10] sm:$0xff] }
 0x241   : > { %v633_v45 = vmul.f32 %v6248_v37, %v632_v42  ;;  %v630_v46 = vsel %vm629_vm9, %v6246_v21, %v626_v41  ;;  %vm703_vm9 = vcmp.ne.s32.totalorder %v6843_v17, 0  ;;  %v5569_v19 = vsel %vm701_vm11, 1.0, %v6704_v44 }
 0x242   : > { %6249 = vrsqrt.f32 %v588_v50  ;;  %v674_v47 = vmul.f32 %v630_v46, %v6965_v55  ;;  %vm647_vm14 = vweird.f32 %v588_v50  ;;  %v5571_v34 = vsel %vm703_vm9, 1.0, %v6704_v44 }
 0x243   : > { %v634_v49 = vmul.f32 0.5, %v633_v45 }
 0x244   : > { %v683_v51 = vmul.f32 %v7028_v48, %v674_v47 }
 0x245   : > { %v635_v52 = vsub.f32 1.5, %v634_v49  ;;  %v571_v54 = vpop.xlane.xlu0 %570 }
 0x246   : > { %v581_v56 = vmul.f32 %v571_v54, %v6943_v31  ;;  %v7063_v57 = vadd.f32 %v7034_v53, %v683_v51 }
 0x247   : > { %v636_v58 = vmul.f32 %v6248_v37, %v635_v52 }
 0x248   : > { %v6250_v59 = vpop.eup %6249  ;;  %v589_v61 = vadd.f32 1e-05, %v581_v56  ;;  %5592 = vmatmul.msk.f32.gmra.mxu2 %vm495_vm12, %v7063_v57 }
 0x249   : > { %v642_v55 = vmul.f32 %v6250_v59, %v588_v50  ;;  %v640_v63 = vsel %vm639_vm5, %v6248_v37, %v636_v58  ;;  %vm648_vm13 = vweird.f32 %v6250_v59  ;;  %vm700_vm5 = vcmp.ne.s32.totalorder %v6834_v13, 0 }
 0x24a   : > { %6251 = vrsqrt.f32 %v589_v61  ;;  %v675_v35 = vmul.f32 %v640_v63, %v6971_v60  ;;  %vm649_vm15 = vmor %vm647_vm14, %vm648_vm13  ;;  %vm657_vm1 = vweird.f32 %v589_v61  ;;  %vm699_vm13 = vcmp.ne.s32.totalorder %v6617_v12, 0 }
 0x24b   : > { %v643_v0 = vmul.f32 %v6250_v59, %v642_v55  ;;  %v5567_v13 = vsel %vm699_vm13, 1.0, %v6704_v44 }
 0x24c   : > { %v684_v2 = vmul.f32 %v7028_v48, %v675_v35 }
 0x24d   : > { %v644_v3 = vmul.f32 0.5, %v643_v0 }
 0x24e   : > { %v7070_v4 = vadd.f32 %v7034_v53, %v684_v2 }
 0x24f   : > { %v645_v5 = vsub.f32 1.5, %v644_v3 }
 0x250   : > { %v6252_v7 = vpop.eup %6251  ;;  %5593 = vmatmul.msk.f32.gmra.mxu2 %vm495_vm12, %v7070_v4 }
 0x251   : > { %v646_v8 = vmul.f32 %v6250_v59, %v645_v5  ;;  %v652_v15 = vmul.f32 %v6252_v7, %v589_v61  ;;  %vm658_vm0 = vweird.f32 %v6252_v7 }
 0x252   : > { %vm659_vm2 = vmor %vm657_vm1, %vm658_vm0 }
 0x253   : > { %v653_v16 = vmul.f32 %v6252_v7, %v652_v15  ;;  %v650_v21 = vsel %vm649_vm15, %v6250_v59, %v646_v8  ;;  %v880_v59 = vld [vmem:[%s9588_s6] sm:$0xff]  ;;  %vm979_vm15 = vcmask 64512  }
 0x254   : > { %v676_v60 = vmul.f32 %v650_v21, %v6977_v1  ;;  %v881_v61 = vperm.slane %v880_v59, 0 }
 0x255   : > { %v654_v22 = vmul.f32 0.5, %v653_v16 }
 0x256   : > { %v685_v23 = vmul.f32 %v7028_v48, %v676_v60 }
 0x257   : > { %v655_v24 = vsub.f32 1.5, %v654_v22 }
 0x258   : > { %v7077_v43 = vadd.f32 %v7034_v53, %v685_v23 }
 0x259   : > { %v656_v25 = vmul.f32 %v6252_v7, %v655_v24 }
 0x25a   : > { %5594 = vmatmul.msk.f32.gmra.mxu2 %vm495_vm12, %v7077_v43 }
 0x25b   : > { %v660_v27 = vsel %vm659_vm2, %v6252_v7, %v656_v25 }
 0x25c   : > { %v677_v28 = vmul.f32 %v660_v27, %v6983_v6 }
 0x25e   : > { %v686_v29 = vmul.f32 %v7028_v48, %v677_v28 }
 0x260   : > { %v7084_v1 = vadd.f32 %v7034_v53, %v686_v29 }
 0x262   : > { %5595 = vmatmul.msk.f32.gmra.mxu2 %vm495_vm12, %v7084_v1 }
 0x295   : > { %v574_v32 = vpop.xlane.xlu1 %573 }
 0x296   : > { %v582_v33 = vmul.f32 %v574_v32, %v6943_v31 }
 0x298   : > { %v590_v37 = vadd.f32 1e-05, %v582_v33 }
 0x29a   : > { %6253 = vrsqrt.f32 %v590_v37  ;;  %vm667_vm4 = vweird.f32 %v590_v37 }
 0x2a0   : > { %v6254_v38 = vpop.eup %6253 }
 0x2a1   : > { %v662_v41 = vmul.f32 %v6254_v38, %v590_v37  ;;  %vm668_vm3 = vweird.f32 %v6254_v38 }
 0x2a2   : > { %vm669_vm6 = vmor %vm667_vm4, %vm668_vm3 }
 0x2a3   : > { %v663_v42 = vmul.f32 %v6254_v38, %v662_v41 }
 0x2a5   : > { %v664_v50 = vmul.f32 0.5, %v663_v42 }
 0x2a7   : > { %v665_v45 = vsub.f32 1.5, %v664_v50 }
 0x2a9   : > { %v666_v6 = vmul.f32 %v6254_v38, %v665_v45 }
 0x2ab   : > { %v670_v46 = vsel %vm669_vm6, %v6254_v38, %v666_v6  ;;  %v5572_v6 = vsel %vm704_vm7, 1.0, %v6704_v44 }
 0x2ac   : > { %v678_v47 = vmul.f32 %v670_v46, %v7017_v26  ;;  %5573 = vmatpush.xpose.msk.msra.mxu1 %vm721_vm8, %v5572_v6 }
 0x2ae   : > { %v687_v49 = vmul.f32 %v7028_v48, %v678_v47 }
 0x2b0   : > { %v7092_v51 = vadd.f32 %v7034_v53, %v687_v49  ;;  %5574 = vmatpush.xpose.msk.msra.mxu1 %vm721_vm8, %v5571_v34 }
 0x2b2   : > { %v923_v52 = vpop.f32.mrf.mxu2  ;;  %5596 = vmatmul.msk.f32.gmra.mxu2 %vm495_vm12, %v7092_v51 }
 0x2b3   : > { %v7119_v2 = vadd.f32 %v923_v52, %v881_v61  ;;  %v5570_v52 = vsel %vm702_vm10, 1.0, %v6704_v44 }
 0x2b4   : > { %5575 = vmatpush.xpose.msk.msra.mxu1 %vm721_vm8, %v5570_v52 }
 0x2b5   : > { %v7180_v24 = vmul.f32 0.35355338, %v7119_v2 }
 0x2b8   : > { %5576 = vmatpush.xpose.msk.msra.mxu1 %vm721_vm8, %v5569_v19 }
 0x2ba   : > { %v926_v54 = vpop.f32.mrf.mxu2 }
 0x2bb   : > { %v7121_v3 = vadd.f32 %v926_v54, %v881_v61 }
 0x2bd   : > { %v7132_v5 = vmul.f32 0.35355338, %v7121_v3  ;;  %v7291_v59 = vpack.i.bf16 %v7119_v2, %v7121_v3 }
 0x2c2   : > { %v929_v56 = vpop.f32.mrf.mxu2 }
 0x2c3   : > { %v7138_v7 = vadd.f32 %v929_v56, %v881_v61 }
 0x2c5   : > { %v7144_v15 = vmul.f32 0.35355338, %v7138_v7 }
 0x2cb   : > { %v932_v58 = vpop.f32.mrf.mxu2 }
 0x2cc   : > { %v7107_v35 = vadd.f32 %v932_v58, %v881_v61  ;;  %v5568_v58 = vsel %vm700_vm5, 1.0, %v6704_v44 }
 0x2cd   : > { %5577 = vmatpush.xpose.msk.msra.mxu1 %vm721_vm8, %v5568_v58 }
 0x2ce   : > { %v7141_v8 = vmul.f32 0.35355338, %v7107_v35  ;;  %v7273_v17 = vpack.i.bf16 %v7138_v7, %v7107_v35 }
 0x2d1   : > { %5578 = vmatpush.xpose.msk.msra.mxu1 %vm721_vm8, %v5567_v13 }
 0x2d3   : > { %v935_v55 = vpop.f32.mrf.mxu2 }
 0x2d4   : > { %v7099_v63 = vadd.f32 %v935_v55, %v881_v61 }
 0x2d6   : > { %971 = vrot.lane.b32.xlu0 %v7099_v63, %s9617_s25  ;;  %v7151_v16 = vmul.f32 0.35355338, %v7099_v63 }
 0x2dd   : > { %v938_v26 = vpop.f32.mrf.mxu2 }
 0x2de   : > { %v7103_v48 = vadd.f32 %v938_v26, %v881_v61 }
 0x2e0   : > { %973 = vrot.lane.b32.xlu1 %v7103_v48, %s9617_s25  ;;  %v7234_v41 = vmul.f32 0.35355338, %v7103_v48  ;;  %v7254_v46 = vpack.i.bf16 %v7099_v63, %v7103_v48 }
 0x2e5   : > { %v941_v53 = vpop.f32.mrf.mxu2 }
 0x2e6   : > { %v7109_v0 = vadd.f32 %v941_v53, %v881_v61 }
 0x2e8   : > { %969 = vrot.lane.b32.xlu1 %v7107_v35, %s9617_s25  ;;  %975 = vrot.lane.b32.xlu0 %v7109_v0, %s9617_s25  ;;  %v7170_v22 = vmul.f32 0.35355338, %v7109_v0 }
 0x2f0   : > { %1233 = vrot.lane.b32.xlu1 %v7103_v48, %s9619_s26  ;;  %1235 = vrot.lane.b32.xlu0 %v7109_v0, %s9619_s26 }
 0x2f8   : > { %963 = vrot.lane.b32.xlu1 %v7119_v2, %s9617_s25  ;;  %965 = vrot.lane.b32.xlu0 %v7121_v3, %s9617_s25 }
 0x300   : > { %1225 = vrot.lane.b32.xlu1 %v7121_v3, %s9619_s26  ;;  %1229 = vrot.lane.b32.xlu0 %v7107_v35, %s9619_s26 }
 0x308   : > { %1209 = vrot.lane.b32.xlu1 %v7132_v5, %s9615_s27  ;;  %1223 = vrot.lane.b32.xlu0 %v7119_v2, %s9619_s26 }
 0x310   : > { %1213 = vrot.lane.b32.xlu1 %v7141_v8, %s9615_s27  ;;  %1211 = vrot.lane.b32.xlu0 %v7144_v15, %s9615_s27 }
 0x318   : > { %1215 = vrot.lane.b32.xlu1 %v7151_v16, %s9615_s27  ;;  %1485 = vrot.lane.b32.xlu0 %v7109_v0, %s9611_s9 }
 0x320   : > { %1479 = vrot.lane.b32.xlu1 %v7107_v35, %s9611_s9  ;;  %1481 = vrot.lane.b32.xlu0 %v7099_v63, %s9611_s9 }
 0x328   : > { %1477 = vrot.lane.b32.xlu1 %v7138_v7, %s9611_s9  ;;  %1735 = vrot.lane.b32.xlu0 %v7109_v0, %s9613_s11 }
 0x330   : > { %1731 = vrot.lane.b32.xlu1 %v7099_v63, %s9613_s11  ;;  %1733 = vrot.lane.b32.xlu0 %v7103_v48, %s9613_s11 }
 0x335   : > { %v944_v21 = vpop.f32.mrf.mxu2 }
 0x336   : > { %v945_v60 = vadd.f32 %v944_v21, %v881_v61 }
 0x338   : > { %1729 = vrot.lane.b32.xlu1 %v7107_v35, %s9613_s11  ;;  %977 = vrot.lane.b32.xlu2 %v945_v60, %s9617_s25  ;;  %v7177_v23 = vmul.f32 0.35355338, %v945_v60  ;;  %v7237_v42 = vpack.i.bf16 %v7109_v0, %v945_v60 }
 0x339   : > { %1219 = vrot.lane.b32.xlu0 %v7170_v22, %s9615_s27 }
 0x340   : > { %1237 = vrot.lane.b32.xlu2 %v945_v60, %s9619_s26  ;;  %1221 = vrot.lane.b32.xlu1 %v7177_v23, %s9615_s27 }
 0x341   : > { %1457 = vrot.lane.b32.xlu0 %v7180_v24, %s9609_s12 }
 0x348   : > { %967 = vrot.lane.b32.xlu2 %v7138_v7, %s9617_s25  ;;  %1723 = vrot.lane.b32.xlu1 %v7119_v2, %s9613_s11  ;;  %v7199_v25 = vpop.permute.xlu0 %971 }
 0x349   : > { %1725 = vrot.lane.b32.xlu0 %v7121_v3, %s9613_s11 }
 0x350   : > { %1231 = vrot.lane.b32.xlu2 %v7099_v63, %s9619_s26  ;;  %1709 = vrot.lane.b32.xlu1 %v7132_v5, %s9607_s16  ;;  %v6618_v63 = vld [vmem:[%s6822_s20 + $0x8] sm:$0xff] }
 0x351   : > { %1707 = vrot.lane.b32.xlu0 %v7180_v24, %s9607_s16  ;;  %vm698_vm14 = vcmp.ne.s32.totalorder %v6618_v63, 0 }
 0x352   : > { %v7201_v27 = vpop.permute.xlu1 %973  ;;  %v5566_v26 = vsel %vm698_vm14, 1.0, %v6704_v44 }
 0x353   : > { %5579 = vmatpush.xpose.msk.msra.mxu1 %vm721_vm8, %v5566_v26 }
 0x358   : > { %1227 = vrot.lane.b32.xlu2 %v7138_v7, %s9619_s26  ;;  %1465 = vrot.lane.b32.xlu1 %v7151_v16, %s9609_s12 }
 0x359   : > { %1463 = vrot.lane.b32.xlu0 %v7141_v8, %s9609_s12 }
 0x35a   : > { %v7209_v28 = vpop.permute.xlu1 %969  ;;  %v7211_v29 = vpop.permute.xlu0 %975 }
 0x360   : > { %1207 = vrot.lane.b32.xlu2 %v7180_v24, %s9615_s27  ;;  %1715 = vrot.lane.b32.xlu1 %v7151_v16, %s9607_s16 }
 0x361   : > { %1713 = vrot.lane.b32.xlu0 %v7141_v8, %s9607_s16 }
 0x362   : > { %v7219_v32 = vpop.permute.xlu1 %1233  ;;  %v7221_v33 = vpop.permute.xlu0 %1235 }
 0x368   : > { %1483 = vrot.lane.b32.xlu2 %v7103_v48, %s9611_s9  ;;  %1471 = vrot.lane.b32.xlu1 %v7177_v23, %s9609_s12  ;;  %v6619_v48 = vld [vmem:[%s6822_s20] sm:$0xff]  ;;  %s9597_s20 = smov 32  }
 0x369   : > { %1469 = vrot.lane.b32.xlu0 %v7170_v22, %s9609_s12  ;;  %vm697_vm0 = vcmp.ne.s32.totalorder %v6619_v48, 0 }
 0x36a   : > { %v7229_v37 = vpop.permute.xlu1 %963  ;;  %v7231_v38 = vpop.permute.xlu0 %965  ;;  %v5565_v53 = vsel %vm697_vm0, 1.0, %v6704_v44  ;;  %vm1077_vm0 = vcmask 523264  }
 0x36b   : > { %5580 = vmatpush.xpose.msk.msra.mxu1 %vm721_vm8, %v5565_v53 }
 0x370   : > { %1217 = vrot.lane.b32.xlu2 %v7234_v41, %s9615_s27  ;;  %6032 = vrot.lane.b32.xlu1 %v7237_v42, %s9603_s17 }
 0x371   : > { %1719 = vrot.lane.b32.xlu0 %v7170_v22, %s9607_s16 }
 0x372   : > { %v7245_v50 = vpop.permute.xlu1 %1225  ;;  %v7247_v45 = vpop.permute.xlu0 %1229 }
 0x378   : > { %1487 = vrot.lane.b32.xlu2 %v945_v60, %s9611_s9  ;;  %6042 = vrot.lane.b32.xlu1 %v7237_v42, %s9605_s18 }
 0x379   : > { %6037 = vrot.lane.b32.xlu0 %v7254_v46, %s9603_s17 }
 0x37a   : > { %v7263_v47 = vpop.permute.xlu1 %1209  ;;  %v7265_v49 = vpop.permute.xlu0 %1223 }
 0x380   : > { %1737 = vrot.lane.b32.xlu2 %v945_v60, %s9613_s11  ;;  %6052 = vrot.lane.b32.xlu1 %v7254_v46, %s9605_s18 }
 0x381   : > { %6047 = vrot.lane.b32.xlu0 %v7273_v17, %s9603_s17 }
 0x382   : > { %v7282_v54 = vpop.permute.xlu1 %1213  ;;  %v7284_v56 = vpop.permute.xlu0 %1211 }
 0x388   : > { %1475 = vrot.lane.b32.xlu2 %v7121_v3, %s9611_s9  ;;  %6067 = vrot.lane.b32.xlu1 %v7291_v59, %s9605_s18 }
 0x389   : > { %6057 = vrot.lane.b32.xlu0 %v7291_v59, %s9603_s17  ;;  %s9656_s17 = smov 48  }
 0x38a   : > { %v7302_v61 = vpop.permute.xlu1 %1215  ;;  %v7304_v55 = vpop.permute.xlu0 %1485 }
 0x390   : > { %1473 = vrot.lane.b32.xlu2 %v7119_v2, %s9611_s9  ;;  %6077 = vrot.lane.b32.xlu1 %v7254_v46, %s9601_s19  ;;  %v6717_v2 = vmov 1.0  }
 0x391   : > { %6082 = vrot.lane.b32.xlu0 %v7237_v42, %s9599_s21  ;;  %5581 = vmatmul.msk.f32.vlgmr.msra.gmra.mxu1 %vm721_vm8, %v6717_v2 }
 0x392   : > { %v7318_v35 = vpop.permute.xlu1 %1479  ;;  %v978_v0 = vpop.permute.xlu2 %977 }
 0x393   : > { %v7321_v3 = vpop.permute.xlu0 %1481  ;;  %5597 = vmatpush.xpose.msk.msra.mxu3 %vm979_vm15, %v978_v0 }
 0x397   : > { %5598 = vmatpush.xpose.msk.msra.mxu3 %vm979_vm15, %v7211_v29 }
 0x398   : > { %1727 = vrot.lane.b32.xlu2 %v7138_v7, %s9613_s11 }
 0x399   : > { %5582 = vmatmul.msk.f32.gmra.mxu1 %vm721_vm8, %v6717_v2 }
 0x39a   : > { %v7329_v21 = vpop.permute.xlu1 %1477  ;;  %v1238_v44 = vpop.permute.xlu2 %1237 }
 0x39b   : > { %v7331_v60 = vpop.permute.xlu0 %1735  ;;  %5599 = vmatpush.xpose.msk.msra.mxu3 %vm979_vm15, %v7201_v27  ;;  %5621 = vmatpush.xpose.msk.msrb.mxu0 %vm979_vm15, %v1238_v44 }
 0x39f   : > { %5600 = vmatpush.xpose.msk.msra.mxu3 %vm979_vm15, %v7199_v25  ;;  %5622 = vmatpush.xpose.msk.msrb.mxu0 %vm979_vm15, %v7221_v33 }
 0x3a0   : > { %1459 = vrot.lane.b32.xlu2 %v7132_v5, %s9609_s12 }
 0x3a1   : > { %5583 = vmatmul.msk.f32.gmra.mxu1 %vm721_vm8, %v6717_v2 }
 0x3a2   : > { %v7343_v7 = vpop.permute.xlu1 %1731  ;;  %v968_v29 = vpop.permute.xlu2 %967 }
 0x3a3   : > { %v7345_v6 = vpop.permute.xlu0 %1733  ;;  %5601 = vmatpush.xpose.msk.msra.mxu3 %vm979_vm15, %v7209_v28  ;;  %5623 = vmatpush.xpose.msk.msrb.mxu0 %vm979_vm15, %v7219_v32 }
 0x3a7   : > { %5602 = vmatpush.xpose.msk.msra.mxu3 %vm979_vm15, %v968_v29 }
 0x3a8   : > { %1461 = vrot.lane.b32.xlu2 %v7144_v15, %s9609_s12 }
 0x3a9   : > { %5584 = vmatmul.msk.f32.gmra.mxu1 %vm721_vm8, %v6717_v2 }
 0x3aa   : > { %v7355_v25 = vpop.permute.xlu1 %1729  ;;  %v1232_v27 = vpop.permute.xlu2 %1231 }
 0x3ab   : > { %v7357_v33 = vpop.permute.xlu0 %1219  ;;  %5603 = vmatpush.xpose.msk.msra.mxu3 %vm979_vm15, %v7231_v38  ;;  %5624 = vmatpush.xpose.msk.msrb.mxu0 %vm979_vm15, %v1232_v27 }
 0x3af   : > { %5604 = vmatpush.xpose.msk.msra.mxu3 %vm979_vm15, %v7229_v37  ;;  %5625 = vmatpush.xpose.msk.msrb.mxu0 %vm979_vm15, %v7247_v45 }
 0x3b0   : > { %1711 = vrot.lane.b32.xlu2 %v7144_v15, %s9607_s16 }
 0x3b1   : > { %5585 = vmatmul.msk.f32.gmra.mxu1 %vm721_vm8, %v6717_v2 }
 0x3b2   : > { %v1228_v28 = vpop.permute.xlu2 %1227  ;;  %v7369_v32 = vpop.permute.xlu1 %1221  ;;  %5605 = vmatmul.msk.f32.vlgmr.msra.gmra.mxu3 %vm979_vm15, %v7180_v24 }
 0x3b3   : > { %v7373_v38 = vpop.permute.xlu0 %1457  ;;  %5626 = vmatpush.xpose.msk.msrb.mxu0 %vm979_vm15, %v1228_v28 }
 0x3b7   : > { %5627 = vmatpush.xpose.msk.msrb.mxu0 %vm979_vm15, %v7245_v50 }
 0x3b8   : > { %1467 = vrot.lane.b32.xlu2 %v7234_v41, %s9609_s12  ;;  %s9652_s12 = smov 112  }
 0x3b9   : > { %5586 = vmatmul.msk.f32.gmra.mxu1 %vm721_vm8, %v6717_v2 }
 0x3ba   : > { %v1208_v37 = vpop.permute.xlu2 %1207  ;;  %v7381_v45 = vpop.permute.xlu1 %1723  ;;  %5606 = vmatmul.msk.f32.gmra.mxu3 %vm979_vm15, %v7132_v5 }
 0x3bb   : > { %v7385_v34 = vpop.permute.xlu0 %1725  ;;  %5628 = vmatpush.xpose.msk.msrb.mxu0 %vm979_vm15, %v7265_v49 }
 0x3be   : > { %5629 = vmatmul.msk.f32.vlgmr.msrb.gmra.mxu0 %vm979_vm15, %v1208_v37 }
 0x3c0   : > { %1717 = vrot.lane.b32.xlu2 %v7234_v41, %s9607_s16 }
 0x3c1   : > { %5587 = vmatmul.msk.f32.gmra.mxu1 %vm721_vm8, %v6717_v2 }
 0x3c2   : > { %v1484_v24 = vpop.permute.xlu2 %1483  ;;  %v7393_v50 = vpop.permute.xlu1 %1709  ;;  %5607 = vmatmul.msk.f32.gmra.mxu3 %vm979_vm15, %v7144_v15 }
 0x3c3   : > { %v7397_v52 = vpop.permute.xlu0 %1707 }
 0x3c6   : > { %5630 = vmatmul.msk.f32.gmra.mxu0 %vm979_vm15, %v7263_v47 }
 0x3c8   : > { %6062 = vrot.lane.b32.xlu2 %v7273_v17, %s9605_s18  ;;  %s9657_s18 = smov 40  }
 0x3c9   : > { %5588 = vmatmul.msk.f32.gmra.mxu1 %vm721_vm8, %v6717_v2 }
 0x3ca   : > { %v1218_v5 = vpop.permute.xlu2 %1217  ;;  %v7404_v49 = vpop.permute.xlu1 %1465  ;;  %5608 = vmatmul.msk.f32.gmra.mxu3 %vm979_vm15, %v7141_v8 }
 0x3cb   : > { %v7408_v19 = vpop.permute.xlu0 %1463 }
 0x3ce   : > { %5631 = vmatmul.msk.f32.gmra.mxu0 %vm979_vm15, %v7284_v56 }
 0x3d0   : > { %1721 = vrot.lane.b32.xlu2 %v7177_v23, %s9607_s16  ;;  %s9653_s16 = smov 104  }
 0x3d2   : > { %v1488_v15 = vpop.permute.xlu2 %1487  ;;  %v7415_v47 = vpop.permute.xlu1 %1715  ;;  %5609 = vmatmul.msk.f32.gmra.mxu3 %vm979_vm15, %v7151_v16 }
 0x3d3   : > { %v7419_v58 = vpop.permute.xlu0 %1713  ;;  %5645 = vmatpush.xpose.msk.msrb.mxu3 %vm979_vm15, %v1488_v15 }
 0x3d6   : > { %5632 = vmatmul.msk.f32.gmra.mxu0 %vm979_vm15, %v7282_v54 }
 0x3d7   : > { %5646 = vmatpush.xpose.msk.msrb.mxu3 %vm979_vm15, %v7304_v55 }
 0x3d8   : > { %6072 = vrot.lane.b32.xlu2 %v7237_v42, %s9601_s19 }
 0x3da   : > { %v1738_v8 = vpop.permute.xlu2 %1737  ;;  %v7428_v56 = vpop.permute.xlu1 %1471  ;;  %5610 = vmatmul.msk.f32.gmra.mxu3 %vm979_vm15, %v7234_v41 }
 0x3db   : > { %v7432_v16 = vpop.permute.xlu0 %1469  ;;  %5647 = vmatpush.xpose.msk.msrb.mxu3 %vm979_vm15, %v1484_v24  ;;  %5669 = vmatpush.xpose.msk.msra.mxu0 %vm979_vm15, %v1738_v8  ;;  %v7493_v24 = vshrl.u32 %v277_v39, 7 }
 0x3dd   : > { %vm824_vm2 = vcmp.eq.s32.totalorder %v7493_v24, %v6893_v40 }
 0x3de   : > { %5633 = vmatmul.msk.f32.gmra.mxu0 %vm979_vm15, %v7302_v61 }
 0x3df   : > { %5648 = vmatpush.xpose.msk.msrb.mxu3 %vm979_vm15, %v7321_v3  ;;  %5670 = vmatpush.xpose.msk.msra.mxu0 %vm979_vm15, %v7331_v60 }
 0x3e0   : > { %6087 = vrot.lane.b32.xlu2 %v7273_v17, %s9601_s19 }
 0x3e2   : > { %v1476_v42 = vpop.permute.xlu2 %1475  ;;  %v6033_v41 = vpop.permute.xlu1 %6032  ;;  %5611 = vmatmul.msk.f32.gmra.mxu3 %vm979_vm15, %v7170_v22 }
 0x3e3   : > { %v7446_v54 = vpop.permute.xlu0 %1719  ;;  %5649 = vmatpush.xpose.msk.msrb.mxu3 %vm979_vm15, %v7318_v35  ;;  %5671 = vmatpush.xpose.msk.msra.mxu0 %vm979_vm15, %v7345_v6  ;;  %v6034_v12 = vunpack.i.l.bf16 %v6033_v41  ;;  %v6035_v13 = vunpack.i.h.bf16 %v6033_v41 }
 0x3e5   : > { %1174 = vmatpush.msrb.mxu2 %v6034_v12 }
 0x3e6   : > { %5634 = vmatmul.msk.f32.gmra.mxu0 %vm979_vm15, %v1218_v5 }
 0x3e7   : > { %1175 = vmatpush.msrb.mxu2 %v6035_v13  ;;  %5650 = vmatpush.xpose.msk.msrb.mxu3 %vm979_vm15, %v7329_v21 }
 0x3e8   : > { %5672 = vmatpush.xpose.msk.msra.mxu0 %vm979_vm15, %v7343_v7 }
 0x3ea   : > { %v1474_v22 = vpop.permute.xlu2 %1473  ;;  %v6043_v61 = vpop.permute.xlu1 %6042  ;;  %5612 = vmatmul.msk.f32.gmra.mxu3 %vm979_vm15, %v7177_v23 }
 0x3eb   : > { %v6038_v55 = vpop.permute.xlu0 %6037  ;;  %5651 = vmatpush.xpose.msk.msrb.mxu3 %vm979_vm15, %v1476_v42  ;;  %v6044_v63 = vunpack.i.l.bf16 %v6043_v61  ;;  %v6045_v48 = vunpack.i.h.bf16 %v6043_v61  ;;  %v793_v61 = vadd.s32 16, %v7493_v24 }
 0x3ec   : > { %5673 = vmatpush.xpose.msk.msra.mxu0 %vm979_vm15, %v7355_v25  ;;  %v6039_v26 = vunpack.i.l.bf16 %v6038_v55  ;;  %v6040_v53 = vunpack.i.h.bf16 %v6038_v55 }
 0x3ed   : > { %1424 = vmatpush.msrb.mxu1 %v6044_v63  ;;  %vm826_vm10 = vcmp.eq.s32.totalorder %v793_v61, %v6893_v40 }
 0x3ee   : > { %1176 = vmatpush.msrb.mxu2 %v6039_v26  ;;  %5635 = vmatmul.msk.f32.gmra.mxu0 %vm979_vm15, %v7357_v33 }
 0x3ef   : > { %1425 = vmatpush.msrb.mxu1 %v6045_v48  ;;  %5652 = vmatpush.xpose.msk.msrb.mxu3 %vm979_vm15, %v1474_v22 }
 0x3f0   : > { %1177 = vmatpush.msrb.mxu2 %v6040_v53 }
 0x3f2   : > { %v1728_v23 = vpop.permute.xlu2 %1727  ;;  %v6053_v35 = vpop.permute.xlu1 %6052  ;;  %5653 = vmatmul.msk.f32.vlgmr.msrb.gmra.mxu3 %vm979_vm15, %v7373_v38 }
 0x3f3   : > { %v6048_v0 = vpop.permute.xlu0 %6047  ;;  %5674 = vmatpush.xpose.msk.msra.mxu0 %vm979_vm15, %v1728_v23  ;;  %v6054_v3 = vunpack.i.l.bf16 %v6053_v35  ;;  %v6055_v21 = vunpack.i.h.bf16 %v6053_v35  ;;  %v801_v23 = vshra.s32 %v793_v61, 4 }
 0x3f4   : > { %v6049_v2 = vunpack.i.l.bf16 %v6048_v0  ;;  %v6050_v44 = vunpack.i.h.bf16 %v6048_v0 }
 0x3f5   : > { %1426 = vmatpush.msrb.mxu1 %v6054_v3 }
 0x3f6   : > { %1178 = vmatpush.msrb.mxu2 %v6049_v2  ;;  %5636 = vmatmul.msk.f32.gmra.mxu0 %vm979_vm15, %v7369_v32 }
 0x3f7   : > { %1427 = vmatpush.msrb.mxu1 %v6055_v21  ;;  %5675 = vmatpush.xpose.msk.msra.mxu0 %vm979_vm15, %v7385_v34 }
 0x3f8   : > { %1179 = vmatpush.msrb.mxu2 %v6050_v44 }
 0x3fa   : > { %v1460_v60 = vpop.permute.xlu2 %1459 }
 0x3fb   : > { %v6058_v7 = vpop.permute.xlu0 %6057  ;;  %5654 = vmatmul.msk.f32.gmra.mxu3 %vm979_vm15, %v1460_v60  ;;  %5676 = vmatpush.xpose.msk.msra.mxu0 %vm979_vm15, %v7381_v45  ;;  %v6068_v45 = vpop.permute.xlu1 %6067 }
 0x3fc   : > { %v6059_v29 = vunpack.i.l.bf16 %v6058_v7  ;;  %v6060_v6 = vunpack.i.h.bf16 %v6058_v7  ;;  %v6070_v5 = vunpack.i.h.bf16 %v6068_v45 }
 0x3fe   : > { %1180 = vmatpush.msrb.mxu2 %v6059_v29  ;;  %5677 = vmatmul.msk.f32.vlgmr.msra.gmra.mxu0 %vm979_vm15, %v7397_v52  ;;  %v6069_v52 = vunpack.i.l.bf16 %v6068_v45  ;;  %v794_v45 = vadd.s32 24, %v7493_v24 }
 0x400   : > { %1181 = vmatpush.msrb.mxu2 %v6060_v6 }
 0x402   : > { %v1462_v25 = vpop.permute.xlu2 %1461 }
 0x403   : > { %5655 = vmatmul.msk.f32.gmra.mxu3 %vm979_vm15, %v1462_v25  ;;  %v6078_v12 = vpop.permute.xlu1 %6077 }
 0x404   : > { %v6080_v53 = vunpack.i.h.bf16 %v6078_v12 }
 0x406   : > { %5678 = vmatmul.msk.f32.gmra.mxu0 %vm979_vm15, %v7393_v50  ;;  %v6083_v50 = vpop.permute.xlu0 %6082 }
 0x407   : > { %v6084_v15 = vunpack.i.l.bf16 %v6083_v50  ;;  %v6085_v39 = vunpack.i.h.bf16 %v6083_v50 }
 0x40a   : > { %v1712_v27 = vpop.permute.xlu2 %1711 }
 0x40b   : > { %5656 = vmatmul.msk.f32.gmra.mxu3 %vm979_vm15, %v7408_v19  ;;  %v7498_v19 = vshra.s32 %v6893_v40, 4 }
 0x40d   : > { %vm810_vm13 = vcmp.eq.s32.totalorder %v801_v23, %v7498_v19 }
 0x40e   : > { %5679 = vmatmul.msk.f32.gmra.mxu0 %vm979_vm15, %v1712_v27  ;;  %v766_v37 = vpop.f32.mrf.mxu1 }
 0x40f   : > { %vm816_vm1 = vcmp.gt.f32.partialorder %v766_v37, 0.5 }
 0x410   : > { %vm832_vm4 = vmor %vm816_vm1, %vm824_vm2 }
 0x412   : > { %v1468_v33 = vpop.permute.xlu2 %1467 }
 0x413   : > { %5657 = vmatmul.msk.f32.gmra.mxu3 %vm979_vm15, %v7404_v49  ;;  %v799_v49 = vshra.s32 %v7493_v24, 4 }
 0x415   : > { %vm808_vm3 = vcmp.eq.s32.totalorder %v799_v49, %v7498_v19 }
 0x416   : > { %5680 = vmatmul.msk.f32.gmra.mxu0 %vm979_vm15, %v7419_v58  ;;  %v769_v58 = vpop.f32.mrf.mxu1  ;;  %vm840_vm6 = vmand %vm808_vm3, %vm832_vm4  ;;  %vm827_vm4 = vcmp.eq.s32.totalorder %v794_v45, %v6893_v40 }
 0x417   : > { %vm817_vm7 = vcmp.gt.f32.partialorder %v769_v58, 0.5 }
 0x41a   : > { %v1718_v28 = vpop.permute.xlu2 %1717 }
 0x41b   : > { %5658 = vmatmul.msk.f32.gmra.mxu3 %vm979_vm15, %v1468_v33 }
 0x41e   : > { %5681 = vmatmul.msk.f32.gmra.mxu0 %vm979_vm15, %v7415_v47  ;;  %v772_v63 = vpop.f32.mrf.mxu1 }
 0x41f   : > { %vm818_vm9 = vcmp.gt.f32.partialorder %v772_v63, 0.5 }
 0x420   : > { %vm834_vm14 = vmor %vm818_vm9, %vm826_vm10 }
 0x421   : > { %vm842_vm2 = vmand %vm810_vm13, %vm834_vm14 }
 0x422   : > { %v6063_v32 = vpop.permute.xlu2 %6062 }
 0x423   : > { %5659 = vmatmul.msk.f32.gmra.mxu3 %vm979_vm15, %v7432_v16  ;;  %v6064_v38 = vunpack.i.l.bf16 %v6063_v32  ;;  %v6065_v34 = vunpack.i.h.bf16 %v6063_v32  ;;  %v9590_v16 = vmov -1e+09  }
 0x424   : > { %v7508_v42 = vsel %vm840_vm6, 0.0, %v9590_v16 }
 0x425   : > { %1428 = vmatpush.msrb.mxu1 %v6064_v38 }
 0x426   : > { %5682 = vmatmul.msk.f32.gmra.mxu0 %vm979_vm15, %v1718_v28  ;;  %v775_v27 = vpop.f32.mrf.mxu1  ;;  %v7539_v28 = vsel %vm842_vm2, 0.0, %v9590_v16 }
 0x427   : > { %1429 = vmatpush.msrb.mxu1 %v6065_v34  ;;  %vm819_vm3 = vcmp.gt.f32.partialorder %v775_v27, 0.5 }
 0x429   : > { %1430 = vmatpush.msrb.mxu1 %v6069_v52 }
 0x42a   : > { %v1722_v47 = vpop.permute.xlu2 %1721 }
 0x42b   : > { %1431 = vmatpush.msrb.mxu1 %v6070_v5  ;;  %5660 = vmatmul.msk.f32.gmra.mxu3 %vm979_vm15, %v7428_v56  ;;  %v792_v56 = vadd.s32 8, %v7493_v24 }
 0x42d   : > { %1924 = vmatpush.msra.mxu1 %v6084_v15  ;;  %v800_v48 = vshra.s32 %v792_v56, 4  ;;  %vm825_vm8 = vcmp.eq.s32.totalorder %v792_v56, %v6893_v40 }
 0x42e   : > { %5683 = vmatmul.msk.f32.gmra.mxu0 %vm979_vm15, %v7446_v54  ;;  %v6079_v54 = vunpack.i.l.bf16 %v6078_v12  ;;  %vm7521_vm5 = vmor %vm817_vm7, %vm825_vm8 }
 0x42f   : > { %1925 = vmatpush.msra.mxu1 %v6085_v39  ;;  %vm7517_vm11 = vcmp.eq.s32.totalorder %v800_v48, %v7498_v19  ;;  %vm835_vm7 = vmor %vm819_vm3, %vm827_vm4 }
 0x430   : > { %vm841_vm1 = vmand %vm7517_vm11, %vm7521_vm5 }
 0x431   : > { %v7536_v33 = vsel %vm841_vm1, 0.0, %v9590_v16 }
 0x432   : > { %v6073_v8 = vpop.permute.xlu2 %6072 }
 0x433   : > { %v6074_v41 = vunpack.i.l.bf16 %v6073_v8  ;;  %v6075_v13 = vunpack.i.h.bf16 %v6073_v8  ;;  %v778_v8 = vpop.f32.mrf.mxu1 }
 0x434   : > { %vm820_vm9 = vcmp.gt.f32.partialorder %v778_v8, 0.5 }
 0x435   : > { %v1037_v22 = vpop.f32.mrf.mxu3  ;;  %1674 = vmatpush.msra.mxu2 %v6074_v41 }
 0x436   : > { %v1038_v55 = vadd.f32 %v1037_v22, %v7508_v42  ;;  %5684 = vmatmul.msk.f32.gmra.mxu0 %vm979_vm15, %v1722_v47  ;;  %v802_v47 = vshra.s32 %v794_v45, 4  ;;  %v795_v22 = vadd.s32 32, %v7493_v24  ;;  %v797_v45 = vadd.s32 48, %v7493_v24 }
 0x437   : > { %1675 = vmatpush.msra.mxu2 %v6075_v13 }
 0x438   : > { %v1061_v26 = vmul.f32 1.442695, %v1038_v55  ;;  %vm811_vm6 = vcmp.eq.s32.totalorder %v802_v47, %v7498_v19  ;;  %vm828_vm10 = vcmp.eq.s32.totalorder %v795_v22, %v6893_v40  ;;  %v805_v47 = vshra.s32 %v797_v45, 4 }
 0x439   : > { %1676 = vmatpush.msra.mxu2 %v6079_v54  ;;  %vm843_vm8 = vmand %vm811_vm6, %vm835_vm7  ;;  %vm830_vm7 = vcmp.eq.s32.totalorder %v797_v45, %v6893_v40 }
 0x43a   : > { %6255 = vpow2.f32 %v1061_v26  ;;  %v6088_v35 = vpop.permute.xlu2 %6087  ;;  %v7562_v63 = vsel %vm843_vm8, 0.0, %v9590_v16  ;;  %v803_v26 = vshra.s32 %v795_v22, 4  ;;  %vm836_vm5 = vmor %vm820_vm9, %vm828_vm10  ;;  %vm814_vm8 = vcmp.eq.s32.totalorder %v805_v47, %v7498_v19 }
 0x43b   : > { %v6089_v0 = vunpack.i.l.bf16 %v6088_v35  ;;  %v1288_v3 = vpop.f32.mrf.mxu0  ;;  %1677 = vmatpush.msra.mxu2 %v6080_v53  ;;  %v6090_v60 = vunpack.i.h.bf16 %v6088_v35 }
 0x43c   : > { %v1289_v44 = vadd.f32 %v1288_v3, %v7508_v42  ;;  %v796_v3 = vadd.s32 40, %v7493_v24  ;;  %vm812_vm11 = vcmp.eq.s32.totalorder %v803_v26, %v7498_v19 }
 0x43d   : > { %v1040_v7 = vpop.f32.mrf.mxu3  ;;  %1678 = vmatpush.msra.mxu2 %v6089_v0  ;;  %v781_v0 = vpop.f32.mrf.mxu1  ;;  %vm844_vm13 = vmand %vm812_vm11, %vm836_vm5 }
 0x43e   : > { %v1312_v29 = vmul.f32 1.442695, %v1289_v44  ;;  %v1041_v50 = vadd.f32 %v1040_v7, %v7536_v33  ;;  %vm821_vm14 = vcmp.gt.f32.partialorder %v781_v0, 0.5  ;;  %vm829_vm1 = vcmp.eq.s32.totalorder %v796_v3, %v6893_v40 }
 0x43f   : > { %1679 = vmatpush.msra.mxu2 %v6090_v60  ;;  %v804_v60 = vshra.s32 %v796_v3, 4  ;;  %v7577_v27 = vsel %vm844_vm13, 0.0, %v9590_v16  ;;  %vm7584_vm3 = vmor %vm821_vm14, %vm829_vm1 }
 0x440   : > { %v7531_v6 = vpop.eup %6255  ;;  %6257 = vpow2.f32 %v1312_v29  ;;  %v1063_v39 = vmul.f32 1.442695, %v1041_v50 }
 0x441   : > { %v1078_v25 = vsel %vm1077_vm0, %v7531_v6, 0.0  ;;  %vm7580_vm2 = vcmp.eq.s32.totalorder %v804_v60, %v7498_v19  ;;  %v798_v60 = vadd.s32 56, %v7493_v24 }
 0x442   : > { %1079 = vadd.xlane.f32.xlu2 %v1078_v25  ;;  %vm845_vm4 = vmand %vm7580_vm2, %vm7584_vm3  ;;  %vm2061_vm2 = vcmask 130048   ;;  %vm2070_vm3 = vcmask 195584  }
 0x443   : > { %v1291_v32 = vpop.f32.mrf.mxu0  ;;  %v806_v45 = vshra.s32 %v798_v60, 4  ;;  %vm831_vm5 = vcmp.eq.s32.totalorder %v798_v60, %v6893_v40 }
 0x444   : > { %v1292_v38 = vadd.f32 %v1291_v32, %v7536_v33 }
 0x445   : > { %v1043_v37 = vpop.f32.mrf.mxu3  ;;  %vm815_vm13 = vcmp.eq.s32.totalorder %v806_v45, %v7498_v19 }
 0x446   : > { %v7543_v34 = vpop.eup %6257  ;;  %v1314_v52 = vmul.f32 1.442695, %v1292_v38  ;;  %v1044_v5 = vadd.f32 %v1043_v37, %v7539_v28 }
 0x447   : > { %v1328_v49 = vsel %vm1077_vm0, %v7543_v34, 0.0 }
 0x448   : > { %6259 = vpow2.f32 %v1314_v52  ;;  %v1065_v15 = vmul.f32 1.442695, %v1044_v5  ;;  %1329 = vadd.xlane.f32.xlu1 %v1328_v49 }
 0x44a   : > { %6261 = vpow2.f32 %v1065_v15  ;;  %v784_v15 = vpop.f32.mrf.mxu1 }
 0x44b   : > { %v1294_v58 = vpop.f32.mrf.mxu0  ;;  %6263 = vpow2.f32 %v1063_v39  ;;  %vm822_vm6 = vcmp.gt.f32.partialorder %v784_v15, 0.5 }
 0x44c   : > { %v1295_v56 = vadd.f32 %v1294_v58, %v7539_v28  ;;  %v7602_v58 = vsel %vm845_vm4, 0.0, %v9590_v16  ;;  %vm838_vm9 = vmor %vm822_vm6, %vm830_vm7 }
 0x44d   : > { %v1046_v41 = vpop.f32.mrf.mxu3  ;;  %vm846_vm10 = vmand %vm814_vm8, %vm838_vm9 }
 0x44e   : > { %v7551_v12 = vpop.eup %6259  ;;  %v1316_v54 = vmul.f32 1.442695, %v1295_v56  ;;  %v1047_v2 = vadd.f32 %v1046_v41, %v7562_v63 }
 0x44f   : > { %v1331_v13 = vsel %vm1077_vm0, %v7551_v12, 0.0 }
 0x450   : > { %v7557_v61 = vpop.eup %6261  ;;  %1332 = vadd.xlane.f32.xlu0 %v1331_v13  ;;  %6265 = vpow2.f32 %v1316_v54  ;;  %v1067_v7 = vmul.f32 1.442695, %v1047_v2 }
 0x451   : > { %v1084_v55 = vsel %vm1077_vm0, %v7557_v61, 0.0  ;;  %v7564_v53 = vpop.eup %6263 }
 0x452   : > { %1085 = vadd.xlane.f32.xlu2 %v1084_v55  ;;  %v1081_v44 = vsel %vm1077_vm0, %v7564_v53, 0.0  ;;  %v787_v32 = vpop.f32.mrf.mxu1 }
 0x453   : > { %v1297_v48 = vpop.f32.mrf.mxu0  ;;  %vm823_vm11 = vcmp.gt.f32.partialorder %v787_v32, 0.5 }
 0x454   : > { %v1298_v23 = vadd.f32 %v1297_v48, %v7562_v63  ;;  %v7612_v48 = vsel %vm846_vm10, 0.0, %v9590_v16  ;;  %vm839_vm14 = vmor %vm823_vm11, %vm831_vm5 }
 0x455   : > { %v1049_v35 = vpop.f32.mrf.mxu3  ;;  %vm847_vm1 = vmand %vm815_vm13, %vm839_vm14 }
 0x456   : > { %v1318_v21 = vmul.f32 1.442695, %v1298_v23  ;;  %v7574_v25 = vpop.eup %6265  ;;  %v1050_v22 = vadd.f32 %v1049_v35, %v7577_v27 }
 0x457   : > { %v1334_v49 = vsel %vm1077_vm0, %v7574_v25, 0.0 }
 0x458   : > { %6267 = vpow2.f32 %v1318_v21  ;;  %1082 = vadd.xlane.f32.xlu0 %v1081_v44  ;;  %v1069_v26 = vmul.f32 1.442695, %v1050_v22 }
 0x459   : > { %6269 = vpow2.f32 %v1067_v7 }
 0x45b   : > { %v1300_v29 = vpop.f32.mrf.mxu0 }
 0x45c   : > { %v1301_v52 = vadd.f32 %v1300_v29, %v7577_v27 }
 0x45d   : > { %v1052_v37 = vpop.f32.mrf.mxu3 }
 0x45e   : > { %v7589_v50 = vpop.eup %6267  ;;  %v1320_v39 = vmul.f32 1.442695, %v1301_v52  ;;  %v1053_v35 = vadd.f32 %v1052_v37, %v7602_v58 }
 0x45f   : > { %v1337_v5 = vsel %vm1077_vm0, %v7589_v50, 0.0  ;;  %v7604_v41 = vpop.eup %6269 }
 0x460   : > { %1338 = vadd.xlane.f32.xlu1 %v1337_v5  ;;  %1335 = vadd.xlane.f32.xlu0 %v1334_v49  ;;  %6271 = vpow2.f32 %v1320_v39  ;;  %v1087_v54 = vsel %vm1077_vm0, %v7604_v41, 0.0  ;;  %v1071_v38 = vmul.f32 1.442695, %v1053_v35 }
 0x463   : > { %v1303_v8 = vpop.f32.mrf.mxu0 }
 0x464   : > { %v1304_v56 = vadd.f32 %v1303_v8, %v7602_v58 }
 0x465   : > { %v1055_v13 = vpop.f32.mrf.mxu3 }
 0x466   : > { %v1322_v55 = vmul.f32 1.442695, %v1304_v56  ;;  %v7614_v0 = vpop.eup %6271  ;;  %v1056_v15 = vadd.f32 %v1055_v13, %v7612_v48  ;;  %v7641_v13 = vsel %vm847_vm1, 0.0, %v9590_v16 }
 0x467   : > { %v1340_v29 = vsel %vm1077_vm0, %v7614_v0, 0.0 }
 0x468   : > { %6273 = vpow2.f32 %v1322_v55  ;;  %1088 = vadd.xlane.f32.xlu0 %v1087_v54  ;;  %v1073_v8 = vmul.f32 1.442695, %v1056_v15 }
 0x469   : > { %6275 = vpow2.f32 %v1069_v26 }
 0x46b   : > { %v1306_v23 = vpop.f32.mrf.mxu0 }
 0x46c   : > { %v1307_v3 = vadd.f32 %v1306_v23, %v7612_v48 }
 0x46d   : > { %v1058_v2 = vpop.f32.mrf.mxu3 }
 0x46e   : > { %v7617_v21 = vpop.eup %6273  ;;  %v1324_v44 = vmul.f32 1.442695, %v1307_v3 }
 0x46f   : > { %v1343_v7 = vsel %vm1077_vm0, %v7617_v21, 0.0  ;;  %v7625_v5 = vpop.eup %6275 }
 0x470   : > { %6277 = vpow2.f32 %v1324_v44  ;;  %1344 = vadd.xlane.f32.xlu2 %v1343_v7  ;;  %1341 = vadd.xlane.f32.xlu0 %v1340_v29  ;;  %v1090_v47 = vsel %vm1077_vm0, %v7625_v5, 0.0 }
 0x471   : > { %6279 = vpow2.f32 %v1071_v38 }
 0x472   : > { %6281 = vpow2.f32 %v1073_v8 }
 0x473   : > { %v1309_v52 = vpop.f32.mrf.mxu0 }
 0x474   : > { %v1310_v19 = vadd.f32 %v1309_v52, %v7641_v13 }
 0x475   : > { %v1538_v37 = vpop.f32.mrf.mxu3 }
 0x476   : > { %v7628_v49 = vpop.eup %6277  ;;  %v1326_v26 = vmul.f32 1.442695, %v1310_v19  ;;  %v1539_v29 = vadd.f32 %v1538_v37, %v7508_v42 }
 0x477   : > { %v1346_v39 = vsel %vm1077_vm0, %v7628_v49, 0.0  ;;  %v7638_v56 = vpop.eup %6279 }
 0x478   : > { %1091 = vadd.xlane.f32.xlu0 %v1090_v47  ;;  %1347 = vadd.xlane.f32.xlu2 %v1346_v39  ;;  %v1093_v54 = vsel %vm1077_vm0, %v7638_v56, 0.0  ;;  %v7646_v23 = vpop.eup %6281  ;;  %6283 = vpow2.f32 %v1326_v26  ;;  %v1562_v52 = vmul.f32 1.442695, %v1539_v29 }
 0x479   : > { %6092 = vrot.lane.b32.xlu1 %v7254_v46, %s9599_s21  ;;  %v1059_v46 = vadd.f32 %v1058_v2, %v7641_v13  ;;  %v1096_v44 = vsel %vm1077_vm0, %v7646_v23, 0.0 }
 0x47b   : > { %v1788_v22 = vpop.f32.mrf.mxu0  ;;  %v1075_v60 = vmul.f32 1.442695, %v1059_v46 }
 0x47c   : > { %v1789_v2 = vadd.f32 %v1788_v22, %v7508_v42 }
 0x47d   : > { %6285 = vpow2.f32 %v1075_v60 }
 0x47e   : > { %v1541_v55 = vpop.f32.mrf.mxu3  ;;  %v7653_v7 = vpop.eup %6283  ;;  %v1812_v47 = vmul.f32 1.442695, %v1789_v2  ;;  %6287 = vpow2.f32 %v1562_v52 }
 0x47f   : > { %v1349_v38 = vsel %vm1077_vm0, %v7653_v7, 0.0  ;;  %v1542_v52 = vadd.f32 %v1541_v55, %v7536_v33 }
 0x480   : > { %1094 = vadd.xlane.f32.xlu0 %v1093_v54  ;;  %6289 = vpow2.f32 %v1812_v47 }
 0x483   : > { %v7649_v3 = vpop.f32.mrf.mxu0  ;;  %v7661_v15 = vpop.eup %6285 }
 0x484   : > { %v1099_v39 = vsel %vm1077_vm0, %v7661_v15, 0.0  ;;  %v7666_v54 = vpop.eup %6287 }
 0x485   : > { %v1578_v22 = vsel %vm1077_vm0, %v7666_v54, 0.0 }
 0x486   : > { %v1544_v35 = vpop.f32.mrf.mxu3  ;;  %v7668_v46 = vpop.eup %6289 }
 0x487   : > { %v1545_v8 = vadd.f32 %v1544_v35, %v7539_v28  ;;  %v1828_v29 = vsel %vm1077_vm0, %v7668_v46, 0.0 }
 0x488   : > { %1097 = vadd.xlane.f32.xlu0 %v1096_v44 }
 0x489   : > { %v1566_v26 = vmul.f32 1.442695, %v1545_v8  ;;  %v1564_v8 = vmul.f32 1.442695, %v1542_v52 }
 0x48b   : > { %v1794_v45 = vpop.f32.mrf.mxu0  ;;  %6291 = vpow2.f32 %v1566_v26 }
 0x48e   : > { %v1547_v32 = vpop.f32.mrf.mxu3 }
 0x48f   : > { %v1548_v44 = vadd.f32 %v1547_v32, %v7562_v63 }
 0x490   : > { %1350 = vadd.xlane.f32.xlu0 %v1349_v38  ;;  %6097 = vrot.lane.b32.xlu2 %v7291_v59, %s9601_s19  ;;  %s9658_s19 = smov 32  }
 0x491   : > { %v1568_v38 = vmul.f32 1.442695, %v1548_v44  ;;  %v7677_v2 = vpop.eup %6291  ;;  %v1795_v44 = vadd.f32 %v1794_v45, %v7539_v28 }
 0x493   : > { %v1797_v19 = vpop.f32.mrf.mxu0  ;;  %6293 = vpow2.f32 %v1568_v38 }
 0x494   : > { %6295 = vpow2.f32 %v1564_v8  ;;  %v1798_v45 = vadd.f32 %v1797_v19, %v7562_v63 }
 0x496   : > { %v1550_v37 = vpop.f32.mrf.mxu3 }
 0x497   : > { %v1551_v47 = vadd.f32 %v1550_v37, %v7577_v27  ;;  %v1816_v37 = vmul.f32 1.442695, %v1795_v44  ;;  %v1818_v44 = vmul.f32 1.442695, %v1798_v45 }
 0x498   : > { %1100 = vadd.xlane.f32.xlu0 %v1099_v39  ;;  %v1584_v39 = vsel %vm1077_vm0, %v7677_v2, 0.0 }
 0x499   : > { %v1570_v26 = vmul.f32 1.442695, %v1551_v47  ;;  %v7683_v16 = vpop.eup %6293 }
 0x49a   : > { %v1587_v55 = vsel %vm1077_vm0, %v7683_v16, 0.0  ;;  %v7691_v38 = vpop.eup %6295 }
 0x49b   : > { %v1800_v35 = vpop.f32.mrf.mxu0  ;;  %6297 = vpow2.f32 %v1570_v26  ;;  %v1581_v26 = vsel %vm1077_vm0, %v7691_v38, 0.0 }
 0x49e   : > { %v7673_v60 = vpop.f32.mrf.mxu3 }
 0x4a0   : > { %1579 = vadd.xlane.f32.xlu0 %v1578_v22 }
 0x4a1   : > { %v7693_v8 = vpop.eup %6297 }
 0x4a3   : > { %1829 = vadd.xlane.f32.xlu1 %v1828_v29  ;;  %v1803_v22 = vpop.f32.mrf.mxu0 }
 0x4a4   : > { %v1804_v29 = vadd.f32 %v1803_v22, %v7602_v58 }
 0x4a6   : > { %v1556_v32 = vpop.f32.mrf.mxu3  ;;  %v1822_v52 = vmul.f32 1.442695, %v1804_v29 }
 0x4ab   : > { %1585 = vadd.xlane.f32.xlu1 %v1584_v39 }
 0x4ae   : > { %v1559_v39 = vpop.f32.mrf.mxu3 }
 0x4af   : > { %v1560_v22 = vadd.f32 %v1559_v39, %v7641_v13  ;;  %v1801_v39 = vadd.f32 %v1800_v35, %v7577_v27 }
 0x4b1   : > { %v1576_v19 = vmul.f32 1.442695, %v1560_v22  ;;  %v1820_v22 = vmul.f32 1.442695, %v1801_v39 }
 0x4b3   : > { %1588 = vadd.xlane.f32.xlu1 %v1587_v55 }
 0x4b4   : > { %6102 = vrot.lane.b32.xlu0 %v7273_v17, %s9599_s21  ;;  %v1590_v17 = vsel %vm1077_vm0, %v7693_v8, 0.0 }
 0x4b5   : > { %v1080_v47 = vpop.xlane.xlu2 %1079 }
 0x4b6   : > { %6299 = vrcp.f32 %v1080_v47 }
 0x4b7   : > { %6301 = vpow2.f32 %v1816_v37 }
 0x4b8   : > { %6303 = vpow2.f32 %v1822_v52 }
 0x4b9   : > { %1582 = vadd.xlane.f32.xlu2 %v1581_v26 }
 0x4bb   : > { %v1330_v29 = vpop.xlane.xlu1 %1329  ;;  %1591 = vadd.xlane.f32.xlu1 %v1590_v17  ;;  %v7712_v17 = vpop.f32.mrf.mxu0 }
 0x4bc   : > { %v6300_v55 = vpop.eup %6299  ;;  %6305 = vrcp.f32 %v1330_v29  ;;  %6107 = vrot.lane.b32.xlu0 %v7291_v59, %s9599_s21  ;;  %s9659_s21 = smov 8  }
 0x4bd   : > { %v7703_v37 = vpop.eup %6301  ;;  %v1110_v47 = vmul.f32 %v6300_v55, %v7531_v6  ;;  %6307 = vpow2.f32 %v1818_v44  ;;  %v1557_v55 = vadd.f32 %v1556_v32, %v7612_v48 }
 0x4be   : > { %v7706_v52 = vpop.eup %6303  ;;  %v1834_v45 = vsel %vm1077_vm0, %v7703_v37, 0.0  ;;  %6309 = vpow2.f32 %v1576_v19 }
 0x4bf   : > { %5613 = vmatmul.msk.f32.vlgmr.msrb.gmra.mxu2 %vm1077_vm0, %v1110_v47  ;;  %v1843_v59 = vsel %vm1077_vm0, %v7706_v52, 0.0 }
 0x4c1   : > { %1835 = vadd.xlane.f32.xlu2 %v1834_v45  ;;  %v1574_v45 = vmul.f32 1.442695, %v1557_v55  ;;  %v1792_v55 = vadd.f32 %v7649_v3, %v7536_v33 }
 0x4c2   : > { %v6306_v26 = vpop.eup %6305 }
 0x4c3   : > { %1844 = vadd.xlane.f32.xlu1 %v1843_v59  ;;  %v1333_v6 = vpop.xlane.xlu0 %1332  ;;  %v1360_v44 = vmul.f32 %v6306_v26, %v7543_v34  ;;  %v7717_v35 = vpop.eup %6307 }
 0x4c4   : > { %6311 = vrcp.f32 %v1333_v6  ;;  %v7720_v29 = vpop.eup %6309  ;;  %v1837_v19 = vsel %vm1077_vm0, %v7717_v35, 0.0  ;;  %v1809_v59 = vpop.f32.mrf.mxu0 }
 0x4c5   : > { %5637 = vmatmul.msk.f32.vlgmr.msrb.gmra.mxu1 %vm1077_vm0, %v1360_v44  ;;  %6313 = vpow2.f32 %v1820_v22  ;;  %v1599_v39 = vsel %vm1077_vm0, %v7720_v29, 0.0  ;;  %v1810_v32 = vadd.f32 %v1809_v59, %v7641_v13  ;;  %v1086_v22 = vpop.xlane.xlu2 %1085 }
 0x4c9   : > { %1838 = vadd.xlane.f32.xlu2 %v1837_v19 }
 0x4ca   : > { %v6312_v47 = vpop.eup %6311 }
 0x4cb   : > { %1600 = vadd.xlane.f32.xlu1 %v1599_v39  ;;  %v1083_v34 = vpop.xlane.xlu0 %1082  ;;  %v1361_v26 = vmul.f32 %v6312_v47, %v7551_v12  ;;  %v7728_v6 = vpop.eup %6313  ;;  %v1826_v12 = vmul.f32 1.442695, %v1810_v32 }
 0x4cc   : > { %6315 = vrcp.f32 %v1083_v34  ;;  %v1840_v44 = vsel %vm1077_vm0, %v7728_v6, 0.0 }
 0x4cd   : > { %5638 = vmatmul.msk.f32.gmra.mxu1 %vm1077_vm0, %v1361_v26  ;;  %6317 = vpow2.f32 %v1574_v45  ;;  %v1814_v45 = vmul.f32 1.442695, %v1792_v55 }
 0x4ce   : > { %6319 = vrcp.f32 %v1086_v22 }
 0x4d1   : > { %1841 = vadd.xlane.f32.xlu2 %v1840_v44 }
 0x4d2   : > { %v6316_v19 = vpop.eup %6315 }
 0x4d3   : > { %v1336_v47 = vpop.xlane.xlu0 %1335  ;;  %v1111_v39 = vmul.f32 %v6316_v19, %v7564_v53  ;;  %v7737_v34 = vpop.eup %6317  ;;  %v1554_v53 = vadd.f32 %v7673_v60, %v7602_v58 }
 0x4d4   : > { %6321 = vrcp.f32 %v1336_v47  ;;  %v6320_v26 = vpop.eup %6319  ;;  %v1339_v59 = vpop.xlane.xlu1 %1338  ;;  %v1596_v44 = vsel %vm1077_vm0, %v7737_v34, 0.0 }
 0x4d5   : > { %5614 = vmatmul.msk.f32.gmra.mxu2 %vm1077_vm0, %v1111_v39  ;;  %6323 = vpow2.f32 %v1826_v12  ;;  %v1112_v22 = vmul.f32 %v6320_v26, %v7557_v61  ;;  %v1572_v47 = vmul.f32 1.442695, %v1554_v53 }
 0x4d6   : > { %6325 = vpow2.f32 %v1814_v45 }
 0x4d7   : > { %6327 = vrcp.f32 %v1339_v59 }
 0x4d9   : > { %1597 = vadd.xlane.f32.xlu2 %v1596_v44 }
 0x4da   : > { %v6322_v3 = vpop.eup %6321 }
 0x4db   : > { %v1089_v32 = vpop.xlane.xlu0 %1088  ;;  %v1362_v19 = vmul.f32 %v6322_v3, %v7574_v25  ;;  %v7746_v55 = vpop.eup %6323  ;;  %v1807_v25 = vadd.f32 %v7712_v17, %v7612_v48 }
 0x4dc   : > { %6329 = vrcp.f32 %v1089_v32  ;;  %v7750_v12 = vpop.eup %6325  ;;  %v1849_v39 = vsel %vm1077_vm0, %v7746_v55, 0.0 }
 0x4dd   : > { %5615 = vmatmul.msk.f32.gmra.mxu2 %vm1077_vm0, %v1112_v22  ;;  %5639 = vmatmul.msk.f32.gmra.mxu1 %vm1077_vm0, %v1362_v19  ;;  %v6328_v45 = vpop.eup %6327  ;;  %6331 = vpow2.f32 %v1572_v47  ;;  %v1831_v3 = vsel %vm1077_vm0, %v7750_v12, 0.0  ;;  %v1824_v32 = vmul.f32 1.442695, %v1807_v25 }
 0x4de   : > { %v1363_v44 = vmul.f32 %v6328_v45, %v7589_v50 }
 0x4e1   : > { %1850 = vadd.xlane.f32.xlu2 %v1849_v39 }
 0x4e2   : > { %v6330_v61 = vpop.eup %6329 }
 0x4e3   : > { %v1345_v26 = vpop.xlane.xlu2 %1344  ;;  %v1342_v60 = vpop.xlane.xlu0 %1341  ;;  %v1113_v59 = vmul.f32 %v6330_v61, %v7604_v41 }
 0x4e4   : > { %6333 = vrcp.f32 %v1342_v60  ;;  %v7762_v22 = vpop.eup %6331 }
 0x4e5   : > { %5616 = vmatmul.msk.f32.gmra.mxu2 %vm1077_vm0, %v1113_v59  ;;  %5640 = vmatmul.msk.f32.gmra.mxu1 %vm1077_vm0, %v1363_v44  ;;  %6335 = vrcp.f32 %v1345_v26  ;;  %v1593_v39 = vsel %vm1077_vm0, %v7762_v22, 0.0 }
 0x4e6   : > { %1832 = vadd.xlane.f32.xlu0 %v1831_v3  ;;  %6337 = vpow2.f32 %v1824_v32 }
 0x4ea   : > { %v6334_v53 = vpop.eup %6333 }
 0x4eb   : > { %v6093_v41 = vpop.permute.xlu1 %6092  ;;  %v1348_v19 = vpop.xlane.xlu2 %1347  ;;  %v1364_v50 = vmul.f32 %v6334_v53, %v7614_v0 }
 0x4ec   : > { %v6094_v17 = vunpack.i.l.bf16 %v6093_v41  ;;  %v1092_v47 = vpop.xlane.xlu0 %1091  ;;  %v6095_v45 = vunpack.i.h.bf16 %v6093_v41  ;;  %v6336_v61 = vpop.eup %6335 }
 0x4ed   : > { %6339 = vrcp.f32 %v1092_v47  ;;  %5641 = vmatmul.msk.f32.gmra.mxu1 %vm1077_vm0, %v1364_v50  ;;  %v7768_v60 = vpop.eup %6337  ;;  %v1365_v3 = vmul.f32 %v6336_v61, %v7617_v21 }
 0x4ee   : > { %1594 = vadd.xlane.f32.xlu0 %v1593_v39  ;;  %1926 = vmatpush.msra.mxu1 %v6094_v17  ;;  %6341 = vrcp.f32 %v1348_v19  ;;  %v1846_v32 = vsel %vm1077_vm0, %v7768_v60, 0.0 }
 0x4f0   : > { %1927 = vmatpush.msra.mxu1 %v6095_v45 }
 0x4f3   : > { %v6340_v26 = vpop.eup %6339  ;;  %v6098_v59 = vpop.permute.xlu2 %6097 }
 0x4f4   : > { %v6099_v25 = vunpack.i.l.bf16 %v6098_v59  ;;  %v1095_v44 = vpop.xlane.xlu0 %1094  ;;  %v1114_v0 = vmul.f32 %v6340_v26, %v7625_v5  ;;  %v6100_v53 = vunpack.i.h.bf16 %v6098_v59  ;;  %v6342_v41 = vpop.eup %6341 }
 0x4f5   : > { %6343 = vrcp.f32 %v1095_v44  ;;  %5642 = vmatmul.msk.f32.gmra.mxu1 %vm1077_vm0, %v1365_v3  ;;  %v1366_v17 = vmul.f32 %v6342_v41, %v7628_v49 }
 0x4f6   : > { %5617 = vmatmul.msk.f32.gmra.mxu2 %vm1077_vm0, %v1114_v0  ;;  %1847 = vadd.xlane.f32.xlu0 %v1846_v32 }
 0x4f7   : > { %1680 = vmatpush.msra.mxu2 %v6099_v25 }
 0x4f9   : > { %1681 = vmatpush.msra.mxu2 %v6100_v53  ;;  %6117 = vrot.lane.b32.xlu2 %v6116_v30, %s9597_s20 }
 0x4fb   : > { %v6344_v21 = vpop.eup %6343 }
 0x4fc   : > { %v1098_v5 = vpop.xlane.xlu0 %1097  ;;  %v1115_v19 = vmul.f32 %v6344_v21, %v7638_v56 }
 0x4fd   : > { %6345 = vrcp.f32 %v1098_v5  ;;  %5643 = vmatmul.msk.f32.gmra.mxu1 %vm1077_vm0, %v1366_v17 }
 0x4fe   : > { %5618 = vmatmul.msk.f32.gmra.mxu2 %vm1077_vm0, %v1115_v19 }
 0x503   : > { %v6346_v47 = vpop.eup %6345 }
 0x504   : > { %v1351_v50 = vpop.xlane.xlu0 %1350  ;;  %v1116_v39 = vmul.f32 %v6346_v47, %v7646_v23 }
 0x505   : > { %6347 = vrcp.f32 %v1351_v50 }
 0x506   : > { %5619 = vmatmul.msk.f32.gmra.mxu2 %vm1077_vm0, %v1116_v39 }
 0x50a   : > { %6112 = vrot.lane.b32.xlu0 %v6111_v20, %s9597_s20  ;;  %s9660_s20 = smov 16  }
 0x50b   : > { %v6348_v11 = vpop.eup %6347 }
 0x50c   : > { %v1101_v14 = vpop.xlane.xlu0 %1100  ;;  %v1367_v30 = vmul.f32 %v6348_v11, %v7653_v7 }
 0x50d   : > { %6349 = vrcp.f32 %v1101_v14 }
 0x50e   : > { %5644 = vmatmul.msk.f32.gmra.mxu1 %vm1077_vm0, %v1367_v30 }
 0x513   : > { %v6350_v49 = vpop.eup %6349 }
 0x514   : > { %v1580_v56 = vpop.xlane.xlu0 %1579  ;;  %v1117_v45 = vmul.f32 %v6350_v49, %v7661_v15 }
 0x515   : > { %6351 = vrcp.f32 %v1580_v56 }
 0x516   : > { %5620 = vmatmul.msk.f32.gmra.mxu2 %vm1077_vm0, %v1117_v45  ;;  %v1830_v9 = vpop.xlane.xlu1 %1829 }
 0x517   : > { %6353 = vrcp.f32 %v1830_v9 }
 0x51b   : > { %v6352_v23 = vpop.eup %6351 }
 0x51c   : > { %v1610_v61 = vmul.f32 %v6352_v23, %v7666_v54 }
 0x51d   : > { %v6354_v15 = vpop.eup %6353 }
 0x51e   : > { %5661 = vmatmul.msk.f32.vlgmr.msra.gmra.mxu2 %vm1077_vm0, %v1610_v61  ;;  %v1586_v26 = vpop.xlane.xlu1 %1585  ;;  %v1860_v3 = vmul.f32 %v6354_v15, %v7668_v46 }
 0x526   : > { %v6103_v10 = vpop.permute.xlu0 %6102  ;;  %v1589_v53 = vpop.xlane.xlu1 %1588 }
 0x527   : > { %v6104_v20 = vunpack.i.l.bf16 %v6103_v10  ;;  %v6105_v7 = vunpack.i.h.bf16 %v6103_v10 }
 0x529   : > { %1928 = vmatpush.msra.mxu1 %v6104_v20 }
 0x52b   : > { %1929 = vmatpush.msra.mxu1 %v6105_v7 }
 0x52c   : > { %v1583_v59 = vpop.xlane.xlu2 %1582 }
 0x52d   : > { %6355 = vrcp.f32 %v1583_v59 }
 0x52e   : > { %v6108_v25 = vpop.permute.xlu0 %6107  ;;  %6357 = vrcp.f32 %v1586_v26  ;;  %v1592_v5 = vpop.xlane.xlu1 %1591 }
 0x52f   : > { %v6109_v44 = vunpack.i.l.bf16 %v6108_v25  ;;  %v6110_v0 = vunpack.i.h.bf16 %v6108_v25  ;;  %6359 = vrcp.f32 %v1589_v53 }
 0x530   : > { %6361 = vrcp.f32 %v1592_v5 }
 0x531   : > { %1930 = vmatpush.msra.mxu1 %v6109_v44 }
 0x533   : > { %v6356_v54 = vpop.eup %6355  ;;  %1931 = vmatpush.msra.mxu1 %v6110_v0 }
 0x534   : > { %5685 = vmatmul.msk.f32.vlgmr.msra.gmra.mxu1 %vm1077_vm0, %v1860_v3  ;;  %v1611_v32 = vmul.f32 %v6356_v54, %v7691_v38  ;;  %v6358_v41 = vpop.eup %6357  ;;  %v1836_v38 = vpop.xlane.xlu2 %1835 }
 0x535   : > { %v1612_v21 = vmul.f32 %v6358_v41, %v7677_v2  ;;  %v6360_v19 = vpop.eup %6359 }
 0x536   : > { %5662 = vmatmul.msk.f32.gmra.mxu2 %vm1077_vm0, %v1611_v32  ;;  %v1613_v46 = vmul.f32 %v6360_v19, %v7683_v16  ;;  %v6362_v47 = vpop.eup %6361  ;;  %v1845_v23 = vpop.xlane.xlu1 %1844 }
 0x537   : > { %v1614_v2 = vmul.f32 %v6362_v47, %v7693_v8 }
 0x53c   : > { %v1839_v39 = vpop.xlane.xlu2 %1838 }
 0x53e   : > { %5663 = vmatmul.msk.f32.gmra.mxu2 %vm1077_vm0, %v1612_v21 }
 0x542   : > { %v1433_v17 = vpop.f32.mrf.mxu1  ;;  %v7808_v11 = vpop.f32.mrf.mxu2 }
 0x543   : > { %1965 = vrot.lane.b32.xlu1 %v1433_v17, %s9595_s22 }
 0x544   : > { %v1842_v30 = vpop.xlane.xlu2 %1841 }
 0x546   : > { %5664 = vmatmul.msk.f32.gmra.mxu2 %vm1077_vm0, %v1613_v46 }
 0x54a   : > { %v1436_v50 = vpop.f32.mrf.mxu1 }
 0x54b   : > { %1967 = vrot.lane.b32.xlu0 %v1436_v50, %s9595_s22 }
 0x54c   : > { %v1598_v8 = vpop.xlane.xlu2 %1597 }
 0x54e   : > { %5665 = vmatmul.msk.f32.gmra.mxu2 %vm1077_vm0, %v1614_v2 }
 0x554   : > { %v1851_v21 = vpop.xlane.xlu2 %1850 }
 0x558   : > { %v7810_v16 = vpop.f32.mrf.mxu2 }
 0x559   : > { %v1833_v14 = vpop.xlane.xlu0 %1832 }
 0x55a   : > { %6363 = vrcp.f32 %v1833_v14  ;;  %v1439_v0 = vpop.f32.mrf.mxu1 }
 0x55b   : > { %6365 = vrcp.f32 %v1836_v38 }
 0x560   : > { %v6364_v49 = vpop.eup %6363  ;;  %v7816_v7 = vpop.f32.mrf.mxu2 }
 0x561   : > { %v1595_v56 = vpop.xlane.xlu0 %1594  ;;  %v1861_v45 = vmul.f32 %v6364_v49, %v7750_v12  ;;  %v6366_v61 = vpop.eup %6365 }
 0x562   : > { %6367 = vrcp.f32 %v1595_v56  ;;  %v1862_v20 = vmul.f32 %v6366_v61, %v7703_v37  ;;  %v1601_v12 = vpop.xlane.xlu1 %1600  ;;  %v1442_v41 = vpop.f32.mrf.mxu1 }
 0x563   : > { %5686 = vmatmul.msk.f32.gmra.mxu1 %vm1077_vm0, %v1861_v45  ;;  %6369 = vrcp.f32 %v1839_v39 }
 0x564   : > { %6371 = vrcp.f32 %v1598_v8 }
 0x565   : > { %6373 = vrcp.f32 %v1601_v12 }
 0x566   : > { %6375 = vrcp.f32 %v1842_v30 }
 0x567   : > { %6377 = vrcp.f32 %v1845_v23 }
 0x568   : > { %v6368_v9 = vpop.eup %6367 }
 0x569   : > { %v1615_v10 = vmul.f32 %v6368_v9, %v7762_v22  ;;  %v6370_v26 = vpop.eup %6369  ;;  %v7824_v22 = vpop.f32.mrf.mxu2 }
 0x56a   : > { %v6372_v59 = vpop.eup %6371  ;;  %v1863_v15 = vmul.f32 %v6370_v26, %v7717_v35  ;;  %v6118_v9 = vpop.permute.xlu2 %6117 }
 0x56b   : > { %5666 = vmatmul.msk.f32.gmra.mxu2 %vm1077_vm0, %v1615_v10  ;;  %5687 = vmatmul.msk.f32.gmra.mxu1 %vm1077_vm0, %v1862_v20  ;;  %v1616_v25 = vmul.f32 %v6372_v59, %v7737_v34  ;;  %v6374_v37 = vpop.eup %6373  ;;  %v1848_v34 = vpop.xlane.xlu0 %1847  ;;  %v6120_v10 = vunpack.i.h.bf16 %v6118_v9  ;;  %v6119_v20 = vunpack.i.l.bf16 %v6118_v9 }
 0x56c   : > { %v6376_v44 = vpop.eup %6375  ;;  %v1617_v3 = vmul.f32 %v6374_v37, %v7720_v29  ;;  %6379 = vrcp.f32 %v1848_v34 }
 0x56d   : > { %v1864_v54 = vmul.f32 %v6376_v44, %v7728_v6  ;;  %v6378_v32 = vpop.eup %6377  ;;  %6381 = vrcp.f32 %v1851_v21  ;;  %v1445_v6 = vpop.f32.mrf.mxu1 }
 0x56e   : > { %v1865_v53 = vmul.f32 %v6378_v32, %v7706_v52 }
 0x572   : > { %v6380_v5 = vpop.eup %6379 }
 0x573   : > { %5667 = vmatmul.msk.f32.gmra.mxu2 %vm1077_vm0, %v1616_v25  ;;  %5688 = vmatmul.msk.f32.gmra.mxu1 %vm1077_vm0, %v1863_v15  ;;  %v1866_v29 = vmul.f32 %v6380_v5, %v7768_v60  ;;  %v6382_v17 = vpop.eup %6381 }
 0x574   : > { %v1867_v38 = vmul.f32 %v6382_v17, %v7746_v55 }
 0x575   : > { %v1448_v47 = vpop.f32.mrf.mxu1 }
 0x579   : > { %v7830_v35 = vpop.f32.mrf.mxu2 }
 0x57b   : > { %5668 = vmatmul.msk.f32.gmra.mxu2 %vm1077_vm0, %v1617_v3  ;;  %5689 = vmatmul.msk.f32.gmra.mxu1 %vm1077_vm0, %v1864_v54 }
 0x57c   : > { %v6113_v52 = vpop.permute.xlu0 %6112 }
 0x57d   : > { %v6115_v50 = vunpack.i.h.bf16 %v6113_v52  ;;  %v6114_v2 = vunpack.i.l.bf16 %v6113_v52  ;;  %v1451_v60 = vpop.f32.mrf.mxu1 }
 0x57f   : > { %2132 = vmatpush.msrb.mxu1 %v6114_v2  ;;  %5947 = vmatpush.msra.mxu3 %v6114_v2 }
 0x581   : > { %v7834_v19 = vpop.f32.mrf.mxu2  ;;  %2133 = vmatpush.msrb.mxu1 %v6115_v50  ;;  %5948 = vmatpush.msra.mxu3 %v6115_v50 }
 0x583   : > { %5690 = vmatmul.msk.f32.gmra.mxu1 %vm1077_vm0, %v1865_v53  ;;  %5949 = vmatpush.msra.mxu3 %v6119_v20 }
 0x584   : > { %2134 = vmatpush.msrb.mxu1 %v6119_v20 }
 0x585   : > { %5950 = vmatpush.msra.mxu3 %v6120_v10 }
 0x586   : > { %2135 = vmatpush.msrb.mxu1 %v6120_v10 }
 0x589   : > { %v7838_v46 = vpop.f32.mrf.mxu2 }
 0x58b   : > { %5691 = vmatmul.msk.f32.gmra.mxu1 %vm1077_vm0, %v1866_v29  ;;  %v1454_v30 = vpop.f32.mrf.mxu1 }
 0x593   : > { %5692 = vmatmul.msk.f32.gmra.mxu1 %vm1077_vm0, %v1867_v38 }
 0x599   : > { %v7842_v39 = vpop.f32.mrf.mxu2 }
 0x5a1   : > { %v1683_v14 = vpop.f32.mrf.mxu2 }
 0x5a2   : > { %1997 = vrot.lane.b32.xlu0 %v1683_v14, %s9593_s23 }
 0x5b1   : > { %v1933_v49 = vpop.f32.mrf.mxu1 }
 0x5b2   : > { %2029 = vrot.lane.b32.xlu1 %v1933_v49, %s9591_s24 }
 0x5b5   : > { %v1966_v54 = vpop.permute.xlu1 %1965 }
 0x5b6   : > { %v2053_v32 = vsel %vm979_vm15, %v7808_v11, %v1966_v54 }
 0x5b9   : > { %v1686_v55 = vpop.f32.mrf.mxu2 }
 0x5ba   : > { %1969 = vrot.lane.b32.xlu1 %v1439_v0, %s9595_s22  ;;  %1999 = vrot.lane.b32.xlu2 %v1686_v55, %s9593_s23 }
 0x5bd   : > { %v1968_v3 = vpop.permute.xlu0 %1967 }
 0x5be   : > { %v2054_v17 = vsel %vm979_vm15, %v7810_v16, %v1968_v3 }
 0x5c1   : > { %v1689_v56 = vpop.f32.mrf.mxu2 }
 0x5c2   : > { %1971 = vrot.lane.b32.xlu1 %v1442_v41, %s9595_s22  ;;  %2001 = vrot.lane.b32.xlu2 %v1689_v56, %s9593_s23 }
 0x5c9   : > { %v1692_v45 = vpop.f32.mrf.mxu2 }
 0x5ca   : > { %1973 = vrot.lane.b32.xlu1 %v1445_v6, %s9595_s22  ;;  %2003 = vrot.lane.b32.xlu2 %v1692_v45, %s9593_s23 }
 0x5d1   : > { %v1695_v23 = vpop.f32.mrf.mxu2 }
 0x5d2   : > { %1975 = vrot.lane.b32.xlu1 %v1448_v47, %s9595_s22  ;;  %2005 = vrot.lane.b32.xlu2 %v1695_v23, %s9593_s23 }
 0x5da   : > { %1977 = vrot.lane.b32.xlu1 %v1451_v60, %s9595_s22 }
 0x5e0   : > { %v1936_v8 = vpop.f32.mrf.mxu1 }
 0x5e1   : > { %2031 = vrot.lane.b32.xlu0 %v1936_v8, %s9591_s24 }
 0x5e2   : > { %1979 = vrot.lane.b32.xlu1 %v1454_v30, %s9595_s22  ;;  %s9661_s22 = smov 24  }
 0x5e8   : > { %v1939_v61 = vpop.f32.mrf.mxu1 }
 0x5e9   : > { %2033 = vrot.lane.b32.xlu0 %v1939_v61, %s9591_s24 }
 0x5ee   : > { %v1698_v12 = vpop.f32.mrf.mxu2 }
 0x5ef   : > { %2007 = vrot.lane.b32.xlu2 %v1698_v12, %s9593_s23 }
 0x5f0   : > { %v1942_v26 = vpop.f32.mrf.mxu1 }
 0x5f1   : > { %2035 = vrot.lane.b32.xlu0 %v1942_v26, %s9591_s24 }
 0x5f6   : > { %v1701_v59 = vpop.f32.mrf.mxu2 }
 0x5f7   : > { %2009 = vrot.lane.b32.xlu2 %v1701_v59, %s9593_s23 }
 0x5f8   : > { %v1945_v25 = vpop.f32.mrf.mxu1 }
 0x5f9   : > { %2037 = vrot.lane.b32.xlu0 %v1945_v25, %s9591_s24 }
 0x5fe   : > { %v1704_v15 = vpop.f32.mrf.mxu2 }
 0x5ff   : > { %2011 = vrot.lane.b32.xlu2 %v1704_v15, %s9593_s23  ;;  %s9654_s23 = smov 56  }
 0x600   : > { %v1948_v37 = vpop.f32.mrf.mxu1 }
 0x601   : > { %2039 = vrot.lane.b32.xlu0 %v1948_v37, %s9591_s24 }
 0x608   : > { %v1951_v44 = vpop.f32.mrf.mxu1 }
 0x609   : > { %2041 = vrot.lane.b32.xlu0 %v1951_v44, %s9591_s24 }
 0x610   : > { %v1954_v0 = vpop.f32.mrf.mxu1 }
 0x611   : > { %2043 = vrot.lane.b32.xlu0 %v1954_v0, %s9591_s24  ;;  %s9655_s24 = smov 64  }
 0x614   : > { %v1998_v34 = vpop.permute.xlu0 %1997  ;;  %v2000_v5 = vpop.permute.xlu2 %1999 }
 0x615   : > { %v2062_v53 = vsel %vm2061_vm2, %v2053_v32, %v1998_v34  ;;  %v2063_v38 = vsel %vm2061_vm2, %v2054_v17, %v2000_v5 }
 0x61c   : > { %v2002_v6 = vpop.permute.xlu2 %2001 }
 0x624   : > { %v2030_v41 = vpop.permute.xlu1 %2029  ;;  %v2004_v2 = vpop.permute.xlu2 %2003 }
 0x625   : > { %v2071_v21 = vsel %vm2070_vm3, %v2062_v53, %v2030_v41 }
 0x626   : > { %5693 = vmatmul.msk.f32.vlgmr.msrb.gmra.mxu1 %vm495_vm12, %v2071_v21 }
 0x62c   : > { %v1970_v29 = vpop.permute.xlu1 %1969  ;;  %v2006_v45 = vpop.permute.xlu2 %2005 }
 0x62d   : > { %v2055_v50 = vsel %vm979_vm15, %v7816_v7, %v1970_v29 }
 0x62e   : > { %v2064_v14 = vsel %vm2061_vm2, %v2055_v50, %v2002_v6 }
 0x634   : > { %v1972_v11 = vpop.permute.xlu1 %1971 }
 0x635   : > { %v2056_v16 = vsel %vm979_vm15, %v7824_v22, %v1972_v11 }
 0x636   : > { %v2065_v56 = vsel %vm2061_vm2, %v2056_v16, %v2004_v2 }
 0x63c   : > { %v1974_v49 = vpop.permute.xlu1 %1973 }
 0x63d   : > { %v2057_v7 = vsel %vm979_vm15, %v7830_v35, %v1974_v49 }
 0x63e   : > { %v2066_v9 = vsel %vm2061_vm2, %v2057_v7, %v2006_v45 }
 0x644   : > { %v1976_v8 = vpop.permute.xlu1 %1975 }
 0x645   : > { %v2058_v22 = vsel %vm979_vm15, %v7834_v19, %v1976_v8 }
 0x649   : > { %v2008_v10 = vpop.permute.xlu2 %2007 }
 0x64a   : > { %v2067_v12 = vsel %vm2061_vm2, %v2058_v22, %v2008_v10 }
 0x64c   : > { %v1978_v25 = vpop.permute.xlu1 %1977 }
 0x64d   : > { %v2059_v15 = vsel %vm979_vm15, %v7838_v46, %v1978_v25  ;;  %v7909_v46 = vld [vmem:[%s9588_s6] sm:$0xff] }
 0x64e   : > { %v2079_v41 = vperm.slane %v7909_v46, 2 }
 0x651   : > { %v2010_v35 = vpop.permute.xlu2 %2009 }
 0x652   : > { %v2068_v37 = vsel %vm2061_vm2, %v2059_v15, %v2010_v35 }
 0x653   : > { %v2032_v52 = vpop.permute.xlu0 %2031 }
 0x654   : > { %v2072_v47 = vsel %vm2070_vm3, %v2063_v38, %v2032_v52  ;;  %v1980_v19 = vpop.permute.xlu1 %1979 }
 0x655   : > { %5694 = vmatmul.msk.f32.vlgmr.msra.gmra.mxu3 %vm495_vm12, %v2072_v47  ;;  %v2060_v54 = vsel %vm979_vm15, %v7842_v39, %v1980_v19 }
 0x659   : > { %v2012_v3 = vpop.permute.xlu2 %2011 }
 0x65a   : > { %v2069_v34 = vsel %vm2061_vm2, %v2060_v54, %v2012_v3 }
 0x65b   : > { %v2034_v60 = vpop.permute.xlu0 %2033 }
 0x65c   : > { %v2073_v30 = vsel %vm2070_vm3, %v2064_v14, %v2034_v60 }
 0x65d   : > { %5695 = vmatmul.msk.f32.gmra.mxu3 %vm495_vm12, %v2073_v30 }
 0x663   : > { %v2036_v55 = vpop.permute.xlu0 %2035 }
 0x664   : > { %v2074_v23 = vsel %vm2070_vm3, %v2065_v56, %v2036_v55 }
 0x665   : > { %5696 = vmatmul.msk.f32.gmra.mxu3 %vm495_vm12, %v2074_v23 }
 0x66b   : > { %v2038_v61 = vpop.permute.xlu0 %2037 }
 0x66c   : > { %v2075_v20 = vsel %vm2070_vm3, %v2066_v9, %v2038_v61 }
 0x66d   : > { %5697 = vmatmul.msk.f32.gmra.mxu3 %vm495_vm12, %v2075_v20 }
 0x673   : > { %v2040_v26 = vpop.permute.xlu0 %2039 }
 0x674   : > { %v2076_v59 = vsel %vm2070_vm3, %v2067_v12, %v2040_v26 }
 0x675   : > { %5698 = vmatmul.msk.f32.gmra.mxu3 %vm495_vm12, %v2076_v59 }
 0x67b   : > { %v2042_v44 = vpop.permute.xlu0 %2041 }
 0x67c   : > { %v2077_v0 = vsel %vm2070_vm3, %v2068_v37, %v2042_v44 }
 0x67d   : > { %5699 = vmatmul.msk.f32.gmra.mxu3 %vm495_vm12, %v2077_v0 }
 0x683   : > { %v2044_v32 = vpop.permute.xlu0 %2043 }
 0x684   : > { %v2078_v53 = vsel %vm2070_vm3, %v2069_v34, %v2044_v32 }
 0x685   : > { %5700 = vmatmul.msk.f32.gmra.mxu3 %vm495_vm12, %v2078_v53 }
 0x6a3   : > { %v2137_v21 = vpop.f32.mrf.mxu1 }
 0x6a4   : > { %v2138_v5 = vadd.f32 %v2137_v21, %v2079_v41 }
 0x6a6   : > { %v2161_v29 = vadd.f32 %v2138_v5, %v7039_v62 }
 0x6a8   : > { %v2169_v39 = vsel %vm495_vm12, %v2161_v29, 0.0 }
 0x6a9   : > { %2170 = vadd.xlane.f32.xlu1 %v2169_v39 }
 0x6d8   : > { %v2140_v6 = vpop.f32.mrf.mxu3 }
 0x6d9   : > { %v2141_v17 = vadd.f32 %v2140_v6, %v2079_v41 }
 0x6db   : > { %v2162_v38 = vadd.f32 %v2141_v17, %v7047_v18 }
 0x6dd   : > { %v2172_v52 = vsel %vm495_vm12, %v2162_v38, 0.0 }
 0x6de   : > { %2173 = vadd.xlane.f32.xlu2 %v2172_v52 }
 0x6e0   : > { %v2143_v47 = vpop.f32.mrf.mxu3 }
 0x6e1   : > { %v2144_v11 = vadd.f32 %v2143_v47, %v2079_v41 }
 0x6e3   : > { %v2163_v50 = vadd.f32 %v2144_v11, %v7054_v36 }
 0x6e5   : > { %v2175_v2 = vsel %vm495_vm12, %v2163_v50, 0.0 }
 0x6e6   : > { %2176 = vadd.xlane.f32.xlu0 %v2175_v2 }
 0x6e8   : > { %v2146_v60 = vpop.f32.mrf.mxu3 }
 0x6e9   : > { %v2147_v14 = vadd.f32 %v2146_v60, %v2079_v41 }
 0x6eb   : > { %v2164_v62 = vadd.f32 %v2147_v14, %v7063_v57 }
 0x6ed   : > { %v2178_v30 = vsel %vm495_vm12, %v2164_v62, 0.0 }
 0x6ee   : > { %2179 = vadd.xlane.f32.xlu2 %v2178_v30  ;;  %v863_v30 = vld [vmem:[%s9586_s4 + $0x38] sm:$0xff] }
 0x6ef   : > { %2400 = vmatpush.msrb.mxu2 %v863_v30 }
 0x6f0   : > { %v2149_v16 = vpop.f32.mrf.mxu3 }
 0x6f1   : > { %v2150_v49 = vadd.f32 %v2149_v16, %v2079_v41  ;;  %v861_v16 = vld [vmem:[%s9586_s4 + $0x28] sm:$0xff] }
 0x6f2   : > { %2401 = vmatpush.msrb.mxu2 %v861_v16 }
 0x6f3   : > { %v2165_v18 = vadd.f32 %v2150_v49, %v7070_v4  ;;  %v859_v49 = vld [vmem:[%s9586_s4 + $0x18] sm:$0xff] }
 0x6f4   : > { %2402 = vmatpush.msrb.mxu2 %v859_v49 }
 0x6f5   : > { %v2181_v55 = vsel %vm495_vm12, %v2165_v18, 0.0 }
 0x6f6   : > { %2182 = vadd.xlane.f32.xlu1 %v2181_v55 }
 0x6f8   : > { %v2152_v56 = vpop.f32.mrf.mxu3 }
 0x6f9   : > { %v2153_v45 = vadd.f32 %v2152_v56, %v2079_v41 }
 0x6fb   : > { %v2166_v36 = vadd.f32 %v2153_v45, %v7077_v43 }
 0x6fd   : > { %v2184_v23 = vsel %vm495_vm12, %v2166_v36, 0.0 }
 0x6fe   : > { %2185 = vadd.xlane.f32.xlu0 %v2184_v23 }
 0x700   : > { %v2155_v7 = vpop.f32.mrf.mxu3 }
 0x701   : > { %v2156_v8 = vadd.f32 %v2155_v7, %v2079_v41 }
 0x703   : > { %v2167_v57 = vadd.f32 %v2156_v8, %v7084_v1 }
 0x705   : > { %v2187_v61 = vsel %vm495_vm12, %v2167_v57, 0.0 }
 0x706   : > { %2188 = vadd.xlane.f32.xlu1 %v2187_v61 }
 0x708   : > { %v2158_v20 = vpop.f32.mrf.mxu3 }
 0x709   : > { %v2159_v43 = vadd.f32 %v2158_v20, %v2079_v41 }
 0x70b   : > { %v2168_v26 = vadd.f32 %v2159_v43, %v7092_v51 }
 0x70d   : > { %v2190_v1 = vsel %vm495_vm12, %v2168_v26, 0.0 }
 0x71c   : > { %v2171_v9 = vpop.xlane.xlu1 %2170 }
 0x71d   : > { %v2193_v4 = vmul.f32 %v2171_v9, %v6943_v31 }
 0x71f   : > { %v7927_v10 = vsub.f32 %v2161_v29, %v2193_v4 }
 0x721   : > { %v2209_v22 = vmul.f32 %v7927_v10, %v7927_v10 }
 0x723   : > { %v2217_v12 = vsel %vm495_vm12, %v2209_v22, 0.0 }
 0x724   : > { %2218 = vadd.xlane.f32.xlu2 %v2217_v12  ;;  %v7990_v12 = vperm.slane %v7909_v46, 4 }
 0x72c   : > { %2191 = vadd.xlane.f32.xlu2 %v2190_v1 }
 0x751   : > { %v2174_v59 = vpop.xlane.xlu2 %2173 }
 0x752   : > { %v2194_v25 = vmul.f32 %v2174_v59, %v6943_v31 }
 0x754   : > { %v7935_v35 = vsub.f32 %v2162_v38, %v2194_v25 }
 0x756   : > { %v2210_v15 = vmul.f32 %v7935_v35, %v7935_v35 }
 0x758   : > { %v2220_v37 = vsel %vm495_vm12, %v2210_v15, 0.0 }
 0x759   : > { %v2177_v44 = vpop.xlane.xlu0 %2176  ;;  %2221 = vadd.xlane.f32.xlu0 %v2220_v37 }
 0x75a   : > { %v2195_v0 = vmul.f32 %v2177_v44, %v6943_v31 }
 0x75c   : > { %v7941_v19 = vsub.f32 %v2163_v50, %v2195_v0 }
 0x75e   : > { %v2211_v51 = vmul.f32 %v7941_v19, %v7941_v19 }
 0x760   : > { %v2223_v3 = vsel %vm495_vm12, %v2211_v51, 0.0 }
 0x761   : > { %2224 = vadd.xlane.f32.xlu1 %v2223_v3  ;;  %v2180_v54 = vpop.xlane.xlu2 %2179 }
 0x762   : > { %v2196_v34 = vmul.f32 %v2180_v54, %v6943_v31 }
 0x764   : > { %v7947_v32 = vsub.f32 %v2164_v62, %v2196_v34 }
 0x766   : > { %v2212_v53 = vmul.f32 %v7947_v32, %v7947_v32 }
 0x768   : > { %v2226_v41 = vsel %vm495_vm12, %v2212_v53, 0.0 }
 0x769   : > { %v2183_v21 = vpop.xlane.xlu1 %2182  ;;  %2227 = vadd.xlane.f32.xlu0 %v2226_v41 }
 0x76a   : > { %v2197_v5 = vmul.f32 %v2183_v21, %v6943_v31 }
 0x76c   : > { %v7953_v29 = vsub.f32 %v2165_v18, %v2197_v5  ;;  %v857_v18 = vld [vmem:[%s9586_s4 + $0x8] sm:$0xff] }
 0x76d   : > { %2403 = vmatpush.msrb.mxu2 %v857_v18 }
 0x76e   : > { %v2213_v39 = vmul.f32 %v7953_v29, %v7953_v29 }
 0x770   : > { %v2229_v6 = vsel %vm495_vm12, %v2213_v39, 0.0 }
 0x771   : > { %v2186_v17 = vpop.xlane.xlu0 %2185  ;;  %2230 = vadd.xlane.f32.xlu2 %v2229_v6 }
 0x772   : > { %v2198_v38 = vmul.f32 %v2186_v17, %v6943_v31 }
 0x774   : > { %v7959_v52 = vsub.f32 %v2166_v36, %v2198_v38 }
 0x776   : > { %v2214_v47 = vmul.f32 %v7959_v52, %v7959_v52 }
 0x778   : > { %v2232_v11 = vsel %vm495_vm12, %v2214_v47, 0.0 }
 0x779   : > { %2233 = vadd.xlane.f32.xlu1 %v2232_v11  ;;  %v2189_v50 = vpop.xlane.xlu1 %2188 }
 0x77a   : > { %v2199_v2 = vmul.f32 %v2189_v50, %v6943_v31 }
 0x77c   : > { %v7965_v60 = vsub.f32 %v2167_v57, %v2199_v2 }
 0x77e   : > { %v2215_v14 = vmul.f32 %v7965_v60, %v7965_v60 }
 0x780   : > { %v2235_v62 = vsel %vm495_vm12, %v2215_v14, 0.0 }
 0x781   : > { %2236 = vadd.xlane.f32.xlu0 %v2235_v62 }
 0x797   : > { %v2219_v55 = vpop.xlane.xlu2 %2218 }
 0x798   : > { %v2241_v56 = vmul.f32 %v2219_v55, %v6943_v31 }
 0x79a   : > { %v2249_v45 = vadd.f32 1e-05, %v2241_v56 }
 0x79c   : > { %6383 = vrsqrt.f32 %v2249_v45  ;;  %vm2263_vm6 = vweird.f32 %v2249_v45 }
 0x79f   : > { %v2192_v36 = vpop.xlane.xlu2 %2191 }
 0x7a0   : > { %v2200_v23 = vmul.f32 %v2192_v36, %v6943_v31 }
 0x7a2   : > { %v6384_v7 = vpop.eup %6383  ;;  %v7984_v8 = vsub.f32 %v2168_v26, %v2200_v23  ;;  %v7993_v26 = vperm.slane %v7909_v46, 5 }
 0x7a3   : > { %v2258_v57 = vmul.f32 %v6384_v7, %v2249_v45  ;;  %vm2264_vm4 = vweird.f32 %v6384_v7 }
 0x7a4   : > { %v2216_v61 = vmul.f32 %v7984_v8, %v7984_v8  ;;  %vm2265_vm7 = vmor %vm2263_vm6, %vm2264_vm4 }
 0x7a5   : > { %v2259_v9 = vmul.f32 %v6384_v7, %v2258_v57 }
 0x7a6   : > { %v2238_v4 = vsel %vm495_vm12, %v2216_v61, 0.0 }
 0x7a7   : > { %v2260_v20 = vmul.f32 0.5, %v2259_v9  ;;  %2239 = vadd.xlane.f32.xlu2 %v2238_v4 }
 0x7a9   : > { %v2261_v22 = vsub.f32 1.5, %v2260_v20 }
 0x7ab   : > { %v2262_v43 = vmul.f32 %v6384_v7, %v2261_v22 }
 0x7ad   : > { %v2266_v1 = vsel %vm2265_vm7, %v6384_v7, %v2262_v43 }
 0x7ae   : > { %v2337_v59 = vmul.f32 %v2266_v1, %v7927_v10 }
 0x7b0   : > { %v2346_v25 = vmul.f32 %v7990_v12, %v2337_v59 }
 0x7b2   : > { %v7998_v15 = vadd.f32 %v7993_v26, %v2346_v25 }
 0x7b4   : > { %5701 = vmatmul.msk.f32.vlgmr.msrb.gmra.mxu2 %vm495_vm12, %v7998_v15 }
 0x7cc   : > { %v2222_v37 = vpop.xlane.xlu0 %2221 }
 0x7cd   : > { %v2242_v44 = vmul.f32 %v2222_v37, %v6943_v31 }
 0x7cf   : > { %v2250_v0 = vadd.f32 1e-05, %v2242_v44 }
 0x7d1   : > { %6385 = vrsqrt.f32 %v2250_v0  ;;  %vm2273_vm9 = vweird.f32 %v2250_v0 }
 0x7d4   : > { %v2225_v51 = vpop.xlane.xlu1 %2224 }
 0x7d5   : > { %v2243_v3 = vmul.f32 %v2225_v51, %v6943_v31 }
 0x7d7   : > { %v6386_v54 = vpop.eup %6385  ;;  %v2251_v34 = vadd.f32 1e-05, %v2243_v3 }
 0x7d8   : > { %v2268_v53 = vmul.f32 %v6386_v54, %v2250_v0  ;;  %vm2274_vm8 = vweird.f32 %v6386_v54 }
 0x7d9   : > { %6387 = vrsqrt.f32 %v2251_v34  ;;  %vm2275_vm10 = vmor %vm2273_vm9, %vm2274_vm8  ;;  %vm2283_vm5 = vweird.f32 %v2251_v34 }
 0x7da   : > { %v2269_v10 = vmul.f32 %v6386_v54, %v2268_v53 }
 0x7dc   : > { %v2270_v41 = vmul.f32 0.5, %v2269_v10  ;;  %v2228_v21 = vpop.xlane.xlu0 %2227 }
 0x7dd   : > { %v2244_v5 = vmul.f32 %v2228_v21, %v6943_v31 }
 0x7de   : > { %v2271_v39 = vsub.f32 1.5, %v2270_v41 }
 0x7df   : > { %v6388_v6 = vpop.eup %6387  ;;  %v2252_v17 = vadd.f32 1e-05, %v2244_v5 }
 0x7e0   : > { %v2272_v38 = vmul.f32 %v6386_v54, %v2271_v39  ;;  %v2278_v47 = vmul.f32 %v6388_v6, %v2251_v34  ;;  %vm2284_vm11 = vweird.f32 %v6388_v6 }
 0x7e1   : > { %6389 = vrsqrt.f32 %v2252_v17  ;;  %vm2285_vm13 = vmor %vm2283_vm5, %vm2284_vm11  ;;  %vm2293_vm1 = vweird.f32 %v2252_v17 }
 0x7e2   : > { %v2276_v11 = vsel %vm2275_vm10, %v6386_v54, %v2272_v38  ;;  %v2279_v50 = vmul.f32 %v6388_v6, %v2278_v47  ;;  %v879_v47 = vld [vmem:[%s9587_s5 + $0x78] sm:$0xff] }
 0x7e3   : > { %v2338_v2 = vmul.f32 %v2276_v11, %v7935_v35  ;;  %2438 = vmatpush.msrb.mxu0 %v879_v47  ;;  %v2363_v47 = vperm.slane %v7909_v46, 1 }
 0x7e4   : > { %v2280_v14 = vmul.f32 0.5, %v2279_v50  ;;  %v2231_v62 = vpop.xlane.xlu2 %2230 }
 0x7e5   : > { %v2245_v30 = vmul.f32 %v2231_v62, %v6943_v31  ;;  %v2347_v16 = vmul.f32 %v7990_v12, %v2338_v2 }
 0x7e6   : > { %v2281_v49 = vsub.f32 1.5, %v2280_v14  ;;  %v878_v14 = vld [vmem:[%s9587_s5 + $0x70] sm:$0xff] }
 0x7e7   : > { %v6390_v18 = vpop.eup %6389  ;;  %v2253_v55 = vadd.f32 1e-05, %v2245_v30  ;;  %v8009_v56 = vadd.f32 %v7993_v26, %v2347_v16  ;;  %2439 = vmatpush.msrb.mxu0 %v878_v14  ;;  %v877_v30 = vld [vmem:[%s9587_s5 + $0x68] sm:$0xff] }
 0x7e8   : > { %v2282_v45 = vmul.f32 %v6388_v6, %v2281_v49  ;;  %v2288_v36 = vmul.f32 %v6390_v18, %v2252_v17  ;;  %vm2294_vm14 = vweird.f32 %v6390_v18 }
 0x7e9   : > { %6391 = vrsqrt.f32 %v2253_v55  ;;  %5702 = vmatmul.msk.f32.gmra.mxu2 %vm495_vm12, %v8009_v56  ;;  %vm2295_vm4 = vmor %vm2293_vm1, %vm2294_vm14  ;;  %vm2303_vm7 = vweird.f32 %v2253_v55  ;;  %2440 = vmatpush.msrb.mxu0 %v877_v30 }
 0x7ea   : > { %v2286_v35 = vsel %vm2285_vm13, %v6388_v6, %v2282_v45  ;;  %v2289_v23 = vmul.f32 %v6390_v18, %v2288_v36 }
 0x7eb   : > { %v2339_v7 = vmul.f32 %v2286_v35, %v7941_v19  ;;  %v875_v35 = vld [vmem:[%s9587_s5 + $0x58] sm:$0xff] }
 0x7ec   : > { %v2290_v57 = vmul.f32 0.5, %v2289_v23  ;;  %v2234_v61 = vpop.xlane.xlu1 %2233 }
 0x7ed   : > { %v2246_v9 = vmul.f32 %v2234_v61, %v6943_v31  ;;  %v2348_v4 = vmul.f32 %v7990_v12, %v2339_v7  ;;  %v873_v61 = vld [vmem:[%s9587_s5 + $0x48] sm:$0xff] }
 0x7ee   : > { %v2291_v20 = vsub.f32 1.5, %v2290_v57 }
 0x7ef   : > { %v6392_v22 = vpop.eup %6391  ;;  %v2254_v43 = vadd.f32 1e-05, %v2246_v9  ;;  %v8017_v1 = vadd.f32 %v7993_v26, %v2348_v4 }
 0x7f0   : > { %v2292_v59 = vmul.f32 %v6390_v18, %v2291_v20  ;;  %v2298_v25 = vmul.f32 %v6392_v22, %v2253_v55  ;;  %vm2304_vm6 = vweird.f32 %v6392_v22  ;;  %v876_v55 = vld [vmem:[%s9587_s5 + $0x60] sm:$0xff] }
 0x7f1   : > { %6393 = vrsqrt.f32 %v2254_v43  ;;  %5703 = vmatmul.msk.f32.gmra.mxu2 %vm495_vm12, %v8017_v1  ;;  %vm2305_vm8 = vmor %vm2303_vm7, %vm2304_vm6  ;;  %vm2313_vm10 = vweird.f32 %v2254_v43  ;;  %2441 = vmatpush.msrb.mxu0 %v876_v55  ;;  %v872_v20 = vld [vmem:[%s9587_s5 + $0x40] sm:$0xff] }
 0x7f2   : > { %v2296_v19 = vsel %vm2295_vm4, %v6390_v18, %v2292_v59  ;;  %v2299_v37 = vmul.f32 %v6392_v22, %v2298_v25  ;;  %v870_v25 = vld [vmem:[%s9587_s5 + $0x30] sm:$0xff] }
 0x7f3   : > { %v2340_v44 = vmul.f32 %v2296_v19, %v7947_v32  ;;  %2442 = vmatpush.msrb.mxu0 %v875_v35  ;;  %v868_v19 = vld [vmem:[%s9587_s5 + $0x20] sm:$0xff] }
 0x7f4   : > { %v2300_v0 = vmul.f32 0.5, %v2299_v37  ;;  %v2237_v51 = vpop.xlane.xlu0 %2236  ;;  %v867_v37 = vld [vmem:[%s9587_s5 + $0x18] sm:$0xff] }
 0x7f5   : > { %v2247_v3 = vmul.f32 %v2237_v51, %v6943_v31  ;;  %v2349_v54 = vmul.f32 %v7990_v12, %v2340_v44  ;;  %v866_v44 = vld [vmem:[%s9587_s5 + $0x10] sm:$0xff] }
 0x7f6   : > { %v2301_v34 = vsub.f32 1.5, %v2300_v0  ;;  %v865_v0 = vld [vmem:[%s9587_s5 + $0x8] sm:$0xff] }
 0x7f7   : > { %v6394_v53 = vpop.eup %6393  ;;  %v2255_v10 = vadd.f32 1e-05, %v2247_v3  ;;  %v8025_v41 = vadd.f32 %v7993_v26, %v2349_v54  ;;  %v864_v3 = vld [vmem:[%s9587_s5] sm:$0xff] }
 0x7f8   : > { %v2302_v21 = vmul.f32 %v6392_v22, %v2301_v34  ;;  %v2308_v5 = vmul.f32 %v6394_v53, %v2254_v43  ;;  %vm2314_vm9 = vweird.f32 %v6394_v53  ;;  %v871_v43 = vld [vmem:[%s9587_s5 + $0x38] sm:$0xff] }
 0x7f9   : > { %6395 = vrsqrt.f32 %v2255_v10  ;;  %5704 = vmatmul.msk.f32.gmra.mxu2 %vm495_vm12, %v8025_v41  ;;  %vm2315_vm11 = vmor %vm2313_vm10, %vm2314_vm9  ;;  %vm2323_vm13 = vweird.f32 %v2255_v10 }
 0x7fa   : > { %v2306_v32 = vsel %vm2305_vm8, %v6392_v22, %v2302_v21  ;;  %v2309_v39 = vmul.f32 %v6394_v53, %v2308_v5 }
 0x7fb   : > { %v2341_v6 = vmul.f32 %v2306_v32, %v7953_v29 }
 0x7fc   : > { %v2310_v17 = vmul.f32 0.5, %v2309_v39 }
 0x7fd   : > { %v2350_v38 = vmul.f32 %v7990_v12, %v2341_v6 }
 0x7fe   : > { %v2311_v11 = vsub.f32 1.5, %v2310_v17 }
 0x7ff   : > { %v6396_v50 = vpop.eup %6395  ;;  %v8035_v2 = vadd.f32 %v7993_v26, %v2350_v38 }
 0x800   : > { %v2312_v62 = vmul.f32 %v6394_v53, %v2311_v11  ;;  %v2318_v29 = vmul.f32 %v6396_v50, %v2255_v10  ;;  %vm2324_vm5 = vweird.f32 %v6396_v50 }
 0x801   : > { %5705 = vmatmul.msk.f32.gmra.mxu2 %vm495_vm12, %v8035_v2  ;;  %vm2325_vm14 = vmor %vm2323_vm13, %vm2324_vm5 }
 0x802   : > { %v2316_v16 = vsel %vm2315_vm11, %v6394_v53, %v2312_v62  ;;  %v2319_v49 = vmul.f32 %v6396_v50, %v2318_v29 }
 0x803   : > { %v2342_v18 = vmul.f32 %v2316_v16, %v7959_v52  ;;  %v874_v52 = vld [vmem:[%s9587_s5 + $0x50] sm:$0xff] }
 0x804   : > { %v2320_v45 = vmul.f32 0.5, %v2319_v49  ;;  %2443 = vmatpush.msrb.mxu0 %v874_v52 }
 0x805   : > { %v2351_v36 = vmul.f32 %v7990_v12, %v2342_v18 }
 0x806   : > { %v2321_v23 = vsub.f32 1.5, %v2320_v45  ;;  %2444 = vmatpush.msrb.mxu0 %v873_v61 }
 0x807   : > { %v8054_v7 = vadd.f32 %v7993_v26, %v2351_v36 }
 0x808   : > { %v2322_v57 = vmul.f32 %v6396_v50, %v2321_v23  ;;  %2445 = vmatpush.msrb.mxu0 %v872_v20  ;;  %v2437_v20 = vperm.slane %v7909_v46, 3 }
 0x809   : > { %5706 = vmatmul.msk.f32.gmra.mxu2 %vm495_vm12, %v8054_v7 }
 0x80a   : > { %v2326_v9 = vsel %vm2325_vm14, %v6396_v50, %v2322_v57  ;;  %2446 = vmatpush.msrb.mxu0 %v871_v43 }
 0x80b   : > { %v2343_v4 = vmul.f32 %v2326_v9, %v7965_v60  ;;  %v869_v60 = vld [vmem:[%s9587_s5 + $0x28] sm:$0xff] }
 0x80c   : > { %2447 = vmatpush.msrb.mxu0 %v870_v25 }
 0x80d   : > { %v2352_v22 = vmul.f32 %v7990_v12, %v2343_v4 }
 0x80e   : > { %2448 = vmatpush.msrb.mxu0 %v869_v60 }
 0x80f   : > { %v8073_v59 = vadd.f32 %v7993_v26, %v2352_v22 }
 0x810   : > { %2449 = vmatpush.msrb.mxu0 %v868_v19 }
 0x811   : > { %5707 = vmatmul.msk.f32.gmra.mxu2 %vm495_vm12, %v8073_v59 }
 0x812   : > { %2450 = vmatpush.msrb.mxu0 %v867_v37 }
 0x814   : > { %2451 = vmatpush.msrb.mxu0 %v866_v44 }
 0x816   : > { %2452 = vmatpush.msrb.mxu0 %v865_v0 }
 0x818   : > { %2453 = vmatpush.msrb.mxu0 %v864_v3 }
 0x81a   : > { %v2240_v51 = vpop.xlane.xlu2 %2239 }
 0x81b   : > { %v2248_v54 = vmul.f32 %v2240_v51, %v6943_v31 }
 0x81d   : > { %v2256_v34 = vadd.f32 1e-05, %v2248_v54 }
 0x81f   : > { %6397 = vrsqrt.f32 %v2256_v34  ;;  %vm2333_vm4 = vweird.f32 %v2256_v34 }
 0x825   : > { %v6398_v53 = vpop.eup %6397 }
 0x826   : > { %v2328_v10 = vmul.f32 %v6398_v53, %v2256_v34  ;;  %vm2334_vm1 = vweird.f32 %v6398_v53 }
 0x827   : > { %vm2335_vm6 = vmor %vm2333_vm4, %vm2334_vm1 }
 0x828   : > { %v2329_v21 = vmul.f32 %v6398_v53, %v2328_v10 }
 0x82a   : > { %v2330_v5 = vmul.f32 0.5, %v2329_v21 }
 0x82c   : > { %v2331_v32 = vsub.f32 1.5, %v2330_v5 }
 0x82e   : > { %v2332_v39 = vmul.f32 %v6398_v53, %v2331_v32 }
 0x830   : > { %v2336_v6 = vsel %vm2335_vm6, %v6398_v53, %v2332_v39 }
 0x831   : > { %v2344_v17 = vmul.f32 %v2336_v6, %v7984_v8 }
 0x833   : > { %v2353_v38 = vmul.f32 %v7990_v12, %v2344_v17 }
 0x835   : > { %v8103_v11 = vadd.f32 %v7993_v26, %v2353_v38 }
 0x837   : > { %v2405_v50 = vpop.f32.mrf.mxu2  ;;  %5708 = vmatmul.msk.f32.gmra.mxu2 %vm495_vm12, %v8103_v11 }
 0x838   : > { %v2406_v14 = vadd.f32 %v2405_v50, %v2363_v47 }
 0x83a   : > { %v2429_v62 = vmax.f32 %v2406_v14, 0.0 }
 0x83c   : > { %2454 = vmatmul.f32.vlgmr.msrb.gmra.mxu0 %v2429_v62 }
 0x86c   : > { %v2408_v29 = vpop.f32.mrf.mxu2 }
 0x86d   : > { %v2409_v30 = vadd.f32 %v2408_v29, %v2363_v47 }
 0x86f   : > { %v2430_v16 = vmax.f32 %v2409_v30, 0.0 }
 0x871   : > { %2457 = vmatmul.f32.gmra.mxu0 %v2430_v16 }
 0x874   : > { %v2411_v49 = vpop.f32.mrf.mxu2 }
 0x875   : > { %v2412_v8 = vadd.f32 %v2411_v49, %v2363_v47 }
 0x877   : > { %v2431_v18 = vmax.f32 %v2412_v8, 0.0 }
 0x879   : > { %2460 = vmatmul.f32.gmra.mxu0 %v2431_v18 }
 0x87c   : > { %v2414_v12 = vpop.f32.mrf.mxu2 }
 0x87d   : > { %v2415_v55 = vadd.f32 %v2414_v12, %v2363_v47 }
 0x87f   : > { %v2432_v45 = vmax.f32 %v2415_v55, 0.0 }
 0x881   : > { %2463 = vmatmul.f32.gmra.mxu0 %v2432_v45 }
 0x884   : > { %v2417_v26 = vpop.f32.mrf.mxu2 }
 0x885   : > { %v2418_v36 = vadd.f32 %v2417_v26, %v2363_v47 }
 0x887   : > { %v2433_v35 = vmax.f32 %v2418_v36, 0.0 }
 0x889   : > { %2466 = vmatmul.f32.gmra.mxu0 %v2433_v35 }
 0x88c   : > { %v2420_v23 = vpop.f32.mrf.mxu2 }
 0x88d   : > { %v2421_v52 = vadd.f32 %v2420_v23, %v2363_v47 }
 0x88f   : > { %v2434_v57 = vmax.f32 %v2421_v52, 0.0 }
 0x891   : > { %2469 = vmatmul.f32.gmra.mxu0 %v2434_v57 }
 0x894   : > { %v2423_v61 = vpop.f32.mrf.mxu2 }
 0x895   : > { %v2424_v9 = vadd.f32 %v2423_v61, %v2363_v47 }
 0x897   : > { %v2435_v4 = vmax.f32 %v2424_v9, 0.0 }
 0x899   : > { %2472 = vmatmul.f32.gmra.mxu0 %v2435_v4 }
 0x8b9   : > { %v2455_v22 = vpop.f32.mrf.mxu0 }
 0x8ba   : > { %v2456_v43 = vadd.f32 %v2455_v22, %v2437_v20  ;;  %v2426_v25 = vpop.f32.mrf.mxu2 }
 0x8bb   : > { %v2427_v60 = vadd.f32 %v2426_v25, %v2363_v47 }
 0x8bc   : > { %v2479_v19 = vadd.f32 %v2456_v43, %v7998_v15 }
 0x8bd   : > { %v2436_v37 = vmax.f32 %v2427_v60, 0.0 }
 0x8be   : > { %v2487_v44 = vsel %vm495_vm12, %v2479_v19, 0.0 }
 0x8bf   : > { %2488 = vadd.xlane.f32.xlu1 %v2487_v44  ;;  %2475 = vmatmul.f32.gmra.mxu0 %v2436_v37 }
 0x8ee   : > { %v2458_v0 = vpop.f32.mrf.mxu0 }
 0x8ef   : > { %v2459_v51 = vadd.f32 %v2458_v0, %v2437_v20 }
 0x8f1   : > { %v2480_v3 = vadd.f32 %v2459_v51, %v8009_v56 }
 0x8f3   : > { %v2490_v54 = vsel %vm495_vm12, %v2480_v3, 0.0 }
 0x8f4   : > { %2491 = vadd.xlane.f32.xlu0 %v2490_v54 }
 0x8f6   : > { %v2461_v34 = vpop.f32.mrf.mxu0 }
 0x8f7   : > { %v2462_v53 = vadd.f32 %v2461_v34, %v2437_v20 }
 0x8f9   : > { %v2481_v10 = vadd.f32 %v2462_v53, %v8017_v1 }
 0x8fb   : > { %v2493_v21 = vsel %vm495_vm12, %v2481_v10, 0.0 }
 0x8fc   : > { %2494 = vadd.xlane.f32.xlu2 %v2493_v21 }
 0x8fe   : > { %v2464_v15 = vpop.f32.mrf.mxu0 }
 0x8ff   : > { %v2465_v5 = vadd.f32 %v2464_v15, %v2437_v20 }
 0x901   : > { %v2482_v32 = vadd.f32 %v2465_v5, %v8025_v41 }
 0x903   : > { %v2496_v39 = vsel %vm495_vm12, %v2482_v32, 0.0 }
 0x904   : > { %2497 = vadd.xlane.f32.xlu1 %v2496_v39  ;;  %v8169_v39 = vld [vmem:[%s9586_s4 + $0x70] sm:$0xff] }
 0x905   : > { %2746 = vmatpush.msra.mxu1 %v8169_v39 }
 0x906   : > { %v2467_v6 = vpop.f32.mrf.mxu0 }
 0x907   : > { %v2468_v17 = vadd.f32 %v2467_v6, %v2437_v20  ;;  %v8175_v6 = vld [vmem:[%s9586_s4 + $0x60] sm:$0xff] }
 0x908   : > { %2747 = vmatpush.msra.mxu1 %v8175_v6 }
 0x909   : > { %v2483_v56 = vadd.f32 %v2468_v17, %v8035_v2  ;;  %v8181_v17 = vld [vmem:[%s9586_s4 + $0x50] sm:$0xff] }
 0x90a   : > { %2748 = vmatpush.msra.mxu1 %v8181_v17 }
 0x90b   : > { %v2499_v38 = vsel %vm495_vm12, %v2483_v56, 0.0 }
 0x90c   : > { %2500 = vadd.xlane.f32.xlu0 %v2499_v38  ;;  %v8189_v38 = vld [vmem:[%s9586_s4 + $0x40] sm:$0xff] }
 0x90d   : > { %2749 = vmatpush.msra.mxu1 %v8189_v38 }
 0x90e   : > { %v2470_v47 = vpop.f32.mrf.mxu0 }
 0x90f   : > { %v2471_v50 = vadd.f32 %v2470_v47, %v2437_v20  ;;  %v6206_v47 = vpack.i.bf16 %v8189_v38, %v8181_v17 }
 0x911   : > { %v2484_v1 = vadd.f32 %v2471_v50, %v8054_v7 }
 0x913   : > { %v2502_v14 = vsel %vm495_vm12, %v2484_v1, 0.0 }
 0x914   : > { %2503 = vadd.xlane.f32.xlu2 %v2502_v14 }
 0x916   : > { %v2473_v62 = vpop.f32.mrf.mxu0 }
 0x917   : > { %v2474_v29 = vadd.f32 %v2473_v62, %v2437_v20 }
 0x919   : > { %v2485_v41 = vadd.f32 %v2474_v29, %v8073_v59 }
 0x91b   : > { %v2505_v30 = vsel %vm495_vm12, %v2485_v41, 0.0 }
 0x91c   : > { %2506 = vadd.xlane.f32.xlu0 %v2505_v30 }
 0x932   : > { %v2489_v16 = vpop.xlane.xlu1 %2488 }
 0x933   : > { %v2511_v2 = vmul.f32 %v2489_v16, %v6943_v31 }
 0x935   : > { %v8123_v49 = vsub.f32 %v2479_v19, %v2511_v2 }
 0x937   : > { %v2527_v8 = vmul.f32 %v8123_v49, %v8123_v49 }
 0x939   : > { %v2535_v7 = vsel %vm495_vm12, %v2527_v8, 0.0 }
 0x93a   : > { %2536 = vadd.xlane.f32.xlu1 %v2535_v7 }
 0x93c   : > { %v2476_v18 = vpop.f32.mrf.mxu0 }
 0x93d   : > { %v2477_v12 = vadd.f32 %v2476_v18, %v2437_v20 }
 0x93f   : > { %v2486_v55 = vadd.f32 %v2477_v12, %v8103_v11 }
 0x941   : > { %v2508_v59 = vsel %vm495_vm12, %v2486_v55, 0.0 }
 0x942   : > { %2509 = vadd.xlane.f32.xlu1 %v2508_v59 }
 0x967   : > { %v2492_v45 = vpop.xlane.xlu0 %2491 }
 0x968   : > { %v2512_v26 = vmul.f32 %v2492_v45, %v6943_v31  ;;  %v8202_v45 = vperm.slane %v7909_v46, 6 }
 0x96a   : > { %v8131_v36 = vsub.f32 %v2480_v3, %v2512_v26 }
 0x96c   : > { %v2528_v35 = vmul.f32 %v8131_v36, %v8131_v36 }
 0x96e   : > { %v2538_v23 = vsel %vm495_vm12, %v2528_v35, 0.0 }
 0x96f   : > { %2539 = vadd.xlane.f32.xlu2 %v2538_v23  ;;  %v2495_v52 = vpop.xlane.xlu2 %2494 }
 0x970   : > { %v2513_v57 = vmul.f32 %v2495_v52, %v6943_v31 }
 0x972   : > { %v8137_v61 = vsub.f32 %v2481_v10, %v2513_v57 }
 0x974   : > { %v2529_v11 = vmul.f32 %v8137_v61, %v8137_v61 }
 0x976   : > { %v2541_v9 = vsel %vm495_vm12, %v2529_v11, 0.0 }
 0x977   : > { %v2498_v4 = vpop.xlane.xlu1 %2497  ;;  %2542 = vadd.xlane.f32.xlu0 %v2541_v9 }
 0x978   : > { %v2514_v20 = vmul.f32 %v2498_v4, %v6943_v31 }
 0x97a   : > { %v8143_v22 = vsub.f32 %v2482_v32, %v2514_v20 }
 0x97c   : > { %v2530_v43 = vmul.f32 %v8143_v22, %v8143_v22 }
 0x97e   : > { %v2544_v25 = vsel %vm495_vm12, %v2530_v43, 0.0 }
 0x97f   : > { %2545 = vadd.xlane.f32.xlu2 %v2544_v25  ;;  %v2501_v60 = vpop.xlane.xlu0 %2500 }
 0x980   : > { %v2515_v19 = vmul.f32 %v2501_v60, %v6943_v31 }
 0x982   : > { %v8149_v37 = vsub.f32 %v2483_v56, %v2515_v19  ;;  %v6201_v56 = vpack.i.bf16 %v8175_v6, %v8169_v39 }
 0x984   : > { %v2531_v44 = vmul.f32 %v8149_v37, %v8149_v37 }
 0x986   : > { %v2547_v0 = vsel %vm495_vm12, %v2531_v44, 0.0 }
 0x987   : > { %2548 = vadd.xlane.f32.xlu1 %v2547_v0  ;;  %v2504_v51 = vpop.xlane.xlu2 %2503 }
 0x988   : > { %v2516_v3 = vmul.f32 %v2504_v51, %v6943_v31 }
 0x98a   : > { %v8155_v54 = vsub.f32 %v2484_v1, %v2516_v3 }
 0x98c   : > { %v2532_v34 = vmul.f32 %v8155_v54, %v8155_v54 }
 0x98e   : > { %v2550_v53 = vsel %vm495_vm12, %v2532_v34, 0.0 }
 0x98f   : > { %v2507_v10 = vpop.xlane.xlu0 %2506  ;;  %2551 = vadd.xlane.f32.xlu0 %v2550_v53 }
 0x990   : > { %v2517_v21 = vmul.f32 %v2507_v10, %v6943_v31 }
 0x992   : > { %v8161_v15 = vsub.f32 %v2485_v41, %v2517_v21 }
 0x994   : > { %v2533_v5 = vmul.f32 %v8161_v15, %v8161_v15 }
 0x996   : > { %v2553_v32 = vsel %vm495_vm12, %v2533_v5, 0.0 }
 0x997   : > { %2554 = vadd.xlane.f32.xlu2 %v2553_v32 }
 0x9ad   : > { %v2537_v50 = vpop.xlane.xlu1 %2536 }
 0x9ae   : > { %v2559_v1 = vmul.f32 %v2537_v50, %v6943_v31 }
 0x9b0   : > { %v2567_v14 = vadd.f32 1e-05, %v2559_v1 }
 0x9b2   : > { %6399 = vrsqrt.f32 %v2567_v14  ;;  %vm2581_vm8 = vweird.f32 %v2567_v14 }
 0x9b5   : > { %v2510_v62 = vpop.xlane.xlu1 %2509 }
 0x9b6   : > { %v2518_v29 = vmul.f32 %v2510_v62, %v6943_v31 }
 0x9b8   : > { %v6400_v41 = vpop.eup %6399  ;;  %v8196_v30 = vsub.f32 %v2486_v55, %v2518_v29  ;;  %v8205_v55 = vperm.slane %v7909_v46, 7 }
 0x9b9   : > { %v2576_v16 = vmul.f32 %v6400_v41, %v2567_v14  ;;  %vm2582_vm7 = vweird.f32 %v6400_v41 }
 0x9ba   : > { %v2534_v2 = vmul.f32 %v8196_v30, %v8196_v30  ;;  %vm2583_vm9 = vmor %vm2581_vm8, %vm2582_vm7 }
 0x9bb   : > { %v2577_v8 = vmul.f32 %v6400_v41, %v2576_v16 }
 0x9bc   : > { %v2556_v7 = vsel %vm495_vm12, %v2534_v2, 0.0 }
 0x9bd   : > { %v2578_v18 = vmul.f32 0.5, %v2577_v8  ;;  %2557 = vadd.xlane.f32.xlu1 %v2556_v7 }
 0x9bf   : > { %v2579_v12 = vsub.f32 1.5, %v2578_v18 }
 0x9c1   : > { %v2580_v59 = vmul.f32 %v6400_v41, %v2579_v12 }
 0x9c3   : > { %v2584_v26 = vsel %vm2583_vm9, %v6400_v41, %v2580_v59 }
 0x9c4   : > { %v2655_v35 = vmul.f32 %v2584_v26, %v8123_v49 }
 0x9c6   : > { %v2664_v23 = vmul.f32 %v8202_v45, %v2655_v35 }
 0x9c8   : > { %v8210_v52 = vadd.f32 %v8205_v55, %v2664_v23 }
 0x9ca   : > { %5734 = vmatmul.msk.f32.vlgmr.msra.gmra.mxu1 %vm495_vm12, %v8210_v52 }
 0x9e2   : > { %v2540_v57 = vpop.xlane.xlu2 %2539 }
 0x9e3   : > { %v2560_v11 = vmul.f32 %v2540_v57, %v6943_v31 }
 0x9e5   : > { %v2568_v9 = vadd.f32 1e-05, %v2560_v11 }
 0x9e7   : > { %6401 = vrsqrt.f32 %v2568_v9  ;;  %vm2591_vm11 = vweird.f32 %v2568_v9 }
 0x9ea   : > { %v2543_v4 = vpop.xlane.xlu0 %2542 }
 0x9eb   : > { %v2561_v20 = vmul.f32 %v2543_v4, %v6943_v31 }
 0x9ed   : > { %v6402_v46 = vpop.eup %6401  ;;  %v2569_v43 = vadd.f32 1e-05, %v2561_v20 }
 0x9ee   : > { %v2586_v25 = vmul.f32 %v6402_v46, %v2568_v9  ;;  %vm2592_vm10 = vweird.f32 %v6402_v46 }
 0x9ef   : > { %6403 = vrsqrt.f32 %v2569_v43  ;;  %vm2593_vm5 = vmor %vm2591_vm11, %vm2592_vm10  ;;  %vm2601_vm14 = vweird.f32 %v2569_v43 }
 0x9f0   : > { %v2587_v49 = vmul.f32 %v6402_v46, %v2586_v25 }
 0x9f2   : > { %v2588_v60 = vmul.f32 0.5, %v2587_v49  ;;  %v2546_v19 = vpop.xlane.xlu2 %2545 }
 0x9f3   : > { %v2562_v44 = vmul.f32 %v2546_v19, %v6943_v31 }
 0x9f4   : > { %v2589_v0 = vsub.f32 1.5, %v2588_v60 }
 0x9f5   : > { %v6404_v51 = vpop.eup %6403  ;;  %v2570_v3 = vadd.f32 1e-05, %v2562_v44 }
 0x9f6   : > { %v2590_v34 = vmul.f32 %v6402_v46, %v2589_v0  ;;  %v2596_v53 = vmul.f32 %v6404_v51, %v2569_v43  ;;  %vm2602_vm13 = vweird.f32 %v6404_v51 }
 0x9f7   : > { %6405 = vrsqrt.f32 %v2570_v3  ;;  %vm2603_vm1 = vmor %vm2601_vm14, %vm2602_vm13  ;;  %vm2611_vm6 = vweird.f32 %v2570_v3 }
 0x9f8   : > { %v2594_v10 = vsel %vm2593_vm5, %v6402_v46, %v2590_v34  ;;  %v2597_v21 = vmul.f32 %v6404_v51, %v2596_v53 }
 0x9f9   : > { %v2656_v5 = vmul.f32 %v2594_v10, %v8131_v36 }
 0x9fa   : > { %v2598_v32 = vmul.f32 0.5, %v2597_v21  ;;  %v2549_v50 = vpop.xlane.xlu1 %2548 }
 0x9fb   : > { %v2563_v1 = vmul.f32 %v2549_v50, %v6943_v31  ;;  %v2665_v14 = vmul.f32 %v8202_v45, %v2656_v5 }
 0x9fc   : > { %v2599_v62 = vsub.f32 1.5, %v2598_v32 }
 0x9fd   : > { %v6406_v29 = vpop.eup %6405  ;;  %v2571_v41 = vadd.f32 1e-05, %v2563_v1  ;;  %v8221_v16 = vadd.f32 %v8205_v55, %v2665_v14 }
 0x9fe   : > { %v2600_v2 = vmul.f32 %v6404_v51, %v2599_v62  ;;  %v2606_v8 = vmul.f32 %v6406_v29, %v2570_v3  ;;  %vm2612_vm4 = vweird.f32 %v6406_v29 }
 0x9ff   : > { %6407 = vrsqrt.f32 %v2571_v41  ;;  %5735 = vmatmul.msk.f32.gmra.mxu1 %vm495_vm12, %v8221_v16  ;;  %vm2613_vm7 = vmor %vm2611_vm6, %vm2612_vm4  ;;  %vm2621_vm9 = vweird.f32 %v2571_v41 }
 0xa00   : > { %v2604_v36 = vsel %vm2603_vm1, %v6404_v51, %v2600_v2  ;;  %v2607_v7 = vmul.f32 %v6406_v29, %v2606_v8 }
 0xa01   : > { %v2657_v18 = vmul.f32 %v2604_v36, %v8137_v61 }
 0xa02   : > { %v2608_v12 = vmul.f32 0.5, %v2607_v7  ;;  %v2552_v59 = vpop.xlane.xlu0 %2551 }
 0xa03   : > { %v2564_v26 = vmul.f32 %v2552_v59, %v6943_v31  ;;  %v2666_v35 = vmul.f32 %v8202_v45, %v2657_v18 }
 0xa04   : > { %v2609_v23 = vsub.f32 1.5, %v2608_v12 }
 0xa05   : > { %v6408_v57 = vpop.eup %6407  ;;  %v2572_v11 = vadd.f32 1e-05, %v2564_v26  ;;  %v8229_v9 = vadd.f32 %v8205_v55, %v2666_v35 }
 0xa06   : > { %v2610_v4 = vmul.f32 %v6406_v29, %v2609_v23  ;;  %v2616_v20 = vmul.f32 %v6408_v57, %v2571_v41  ;;  %vm2622_vm8 = vweird.f32 %v6408_v57 }
 0xa07   : > { %6409 = vrsqrt.f32 %v2572_v11  ;;  %5736 = vmatmul.msk.f32.gmra.mxu1 %vm495_vm12, %v8229_v9  ;;  %vm2623_vm10 = vmor %vm2621_vm9, %vm2622_vm8  ;;  %vm2631_vm5 = vweird.f32 %v2572_v11 }
 0xa08   : > { %v2614_v61 = vsel %vm2613_vm7, %v6406_v29, %v2610_v4  ;;  %v2617_v46 = vmul.f32 %v6408_v57, %v2616_v20 }
 0xa09   : > { %v2658_v43 = vmul.f32 %v2614_v61, %v8143_v22 }
 0xa0a   : > { %v2618_v25 = vmul.f32 0.5, %v2617_v46  ;;  %v2555_v49 = vpop.xlane.xlu2 %2554 }
 0xa0b   : > { %v2565_v60 = vmul.f32 %v2555_v49, %v6943_v31  ;;  %v2667_v19 = vmul.f32 %v8202_v45, %v2658_v43 }
 0xa0c   : > { %v2619_v44 = vsub.f32 1.5, %v2618_v25 }
 0xa0d   : > { %v6410_v0 = vpop.eup %6409  ;;  %v2573_v51 = vadd.f32 1e-05, %v2565_v60  ;;  %v8237_v3 = vadd.f32 %v8205_v55, %v2667_v19 }
 0xa0e   : > { %v2620_v34 = vmul.f32 %v6408_v57, %v2619_v44  ;;  %v2626_v53 = vmul.f32 %v6410_v0, %v2572_v11  ;;  %vm2632_vm11 = vweird.f32 %v6410_v0 }
 0xa0f   : > { %6411 = vrsqrt.f32 %v2573_v51  ;;  %5737 = vmatmul.msk.f32.gmra.mxu1 %vm495_vm12, %v8237_v3  ;;  %vm2633_vm13 = vmor %vm2631_vm5, %vm2632_vm11  ;;  %vm2641_vm1 = vweird.f32 %v2573_v51 }
 0xa10   : > { %v2624_v22 = vsel %vm2623_vm10, %v6408_v57, %v2620_v34  ;;  %v2627_v10 = vmul.f32 %v6410_v0, %v2626_v53 }
 0xa11   : > { %v2659_v21 = vmul.f32 %v2624_v22, %v8149_v37  ;;  %v5733_v22 = vld [vmem:[%s9588_s6 + $0x8] sm:$0xff] }
 0xa12   : > { %v2628_v5 = vmul.f32 0.5, %v2627_v10  ;;  %v2709_v10 = vperm.slane %v5733_v22, 0 }
 0xa13   : > { %v2668_v32 = vmul.f32 %v8202_v45, %v2659_v21 }
 0xa14   : > { %v2629_v50 = vsub.f32 1.5, %v2628_v5 }
 0xa15   : > { %v6412_v1 = vpop.eup %6411  ;;  %v8244_v14 = vadd.f32 %v8205_v55, %v2668_v32 }
 0xa16   : > { %v2630_v62 = vmul.f32 %v6410_v0, %v2629_v50  ;;  %v2636_v29 = vmul.f32 %v6412_v1, %v2573_v51  ;;  %vm2642_vm14 = vweird.f32 %v6412_v1 }
 0xa17   : > { %5738 = vmatmul.msk.f32.gmra.mxu1 %vm495_vm12, %v8244_v14  ;;  %vm2643_vm4 = vmor %vm2641_vm1, %vm2642_vm14 }
 0xa18   : > { %v2634_v41 = vsel %vm2633_vm13, %v6410_v0, %v2630_v62  ;;  %v2637_v2 = vmul.f32 %v6412_v1, %v2636_v29 }
 0xa19   : > { %v2660_v37 = vmul.f32 %v2634_v41, %v8155_v54 }
 0xa1a   : > { %v2638_v8 = vmul.f32 0.5, %v2637_v2 }
 0xa1b   : > { %v2669_v36 = vmul.f32 %v8202_v45, %v2660_v37 }
 0xa1c   : > { %v2639_v7 = vsub.f32 1.5, %v2638_v8 }
 0xa1d   : > { %v8251_v18 = vadd.f32 %v8205_v55, %v2669_v36 }
 0xa1e   : > { %v2640_v12 = vmul.f32 %v6412_v1, %v2639_v7 }
 0xa1f   : > { %5739 = vmatmul.msk.f32.gmra.mxu1 %vm495_vm12, %v8251_v18 }
 0xa20   : > { %v2644_v59 = vsel %vm2643_vm4, %v6412_v1, %v2640_v12 }
 0xa21   : > { %v2661_v26 = vmul.f32 %v2644_v59, %v8161_v15 }
 0xa23   : > { %v2670_v35 = vmul.f32 %v8202_v45, %v2661_v26 }
 0xa25   : > { %v8258_v54 = vadd.f32 %v8205_v55, %v2670_v35 }
 0xa27   : > { %5740 = vmatmul.msk.f32.gmra.mxu1 %vm495_vm12, %v8258_v54 }
 0xa30   : > { %v2558_v23 = vpop.xlane.xlu1 %2557 }
 0xa31   : > { %v2566_v57 = vmul.f32 %v2558_v23, %v6943_v31 }
 0xa33   : > { %v2574_v11 = vadd.f32 1e-05, %v2566_v57 }
 0xa35   : > { %6413 = vrsqrt.f32 %v2574_v11  ;;  %vm2651_vm7 = vweird.f32 %v2574_v11 }
 0xa3b   : > { %v6414_v4 = vpop.eup %6413 }
 0xa3c   : > { %v2646_v20 = vmul.f32 %v6414_v4, %v2574_v11  ;;  %vm2652_vm6 = vweird.f32 %v6414_v4 }
 0xa3d   : > { %vm2653_vm8 = vmor %vm2651_vm7, %vm2652_vm6 }
 0xa3e   : > { %v2647_v61 = vmul.f32 %v6414_v4, %v2646_v20 }
 0xa40   : > { %v2648_v46 = vmul.f32 0.5, %v2647_v61 }
 0xa42   : > { %v2649_v43 = vsub.f32 1.5, %v2648_v46 }
 0xa44   : > { %v2650_v15 = vmul.f32 %v6414_v4, %v2649_v43 }
 0xa46   : > { %v2654_v25 = vsel %vm2653_vm8, %v6414_v4, %v2650_v15 }
 0xa47   : > { %v2662_v49 = vmul.f32 %v2654_v25, %v8196_v30  ;;  %v2751_v44 = vpop.f32.mrf.mxu1 }
 0xa48   : > { %v8291_v50 = vadd.f32 %v2751_v44, %v2709_v10 }
 0xa49   : > { %v2671_v60 = vmul.f32 %v8202_v45, %v2662_v49 }
 0xa4a   : > { %v8309_v41 = vmul.f32 0.35355338, %v8291_v50 }
 0xa4b   : > { %v8266_v19 = vadd.f32 %v8205_v55, %v2671_v60 }
 0xa4d   : > { %5741 = vmatmul.msk.f32.gmra.mxu1 %vm495_vm12, %v8266_v19 }
 0xa7c   : > { %v2754_v0 = vpop.f32.mrf.mxu1 }
 0xa7d   : > { %v8299_v62 = vadd.f32 %v2754_v0, %v2709_v10 }
 0xa7f   : > { %v8306_v29 = vmul.f32 0.35355338, %v8299_v62 }
 0xa84   : > { %v2757_v51 = vpop.f32.mrf.mxu1 }
 0xa85   : > { %v8285_v32 = vadd.f32 %v2757_v51, %v2709_v10  ;;  %v8446_v51 = vpack.i.bf16 %v8291_v50, %v8299_v62 }
 0xa87   : > { %v8363_v12 = vmul.f32 0.35355338, %v8285_v32 }
 0xa8c   : > { %v2760_v34 = vpop.f32.mrf.mxu1 }
 0xa8d   : > { %v8277_v55 = vadd.f32 %v2760_v34, %v2709_v10 }
 0xa8f   : > { %v8320_v8 = vmul.f32 0.35355338, %v8277_v55  ;;  %v8415_v46 = vpack.i.bf16 %v8285_v32, %v8277_v55 }
 0xa94   : > { %v2763_v53 = vpop.f32.mrf.mxu1 }
 0xa95   : > { %v8293_v1 = vadd.f32 %v2763_v53, %v2709_v10 }
 0xa97   : > { %v8329_v36 = vmul.f32 0.35355338, %v8293_v1 }
 0xa9c   : > { %v2766_v21 = vpop.f32.mrf.mxu1 }
 0xa9d   : > { %v8273_v30 = vadd.f32 %v2766_v21, %v2709_v10 }
 0xa9f   : > { %2801 = vrot.lane.b32.xlu1 %v8273_v30, %s9617_s25  ;;  %v8338_v7 = vmul.f32 0.35355338, %v8273_v30  ;;  %v8426_v25 = vpack.i.bf16 %v8293_v1, %v8273_v30 }
 0xaa4   : > { %v2769_v45 = vpop.f32.mrf.mxu1 }
 0xaa5   : > { %v8279_v5 = vadd.f32 %v2769_v45, %v2709_v10 }
 0xaa7   : > { %2797 = vrot.lane.b32.xlu1 %v8277_v55, %s9617_s25  ;;  %2803 = vrot.lane.b32.xlu2 %v8279_v5, %s9617_s25  ;;  %v8401_v4 = vmul.f32 0.35355338, %v8279_v5 }
 0xaaf   : > { %3059 = vrot.lane.b32.xlu1 %v8273_v30, %s9619_s26  ;;  %2795 = vrot.lane.b32.xlu2 %v8285_v32, %s9617_s25 }
 0xab7   : > { %2791 = vrot.lane.b32.xlu1 %v8291_v50, %s9617_s25  ;;  %3057 = vrot.lane.b32.xlu2 %v8293_v1, %s9619_s26 }
 0xabf   : > { %3051 = vrot.lane.b32.xlu1 %v8299_v62, %s9619_s26  ;;  %3053 = vrot.lane.b32.xlu2 %v8285_v32, %s9619_s26 }
 0xac7   : > { %3035 = vrot.lane.b32.xlu1 %v8306_v29, %s9615_s27  ;;  %3033 = vrot.lane.b32.xlu2 %v8309_v41, %s9615_s27 }
 0xaca   : > { %v2772_v2 = vpop.f32.mrf.mxu1 }
 0xacb   : > { %v8315_v37 = vadd.f32 %v2772_v2, %v2709_v10 }
 0xacd   : > { %2805 = vrot.lane.b32.xlu0 %v8315_v37, %s9617_s25  ;;  %v8368_v59 = vmul.f32 0.35355338, %v8315_v37 }
 0xacf   : > { %3039 = vrot.lane.b32.xlu1 %v8320_v8, %s9615_s27  ;;  %3309 = vrot.lane.b32.xlu2 %v8273_v30, %s9611_s9 }
 0xad5   : > { %2799 = vrot.lane.b32.xlu0 %v8293_v1, %s9617_s25 }
 0xad7   : > { %3041 = vrot.lane.b32.xlu1 %v8329_v36, %s9615_s27  ;;  %3063 = vrot.lane.b32.xlu2 %v8315_v37, %s9619_s26 }
 0xadd   : > { %3061 = vrot.lane.b32.xlu0 %v8279_v5, %s9619_s26 }
 0xadf   : > { %3305 = vrot.lane.b32.xlu1 %v8277_v55, %s9611_s9  ;;  %3043 = vrot.lane.b32.xlu2 %v8338_v7, %s9615_s27 }
 0xae5   : > { %2793 = vrot.lane.b32.xlu0 %v8299_v62, %s9617_s25  ;;  %s9666_s25 = smov 80  }
 0xae7   : > { %3303 = vrot.lane.b32.xlu1 %v8285_v32, %s9611_s9  ;;  %3301 = vrot.lane.b32.xlu2 %v8299_v62, %s9611_s9 }
 0xaed   : > { %3055 = vrot.lane.b32.xlu0 %v8277_v55, %s9619_s26 }
 0xaef   : > { %3557 = vrot.lane.b32.xlu1 %v8293_v1, %s9613_s11  ;;  %3299 = vrot.lane.b32.xlu2 %v8291_v50, %s9611_s9 }
 0xaf5   : > { %3049 = vrot.lane.b32.xlu0 %v8291_v50, %s9619_s26  ;;  %s251_s26 = sand.u32 1, %s6690_s29  }
 0xaf7   : > { %3555 = vrot.lane.b32.xlu1 %v8277_v55, %s9613_s11  ;;  %3553 = vrot.lane.b32.xlu2 %v8285_v32, %s9613_s11 }
 0xafd   : > { %3037 = vrot.lane.b32.xlu0 %v8363_v12, %s9615_s27 }
 0xaff   : > { %3047 = vrot.lane.b32.xlu1 %v8368_v59, %s9615_s27  ;;  %3285 = vrot.lane.b32.xlu2 %v8306_v29, %s9652_s12 }
 0xb01   : > { %v2804_v26 = vpop.permute.xlu2 %2803 }
 0xb05   : > { %3311 = vrot.lane.b32.xlu0 %v8279_v5, %s9611_s9 }
 0xb07   : > { %3549 = vrot.lane.b32.xlu1 %v8291_v50, %s9613_s11  ;;  %3313 = vrot.lane.b32.xlu2 %v8315_v37, %s9611_s9  ;;  %v6121_v50 = vpack.i.bf16 %v8279_v5, %v8315_v37 }
 0xb09   : > { %v2796_v35 = vpop.permute.xlu2 %2795 }
 0xb0d   : > { %3307 = vrot.lane.b32.xlu0 %v8293_v1, %s9611_s9 }
 0xb0f   : > { %3535 = vrot.lane.b32.xlu1 %v8306_v29, %s9653_s16  ;;  %3563 = vrot.lane.b32.xlu2 %v8315_v37, %s9613_s11 }
 0xb11   : > { %v3058_v23 = vpop.permute.xlu2 %3057  ;;  %v2802_v20 = vpop.permute.xlu1 %2801 }
 0xb15   : > { %3561 = vrot.lane.b32.xlu0 %v8279_v5, %s9613_s11 }
 0xb17   : > { %3291 = vrot.lane.b32.xlu1 %v8329_v36, %s9652_s12  ;;  %3287 = vrot.lane.b32.xlu2 %v8363_v12, %s9652_s12 }
 0xb19   : > { %v3054_v57 = vpop.permute.xlu2 %3053  ;;  %v2798_v15 = vpop.permute.xlu1 %2797 }
 0xb1d   : > { %3559 = vrot.lane.b32.xlu0 %v8273_v30, %s9613_s11 }
 0xb1f   : > { %3541 = vrot.lane.b32.xlu1 %v8329_v36, %s9653_s16  ;;  %3537 = vrot.lane.b32.xlu2 %v8363_v12, %s9653_s16 }
 0xb21   : > { %v8398_v11 = vpop.permute.xlu2 %3033  ;;  %v3060_v60 = vpop.permute.xlu1 %3059 }
 0xb25   : > { %3045 = vrot.lane.b32.xlu0 %v8401_v4, %s9615_s27  ;;  %s5545_s27 = sshll.u32 %s251_s26, 2 }
 0xb27   : > { %3293 = vrot.lane.b32.xlu2 %v8338_v7, %s9652_s12  ;;  %3545 = vrot.lane.b32.xlu1 %v8401_v4, %s9653_s16 }
 0xb29   : > { %v8409_v61 = vpop.permute.xlu2 %3309  ;;  %v2792_v34 = vpop.permute.xlu1 %2791 }
 0xb2d   : > { %3283 = vrot.lane.b32.xlu0 %v8309_v41, %s9652_s12 }
 0xb2f   : > { %3543 = vrot.lane.b32.xlu2 %v8338_v7, %s9653_s16  ;;  %6152 = vrot.lane.b32.xlu1 %v8415_v46, %s9654_s23 }
 0xb31   : > { %v3064_v43 = vpop.permute.xlu2 %3063  ;;  %v3052_v21 = vpop.permute.xlu1 %3051 }
 0xb32   : > { %5766 = vmatpush.xpose.msk.msra.mxu0 %vm979_vm15, %v3064_v43 }
 0xb35   : > { %3551 = vrot.lane.b32.xlu0 %v8299_v62, %s9613_s11  ;;  %s9662_s11 = smov 88  }
 0xb37   : > { %6127 = vrot.lane.b32.xlu2 %v8426_v25, %s9655_s24  ;;  %6177 = vrot.lane.b32.xlu1 %v8415_v46, %s9656_s17 }
 0xb39   : > { %v8432_v49 = vpop.permute.xlu2 %3043  ;;  %v3036_v32 = vpop.permute.xlu1 %3035 }
 0xb3d   : > { %3533 = vrot.lane.b32.xlu0 %v8309_v41, %s9653_s16 }
 0xb3f   : > { %v2806_v44 = vpop.permute.xlu0 %2805  ;;  %6137 = vrot.lane.b32.xlu2 %v8415_v46, %s9655_s24 }
 0xb40   : > { %5742 = vmatpush.xpose.msk.msrb.mxu3 %vm979_vm15, %v2806_v44 }
 0xb41   : > { %v8439_v0 = vpop.permute.xlu2 %3301  ;;  %v3040_v2 = vpop.permute.xlu1 %3039 }
 0xb44   : > { %5743 = vmatpush.xpose.msk.msrb.mxu3 %vm979_vm15, %v2804_v26 }
 0xb45   : > { %3289 = vrot.lane.b32.xlu0 %v8320_v8, %s9652_s12 }
 0xb47   : > { %v2800_v53 = vpop.permute.xlu0 %2799  ;;  %6147 = vrot.lane.b32.xlu2 %v8446_v51, %s9655_s24 }
 0xb48   : > { %5744 = vmatpush.xpose.msk.msrb.mxu3 %vm979_vm15, %v2802_v20 }
 0xb49   : > { %v8451_v22 = vpop.permute.xlu2 %3299 }
 0xb4c   : > { %5745 = vmatpush.xpose.msk.msrb.mxu3 %vm979_vm15, %v2800_v53 }
 0xb4d   : > { %3539 = vrot.lane.b32.xlu0 %v8320_v8, %s9653_s16 }
 0xb4f   : > { %v3062_v10 = vpop.permute.xlu0 %3061  ;;  %6167 = vrot.lane.b32.xlu2 %v8426_v25, %s9656_s17 }
 0xb50   : > { %5746 = vmatpush.xpose.msk.msrb.mxu3 %vm979_vm15, %v2798_v15  ;;  %5767 = vmatpush.xpose.msk.msra.mxu0 %vm979_vm15, %v3062_v10 }
 0xb51   : > { %v8460_v30 = vpop.permute.xlu2 %3553 }
 0xb54   : > { %5747 = vmatpush.xpose.msk.msrb.mxu3 %vm979_vm15, %v2796_v35  ;;  %5768 = vmatpush.xpose.msk.msra.mxu0 %vm979_vm15, %v3060_v60 }
 0xb55   : > { %3295 = vrot.lane.b32.xlu0 %v8401_v4, %s9652_s12 }
 0xb57   : > { %v2794_v45 = vpop.permute.xlu0 %2793 }
 0xb58   : > { %5748 = vmatpush.xpose.msk.msrb.mxu3 %vm979_vm15, %v2794_v45  ;;  %5769 = vmatpush.xpose.msk.msra.mxu0 %vm979_vm15, %v3058_v23 }
 0xb59   : > { %v8468_v55 = vpop.permute.xlu2 %3285 }
 0xb5c   : > { %5749 = vmatpush.xpose.msk.msrb.mxu3 %vm979_vm15, %v2792_v34 }
 0xb5d   : > { %6122 = vrot.lane.b32.xlu0 %v6121_v50, %s9655_s24 }
 0xb5f   : > { %v3056_v1 = vpop.permute.xlu0 %3055  ;;  %5750 = vmatmul.msk.f32.vlgmr.msrb.gmra.mxu3 %vm979_vm15, %v8309_v41  ;;  %v3042_v41 = vpop.permute.xlu1 %3041 }
 0xb60   : > { %5770 = vmatpush.xpose.msk.msra.mxu0 %vm979_vm15, %v3056_v1 }
 0xb61   : > { %v3314_v62 = vpop.permute.xlu2 %3313 }
 0xb62   : > { %5790 = vmatpush.xpose.msk.msra.mxu3 %vm979_vm15, %v3314_v62 }
 0xb64   : > { %5771 = vmatpush.xpose.msk.msra.mxu0 %vm979_vm15, %v3054_v57 }
 0xb65   : > { %6132 = vrot.lane.b32.xlu0 %v6121_v50, %s9654_s23 }
 0xb67   : > { %v3050_v26 = vpop.permute.xlu0 %3049  ;;  %5751 = vmatmul.msk.f32.gmra.mxu3 %vm979_vm15, %v8306_v29  ;;  %v3306_v35 = vpop.permute.xlu1 %3305 }
 0xb68   : > { %5772 = vmatpush.xpose.msk.msra.mxu0 %vm979_vm15, %v3052_v21 }
 0xb69   : > { %v3564_v5 = vpop.permute.xlu2 %3563 }
 0xb6c   : > { %5773 = vmatpush.xpose.msk.msra.mxu0 %vm979_vm15, %v3050_v26 }
 0xb6d   : > { %6142 = vrot.lane.b32.xlu0 %v8426_v25, %s9654_s23 }
 0xb6f   : > { %v3038_v37 = vpop.permute.xlu0 %3037  ;;  %5752 = vmatmul.msk.f32.gmra.mxu3 %vm979_vm15, %v8363_v12  ;;  %5774 = vmatmul.msk.f32.vlgmr.msra.gmra.mxu0 %vm979_vm15, %v8398_v11  ;;  %v3304_v23 = vpop.permute.xlu1 %3303 }
 0xb70   : > { %5814 = vmatpush.xpose.msk.msrb.mxu0 %vm979_vm15, %v3564_v5 }
 0xb75   : > { %6157 = vrot.lane.b32.xlu0 %v8446_v51, %s9654_s23 }
 0xb77   : > { %v3312_v29 = vpop.permute.xlu0 %3311  ;;  %5753 = vmatmul.msk.f32.gmra.mxu3 %vm979_vm15, %v8320_v8  ;;  %5775 = vmatmul.msk.f32.gmra.mxu0 %vm979_vm15, %v3036_v32 }
 0xb78   : > { %5791 = vmatpush.xpose.msk.msra.mxu3 %vm979_vm15, %v3312_v29 }
 0xb7c   : > { %5792 = vmatpush.xpose.msk.msra.mxu3 %vm979_vm15, %v8409_v61 }
 0xb7d   : > { %6162 = vrot.lane.b32.xlu0 %v6121_v50, %s9656_s17 }
 0xb7f   : > { %v3308_v12 = vpop.permute.xlu0 %3307  ;;  %5754 = vmatmul.msk.f32.gmra.mxu3 %vm979_vm15, %v8329_v36  ;;  %5776 = vmatmul.msk.f32.gmra.mxu0 %vm979_vm15, %v3038_v37  ;;  %v3558_v36 = vpop.permute.xlu1 %3557 }
 0xb80   : > { %5793 = vmatpush.xpose.msk.msra.mxu3 %vm979_vm15, %v3308_v12 }
 0xb84   : > { %5794 = vmatpush.xpose.msk.msra.mxu3 %vm979_vm15, %v3306_v35 }
 0xb85   : > { %6172 = vrot.lane.b32.xlu0 %v6121_v50, %s9657_s18 }
 0xb87   : > { %v3562_v8 = vpop.permute.xlu0 %3561  ;;  %5755 = vmatmul.msk.f32.gmra.mxu3 %vm979_vm15, %v8338_v7  ;;  %5777 = vmatmul.msk.f32.gmra.mxu0 %vm979_vm15, %v3040_v2  ;;  %v3556_v7 = vpop.permute.xlu1 %3555 }
 0xb88   : > { %5795 = vmatpush.xpose.msk.msra.mxu3 %vm979_vm15, %v3304_v23  ;;  %5815 = vmatpush.xpose.msk.msrb.mxu0 %vm979_vm15, %v3562_v8 }
 0xb8c   : > { %5796 = vmatpush.xpose.msk.msra.mxu3 %vm979_vm15, %v8439_v0 }
 0xb8f   : > { %v3560_v57 = vpop.permute.xlu0 %3559  ;;  %5756 = vmatmul.msk.f32.gmra.mxu3 %vm979_vm15, %v8401_v4  ;;  %5778 = vmatmul.msk.f32.gmra.mxu0 %vm979_vm15, %v3042_v41  ;;  %v3288_v4 = vpop.permute.xlu2 %3287 }
 0xb90   : > { %5797 = vmatpush.xpose.msk.msra.mxu3 %vm979_vm15, %v8451_v22  ;;  %5816 = vmatpush.xpose.msk.msrb.mxu0 %vm979_vm15, %v3560_v57  ;;  %v3048_v61 = vpop.permute.xlu1 %3047 }
 0xb94   : > { %5817 = vmatpush.xpose.msk.msrb.mxu0 %vm979_vm15, %v3558_v36 }
 0xb97   : > { %5779 = vmatmul.msk.f32.gmra.mxu0 %vm979_vm15, %v8432_v49  ;;  %v3046_v11 = vpop.permute.xlu0 %3045  ;;  %5757 = vmatmul.msk.f32.gmra.mxu3 %vm979_vm15, %v8368_v59  ;;  %v3538_v43 = vpop.permute.xlu2 %3537 }
 0xb98   : > { %5818 = vmatpush.xpose.msk.msrb.mxu0 %vm979_vm15, %v3556_v7  ;;  %v3550_v49 = vpop.permute.xlu1 %3549 }
 0xb9c   : > { %5819 = vmatpush.xpose.msk.msrb.mxu0 %vm979_vm15, %v8460_v30 }
 0xb9f   : > { %5780 = vmatmul.msk.f32.gmra.mxu0 %vm979_vm15, %v3046_v11  ;;  %v3284_v20 = vpop.permute.xlu0 %3283  ;;  %v3294_v44 = vpop.permute.xlu2 %3293 }
 0xba0   : > { %5798 = vmatmul.msk.f32.vlgmr.msra.gmra.mxu3 %vm979_vm15, %v3284_v20  ;;  %v3536_v0 = vpop.permute.xlu1 %3535 }
 0xba7   : > { %5781 = vmatmul.msk.f32.gmra.mxu0 %vm979_vm15, %v3048_v61  ;;  %v3552_v15 = vpop.permute.xlu0 %3551  ;;  %v3544_v53 = vpop.permute.xlu2 %3543 }
 0xba8   : > { %5799 = vmatmul.msk.f32.gmra.mxu3 %vm979_vm15, %v8468_v55  ;;  %5820 = vmatpush.xpose.msk.msrb.mxu0 %vm979_vm15, %v3552_v15  ;;  %v3292_v22 = vpop.permute.xlu1 %3291 }
 0xbac   : > { %5821 = vmatpush.xpose.msk.msrb.mxu0 %vm979_vm15, %v3550_v49 }
 0xbaf   : > { %v3534_v60 = vpop.permute.xlu0 %3533  ;;  %v6128_v21 = vpop.permute.xlu2 %6127 }
 0xbb0   : > { %5800 = vmatmul.msk.f32.gmra.mxu3 %vm979_vm15, %v3288_v4  ;;  %5822 = vmatmul.msk.f32.vlgmr.msrb.gmra.mxu0 %vm979_vm15, %v3534_v60  ;;  %v3542_v45 = vpop.permute.xlu1 %3541  ;;  %v6129_v62 = vunpack.i.l.bf16 %v6128_v21  ;;  %v6130_v2 = vunpack.i.h.bf16 %v6128_v21 }
 0xbb7   : > { %v3290_v34 = vpop.permute.xlu0 %3289  ;;  %v6138_v55 = vpop.permute.xlu2 %6137 }
 0xbb8   : > { %5801 = vmatmul.msk.f32.gmra.mxu3 %vm979_vm15, %v3290_v34  ;;  %5823 = vmatmul.msk.f32.gmra.mxu0 %vm979_vm15, %v3536_v0  ;;  %v3546_v26 = vpop.permute.xlu1 %3545  ;;  %v6139_v41 = vunpack.i.l.bf16 %v6138_v55  ;;  %v6140_v35 = vunpack.i.h.bf16 %v6138_v55 }
 0xbbf   : > { %v3540_v10 = vpop.permute.xlu0 %3539  ;;  %v6148_v29 = vpop.permute.xlu2 %6147 }
 0xbc0   : > { %5802 = vmatmul.msk.f32.gmra.mxu3 %vm979_vm15, %v3292_v22  ;;  %5824 = vmatmul.msk.f32.gmra.mxu0 %vm979_vm15, %v3538_v43  ;;  %v6149_v23 = vunpack.i.l.bf16 %v6148_v29  ;;  %v6150_v8 = vunpack.i.h.bf16 %v6148_v29  ;;  %v6153_v7 = vpop.permute.xlu1 %6152 }
 0xbc1   : > { %v6154_v61 = vunpack.i.l.bf16 %v6153_v7  ;;  %v6155_v15 = vunpack.i.h.bf16 %v6153_v7 }
 0xbc7   : > { %v3296_v30 = vpop.permute.xlu0 %3295  ;;  %v6168_v55 = vpop.permute.xlu2 %6167 }
 0xbc8   : > { %5803 = vmatmul.msk.f32.gmra.mxu3 %vm979_vm15, %v3294_v44  ;;  %5825 = vmatmul.msk.f32.gmra.mxu0 %vm979_vm15, %v3540_v10 }
 0xbcf   : > { %v6123_v32 = vpop.permute.xlu0 %6122 }
 0xbd0   : > { %v6124_v50 = vunpack.i.l.bf16 %v6123_v32  ;;  %5804 = vmatmul.msk.f32.gmra.mxu3 %vm979_vm15, %v3296_v30  ;;  %5826 = vmatmul.msk.f32.gmra.mxu0 %vm979_vm15, %v3542_v45  ;;  %v6125_v1 = vunpack.i.h.bf16 %v6123_v32 }
 0xbd2   : > { %3000 = vmatpush.msra.mxu2 %v6124_v50 }
 0xbd4   : > { %3001 = vmatpush.msra.mxu2 %v6125_v1 }
 0xbd6   : > { %3002 = vmatpush.msra.mxu2 %v6129_v62  ;;  %v6169_v62 = vunpack.i.l.bf16 %v6168_v55 }
 0xbd7   : > { %v6133_v5 = vpop.permute.xlu0 %6132 }
 0xbd8   : > { %v6134_v37 = vunpack.i.l.bf16 %v6133_v5  ;;  %3003 = vmatpush.msra.mxu2 %v6130_v2  ;;  %5827 = vmatmul.msk.f32.gmra.mxu0 %vm979_vm15, %v3544_v53  ;;  %v6135_v12 = vunpack.i.h.bf16 %v6133_v5 }
 0xbda   : > { %3004 = vmatpush.msra.mxu2 %v6139_v41  ;;  %3250 = vmatpush.msrb.mxu1 %v6134_v37  ;;  %v6170_v37 = vunpack.i.h.bf16 %v6168_v55 }
 0xbdc   : > { %3005 = vmatpush.msra.mxu2 %v6140_v35  ;;  %3251 = vmatpush.msrb.mxu1 %v6135_v12 }
 0xbde   : > { %3006 = vmatpush.msra.mxu2 %v6149_v23 }
 0xbdf   : > { %v6143_v36 = vpop.permute.xlu0 %6142 }
 0xbe0   : > { %v6144_v57 = vunpack.i.l.bf16 %v6143_v36  ;;  %3007 = vmatpush.msra.mxu2 %v6150_v8  ;;  %5828 = vmatmul.msk.f32.gmra.mxu0 %vm979_vm15, %v3546_v26  ;;  %v6145_v11 = vunpack.i.h.bf16 %v6143_v36  ;;  %v6178_v26 = vpop.permute.xlu1 %6177 }
 0xbe1   : > { %v6179_v8 = vunpack.i.l.bf16 %v6178_v26  ;;  %v6180_v7 = vunpack.i.h.bf16 %v6178_v26 }
 0xbe2   : > { %v2864_v4 = vpop.f32.mrf.mxu3  ;;  %3252 = vmatpush.msrb.mxu1 %v6144_v57 }
 0xbe3   : > { %v2865_v20 = vadd.f32 %v2864_v4, %v7508_v42 }
 0xbe4   : > { %3253 = vmatpush.msrb.mxu1 %v6145_v11 }
 0xbe5   : > { %v2888_v43 = vmul.f32 1.442695, %v2865_v20 }
 0xbe6   : > { %3254 = vmatpush.msrb.mxu1 %v6154_v61 }
 0xbe7   : > { %6415 = vpow2.f32 %v2888_v43  ;;  %v6158_v49 = vpop.permute.xlu0 %6157 }
 0xbe8   : > { %v6159_v60 = vunpack.i.l.bf16 %v6158_v49  ;;  %3255 = vmatpush.msrb.mxu1 %v6155_v15  ;;  %v6160_v44 = vunpack.i.h.bf16 %v6158_v49 }
 0xbea   : > { %v2867_v0 = vpop.f32.mrf.mxu3  ;;  %3256 = vmatpush.msrb.mxu1 %v6159_v60 }
 0xbeb   : > { %v2868_v29 = vadd.f32 %v2867_v0, %v7536_v33 }
 0xbec   : > { %v3114_v34 = vpop.f32.mrf.mxu0  ;;  %3257 = vmatpush.msrb.mxu1 %v6160_v44 }
 0xbed   : > { %v8547_v53 = vpop.eup %6415  ;;  %v3115_v22 = vadd.f32 %v3114_v34, %v7508_v42  ;;  %v2890_v11 = vmul.f32 1.442695, %v2868_v29 }
 0xbee   : > { %v2904_v10 = vsel %vm1077_vm0, %v8547_v53, 0.0 }
 0xbef   : > { %v3138_v21 = vmul.f32 1.442695, %v3115_v22  ;;  %2905 = vadd.xlane.f32.xlu1 %v2904_v10  ;;  %v6163_v30 = vpop.permute.xlu0 %6162 }
 0xbf0   : > { %v6164_v45 = vunpack.i.l.bf16 %v6163_v30  ;;  %v6165_v32 = vunpack.i.h.bf16 %v6163_v30 }
 0xbf1   : > { %6417 = vpow2.f32 %v3138_v21 }
 0xbf2   : > { %v2870_v50 = vpop.f32.mrf.mxu3  ;;  %3500 = vmatpush.msrb.mxu2 %v6164_v45 }
 0xbf3   : > { %v2871_v1 = vadd.f32 %v2870_v50, %v7539_v28 }
 0xbf4   : > { %v3117_v2 = vpop.f32.mrf.mxu0  ;;  %3501 = vmatpush.msrb.mxu2 %v6165_v32 }
 0xbf5   : > { %v2892_v5 = vmul.f32 1.442695, %v2871_v1  ;;  %v3118_v41 = vadd.f32 %v3117_v2, %v7536_v33 }
 0xbf6   : > { %3502 = vmatpush.msrb.mxu2 %v6169_v62 }
 0xbf7   : > { %v8555_v35 = vpop.eup %6417  ;;  %6419 = vpow2.f32 %v2892_v5  ;;  %v3140_v12 = vmul.f32 1.442695, %v3118_v41  ;;  %v6173_v23 = vpop.permute.xlu0 %6172 }
 0xbf8   : > { %v6174_v36 = vunpack.i.l.bf16 %v6173_v23  ;;  %3503 = vmatpush.msrb.mxu2 %v6170_v37  ;;  %v3154_v57 = vsel %vm1077_vm0, %v8555_v35, 0.0  ;;  %v6175_v4 = vunpack.i.h.bf16 %v6173_v23 }
 0xbf9   : > { %6421 = vpow2.f32 %v3140_v12  ;;  %3155 = vadd.xlane.f32.xlu0 %v3154_v57 }
 0xbfa   : > { %v2873_v20 = vpop.f32.mrf.mxu3  ;;  %3504 = vmatpush.msrb.mxu2 %v6179_v8  ;;  %3750 = vmatpush.msra.mxu1 %v6174_v36  ;;  %6423 = vpow2.f32 %v2890_v11 }
 0xbfb   : > { %v2874_v61 = vadd.f32 %v2873_v20, %v7562_v63 }
 0xbfc   : > { %v3120_v43 = vpop.f32.mrf.mxu0  ;;  %3505 = vmatpush.msrb.mxu2 %v6180_v7  ;;  %3751 = vmatpush.msra.mxu1 %v6175_v4 }
 0xbfd   : > { %v8560_v15 = vpop.eup %6419  ;;  %v2894_v49 = vmul.f32 1.442695, %v2874_v61  ;;  %v3121_v0 = vadd.f32 %v3120_v43, %v7539_v28 }
 0xbfe   : > { %v2910_v60 = vsel %vm1077_vm0, %v8560_v15, 0.0 }
 0xbff   : > { %v8564_v44 = vpop.eup %6421  ;;  %6425 = vpow2.f32 %v2894_v49  ;;  %2911 = vadd.xlane.f32.xlu1 %v2910_v60  ;;  %v3142_v10 = vmul.f32 1.442695, %v3121_v0 }
 0xc00   : > { %v3157_v34 = vsel %vm1077_vm0, %v8564_v44, 0.0  ;;  %v8569_v21 = vpop.eup %6423 }
 0xc01   : > { %3158 = vadd.xlane.f32.xlu2 %v3157_v34  ;;  %6427 = vpow2.f32 %v3142_v10  ;;  %v2907_v50 = vsel %vm1077_vm0, %v8569_v21, 0.0 }
 0xc02   : > { %v2876_v22 = vpop.f32.mrf.mxu3 }
 0xc03   : > { %v2877_v36 = vadd.f32 %v2876_v22, %v7577_v27 }
 0xc04   : > { %v3123_v30 = vpop.f32.mrf.mxu0 }
 0xc05   : > { %v8571_v45 = vpop.eup %6425  ;;  %v3124_v32 = vadd.f32 %v3123_v30, %v7562_v63  ;;  %v2896_v4 = vmul.f32 1.442695, %v2877_v36 }
 0xc06   : > { %v2913_v55 = vsel %vm1077_vm0, %v8571_v45, 0.0 }
 0xc07   : > { %2914 = vadd.xlane.f32.xlu0 %v2913_v55  ;;  %v3144_v62 = vmul.f32 1.442695, %v3124_v32  ;;  %v8578_v26 = vpop.eup %6427 }
 0xc08   : > { %v3160_v41 = vsel %vm1077_vm0, %v8578_v26, 0.0 }
 0xc09   : > { %2908 = vadd.xlane.f32.xlu2 %v2907_v50  ;;  %6429 = vpow2.f32 %v3144_v62 }
 0xc0a   : > { %v2879_v1 = vpop.f32.mrf.mxu3 }
 0xc0b   : > { %v2880_v60 = vadd.f32 %v2879_v1, %v7602_v58 }
 0xc0c   : > { %v3126_v2 = vpop.f32.mrf.mxu0 }
 0xc0d   : > { %v3127_v5 = vadd.f32 %v3126_v2, %v7577_v27 }
 0xc0f   : > { %v3146_v29 = vmul.f32 1.442695, %v3127_v5  ;;  %v8583_v23 = vpop.eup %6429 }
 0xc10   : > { %v3163_v7 = vsel %vm1077_vm0, %v8583_v23, 0.0 }
 0xc11   : > { %3161 = vadd.xlane.f32.xlu2 %v3160_v41  ;;  %6431 = vpow2.f32 %v3146_v29 }
 0xc12   : > { %v2882_v37 = vpop.f32.mrf.mxu3 }
 0xc13   : > { %v2883_v50 = vadd.f32 %v2882_v37, %v7612_v48 }
 0xc14   : > { %v3129_v12 = vpop.f32.mrf.mxu0 }
 0xc15   : > { %v3130_v8 = vadd.f32 %v3129_v12, %v7602_v58  ;;  %v2900_v29 = vmul.f32 1.442695, %v2883_v50 }
 0xc17   : > { %v3148_v57 = vmul.f32 1.442695, %v3130_v8  ;;  %v8591_v61 = vpop.eup %6431 }
 0xc18   : > { %v3166_v34 = vsel %vm1077_vm0, %v8591_v61, 0.0 }
 0xc19   : > { %6433 = vpow2.f32 %v3148_v57  ;;  %3164 = vadd.xlane.f32.xlu2 %v3163_v7 }
 0xc1a   : > { %v2885_v11 = vpop.f32.mrf.mxu3  ;;  %6435 = vpow2.f32 %v2896_v4 }
 0xc1b   : > { %6182 = vrot.lane.b32.xlu0 %v8426_v25, %s9657_s18  ;;  %v2898_v25 = vmul.f32 1.442695, %v2880_v60  ;;  %v2886_v7 = vadd.f32 %v2885_v11, %v7641_v13 }
 0xc1c   : > { %v3132_v20 = vpop.f32.mrf.mxu0 }
 0xc1d   : > { %v3133_v43 = vadd.f32 %v3132_v20, %v7612_v48 }
 0xc1f   : > { %v8594_v49 = vpop.eup %6433  ;;  %v3150_v0 = vmul.f32 1.442695, %v3133_v43  ;;  %v2902_v43 = vmul.f32 1.442695, %v2886_v7 }
 0xc20   : > { %v3169_v22 = vsel %vm1077_vm0, %v8594_v49, 0.0  ;;  %v8601_v55 = vpop.eup %6435 }
 0xc21   : > { %6437 = vpow2.f32 %v3150_v0  ;;  %3167 = vadd.xlane.f32.xlu2 %v3166_v34  ;;  %3170 = vadd.xlane.f32.xlu1 %v3169_v22  ;;  %v2916_v5 = vsel %vm1077_vm0, %v8601_v55, 0.0 }
 0xc22   : > { %6439 = vpow2.f32 %v2898_v25 }
 0xc23   : > { %v3364_v10 = vpop.f32.mrf.mxu3 }
 0xc24   : > { %v3135_v30 = vpop.f32.mrf.mxu0  ;;  %v3365_v62 = vadd.f32 %v3364_v10, %v7508_v42 }
 0xc25   : > { %v3136_v32 = vadd.f32 %v3135_v30, %v7641_v13 }
 0xc26   : > { %v3388_v12 = vmul.f32 1.442695, %v3365_v62 }
 0xc27   : > { %v8605_v1 = vpop.eup %6437  ;;  %v3152_v2 = vmul.f32 1.442695, %v3136_v32 }
 0xc28   : > { %v3172_v41 = vsel %vm1077_vm0, %v8605_v1, 0.0  ;;  %v8614_v37 = vpop.eup %6439 }
 0xc29   : > { %6441 = vpow2.f32 %v3152_v2  ;;  %2917 = vadd.xlane.f32.xlu2 %v2916_v5  ;;  %3173 = vadd.xlane.f32.xlu1 %v3172_v41  ;;  %v2919_v4 = vsel %vm1077_vm0, %v8614_v37, 0.0 }
 0xc2a   : > { %6443 = vpow2.f32 %v2900_v29 }
 0xc2b   : > { %v8612_v8 = vpop.f32.mrf.mxu3  ;;  %6445 = vpow2.f32 %v3388_v12 }
 0xc2c   : > { %6447 = vpow2.f32 %v2902_v43 }
 0xc2d   : > { %v3614_v36 = vpop.f32.mrf.mxu0 }
 0xc2e   : > { %v3615_v60 = vadd.f32 %v3614_v36, %v7508_v42 }
 0xc2f   : > { %v8616_v57 = vpop.eup %6441 }
 0xc30   : > { %v3175_v20 = vsel %vm1077_vm0, %v8616_v57, 0.0  ;;  %v8624_v34 = vpop.eup %6443  ;;  %v3638_v11 = vmul.f32 1.442695, %v3615_v60 }
 0xc31   : > { %2920 = vadd.xlane.f32.xlu2 %v2919_v4  ;;  %3176 = vadd.xlane.f32.xlu1 %v3175_v20  ;;  %v8626_v22 = vpop.eup %6445  ;;  %v2922_v30 = vsel %vm1077_vm0, %v8624_v34, 0.0 }
 0xc32   : > { %v3404_v10 = vsel %vm1077_vm0, %v8626_v22, 0.0  ;;  %6449 = vpow2.f32 %v3638_v11  ;;  %v8635_v50 = vpop.eup %6447 }
 0xc33   : > { %v3370_v0 = vpop.f32.mrf.mxu3  ;;  %v2925_v5 = vsel %vm1077_vm0, %v8635_v50, 0.0 }
 0xc34   : > { %v3371_v42 = vadd.f32 %v3370_v0, %v7539_v28 }
 0xc35   : > { %v8628_v25 = vpop.f32.mrf.mxu0 }
 0xc36   : > { %v3392_v2 = vmul.f32 1.442695, %v3371_v42 }
 0xc38   : > { %v8639_v41 = vpop.eup %6449  ;;  %6451 = vpow2.f32 %v3392_v2 }
 0xc39   : > { %3405 = vadd.xlane.f32.xlu1 %v3404_v10  ;;  %2923 = vadd.xlane.f32.xlu2 %v2922_v30  ;;  %v3654_v12 = vsel %vm1077_vm0, %v8639_v41, 0.0 }
 0xc3b   : > { %v3373_v32 = vpop.f32.mrf.mxu3 }
 0xc3c   : > { %v3374_v29 = vadd.f32 %v3373_v32, %v7562_v63 }
 0xc3d   : > { %v3620_v62 = vpop.f32.mrf.mxu0 }
 0xc3e   : > { %v3394_v4 = vmul.f32 1.442695, %v3374_v29  ;;  %v8646_v20 = vpop.eup %6451 }
 0xc3f   : > { %v3410_v60 = vsel %vm1077_vm0, %v8646_v20, 0.0 }
 0xc40   : > { %6453 = vpow2.f32 %v3394_v4 }
 0xc41   : > { %2926 = vadd.xlane.f32.xlu2 %v2925_v5 }
 0xc43   : > { %v3376_v7 = vpop.f32.mrf.mxu3 }
 0xc44   : > { %v3377_v43 = vadd.f32 %v3376_v7, %v7577_v27 }
 0xc45   : > { %3655 = vadd.xlane.f32.xlu0 %v3654_v12  ;;  %v8644_v36 = vpop.f32.mrf.mxu0 }
 0xc46   : > { %v3396_v11 = vmul.f32 1.442695, %v3377_v43  ;;  %v8653_v30 = vpop.eup %6453 }
 0xc47   : > { %v3413_v32 = vsel %vm1077_vm0, %v8653_v30, 0.0 }
 0xc48   : > { %6455 = vpow2.f32 %v3396_v11 }
 0xc4b   : > { %v3379_v10 = vpop.f32.mrf.mxu3 }
 0xc4c   : > { %v3380_v42 = vadd.f32 %v3379_v10, %v7602_v58 }
 0xc4d   : > { %v8651_v0 = vpop.f32.mrf.mxu0  ;;  %3411 = vadd.xlane.f32.xlu0 %v3410_v60 }
 0xc4e   : > { %v3398_v5 = vmul.f32 1.442695, %v3380_v42  ;;  %v8660_v29 = vpop.eup %6455 }
 0xc50   : > { %6457 = vpow2.f32 %v3398_v5 }
 0xc52   : > { %6192 = vrot.lane.b32.xlu1 %v8415_v46, %s9657_s18  ;;  %v3416_v46 = vsel %vm1077_vm0, %v8660_v29, 0.0 }
 0xc55   : > { %v3629_v2 = vpop.f32.mrf.mxu0  ;;  %3414 = vadd.xlane.f32.xlu0 %v3413_v32 }
 0xc56   : > { %v8669_v43 = vpop.eup %6457 }
 0xc57   : > { %v3419_v11 = vsel %vm1077_vm0, %v8669_v43, 0.0 }
 0xc59   : > { %6187 = vrot.lane.b32.xlu2 %v8446_v51, %s9656_s17 }
 0xc5a   : > { %6197 = vrot.lane.b32.xlu1 %v8446_v51, %s9657_s18 }
 0xc5d   : > { %v3632_v12 = vpop.f32.mrf.mxu0  ;;  %3417 = vadd.xlane.f32.xlu0 %v3416_v46  ;;  %v3368_v46 = vadd.f32 %v8612_v8, %v7536_v33 }
 0xc5e   : > { %v3633_v7 = vadd.f32 %v3632_v12, %v7612_v48  ;;  %v3618_v12 = vadd.f32 %v8628_v25, %v7536_v33 }
 0xc60   : > { %v3650_v4 = vmul.f32 1.442695, %v3633_v7 }
 0xc62   : > { %6459 = vpow2.f32 %v3650_v4  ;;  %v2906_v60 = vpop.xlane.xlu1 %2905  ;;  %v3390_v4 = vmul.f32 1.442695, %v3368_v46 }
 0xc63   : > { %6461 = vrcp.f32 %v2906_v60 }
 0xc65   : > { %3420 = vadd.xlane.f32.xlu0 %v3419_v11 }
 0xc68   : > { %v8673_v10 = vpop.eup %6459 }
 0xc69   : > { %v6462_v51 = vpop.eup %6461  ;;  %v3672_v5 = vsel %vm1077_vm0, %v8673_v10, 0.0 }
 0xc6a   : > { %v2936_v42 = vmul.f32 %v6462_v51, %v8547_v53  ;;  %v3640_v53 = vmul.f32 1.442695, %v3618_v12  ;;  %v3621_v51 = vadd.f32 %v3620_v62, %v7539_v28  ;;  %v3624_v28 = vadd.f32 %v8644_v36, %v7562_v63 }
 0xc6b   : > { %v3627_v36 = vadd.f32 %v8651_v0, %v7577_v27 }
 0xc6c   : > { %v3156_v32 = vpop.xlane.xlu0 %3155  ;;  %5758 = vmatmul.msk.f32.vlgmr.msra.gmra.mxu2 %vm1077_vm0, %v2936_v42  ;;  %v3630_v42 = vadd.f32 %v3629_v2, %v7602_v58  ;;  %v3642_v8 = vmul.f32 1.442695, %v3621_v51  ;;  %v3644_v12 = vmul.f32 1.442695, %v3624_v28 }
 0xc6d   : > { %6463 = vrcp.f32 %v3156_v32  ;;  %3673 = vadd.xlane.f32.xlu0 %v3672_v5 }
 0xc72   : > { %v2912_v62 = vpop.xlane.xlu1 %2911 }
 0xc73   : > { %v6464_v7 = vpop.eup %6463 }
 0xc74   : > { %v3186_v60 = vmul.f32 %v6464_v7, %v8555_v35  ;;  %v3159_v11 = vpop.xlane.xlu2 %3158  ;;  %v3648_v35 = vmul.f32 1.442695, %v3630_v42 }
 0xc75   : > { %6465 = vrcp.f32 %v3159_v11 }
 0xc76   : > { %5782 = vmatmul.msk.f32.vlgmr.msrb.gmra.mxu1 %vm1077_vm0, %v3186_v60  ;;  %6467 = vpow2.f32 %v3390_v4 }
 0xc77   : > { %6469 = vpow2.f32 %v3640_v53 }
 0xc7a   : > { %v2915_v60 = vpop.xlane.xlu0 %2914 }
 0xc7b   : > { %v6466_v32 = vpop.eup %6465 }
 0xc7c   : > { %v2909_v5 = vpop.xlane.xlu2 %2908  ;;  %v3187_v33 = vmul.f32 %v6466_v32, %v8564_v44  ;;  %v8688_v25 = vpop.eup %6467  ;;  %v3646_v32 = vmul.f32 1.442695, %v3627_v36 }
 0xc7d   : > { %6471 = vrcp.f32 %v2909_v5  ;;  %v8691_v46 = vpop.eup %6469  ;;  %v3407_v58 = vsel %vm1077_vm0, %v8688_v25, 0.0 }
 0xc7e   : > { %5783 = vmatmul.msk.f32.gmra.mxu1 %vm1077_vm0, %v3187_v33  ;;  %6473 = vpow2.f32 %v3642_v8  ;;  %v3657_v44 = vsel %vm1077_vm0, %v8691_v46, 0.0 }
 0xc7f   : > { %6475 = vpow2.f32 %v3648_v35  ;;  %v3382_v35 = vpop.f32.mrf.mxu3 }
 0xc80   : > { %6477 = vrcp.f32 %v2912_v62  ;;  %v3383_v62 = vadd.f32 %v3382_v35, %v7612_v48 }
 0xc82   : > { %3408 = vadd.xlane.f32.xlu2 %v3407_v58 }
 0xc83   : > { %v6472_v2 = vpop.eup %6471 }
 0xc84   : > { %v3162_v7 = vpop.xlane.xlu2 %3161  ;;  %3658 = vadd.xlane.f32.xlu1 %v3657_v44  ;;  %v2937_v4 = vmul.f32 %v6472_v2, %v8569_v21  ;;  %v8700_v11 = vpop.eup %6473  ;;  %v3400_v44 = vmul.f32 1.442695, %v3383_v62 }
 0xc85   : > { %6479 = vrcp.f32 %v3162_v7  ;;  %v8703_v63 = vpop.eup %6475  ;;  %v3660_v51 = vsel %vm1077_vm0, %v8700_v11, 0.0 }
 0xc86   : > { %5759 = vmatmul.msk.f32.gmra.mxu2 %vm1077_vm0, %v2937_v4  ;;  %6481 = vpow2.f32 %v3644_v12  ;;  %v6478_v53 = vpop.eup %6477  ;;  %v3669_v21 = vsel %vm1077_vm0, %v8703_v63, 0.0 }
 0xc87   : > { %6483 = vrcp.f32 %v2915_v60  ;;  %v2938_v5 = vmul.f32 %v6478_v53, %v8560_v15 }
 0xc8a   : > { %3661 = vadd.xlane.f32.xlu2 %v3660_v51 }
 0xc8b   : > { %v6480_v42 = vpop.eup %6479 }
 0xc8c   : > { %v3165_v8 = vpop.xlane.xlu2 %3164  ;;  %3670 = vadd.xlane.f32.xlu1 %v3669_v21  ;;  %v3188_v33 = vmul.f32 %v6480_v42, %v8578_v26  ;;  %v8713_v0 = vpop.eup %6481 }
 0xc8d   : > { %6485 = vrcp.f32 %v3165_v8  ;;  %v6183_v27 = vpop.permute.xlu0 %6182  ;;  %v6484_v2 = vpop.eup %6483  ;;  %v3663_v15 = vsel %vm1077_vm0, %v8713_v0, 0.0 }
 0xc8e   : > { %v6184_v28 = vunpack.i.l.bf16 %v6183_v27  ;;  %5760 = vmatmul.msk.f32.gmra.mxu2 %vm1077_vm0, %v2938_v5  ;;  %5784 = vmatmul.msk.f32.gmra.mxu1 %vm1077_vm0, %v3188_v33  ;;  %6487 = vpow2.f32 %v3646_v32  ;;  %v6185_v58 = vunpack.i.h.bf16 %v6183_v27  ;;  %v2939_v4 = vmul.f32 %v6484_v2, %v8571_v45 }
 0xc90   : > { %3752 = vmatpush.msra.mxu1 %v6184_v28 }
 0xc92   : > { %3753 = vmatpush.msra.mxu1 %v6185_v58  ;;  %3664 = vadd.xlane.f32.xlu2 %v3663_v15 }
 0xc93   : > { %v6486_v26 = vpop.eup %6485 }
 0xc94   : > { %v3168_v12 = vpop.xlane.xlu2 %3167  ;;  %v3171_v7 = vpop.xlane.xlu1 %3170  ;;  %v3189_v60 = vmul.f32 %v6486_v26, %v8583_v23 }
 0xc95   : > { %6489 = vrcp.f32 %v3168_v12  ;;  %v8722_v36 = vpop.eup %6487 }
 0xc96   : > { %5761 = vmatmul.msk.f32.gmra.mxu2 %vm1077_vm0, %v2939_v4  ;;  %5785 = vmatmul.msk.f32.gmra.mxu1 %vm1077_vm0, %v3189_v60  ;;  %6491 = vpow2.f32 %v3400_v44  ;;  %v3666_v48 = vsel %vm1077_vm0, %v8722_v36, 0.0 }
 0xc97   : > { %6493 = vrcp.f32 %v3171_v7 }
 0xc9a   : > { %3667 = vadd.xlane.f32.xlu2 %v3666_v48 }
 0xc9b   : > { %v6490_v53 = vpop.eup %6489 }
 0xc9c   : > { %v2918_v51 = vpop.xlane.xlu2 %2917  ;;  %v3190_v42 = vmul.f32 %v6490_v53, %v8591_v61  ;;  %v8729_v45 = vpop.eup %6491 }
 0xc9d   : > { %6495 = vrcp.f32 %v2918_v51  ;;  %v3174_v23 = vpop.xlane.xlu1 %3173  ;;  %v6494_v21 = vpop.eup %6493  ;;  %v3422_v32 = vsel %vm1077_vm0, %v8729_v45, 0.0 }
 0xc9e   : > { %5786 = vmatmul.msk.f32.gmra.mxu1 %vm1077_vm0, %v3190_v42  ;;  %6497 = vrcp.f32 %v3174_v23  ;;  %v3191_v35 = vmul.f32 %v6494_v21, %v8594_v49 }
 0xca2   : > { %3423 = vadd.xlane.f32.xlu2 %v3422_v32 }
 0xca3   : > { %v6496_v8 = vpop.eup %6495 }
 0xca4   : > { %v2921_v5 = vpop.xlane.xlu2 %2920  ;;  %v2940_v33 = vmul.f32 %v6496_v8, %v8601_v55  ;;  %v6498_v27 = vpop.eup %6497 }
 0xca5   : > { %6499 = vrcp.f32 %v2921_v5  ;;  %3297 = vrot.lane.b32.xlu1 %v8368_v59, %s9652_s12  ;;  %v3177_v61 = vpop.xlane.xlu1 %3176  ;;  %v3192_v2 = vmul.f32 %v6498_v27, %v8605_v1 }
 0xca6   : > { %5762 = vmatmul.msk.f32.gmra.mxu2 %vm1077_vm0, %v2940_v33  ;;  %5787 = vmatmul.msk.f32.gmra.mxu1 %vm1077_vm0, %v3191_v35  ;;  %6501 = vrcp.f32 %v3177_v61 }
 0xcab   : > { %v6500_v28 = vpop.eup %6499 }
 0xcac   : > { %v2924_v62 = vpop.xlane.xlu2 %2923  ;;  %v2941_v58 = vmul.f32 %v6500_v28, %v8614_v37  ;;  %v6502_v49 = vpop.eup %6501 }
 0xcad   : > { %6503 = vrcp.f32 %v2924_v62  ;;  %v3193_v26 = vmul.f32 %v6502_v49, %v8616_v57  ;;  %v3406_v37 = vpop.xlane.xlu1 %3405 }
 0xcae   : > { %5763 = vmatmul.msk.f32.gmra.mxu2 %vm1077_vm0, %v2941_v58  ;;  %5788 = vmatmul.msk.f32.gmra.mxu1 %vm1077_vm0, %v3192_v2 }
 0xcb3   : > { %v6504_v55 = vpop.eup %6503 }
 0xcb4   : > { %v2927_v15 = vpop.xlane.xlu2 %2926  ;;  %v2942_v44 = vmul.f32 %v6504_v55, %v8624_v34 }
 0xcb5   : > { %6505 = vrcp.f32 %v2927_v15 }
 0xcb6   : > { %5789 = vmatmul.msk.f32.gmra.mxu1 %vm1077_vm0, %v3193_v26  ;;  %5764 = vmatmul.msk.f32.gmra.mxu2 %vm1077_vm0, %v2942_v44  ;;  %6507 = vrcp.f32 %v3406_v37 }
 0xcb8   : > { %v3656_v60 = vpop.xlane.xlu0 %3655 }
 0xcb9   : > { %6509 = vrcp.f32 %v3656_v60 }
 0xcba   : > { %6202 = vrot.lane.b32.xlu2 %v6201_v56, %s9658_s19 }
 0xcbb   : > { %v6506_v1 = vpop.eup %6505 }
 0xcbc   : > { %v6188_v12 = vpop.permute.xlu2 %6187  ;;  %v2943_v7 = vmul.f32 %v6506_v1, %v8635_v50  ;;  %v6508_v34 = vpop.eup %6507 }
 0xcbd   : > { %v6189_v4 = vunpack.i.l.bf16 %v6188_v12  ;;  %v6190_v57 = vunpack.i.h.bf16 %v6188_v12  ;;  %v3436_v6 = vmul.f32 %v6508_v34, %v8626_v22 }
 0xcbe   : > { %5765 = vmatmul.msk.f32.gmra.mxu2 %vm1077_vm0, %v2943_v7 }
 0xcbf   : > { %3506 = vmatpush.msrb.mxu2 %v6189_v4  ;;  %v6510_v53 = vpop.eup %6509 }
 0xcc0   : > { %v3686_v23 = vmul.f32 %v6510_v53, %v8639_v41  ;;  %v3412_v17 = vpop.xlane.xlu0 %3411 }
 0xcc1   : > { %3507 = vmatpush.msrb.mxu2 %v6190_v57 }
 0xcc2   : > { %6207 = vrot.lane.b32.xlu2 %v6206_v47, %s9658_s19 }
 0xcc4   : > { %v6193_v39 = vpop.permute.xlu1 %6192 }
 0xcc5   : > { %v6194_v56 = vunpack.i.l.bf16 %v6193_v39  ;;  %v6195_v48 = vunpack.i.h.bf16 %v6193_v39 }
 0xcc6   : > { %5806 = vmatmul.msk.f32.vlgmr.msrb.gmra.mxu2 %vm1077_vm0, %v3436_v6 }
 0xcc7   : > { %3754 = vmatpush.msra.mxu1 %v6194_v56 }
 0xcc8   : > { %v3415_v8 = vpop.xlane.xlu0 %3414 }
 0xcc9   : > { %3755 = vmatpush.msra.mxu1 %v6195_v48 }
 0xccc   : > { %v6198_v50 = vpop.permute.xlu1 %6197 }
 0xccd   : > { %v6199_v51 = vunpack.i.l.bf16 %v6198_v50  ;;  %v6200_v42 = vunpack.i.h.bf16 %v6198_v50 }
 0xccf   : > { %3756 = vmatpush.msra.mxu1 %v6199_v51 }
 0xcd0   : > { %v3418_v2 = vpop.xlane.xlu0 %3417 }
 0xcd1   : > { %3757 = vmatpush.msra.mxu1 %v6200_v42 }
 0xcd2   : > { %5830 = vmatmul.msk.f32.vlgmr.msra.gmra.mxu1 %vm1077_vm0, %v3686_v23 }
 0xcef   : > { %v8768_v28 = vpop.f32.mrf.mxu2 }
 0xcf3   : > { %v3259_v38 = vpop.f32.mrf.mxu1 }
 0xcf4   : > { %3791 = vrot.lane.b32.xlu0 %v3259_v38, %s9659_s21 }
 0xcf5   : > { %v3409_v47 = vpop.xlane.xlu2 %3408 }
 0xcf6   : > { %6511 = vrcp.f32 %v3409_v47 }
 0xcf7   : > { %v3659_v22 = vpop.xlane.xlu1 %3658 }
 0xcf8   : > { %6513 = vrcp.f32 %v3659_v22 }
 0xcf9   : > { %6515 = vrcp.f32 %v3412_v17 }
 0xcfb   : > { %v3262_v21 = vpop.f32.mrf.mxu1 }
 0xcfc   : > { %v6512_v32 = vpop.eup %6511  ;;  %3793 = vrot.lane.b32.xlu2 %v3262_v21, %s9659_s21 }
 0xcfd   : > { %v3662_v5 = vpop.xlane.xlu2 %3661  ;;  %v3437_v41 = vmul.f32 %v6512_v32, %v8688_v25 }
 0xcfe   : > { %v6514_v33 = vpop.eup %6513  ;;  %6517 = vrcp.f32 %v3662_v5 }
 0xcff   : > { %5807 = vmatmul.msk.f32.gmra.mxu2 %vm1077_vm0, %v3437_v41  ;;  %v3687_v35 = vmul.f32 %v6514_v33, %v8691_v46  ;;  %v6516_v61 = vpop.eup %6515  ;;  %6519 = vrcp.f32 %v3415_v8 }
 0xd00   : > { %v3438_v58 = vmul.f32 %v6516_v61, %v8646_v20  ;;  %v3671_v20 = vpop.xlane.xlu1 %3670 }
 0xd01   : > { %5831 = vmatmul.msk.f32.gmra.mxu1 %vm1077_vm0, %v3687_v35 }
 0xd04   : > { %v6518_v27 = vpop.eup %6517 }
 0xd05   : > { %v3665_v62 = vpop.xlane.xlu2 %3664  ;;  %v3688_v25 = vmul.f32 %v6518_v27, %v8700_v11  ;;  %v6520_v49 = vpop.eup %6519 }
 0xd06   : > { %6521 = vrcp.f32 %v3665_v62  ;;  %v3439_v44 = vmul.f32 %v6520_v49, %v8653_v30  ;;  %v3421_v11 = vpop.xlane.xlu0 %3420 }
 0xd07   : > { %5808 = vmatmul.msk.f32.gmra.mxu2 %vm1077_vm0, %v3438_v58  ;;  %6523 = vrcp.f32 %v3418_v2 }
 0xd09   : > { %5832 = vmatmul.msk.f32.gmra.mxu1 %vm1077_vm0, %v3688_v25  ;;  %v8775_v15 = vpop.f32.mrf.mxu2 }
 0xd0b   : > { %v3265_v46 = vpop.f32.mrf.mxu1 }
 0xd0c   : > { %v6522_v55 = vpop.eup %6521  ;;  %3795 = vrot.lane.b32.xlu2 %v3265_v46, %s9659_s21 }
 0xd0d   : > { %v3668_v26 = vpop.xlane.xlu2 %3667  ;;  %v3689_v37 = vmul.f32 %v6522_v55, %v8713_v0  ;;  %v6524_v1 = vpop.eup %6523 }
 0xd0e   : > { %6525 = vrcp.f32 %v3668_v26  ;;  %v3440_v4 = vmul.f32 %v6524_v1, %v8660_v29  ;;  %v3674_v39 = vpop.xlane.xlu0 %3673 }
 0xd0f   : > { %5809 = vmatmul.msk.f32.gmra.mxu2 %vm1077_vm0, %v3439_v44  ;;  %6527 = vrcp.f32 %v3421_v11 }
 0xd10   : > { %6529 = vrcp.f32 %v3671_v20 }
 0xd11   : > { %5833 = vmatmul.msk.f32.gmra.mxu1 %vm1077_vm0, %v3689_v37  ;;  %v8783_v57 = vpop.f32.mrf.mxu2 }
 0xd13   : > { %v3268_v12 = vpop.f32.mrf.mxu1 }
 0xd14   : > { %v6526_v7 = vpop.eup %6525  ;;  %3797 = vrot.lane.b32.xlu2 %v3268_v12, %s9659_s21 }
 0xd15   : > { %v3690_v34 = vmul.f32 %v6526_v7, %v8722_v36  ;;  %v3424_v0 = vpop.xlane.xlu2 %3423  ;;  %v6528_v60 = vpop.eup %6527 }
 0xd16   : > { %v6530_v56 = vpop.eup %6529  ;;  %6531 = vrcp.f32 %v3424_v0  ;;  %v3441_v29 = vmul.f32 %v6528_v60, %v8669_v43 }
 0xd17   : > { %v3298_v30 = vpop.permute.xlu1 %3297  ;;  %5810 = vmatmul.msk.f32.gmra.mxu2 %vm1077_vm0, %v3440_v4  ;;  %6533 = vrcp.f32 %v3674_v39  ;;  %v3691_v48 = vmul.f32 %v6530_v56, %v8703_v63 }
 0xd18   : > { %5805 = vmatmul.msk.f32.gmra.mxu3 %vm979_vm15, %v3298_v30 }
 0xd19   : > { %5834 = vmatmul.msk.f32.gmra.mxu1 %vm1077_vm0, %v3690_v34  ;;  %v8793_v36 = vpop.f32.mrf.mxu2 }
 0xd1b   : > { %v3271_v6 = vpop.f32.mrf.mxu1 }
 0xd1c   : > { %3799 = vrot.lane.b32.xlu2 %v3271_v6, %s9659_s21  ;;  %v6532_v50 = vpop.eup %6531 }
 0xd1d   : > { %v6203_v53 = vpop.permute.xlu2 %6202  ;;  %v6534_v17 = vpop.eup %6533  ;;  %v3442_v38 = vmul.f32 %v6532_v50, %v8729_v45 }
 0xd1e   : > { %v6205_v42 = vunpack.i.h.bf16 %v6203_v53  ;;  %v6204_v23 = vunpack.i.l.bf16 %v6203_v53  ;;  %v3692_v43 = vmul.f32 %v6534_v17, %v8673_v10 }
 0xd1f   : > { %5811 = vmatmul.msk.f32.gmra.mxu2 %vm1077_vm0, %v3441_v29 }
 0xd20   : > { %3956 = vmatpush.msrb.mxu3 %v6204_v23 }
 0xd21   : > { %5835 = vmatmul.msk.f32.gmra.mxu1 %vm1077_vm0, %v3691_v48 }
 0xd22   : > { %3957 = vmatpush.msrb.mxu3 %v6205_v42 }
 0xd23   : > { %v3274_v51 = vpop.f32.mrf.mxu1 }
 0xd24   : > { %3801 = vrot.lane.b32.xlu2 %v3274_v51, %s9659_s21 }
 0xd25   : > { %v6208_v22 = vpop.permute.xlu2 %6207 }
 0xd26   : > { %v6210_v21 = vunpack.i.h.bf16 %v6208_v22  ;;  %v6209_v32 = vunpack.i.l.bf16 %v6208_v22 }
 0xd27   : > { %5812 = vmatmul.msk.f32.gmra.mxu2 %vm1077_vm0, %v3442_v38 }
 0xd28   : > { %3958 = vmatpush.msrb.mxu3 %v6209_v32 }
 0xd29   : > { %v8800_v63 = vpop.f32.mrf.mxu2  ;;  %5836 = vmatmul.msk.f32.gmra.mxu1 %vm1077_vm0, %v3692_v43 }
 0xd2a   : > { %3959 = vmatpush.msrb.mxu3 %v6210_v21 }
 0xd2b   : > { %v3277_v47 = vpop.f32.mrf.mxu1 }
 0xd2c   : > { %3803 = vrot.lane.b32.xlu2 %v3277_v47, %s9659_s21 }
 0xd31   : > { %v8804_v8 = vpop.f32.mrf.mxu2 }
 0xd33   : > { %v8810_v10 = vpop.f32.mrf.mxu1 }
 0xd39   : > { %v8806_v45 = vpop.f32.mrf.mxu2 }
 0xd41   : > { %v8808_v5 = vpop.f32.mrf.mxu2 }
 0xd49   : > { %v3509_v41 = vpop.f32.mrf.mxu2 }
 0xd4a   : > { %3823 = vrot.lane.b32.xlu1 %v3509_v41, %s9660_s20 }
 0xd4f   : > { %v3759_v33 = vpop.f32.mrf.mxu1 }
 0xd50   : > { %3855 = vrot.lane.b32.xlu0 %v3759_v33, %s9661_s22 }
 0xd56   : > { %v3794_v4 = vpop.permute.xlu2 %3793 }
 0xd57   : > { %v3880_v0 = vsel %vm979_vm15, %v8775_v15, %v3794_v4 }
 0xd66   : > { %v3792_v20 = vpop.permute.xlu0 %3791  ;;  %v3796_v34 = vpop.permute.xlu2 %3795 }
 0xd67   : > { %v3879_v11 = vsel %vm979_vm15, %v8768_v28, %v3792_v20  ;;  %v3881_v29 = vsel %vm979_vm15, %v8783_v57, %v3796_v34 }
 0xd6e   : > { %v3798_v56 = vpop.permute.xlu2 %3797 }
 0xd6f   : > { %v3882_v51 = vsel %vm979_vm15, %v8793_v36, %v3798_v56 }
 0xd76   : > { %v3800_v23 = vpop.permute.xlu2 %3799 }
 0xd77   : > { %v3883_v43 = vsel %vm979_vm15, %v8800_v63, %v3800_v23 }
 0xd7e   : > { %v3762_v35 = vpop.f32.mrf.mxu1  ;;  %v3802_v32 = vpop.permute.xlu2 %3801 }
 0xd7f   : > { %3857 = vrot.lane.b32.xlu0 %v3762_v35, %s9661_s22  ;;  %v3884_v41 = vsel %vm979_vm15, %v8804_v8, %v3802_v32 }
 0xd82   : > { %v3512_v61 = vpop.f32.mrf.mxu2 }
 0xd83   : > { %3825 = vrot.lane.b32.xlu1 %v3512_v61, %s9660_s20 }
 0xd86   : > { %v3765_v27 = vpop.f32.mrf.mxu1  ;;  %v3804_v63 = vpop.permute.xlu2 %3803 }
 0xd87   : > { %3859 = vrot.lane.b32.xlu0 %v3765_v27, %s9661_s22  ;;  %v3885_v27 = vsel %vm979_vm15, %v8806_v45, %v3804_v63 }
 0xd8a   : > { %v3515_v62 = vpop.f32.mrf.mxu2 }
 0xd8b   : > { %3827 = vrot.lane.b32.xlu1 %v3515_v62, %s9660_s20 }
 0xd8e   : > { %v3768_v58 = vpop.f32.mrf.mxu1 }
 0xd8f   : > { %3861 = vrot.lane.b32.xlu0 %v3768_v58, %s9661_s22 }
 0xd92   : > { %v3518_v2 = vpop.f32.mrf.mxu2 }
 0xd93   : > { %3829 = vrot.lane.b32.xlu1 %v3518_v2, %s9660_s20 }
 0xd96   : > { %v3771_v25 = vpop.f32.mrf.mxu1 }
 0xd97   : > { %3863 = vrot.lane.b32.xlu0 %v3771_v25, %s9661_s22 }
 0xd9a   : > { %v3521_v49 = vpop.f32.mrf.mxu2 }
 0xd9b   : > { %3831 = vrot.lane.b32.xlu1 %v3521_v49, %s9660_s20  ;;  %v3385_v8 = vpop.f32.mrf.mxu3  ;;  %v8864_v49 = vld [vmem:[%s9588_s6 + $0x8] sm:$0xff] }
 0xd9e   : > { %v3774_v46 = vpop.f32.mrf.mxu1 }
 0xd9f   : > { %3865 = vrot.lane.b32.xlu0 %v3774_v46, %s9661_s22  ;;  %v8867_v46 = vperm.slane %v8864_v49, 2 }
 0xda2   : > { %v3524_v55 = vpop.f32.mrf.mxu2 }
 0xda3   : > { %3833 = vrot.lane.b32.xlu1 %v3524_v55, %s9660_s20 }
 0xda6   : > { %v3777_v26 = vpop.f32.mrf.mxu1 }
 0xda7   : > { %3867 = vrot.lane.b32.xlu0 %v3777_v26, %s9661_s22 }
 0xdaa   : > { %v3527_v44 = vpop.f32.mrf.mxu2 }
 0xdab   : > { %3835 = vrot.lane.b32.xlu1 %v3527_v44, %s9660_s20 }
 0xdbc   : > { %v3824_v37 = vpop.permute.xlu1 %3823 }
 0xdbd   : > { %v3887_v1 = vsel %vm2061_vm2, %v3879_v11, %v3824_v37 }
 0xdc2   : > { %v3856_v12 = vpop.permute.xlu0 %3855 }
 0xdc3   : > { %v3895_v7 = vsel %vm2070_vm3, %v3887_v1, %v3856_v12 }
 0xdc4   : > { %5838 = vmatmul.msk.f32.vlgmr.msrb.gmra.mxu3 %vm495_vm12, %v3895_v7 }
 0xdf1   : > { %v3858_v30 = vpop.permute.xlu0 %3857 }
 0xdf5   : > { %v3826_v60 = vpop.permute.xlu1 %3825 }
 0xdf6   : > { %v3888_v39 = vsel %vm2061_vm2, %v3880_v0, %v3826_v60 }
 0xdf7   : > { %v3896_v6 = vsel %vm2070_vm3, %v3888_v39, %v3858_v30 }
 0xdf8   : > { %5839 = vmatmul.msk.f32.gmra.mxu3 %vm495_vm12, %v3896_v6 }
 0xdf9   : > { %v3860_v28 = vpop.permute.xlu0 %3859 }
 0xdfd   : > { %v3828_v48 = vpop.permute.xlu1 %3827 }
 0xdfe   : > { %v3889_v50 = vsel %vm2061_vm2, %v3881_v29, %v3828_v48  ;;  %v3386_v48 = vadd.f32 %v3385_v8, %v7641_v13 }
 0xdff   : > { %v3897_v53 = vsel %vm2070_vm3, %v3889_v50, %v3860_v28 }
 0xe00   : > { %5840 = vmatmul.msk.f32.gmra.mxu3 %vm495_vm12, %v3897_v53  ;;  %v3402_v50 = vmul.f32 1.442695, %v3386_v48 }
 0xe01   : > { %v3862_v15 = vpop.permute.xlu0 %3861 }
 0xe02   : > { %6535 = vpow2.f32 %v3402_v50 }
 0xe05   : > { %v3830_v42 = vpop.permute.xlu1 %3829 }
 0xe06   : > { %v3890_v17 = vsel %vm2061_vm2, %v3882_v51, %v3830_v42 }
 0xe07   : > { %v3898_v38 = vsel %vm2070_vm3, %v3890_v17, %v3862_v15 }
 0xe08   : > { %5841 = vmatmul.msk.f32.gmra.mxu3 %vm495_vm12, %v3898_v38  ;;  %v6536_v42 = vpop.eup %6535 }
 0xe09   : > { %v3864_v57 = vpop.permute.xlu0 %3863 }
 0xe0d   : > { %v3832_v47 = vpop.permute.xlu1 %3831 }
 0xe0e   : > { %v3891_v22 = vsel %vm2061_vm2, %v3883_v43, %v3832_v47 }
 0xe0f   : > { %v3899_v21 = vsel %vm2070_vm3, %v3891_v22, %v3864_v57 }
 0xe10   : > { %5842 = vmatmul.msk.f32.gmra.mxu3 %vm495_vm12, %v3899_v21 }
 0xe11   : > { %v3866_v36 = vpop.permute.xlu0 %3865 }
 0xe15   : > { %v3834_v33 = vpop.permute.xlu1 %3833 }
 0xe16   : > { %v3892_v35 = vsel %vm2061_vm2, %v3884_v41, %v3834_v33 }
 0xe17   : > { %v3900_v61 = vsel %vm2070_vm3, %v3892_v35, %v3866_v36 }
 0xe18   : > { %5843 = vmatmul.msk.f32.gmra.mxu3 %vm495_vm12, %v3900_v61 }
 0xe19   : > { %v3868_v58 = vpop.permute.xlu0 %3867 }
 0xe1d   : > { %v3836_v62 = vpop.permute.xlu1 %3835 }
 0xe1e   : > { %v3893_v2 = vsel %vm2061_vm2, %v3885_v27, %v3836_v62 }
 0xe1f   : > { %v3901_v25 = vsel %vm2070_vm3, %v3893_v2, %v3868_v58 }
 0xe20   : > { %5844 = vmatmul.msk.f32.gmra.mxu3 %vm495_vm12, %v3901_v25 }
 0xe47   : > { %v3961_v55 = vpop.f32.mrf.mxu3 }
 0xe48   : > { %v3962_v45 = vadd.f32 %v3961_v55, %v8867_v46 }
 0xe4a   : > { %v3985_v26 = vadd.f32 %v3962_v45, %v8210_v52 }
 0xe4c   : > { %v3993_v44 = vsel %vm495_vm12, %v3985_v26, 0.0 }
 0xe4d   : > { %3994 = vadd.xlane.f32.xlu2 %v3993_v44 }
 0xe7b   : > { %v3964_v20 = vpop.f32.mrf.mxu3 }
 0xe7c   : > { %v3965_v37 = vadd.f32 %v3964_v20, %v8867_v46 }
 0xe7e   : > { %v3986_v11 = vadd.f32 %v3965_v37, %v8221_v16 }
 0xe80   : > { %v3996_v1 = vsel %vm495_vm12, %v3986_v11, 0.0 }
 0xe81   : > { %3997 = vadd.xlane.f32.xlu1 %v3996_v1 }
 0xe83   : > { %v3967_v12 = vpop.f32.mrf.mxu3 }
 0xe84   : > { %v3968_v7 = vadd.f32 %v3967_v12, %v8867_v46 }
 0xe86   : > { %v3987_v4 = vadd.f32 %v3968_v7, %v8229_v9 }
 0xe88   : > { %v3999_v30 = vsel %vm495_vm12, %v3987_v4, 0.0 }
 0xe89   : > { %4000 = vadd.xlane.f32.xlu0 %v3999_v30 }
 0xe8b   : > { %v3970_v52 = vpop.f32.mrf.mxu3 }
 0xe8c   : > { %v3971_v34 = vadd.f32 %v3970_v52, %v8867_v46 }
 0xe8e   : > { %v3988_v0 = vadd.f32 %v3971_v34, %v8237_v3 }
 0xe90   : > { %v4002_v60 = vsel %vm495_vm12, %v3988_v0, 0.0 }
 0xe91   : > { %4003 = vadd.xlane.f32.xlu2 %v4002_v60 }
 0xe93   : > { %v3973_v16 = vpop.f32.mrf.mxu3 }
 0xe94   : > { %v3974_v39 = vadd.f32 %v3973_v16, %v8867_v46  ;;  %v5716_v16 = vld [vmem:[%s9586_s4 + $0x78] sm:$0xff] }
 0xe95   : > { %4224 = vmatpush.msra.mxu2 %v5716_v16 }
 0xe96   : > { %v3989_v6 = vadd.f32 %v3974_v39, %v8244_v14  ;;  %v5714_v39 = vld [vmem:[%s9586_s4 + $0x68] sm:$0xff] }
 0xe97   : > { %4225 = vmatpush.msra.mxu2 %v5714_v39 }
 0xe98   : > { %v4005_v28 = vsel %vm495_vm12, %v3989_v6, 0.0 }
 0xe99   : > { %4006 = vadd.xlane.f32.xlu1 %v4005_v28  ;;  %v5710_v28 = vld [vmem:[%s9586_s4 + $0x48] sm:$0xff] }
 0xe9b   : > { %v3976_v9 = vpop.f32.mrf.mxu3 }
 0xe9c   : > { %v3977_v56 = vadd.f32 %v3976_v9, %v8867_v46 }
 0xe9e   : > { %v3990_v29 = vadd.f32 %v3977_v56, %v8251_v18  ;;  %v3425_v18 = vsel %vm1077_vm0, %v6536_v42, 0.0 }
 0xea0   : > { %v4008_v3 = vsel %vm495_vm12, %v3990_v29, 0.0 }
 0xea1   : > { %4009 = vadd.xlane.f32.xlu0 %v4008_v3 }
 0xea3   : > { %v3979_v53 = vpop.f32.mrf.mxu3 }
 0xea4   : > { %v3980_v15 = vadd.f32 %v3979_v53, %v8867_v46 }
 0xea6   : > { %v3991_v51 = vadd.f32 %v3980_v15, %v8258_v54 }
 0xea8   : > { %v4011_v14 = vsel %vm495_vm12, %v3991_v51, 0.0 }
 0xea9   : > { %3547 = vrot.lane.b32.xlu2 %v8368_v59, %s9653_s16  ;;  %4012 = vadd.xlane.f32.xlu0 %v4011_v14  ;;  %v8954_v14 = vperm.slane %v8864_v49, 4 }
 0xeb1   : > { %3426 = vadd.xlane.f32.xlu0 %v3425_v18 }
 0xec0   : > { %v3995_v23 = vpop.xlane.xlu2 %3994 }
 0xec1   : > { %v4017_v17 = vmul.f32 %v3995_v23, %v6943_v31 }
 0xec3   : > { %v8895_v38 = vsub.f32 %v3985_v26, %v4017_v17 }
 0xec5   : > { %v4033_v57 = vmul.f32 %v8895_v38, %v8895_v38 }
 0xec7   : > { %v4041_v54 = vsel %vm495_vm12, %v4033_v57, 0.0 }
 0xec8   : > { %4042 = vadd.xlane.f32.xlu1 %v4041_v54 }
 0xef4   : > { %v3998_v43 = vpop.xlane.xlu1 %3997 }
 0xef5   : > { %v4018_v47 = vmul.f32 %v3998_v43, %v6943_v31 }
 0xef7   : > { %v8901_v59 = vsub.f32 %v3986_v11, %v4018_v47 }
 0xef9   : > { %v4034_v22 = vmul.f32 %v8901_v59, %v8901_v59 }
 0xefb   : > { %v4044_v21 = vsel %vm495_vm12, %v4034_v22, 0.0 }
 0xefc   : > { %v4001_v32 = vpop.xlane.xlu0 %4000  ;;  %4045 = vadd.xlane.f32.xlu1 %v4044_v21 }
 0xefd   : > { %v4019_v36 = vmul.f32 %v4001_v32, %v6943_v31 }
 0xeff   : > { %v8907_v41 = vsub.f32 %v3987_v4, %v4019_v36 }
 0xf01   : > { %v4035_v33 = vmul.f32 %v8907_v41, %v8907_v41 }
 0xf03   : > { %v4047_v35 = vsel %vm495_vm12, %v4035_v33, 0.0 }
 0xf04   : > { %v4004_v61 = vpop.xlane.xlu2 %4003  ;;  %4048 = vadd.xlane.f32.xlu1 %v4047_v35 }
 0xf05   : > { %v4020_v63 = vmul.f32 %v4004_v61, %v6943_v31 }
 0xf07   : > { %v8913_v27 = vsub.f32 %v3988_v0, %v4020_v63 }
 0xf09   : > { %v4036_v62 = vmul.f32 %v8913_v27, %v8913_v27 }
 0xf0b   : > { %v4050_v58 = vsel %vm495_vm12, %v4036_v62, 0.0 }
 0xf0c   : > { %v3548_v2 = vpop.permute.xlu2 %3547  ;;  %4051 = vadd.xlane.f32.xlu0 %v4050_v58  ;;  %v4007_v25 = vpop.xlane.xlu1 %4006 }
 0xf0d   : > { %v4021_v8 = vmul.f32 %v4007_v25, %v6943_v31  ;;  %5829 = vmatmul.msk.f32.gmra.mxu0 %vm979_vm15, %v3548_v2 }
 0xf0f   : > { %v8920_v55 = vsub.f32 %v3989_v6, %v4021_v8  ;;  %v5712_v6 = vld [vmem:[%s9586_s4 + $0x58] sm:$0xff] }
 0xf10   : > { %4226 = vmatpush.msra.mxu2 %v5712_v6 }
 0xf11   : > { %v4037_v45 = vmul.f32 %v8920_v55, %v8920_v55 }
 0xf12   : > { %4227 = vmatpush.msra.mxu2 %v5710_v28 }
 0xf13   : > { %v4053_v26 = vsel %vm495_vm12, %v4037_v45, 0.0 }
 0xf14   : > { %v4010_v44 = vpop.xlane.xlu0 %4009  ;;  %4054 = vadd.xlane.f32.xlu2 %v4053_v26 }
 0xf15   : > { %v4022_v20 = vmul.f32 %v4010_v44, %v6943_v31 }
 0xf17   : > { %v8926_v37 = vsub.f32 %v3990_v29, %v4022_v20 }
 0xf19   : > { %v4038_v11 = vmul.f32 %v8926_v37, %v8926_v37 }
 0xf1b   : > { %v4056_v1 = vsel %vm495_vm12, %v4038_v11, 0.0 }
 0xf1c   : > { %v4013_v12 = vpop.xlane.xlu0 %4012  ;;  %4057 = vadd.xlane.f32.xlu1 %v4056_v1 }
 0xf1d   : > { %v4023_v7 = vmul.f32 %v4013_v12, %v6943_v31 }
 0xf1f   : > { %v8932_v4 = vsub.f32 %v3991_v51, %v4023_v7 }
 0xf21   : > { %v4039_v30 = vmul.f32 %v8932_v4, %v8932_v4 }
 0xf23   : > { %v4059_v52 = vsel %vm495_vm12, %v4039_v30, 0.0 }
 0xf24   : > { %4060 = vadd.xlane.f32.xlu0 %v4059_v52  ;;  %v3427_v34 = vpop.xlane.xlu0 %3426 }
 0xf25   : > { %6537 = vrcp.f32 %v3427_v34 }
 0xf2b   : > { %v6538_v0 = vpop.eup %6537 }
 0xf2c   : > { %v3443_v60 = vmul.f32 %v6538_v0, %v6536_v42 }
 0xf2e   : > { %5813 = vmatmul.msk.f32.gmra.mxu2 %vm1077_vm0, %v3443_v60 }
 0xf38   : > { %3805 = vrot.lane.b32.xlu0 %v8810_v10, %s9659_s21  ;;  %v8957_v10 = vperm.slane %v8864_v49, 5 }
 0xf3b   : > { %v4043_v9 = vpop.xlane.xlu1 %4042 }
 0xf3c   : > { %v4065_v56 = vmul.f32 %v4043_v9, %v6943_v31 }
 0xf3e   : > { %v4073_v29 = vadd.f32 1e-05, %v4065_v56 }
 0xf40   : > { %6539 = vrsqrt.f32 %v4073_v29  ;;  %vm4087_vm10 = vweird.f32 %v4073_v29 }
 0xf46   : > { %v6540_v48 = vpop.eup %6539 }
 0xf47   : > { %v4082_v3 = vmul.f32 %v6540_v48, %v4073_v29  ;;  %vm4088_vm9 = vweird.f32 %v6540_v48 }
 0xf48   : > { %vm4089_vm11 = vmor %vm4087_vm10, %vm4088_vm9 }
 0xf49   : > { %v4083_v50 = vmul.f32 %v6540_v48, %v4082_v3 }
 0xf4b   : > { %v4084_v53 = vmul.f32 0.5, %v4083_v50 }
 0xf4d   : > { %v4085_v15 = vsub.f32 1.5, %v4084_v53 }
 0xf4f   : > { %v4086_v51 = vmul.f32 %v6540_v48, %v4085_v15 }
 0xf51   : > { %v4090_v42 = vsel %vm4089_vm11, %v6540_v48, %v4086_v51 }
 0xf52   : > { %v4161_v18 = vmul.f32 %v4090_v42, %v8895_v38  ;;  %v5731_v42 = vld [vmem:[%s9587_s5 + $0xf0] sm:$0xff] }
 0xf54   : > { %v4170_v23 = vmul.f32 %v8954_v14, %v4161_v18 }
 0xf56   : > { %v8962_v17 = vadd.f32 %v8957_v10, %v4170_v23 }
 0xf58   : > { %5846 = vmatmul.msk.f32.vlgmr.msra.gmra.mxu2 %vm495_vm12, %v8962_v17 }
 0xf6f   : > { %v4046_v57 = vpop.xlane.xlu1 %4045 }
 0xf70   : > { %v4066_v54 = vmul.f32 %v4046_v57, %v6943_v31 }
 0xf72   : > { %v4074_v43 = vadd.f32 1e-05, %v4066_v54 }
 0xf74   : > { %6541 = vrsqrt.f32 %v4074_v43  ;;  %vm4097_vm13 = vweird.f32 %v4074_v43 }
 0xf77   : > { %v4049_v47 = vpop.xlane.xlu1 %4048 }
 0xf78   : > { %v4067_v22 = vmul.f32 %v4049_v47, %v6943_v31  ;;  %v5730_v47 = vld [vmem:[%s9587_s5 + $0xe8] sm:$0xff] }
 0xf7a   : > { %v6542_v21 = vpop.eup %6541  ;;  %v4075_v32 = vadd.f32 1e-05, %v4067_v22 }
 0xf7b   : > { %v4092_v36 = vmul.f32 %v6542_v21, %v4074_v43  ;;  %vm4098_vm5 = vweird.f32 %v6542_v21 }
 0xf7c   : > { %6543 = vrsqrt.f32 %v4075_v32  ;;  %vm4099_vm14 = vmor %vm4097_vm13, %vm4098_vm5  ;;  %vm4107_vm4 = vweird.f32 %v4075_v32 }
 0xf7d   : > { %v4093_v38 = vmul.f32 %v6542_v21, %v4092_v36 }
 0xf7f   : > { %v4094_v33 = vmul.f32 0.5, %v4093_v38  ;;  %v4052_v35 = vpop.xlane.xlu0 %4051  ;;  %v5729_v38 = vld [vmem:[%s9587_s5 + $0xe0] sm:$0xff] }
 0xf80   : > { %v4068_v61 = vmul.f32 %v4052_v35, %v6943_v31 }
 0xf81   : > { %v4095_v63 = vsub.f32 1.5, %v4094_v33 }
 0xf82   : > { %v6544_v62 = vpop.eup %6543  ;;  %v4076_v58 = vadd.f32 1e-05, %v4068_v61 }
 0xf83   : > { %v4096_v2 = vmul.f32 %v6542_v21, %v4095_v63  ;;  %v4102_v25 = vmul.f32 %v6544_v62, %v4075_v32  ;;  %vm4108_vm1 = vweird.f32 %v6544_v62  ;;  %v5728_v63 = vld [vmem:[%s9587_s5 + $0xd8] sm:$0xff] }
 0xf84   : > { %6545 = vrsqrt.f32 %v4076_v58  ;;  %vm4109_vm6 = vmor %vm4107_vm4, %vm4108_vm1  ;;  %vm4117_vm8 = vweird.f32 %v4076_v58 }
 0xf85   : > { %v4100_v8 = vsel %vm4099_vm14, %v6542_v21, %v4096_v2  ;;  %v4103_v45 = vmul.f32 %v6544_v62, %v4102_v25  ;;  %v5727_v2 = vld [vmem:[%s9587_s5 + $0xd0] sm:$0xff] }
 0xf86   : > { %v4162_v26 = vmul.f32 %v4100_v8, %v8901_v59 }
 0xf87   : > { %v4104_v44 = vmul.f32 0.5, %v4103_v45  ;;  %v4055_v20 = vpop.xlane.xlu2 %4054 }
 0xf88   : > { %v4069_v11 = vmul.f32 %v4055_v20, %v6943_v31  ;;  %v4171_v1 = vmul.f32 %v8954_v14, %v4162_v26  ;;  %v5726_v26 = vld [vmem:[%s9587_s5 + $0xc8] sm:$0xff] }
 0xf89   : > { %v4105_v12 = vsub.f32 1.5, %v4104_v44 }
 0xf8a   : > { %v6546_v7 = vpop.eup %6545  ;;  %v4077_v30 = vadd.f32 1e-05, %v4069_v11  ;;  %v3635_v52 = vpop.f32.mrf.mxu0  ;;  %v4180_v34 = vadd.f32 %v8957_v10, %v4171_v1  ;;  %v5725_v11 = vld [vmem:[%s9587_s5 + $0xc0] sm:$0xff] }
 0xf8b   : > { %v4106_v0 = vmul.f32 %v6544_v62, %v4105_v12  ;;  %v4112_v60 = vmul.f32 %v6546_v7, %v4076_v58  ;;  %v3636_v16 = vadd.f32 %v3635_v52, %v7641_v13  ;;  %vm4118_vm7 = vweird.f32 %v6546_v7 }
 0xf8c   : > { %6547 = vrsqrt.f32 %v4077_v30  ;;  %5847 = vmatmul.msk.f32.gmra.mxu2 %vm495_vm12, %v4180_v34  ;;  %vm4119_vm9 = vmor %vm4117_vm8, %vm4118_vm7  ;;  %vm4127_vm11 = vweird.f32 %v4077_v30  ;;  %v5723_v34 = vld [vmem:[%s9587_s5 + $0xb0] sm:$0xff] }
 0xf8d   : > { %v4110_v59 = vsel %vm4109_vm6, %v6544_v62, %v4106_v0  ;;  %v4113_v39 = vmul.f32 %v6546_v7, %v4112_v60  ;;  %v3652_v6 = vmul.f32 1.442695, %v3636_v16 }
 0xf8e   : > { %v4163_v28 = vmul.f32 %v4110_v59, %v8907_v41  ;;  %v5732_v41 = vld [vmem:[%s9587_s5 + $0xf8] sm:$0xff]  ;;  %v5722_v59 = vld [vmem:[%s9587_s5 + $0xa8] sm:$0xff] }
 0xf8f   : > { %v4114_v9 = vmul.f32 0.5, %v4113_v39  ;;  %6549 = vpow2.f32 %v3652_v6  ;;  %v4058_v56 = vpop.xlane.xlu1 %4057  ;;  %4262 = vmatpush.msra.mxu0 %v5732_v41  ;;  %v5717_v41 = vld [vmem:[%s9587_s5 + $0x80] sm:$0xff] }
 0xf90   : > { %v4070_v29 = vmul.f32 %v4058_v56, %v6943_v31  ;;  %v4172_v48 = vmul.f32 %v8954_v14, %v4163_v28  ;;  %v5721_v28 = vld [vmem:[%s9587_s5 + $0xa0] sm:$0xff] }
 0xf91   : > { %v4115_v3 = vsub.f32 1.5, %v4114_v9  ;;  %4263 = vmatpush.msra.mxu0 %v5731_v42  ;;  %v9060_v42 = vperm.slane %v8864_v49, 1 }
 0xf92   : > { %v6548_v50 = vpop.eup %6547  ;;  %v4078_v13 = vadd.f32 1e-05, %v4070_v29  ;;  %v8979_v53 = vadd.f32 %v8957_v10, %v4172_v48 }
 0xf93   : > { %v4116_v15 = vmul.f32 %v6546_v7, %v4115_v3  ;;  %v4122_v51 = vmul.f32 %v6548_v50, %v4077_v30  ;;  %vm4128_vm10 = vweird.f32 %v6548_v50  ;;  %4264 = vmatpush.msra.mxu0 %v5730_v47 }
 0xf94   : > { %6551 = vrsqrt.f32 %v4078_v13  ;;  %5848 = vmatmul.msk.f32.gmra.mxu2 %vm495_vm12, %v8979_v53  ;;  %vm4129_vm5 = vmor %vm4127_vm11, %vm4128_vm10  ;;  %vm4137_vm14 = vweird.f32 %v4078_v13 }
 0xf95   : > { %v8989_v18 = vpop.eup %6549  ;;  %v4120_v23 = vsel %vm4119_vm9, %v6546_v7, %v4116_v15  ;;  %v4123_v57 = vmul.f32 %v6548_v50, %v4122_v51  ;;  %4265 = vmatpush.msra.mxu0 %v5729_v38  ;;  %v5719_v51 = vld [vmem:[%s9587_s5 + $0x90] sm:$0xff] }
 0xf96   : > { %v4164_v54 = vmul.f32 %v4120_v23, %v8913_v27  ;;  %v3675_v43 = vsel %vm1077_vm0, %v8989_v18, 0.0 }
 0xf97   : > { %v4124_v22 = vmul.f32 0.5, %v4123_v57  ;;  %v4061_v21 = vpop.xlane.xlu0 %4060  ;;  %3676 = vadd.xlane.f32.xlu1 %v3675_v43  ;;  %4266 = vmatpush.msra.mxu0 %v5728_v63 }
 0xf98   : > { %v4071_v32 = vmul.f32 %v4061_v21, %v6943_v31  ;;  %v4173_v36 = vmul.f32 %v8954_v14, %v4164_v54 }
 0xf99   : > { %v4125_v27 = vsub.f32 1.5, %v4124_v22  ;;  %4267 = vmatpush.msra.mxu0 %v5727_v2 }
 0xf9a   : > { %v6552_v33 = vpop.eup %6551  ;;  %v4079_v35 = vadd.f32 1e-05, %v4071_v32  ;;  %v4182_v61 = vadd.f32 %v8957_v10, %v4173_v36 }
 0xf9b   : > { %v4126_v62 = vmul.f32 %v6548_v50, %v4125_v27  ;;  %v4132_v58 = vmul.f32 %v6552_v33, %v4078_v13  ;;  %vm4138_vm13 = vweird.f32 %v6552_v33  ;;  %4268 = vmatpush.msra.mxu0 %v5726_v26 }
 0xf9c   : > { %6553 = vrsqrt.f32 %v4079_v35  ;;  %5849 = vmatmul.msk.f32.gmra.mxu2 %vm495_vm12, %v4182_v61  ;;  %vm4139_vm1 = vmor %vm4137_vm14, %vm4138_vm13  ;;  %vm4147_vm6 = vweird.f32 %v4079_v35 }
 0xf9d   : > { %v4130_v25 = vsel %vm4129_vm5, %v6548_v50, %v4126_v62  ;;  %v4133_v8 = vmul.f32 %v6552_v33, %v4132_v58  ;;  %4269 = vmatpush.msra.mxu0 %v5725_v11 }
 0xf9e   : > { %v4165_v45 = vmul.f32 %v4130_v25, %v8920_v55  ;;  %v5724_v55 = vld [vmem:[%s9587_s5 + $0xb8] sm:$0xff] }
 0xf9f   : > { %v4134_v44 = vmul.f32 0.5, %v4133_v8  ;;  %4270 = vmatpush.msra.mxu0 %v5724_v55 }
 0xfa0   : > { %v4174_v20 = vmul.f32 %v8954_v14, %v4165_v45 }
 0xfa1   : > { %v4135_v1 = vsub.f32 1.5, %v4134_v44  ;;  %4271 = vmatpush.msra.mxu0 %v5723_v34 }
 0xfa2   : > { %v6554_v12 = vpop.eup %6553  ;;  %v9019_v7 = vadd.f32 %v8957_v10, %v4174_v20  ;;  %v4261_v20 = vperm.slane %v8864_v49, 3 }
 0xfa3   : > { %v4136_v30 = vmul.f32 %v6552_v33, %v4135_v1  ;;  %v4142_v52 = vmul.f32 %v6554_v12, %v4079_v35  ;;  %vm4148_vm4 = vweird.f32 %v6554_v12  ;;  %4272 = vmatpush.msra.mxu0 %v5722_v59 }
 0xfa4   : > { %5850 = vmatmul.msk.f32.gmra.mxu2 %vm495_vm12, %v9019_v7  ;;  %vm4149_vm7 = vmor %vm4147_vm6, %vm4148_vm4 }
 0xfa5   : > { %v4140_v0 = vsel %vm4139_vm1, %v6552_v33, %v4136_v30  ;;  %v4143_v60 = vmul.f32 %v6554_v12, %v4142_v52  ;;  %4273 = vmatpush.msra.mxu0 %v5721_v28 }
 0xfa6   : > { %v4166_v16 = vmul.f32 %v4140_v0, %v8926_v37  ;;  %v5720_v37 = vld [vmem:[%s9587_s5 + $0x98] sm:$0xff] }
 0xfa7   : > { %v4144_v39 = vmul.f32 0.5, %v4143_v60  ;;  %4274 = vmatpush.msra.mxu0 %v5720_v37 }
 0xfa8   : > { %v4175_v6 = vmul.f32 %v8954_v14, %v4166_v16 }
 0xfa9   : > { %v4145_v9 = vsub.f32 1.5, %v4144_v39  ;;  %4275 = vmatpush.msra.mxu0 %v5719_v51 }
 0xfaa   : > { %v4184_v56 = vadd.f32 %v8957_v10, %v4175_v6 }
 0xfab   : > { %v4146_v29 = vmul.f32 %v6554_v12, %v4145_v9 }
 0xfac   : > { %5851 = vmatmul.msk.f32.gmra.mxu2 %vm495_vm12, %v4184_v56 }
 0xfad   : > { %v4150_v48 = vsel %vm4149_vm7, %v6554_v12, %v4146_v29 }
 0xfae   : > { %v4167_v3 = vmul.f32 %v4150_v48, %v8932_v4  ;;  %v5718_v4 = vld [vmem:[%s9587_s5 + $0x88] sm:$0xff] }
 0xfaf   : > { %4276 = vmatpush.msra.mxu0 %v5718_v4 }
 0xfb0   : > { %v4176_v50 = vmul.f32 %v8954_v14, %v4167_v3 }
 0xfb1   : > { %v3530_v13 = vpop.f32.mrf.mxu2  ;;  %4277 = vmatpush.msra.mxu0 %v5717_v41 }
 0xfb2   : > { %3837 = vrot.lane.b32.xlu1 %v3530_v13, %s9660_s20  ;;  %v9046_v15 = vadd.f32 %v8957_v10, %v4176_v50 }
 0xfb4   : > { %5852 = vmatmul.msk.f32.gmra.mxu2 %vm495_vm12, %v9046_v15 }
 0xfdb   : > { %v4229_v23 = vpop.f32.mrf.mxu2 }
 0xfdc   : > { %v4230_v57 = vadd.f32 %v4229_v23, %v9060_v42 }
 0xfde   : > { %v4253_v54 = vmax.f32 %v4230_v57, 0.0 }
 0xfe0   : > { %4278 = vmatmul.f32.vlgmr.msra.gmra.mxu0 %v4253_v54 }
0x100a   : > { %v3677_v43 = vpop.xlane.xlu1 %3676 }
0x100b   : > { %6555 = vrcp.f32 %v3677_v43 }
0x100f   : > { %v4232_v47 = vpop.f32.mrf.mxu2 }
0x1010   : > { %v4233_v22 = vadd.f32 %v4232_v47, %v9060_v42 }
0x1011   : > { %v6556_v21 = vpop.eup %6555 }
0x1012   : > { %v4254_v32 = vmax.f32 %v4233_v22, 0.0  ;;  %v3693_v36 = vmul.f32 %v6556_v21, %v8989_v18 }
0x1014   : > { %5837 = vmatmul.msk.f32.gmra.mxu1 %vm1077_vm0, %v3693_v36  ;;  %4281 = vmatmul.f32.gmra.mxu0 %v4254_v32 }
0x1017   : > { %v4235_v38 = vpop.f32.mrf.mxu2 }
0x1018   : > { %v4236_v27 = vadd.f32 %v4235_v38, %v9060_v42 }
0x101a   : > { %v4255_v33 = vmax.f32 %v4236_v27, 0.0 }
0x101c   : > { %4283 = vmatmul.f32.gmra.mxu0 %v4255_v33 }
0x101f   : > { %v4238_v35 = vpop.f32.mrf.mxu2 }
0x1020   : > { %v4239_v61 = vadd.f32 %v4238_v35, %v9060_v42 }
0x1022   : > { %v4256_v63 = vmax.f32 %v4239_v61, 0.0 }
0x1024   : > { %4286 = vmatmul.f32.gmra.mxu0 %v4256_v63  ;;  %v3838_v3 = vpop.permute.xlu1 %3837 }
0x1027   : > { %v4241_v62 = vpop.f32.mrf.mxu2 }
0x1028   : > { %v4242_v58 = vadd.f32 %v4241_v62, %v9060_v42 }
0x102a   : > { %v4257_v2 = vmax.f32 %v4242_v58, 0.0 }
0x102c   : > { %4288 = vmatmul.f32.gmra.mxu0 %v4257_v2 }
0x102f   : > { %v4244_v25 = vpop.f32.mrf.mxu2 }
0x1030   : > { %v4245_v18 = vadd.f32 %v4244_v25, %v9060_v42 }
0x1032   : > { %v4258_v8 = vmax.f32 %v4245_v18, 0.0 }
0x1034   : > { %4291 = vmatmul.f32.gmra.mxu0 %v4258_v8 }
0x1037   : > { %v4247_v45 = vpop.f32.mrf.mxu2 }
0x1038   : > { %v4248_v26 = vadd.f32 %v4247_v45, %v9060_v42 }
0x103a   : > { %v4259_v44 = vmax.f32 %v4248_v26, 0.0 }
0x103c   : > { %4293 = vmatmul.f32.gmra.mxu0 %v4259_v44 }
0x105d   : > { %v4279_v11 = vpop.f32.mrf.mxu0 }
0x105e   : > { %v4280_v1 = vadd.f32 %v4279_v11, %v4261_v20  ;;  %v9104_v11 = vperm.slane %v8864_v49, 6 }
0x1060   : > { %v4299_v12 = vadd.f32 %v4280_v1, %v8962_v17 }
0x1062   : > { %v4303_v55 = vsel %vm495_vm12, %v4299_v12, 0.0 }
0x1063   : > { %4304 = vadd.xlane.f32.xlu1 %v4303_v55  ;;  %v4396_v55 = vperm.slane %v8864_v49, 7 }
0x1091   : > { %v3780_v30 = vpop.f32.mrf.mxu1  ;;  %v4282_v52 = vpop.f32.mrf.mxu0 }
0x1092   : > { %3869 = vrot.lane.b32.xlu0 %v3780_v30, %s9661_s22 }
0x1099   : > { %v4284_v34 = vpop.f32.mrf.mxu0 }
0x109a   : > { %v4285_v28 = vadd.f32 %v4284_v34, %v4261_v20 }
0x109c   : > { %v4300_v17 = vadd.f32 %v4285_v28, %v8979_v53  ;;  %v3806_v53 = vpop.permute.xlu0 %3805 }
0x109d   : > { %v3886_v41 = vsel %vm979_vm15, %v8808_v5, %v3806_v53 }
0x109e   : > { %v4306_v37 = vsel %vm495_vm12, %v4300_v17, 0.0  ;;  %v3894_v23 = vsel %vm2061_vm2, %v3886_v41, %v3838_v3 }
0x10a1   : > { %v4287_v0 = vpop.f32.mrf.mxu0 }
0x10a9   : > { %v4289_v60 = vpop.f32.mrf.mxu0 }
0x10aa   : > { %v4290_v16 = vadd.f32 %v4289_v60, %v4261_v20 }
0x10ac   : > { %v4301_v59 = vadd.f32 %v4290_v16, %v9019_v7 }
0x10ae   : > { %v4309_v39 = vsel %vm495_vm12, %v4301_v59, 0.0 }
0x10af   : > { %4310 = vadd.xlane.f32.xlu2 %v4309_v39 }
0x10b1   : > { %v4292_v6 = vpop.f32.mrf.mxu0 }
0x10b9   : > { %v4294_v9 = vpop.f32.mrf.mxu0 }
0x10ba   : > { %v4295_v56 = vadd.f32 %v4294_v9, %v4261_v20 }
0x10bc   : > { %v4302_v29 = vadd.f32 %v4295_v56, %v9046_v15  ;;  %4307 = vadd.xlane.f32.xlu0 %v4306_v37 }
0x10be   : > { %v4312_v48 = vsel %vm495_vm12, %v4302_v29, 0.0 }
0x10bf   : > { %4313 = vadd.xlane.f32.xlu2 %v4312_v48 }
0x10d6   : > { %v4305_v50 = vpop.xlane.xlu1 %4304 }
0x10d7   : > { %v4315_v7 = vmul.f32 %v4305_v50, %v6943_v31 }
0x10d9   : > { %v4319_v13 = vsub.f32 %v4299_v12, %v4315_v7 }
0x10db   : > { %v4323_v51 = vmul.f32 %v4319_v13, %v4319_v13 }
0x10dd   : > { %v4327_v4 = vsel %vm495_vm12, %v4323_v51, 0.0 }
0x10de   : > { %4328 = vadd.xlane.f32.xlu2 %v4327_v4 }
0x1104   : > { %v3870_v15 = vpop.permute.xlu0 %3869 }
0x1105   : > { %v3902_v57 = vsel %vm2070_vm3, %v3894_v23, %v3870_v15 }
0x1106   : > { %5845 = vmatmul.msk.f32.gmra.mxu3 %vm495_vm12, %v3902_v57 }
0x1122   : > { %v4311_v54 = vpop.xlane.xlu2 %4310 }
0x1123   : > { %v4317_v22 = vmul.f32 %v4311_v54, %v6943_v31 }
0x1125   : > { %v9090_v36 = vsub.f32 %v4301_v59, %v4317_v22 }
0x1127   : > { %v4325_v33 = vmul.f32 %v9090_v36, %v9090_v36 }
0x1129   : > { %v4333_v61 = vsel %vm495_vm12, %v4325_v33, 0.0 }
0x112f   : > { %v4308_v43 = vpop.xlane.xlu0 %4307 }
0x1130   : > { %v4316_v47 = vmul.f32 %v4308_v43, %v6943_v31 }
0x1132   : > { %v4320_v21 = vsub.f32 %v4300_v17, %v4316_v47  ;;  %v4314_v5 = vpop.xlane.xlu2 %4313 }
0x1133   : > { %v4318_v27 = vmul.f32 %v4314_v5, %v6943_v31 }
0x1134   : > { %v4324_v32 = vmul.f32 %v4320_v21, %v4320_v21 }
0x1135   : > { %v9096_v35 = vsub.f32 %v4302_v29, %v4318_v27 }
0x1136   : > { %v4330_v38 = vsel %vm495_vm12, %v4324_v32, 0.0 }
0x1137   : > { %4331 = vadd.xlane.f32.xlu2 %v4330_v38  ;;  %v4326_v63 = vmul.f32 %v9096_v35, %v9096_v35 }
0x1139   : > { %v4336_v62 = vsel %vm495_vm12, %v4326_v63, 0.0 }
0x113f   : > { %4334 = vadd.xlane.f32.xlu2 %v4333_v61 }
0x1147   : > { %4337 = vadd.xlane.f32.xlu2 %v4336_v62 }
0x1151   : > { %v4329_v58 = vpop.xlane.xlu2 %4328 }
0x1152   : > { %v4339_v2 = vmul.f32 %v4329_v58, %v6943_v31 }
0x1154   : > { %v4343_v25 = vadd.f32 1e-05, %v4339_v2 }
0x1156   : > { %6557 = vrsqrt.f32 %v4343_v25  ;;  %vm4353_vm8 = vweird.f32 %v4343_v25 }
0x115c   : > { %v6558_v18 = vpop.eup %6557 }
0x115d   : > { %v4348_v8 = vmul.f32 %v6558_v18, %v4343_v25  ;;  %vm4354_vm0 = vweird.f32 %v6558_v18 }
0x115e   : > { %vm4355_vm9 = vmor %vm4353_vm8, %vm4354_vm0 }
0x115f   : > { %v4349_v45 = vmul.f32 %v6558_v18, %v4348_v8 }
0x1161   : > { %v4350_v26 = vmul.f32 0.5, %v4349_v45 }
0x1163   : > { %v4351_v44 = vsub.f32 1.5, %v4350_v26 }
0x1165   : > { %v4352_v20 = vmul.f32 %v6558_v18, %v4351_v44 }
0x1167   : > { %v4356_v1 = vsel %vm4355_vm9, %v6558_v18, %v4352_v20 }
0x1168   : > { %v4387_v12 = vmul.f32 %v4356_v1, %v4319_v13 }
0x116a   : > { %v4392_v30 = vmul.f32 %v9104_v11, %v4387_v12 }
0x116c   : > { %v9108_v52 = vadd.f32 %v4396_v55, %v4392_v30 }
0x116e   : > { %v4403_v34 = vsel %vm495_vm12, %v9108_v52, 0.0 }
0x116f   : > { %4404 = vadd.xlane.f32.xlu2 %v4403_v34 }
0x1189   : > { %v3982_v27 = vpop.f32.mrf.mxu3 }
0x118a   : > { %v3983_v62 = vadd.f32 %v3982_v27, %v8867_v46 }
0x11aa   : > { %v4332_v0 = vpop.xlane.xlu2 %4331 }
0x11ab   : > { %v4340_v60 = vmul.f32 %v4332_v0, %v6943_v31 }
0x11ad   : > { %v4344_v16 = vadd.f32 1e-05, %v4340_v60 }
0x11af   : > { %6559 = vrsqrt.f32 %v4344_v16  ;;  %vm4363_vm11 = vweird.f32 %v4344_v16 }
0x11b2   : > { %v4335_v59 = vpop.xlane.xlu2 %4334 }
0x11b3   : > { %v4341_v39 = vmul.f32 %v4335_v59, %v6943_v31 }
0x11b5   : > { %v6560_v6 = vpop.eup %6559  ;;  %v4345_v28 = vadd.f32 1e-05, %v4341_v39 }
0x11b6   : > { %v4358_v17 = vmul.f32 %v6560_v6, %v4344_v16  ;;  %vm4364_vm10 = vweird.f32 %v6560_v6 }
0x11b7   : > { %6561 = vrsqrt.f32 %v4345_v28  ;;  %vm4365_vm5 = vmor %vm4363_vm11, %vm4364_vm10  ;;  %vm4373_vm14 = vweird.f32 %v4345_v28 }
0x11b8   : > { %v4359_v49 = vmul.f32 %v6560_v6, %v4358_v17 }
0x11ba   : > { %v4360_v9 = vmul.f32 0.5, %v4359_v49  ;;  %v4338_v56 = vpop.xlane.xlu2 %4337 }
0x11bb   : > { %v4342_v37 = vmul.f32 %v4338_v56, %v6943_v31 }
0x11bc   : > { %v4361_v29 = vsub.f32 1.5, %v4360_v9 }
0x11bd   : > { %v6562_v48 = vpop.eup %6561  ;;  %v4346_v3 = vadd.f32 1e-05, %v4342_v37 }
0x11be   : > { %v4362_v50 = vmul.f32 %v6560_v6, %v4361_v29  ;;  %v4368_v7 = vmul.f32 %v6562_v48, %v4345_v28  ;;  %vm4374_vm13 = vweird.f32 %v6562_v48 }
0x11bf   : > { %6563 = vrsqrt.f32 %v4346_v3  ;;  %vm4375_vm1 = vmor %vm4373_vm14, %vm4374_vm13  ;;  %vm4383_vm6 = vweird.f32 %v4346_v3 }
0x11c0   : > { %v4369_v13 = vmul.f32 %v6562_v48, %v4368_v7  ;;  %v4366_v51 = vsel %vm4365_vm5, %v6560_v6, %v4362_v50 }
0x11c1   : > { %v4388_v4 = vmul.f32 %v4366_v51, %v4320_v21 }
0x11c2   : > { %v4370_v53 = vmul.f32 0.5, %v4369_v13 }
0x11c3   : > { %v4393_v41 = vmul.f32 %v9104_v11, %v4388_v4 }
0x11c4   : > { %v4371_v23 = vsub.f32 1.5, %v4370_v53 }
0x11c5   : > { %v6564_v15 = vpop.eup %6563  ;;  %v4398_v57 = vadd.f32 %v4396_v55, %v4393_v41 }
0x11c6   : > { %v4372_v54 = vmul.f32 %v6562_v48, %v4371_v23  ;;  %v4378_v43 = vmul.f32 %v6564_v15, %v4346_v3  ;;  %vm4384_vm4 = vweird.f32 %v6564_v15  ;;  %v9168_v23 = vld [vmem:[%s9586_s4 + $0xb0] sm:$0xff] }
0x11c7   : > { %v4406_v47 = vsel %vm495_vm12, %v4398_v57, 0.0  ;;  %vm4385_vm7 = vmor %vm4383_vm6, %vm4384_vm4  ;;  %4565 = vmatpush.msrb.mxu1 %v9168_v23 }
0x11c8   : > { %v4379_v22 = vmul.f32 %v6564_v15, %v4378_v43  ;;  %4407 = vadd.xlane.f32.xlu0 %v4406_v47  ;;  %v4376_v32 = vsel %vm4375_vm1, %v6562_v48, %v4372_v54  ;;  %v9174_v43 = vld [vmem:[%s9586_s4 + $0xa0] sm:$0xff] }
0x11c9   : > { %v4389_v38 = vmul.f32 %v4376_v32, %v9090_v36  ;;  %v3992_v36 = vadd.f32 %v3983_v62, %v8266_v19  ;;  %4566 = vmatpush.msrb.mxu1 %v9174_v43  ;;  %v9184_v32 = vld [vmem:[%s9586_s4 + $0x90] sm:$0xff] }
0x11ca   : > { %v4380_v5 = vmul.f32 0.5, %v4379_v22  ;;  %v6211_v22 = vpack.i.bf16 %v9174_v43, %v9168_v23 }
0x11cb   : > { %v4394_v21 = vmul.f32 %v9104_v11, %v4389_v38  ;;  %v4014_v45 = vsel %vm495_vm12, %v3992_v36, 0.0  ;;  %v9189_v38 = vld [vmem:[%s9586_s4 + $0x80] sm:$0xff]  ;;  %4567 = vmatpush.msrb.mxu1 %v9184_v32 }
0x11cc   : > { %v4381_v33 = vsub.f32 1.5, %v4380_v5 }
0x11cd   : > { %v4399_v61 = vadd.f32 %v4396_v55, %v4394_v21  ;;  %v6216_v21 = vpack.i.bf16 %v9189_v38, %v9184_v32  ;;  %4568 = vmatpush.msrb.mxu1 %v9189_v38 }
0x11ce   : > { %v4382_v63 = vmul.f32 %v6564_v15, %v4381_v33 }
0x11cf   : > { %v4409_v58 = vsel %vm495_vm12, %v4399_v61, 0.0 }
0x11d0   : > { %4410 = vadd.xlane.f32.xlu1 %v4409_v58  ;;  %v4386_v2 = vsel %vm4385_vm7, %v6564_v15, %v4382_v63 }
0x11d1   : > { %v4390_v25 = vmul.f32 %v4386_v2, %v9096_v35 }
0x11d3   : > { %v4395_v18 = vmul.f32 %v9104_v11, %v4390_v25 }
0x11d5   : > { %v4400_v8 = vadd.f32 %v4396_v55, %v4395_v18 }
0x11d7   : > { %v4412_v26 = vsel %vm495_vm12, %v4400_v8, 0.0 }
0x11d8   : > { %4015 = vadd.xlane.f32.xlu1 %v4014_v45  ;;  %4413 = vadd.xlane.f32.xlu0 %v4412_v26 }
0x11e2   : > { %v4405_v44 = vpop.xlane.xlu2 %4404 }
0x11e3   : > { %v4415_v46 = vmul.f32 %v4405_v44, %v6943_v31 }
0x11e5   : > { %v9128_v20 = vsub.f32 %v9108_v52, %v4415_v46 }
0x11e7   : > { %v4423_v35 = vmul.f32 %v9128_v20, %v9128_v20 }
0x11e9   : > { %v4427_v19 = vsel %vm495_vm12, %v4423_v35, 0.0 }
0x11ea   : > { %4428 = vadd.xlane.f32.xlu1 %v4427_v19 }
0x123b   : > { %v4408_v11 = vpop.xlane.xlu0 %4407 }
0x123c   : > { %v4416_v1 = vmul.f32 %v4408_v11, %v6943_v31 }
0x123e   : > { %v9134_v12 = vsub.f32 %v4398_v57, %v4416_v1 }
0x1240   : > { %v4424_v55 = vmul.f32 %v9134_v12, %v9134_v12 }
0x1242   : > { %v4430_v30 = vsel %vm495_vm12, %v4424_v55, 0.0 }
0x1243   : > { %4431 = vadd.xlane.f32.xlu2 %v4430_v30  ;;  %v4411_v34 = vpop.xlane.xlu1 %4410 }
0x1244   : > { %v4417_v52 = vmul.f32 %v4411_v34, %v6943_v31 }
0x1246   : > { %v9140_v0 = vsub.f32 %v4399_v61, %v4417_v52 }
0x1248   : > { %v4425_v60 = vmul.f32 %v9140_v0, %v9140_v0 }
0x124a   : > { %v4433_v16 = vsel %vm495_vm12, %v4425_v60, 0.0 }
0x124b   : > { %v4016_v59 = vpop.xlane.xlu1 %4015  ;;  %4434 = vadd.xlane.f32.xlu0 %v4433_v16  ;;  %v4414_v39 = vpop.xlane.xlu0 %4413 }
0x124c   : > { %v4024_v6 = vmul.f32 %v4016_v59, %v6943_v31  ;;  %v4418_v28 = vmul.f32 %v4414_v39, %v6943_v31 }
0x124e   : > { %v9147_v17 = vsub.f32 %v3992_v36, %v4024_v6  ;;  %v9149_v49 = vsub.f32 %v4400_v8, %v4418_v28 }
0x1250   : > { %v4040_v9 = vmul.f32 %v9147_v17, %v9147_v17  ;;  %v4426_v56 = vmul.f32 %v9149_v49, %v9149_v49 }
0x1252   : > { %v4062_v37 = vsel %vm495_vm12, %v4040_v9, 0.0  ;;  %v4436_v29 = vsel %vm495_vm12, %v4426_v56, 0.0  ;;  %v6233_v9 = vld [vmem:[%s9585_s3 + $0x2] ss:$0 sm:$0xff] }
0x1253   : > { %4063 = vadd.xlane.f32.xlu0 %v4062_v37  ;;  %4437 = vadd.xlane.f32.xlu2 %v4436_v29 }
0x125d   : > { %v4429_v48 = vpop.xlane.xlu1 %4428 }
0x125e   : > { %v4439_v3 = vmul.f32 %v4429_v48, %v6943_v31 }
0x1260   : > { %v9158_v50 = vadd.f32 1e-05, %v4439_v3 }
0x1262   : > { %6565 = vrsqrt.f32 %v9158_v50  ;;  %vm4453_vm14 = vweird.f32 %v9158_v50 }
0x1268   : > { %v9163_v41 = vpop.eup %6565 }
0x1269   : > { %v4448_v47 = vmul.f32 %v9163_v41, %v9158_v50  ;;  %vm4454_vm5 = vweird.f32 %v9163_v41 }
0x126a   : > { %vm4455_vm1 = vmor %vm4453_vm14, %vm4454_vm5  ;;  %vm4514_vm5 = vcmask 1042432   ;;  %vm4616_vm14 = vcmask 1043456  }
0x126b   : > { %v4449_v63 = vmul.f32 %v9163_v41, %v4448_v47 }
0x126d   : > { %v4450_v45 = vmul.f32 0.5, %v4449_v63  ;;  %v4516_v63 = vstv %s9208_s13  ;;  %s9665_s13 = smov 72  }
0x126f   : > { %v4451_v35 = vsub.f32 1.5, %v4450_v45 }
0x1271   : > { %v4452_v52 = vmul.f32 %v9163_v41, %v4451_v35 }
0x1273   : > { %v4456_v37 = vsel %vm4455_vm1, %v9163_v41, %v4452_v52  ;;  %vm4519_vm1 = vcmp.lt.s32.totalorder %v6893_v40, %v4516_v63  ;;  %v9667_v52 = vmov -1e+09  }
0x1274   : > { %v4487_v50 = vmul.f32 %v4456_v37, %v9128_v20 }
0x12b6   : > { %v4432_v7 = vpop.xlane.xlu2 %4431 }
0x12b7   : > { %v4440_v13 = vmul.f32 %v4432_v7, %v6943_v31 }
0x12b9   : > { %v4444_v51 = vadd.f32 1e-05, %v4440_v13 }
0x12bb   : > { %6567 = vrsqrt.f32 %v4444_v51  ;;  %vm4463_vm8 = vweird.f32 %v4444_v51 }
0x12be   : > { %v4435_v4 = vpop.xlane.xlu0 %4434 }
0x12bf   : > { %v4441_v53 = vmul.f32 %v4435_v4, %v6943_v31 }
0x12c1   : > { %v6568_v15 = vpop.eup %6567  ;;  %v4445_v57 = vadd.f32 1e-05, %v4441_v53 }
0x12c2   : > { %v4458_v54 = vmul.f32 %v6568_v15, %v4444_v51  ;;  %vm4464_vm0 = vweird.f32 %v6568_v15 }
0x12c3   : > { %6569 = vrsqrt.f32 %v4445_v57  ;;  %vm4465_vm9 = vmor %vm4463_vm8, %vm4464_vm0  ;;  %vm4473_vm11 = vweird.f32 %v4445_v57 }
0x12c4   : > { %v4459_v5 = vmul.f32 %v6568_v15, %v4458_v54  ;;  %v4492_v54 = vmul.f32 %v6233_v9, %v4487_v50 }
0x12c6   : > { %v4460_v27 = vmul.f32 0.5, %v4459_v5  ;;  %v4064_v33 = vpop.xlane.xlu0 %4063  ;;  %v4438_v61 = vpop.xlane.xlu2 %4437 }
0x12c7   : > { %v4072_v62 = vmul.f32 %v4064_v33, %v6943_v31  ;;  %v4442_v58 = vmul.f32 %v4438_v61, %v6943_v31 }
0x12c8   : > { %v4461_v25 = vsub.f32 1.5, %v4460_v27 }
0x12c9   : > { %v6570_v2 = vpop.eup %6569  ;;  %v4080_v36 = vadd.f32 1e-05, %v4072_v62  ;;  %v4446_v18 = vadd.f32 1e-05, %v4442_v58 }
0x12ca   : > { %v4468_v8 = vmul.f32 %v6570_v2, %v4445_v57  ;;  %v4462_v44 = vmul.f32 %v6568_v15, %v4461_v25  ;;  %vm4474_vm10 = vweird.f32 %v6570_v2 }
0x12cb   : > { %6571 = vrsqrt.f32 %v4080_v36  ;;  %vm4475_vm13 = vmor %vm4473_vm11, %vm4474_vm10  ;;  %vm4157_vm7 = vweird.f32 %v4080_v36  ;;  %vm4483_vm8 = vweird.f32 %v4446_v18  ;;  %vm4510_vm10 = vcmask 1040384  }
0x12cc   : > { %v4469_v26 = vmul.f32 %v6570_v2, %v4468_v8  ;;  %6573 = vrsqrt.f32 %v4446_v18  ;;  %v4466_v1 = vsel %vm4465_vm9, %v6568_v15, %v4462_v44  ;;  %vm4512_vm11 = vcmask 1041408  }
0x12cd   : > { %v4488_v16 = vmul.f32 %v4466_v1, %v9134_v12 }
0x12ce   : > { %v4470_v46 = vmul.f32 0.5, %v4469_v26 }
0x12cf   : > { %v4493_v48 = vmul.f32 %v6233_v9, %v4488_v16 }
0x12d0   : > { %v4471_v19 = vsub.f32 1.5, %v4470_v46 }
0x12d1   : > { %v6572_v11 = vpop.eup %6571 }
0x12d2   : > { %v6574_v55 = vpop.eup %6573  ;;  %v4472_v30 = vmul.f32 %v6570_v2, %v4471_v19  ;;  %v4152_v34 = vmul.f32 %v6572_v11, %v4080_v36  ;;  %vm4158_vm4 = vweird.f32 %v6572_v11 }
0x12d3   : > { %v4478_v60 = vmul.f32 %v6574_v55, %v4446_v18  ;;  %vm4484_vm6 = vweird.f32 %v6574_v55  ;;  %vm4159_vm0 = vmor %vm4157_vm7, %vm4158_vm4  ;;  %vm4604_vm4 = vcmask 27648   ;;  %vm4881_vm7 = vcmask 257024  }
0x12d4   : > { %v4476_v59 = vsel %vm4475_vm13, %v6570_v2, %v4472_v30  ;;  %v4153_v39 = vmul.f32 %v6572_v11, %v4152_v34  ;;  %vm4485_vm9 = vmor %vm4483_vm8, %vm4484_vm6  ;;  %vm4517_vm13 = vcmp.lt.s32.totalorder %v7493_v24, %v4516_v63  ;;  %vm4612_vm6 = vcmask 31744  }
0x12d5   : > { %v4489_v6 = vmul.f32 %v4476_v59, %v9140_v0  ;;  %v4479_v28 = vmul.f32 %v6574_v55, %v4478_v60  ;;  %v6234_v0 = vld [vmem:[%s9585_s3 + $0x3] ss:$0 sm:$0xff]  ;;  %v9259_v60 = vsel %vm4519_vm1, 0.0, %v9667_v52 }
0x12d6   : > { %v4154_v56 = vmul.f32 0.5, %v4153_v39  ;;  %v4498_v4 = vadd.f32 %v6234_v0, %v4493_v48  ;;  %v4497_v62 = vadd.f32 %v6234_v0, %v4492_v54 }
0x12d7   : > { %v4480_v29 = vmul.f32 0.5, %v4479_v28  ;;  %v4494_v12 = vmul.f32 %v6233_v9, %v4489_v6 }
0x12d8   : > { %v4155_v3 = vsub.f32 1.5, %v4154_v56  ;;  %v4502_v27 = vrot.slane %v4498_v4, 7 }
0x12d9   : > { %v4481_v7 = vsub.f32 1.5, %v4480_v29  ;;  %v4499_v41 = vadd.f32 %v6234_v0, %v4494_v12 }
0x12da   : > { %v4156_v13 = vmul.f32 %v6572_v11, %v4155_v3  ;;  %v4511_v2 = vsel %vm4510_vm10, %v4497_v62, %v4502_v27 }
0x12db   : > { %v4482_v51 = vmul.f32 %v6574_v55, %v4481_v7  ;;  %v4505_v33 = vrot.slane %v4499_v41, 6 }
0x12dc   : > { %v4160_v53 = vsel %vm4159_vm0, %v6572_v11, %v4156_v13 }
0x12dd   : > { %v4168_v15 = vmul.f32 %v4160_v53, %v9147_v17  ;;  %v4486_v57 = vsel %vm4485_vm9, %v6574_v55, %v4482_v51 }
0x12de   : > { %v4490_v47 = vmul.f32 %v4486_v57, %v9149_v49  ;;  %v4513_v49 = vsel %vm4512_vm11, %v4511_v2, %v4505_v33 }
0x12df   : > { %v4177_v5 = vmul.f32 %v8954_v14, %v4168_v15 }
0x12e0   : > { %v4495_v20 = vmul.f32 %v6233_v9, %v4490_v47 }
0x12e1   : > { %v4186_v61 = vadd.f32 %v8957_v10, %v4177_v5  ;;  %v9228_v10 = vld [vmem:[%s9588_s6 + $0x10] sm:$0xff] }
0x12e2   : > { %v4500_v58 = vadd.f32 %v6234_v0, %v4495_v20  ;;  %v4549_v36 = vperm.slane %v9228_v10, 0 }
0x12e3   : > { %5853 = vmatmul.msk.f32.gmra.mxu2 %vm495_vm12, %v4186_v61 }
0x12e4   : > { %v4508_v17 = vrot.slane %v4500_v58, 5 }
0x12e6   : > { %v4515_v25 = vsel %vm4514_vm5, %v4513_v49, %v4508_v17 }
0x12e7   : > { %v9221_v14 = vsel %vm4517_vm13, %v4515_v25, 0.0 }
0x12e8   : > { %5879 = vmatmul.msk.f32.vlgmr.msrb.gmra.mxu1 %vm495_vm12, %v9221_v14 }
0x1365   : > { %v4570_v18 = vpop.f32.mrf.mxu1 }
0x1366   : > { %v9231_v8 = vadd.f32 %v4570_v18, %v4549_v36  ;;  %v4250_v45 = vpop.f32.mrf.mxu2 }
0x1367   : > { %v4251_v24 = vadd.f32 %v4250_v45, %v9060_v42 }
0x1368   : > { %4641 = vrot.lane.b32.xlu2 %v9231_v8, %s9662_s11  ;;  %4575 = vrot.lane.b32.xlu1 %v9231_v8, %s9663_s1  ;;  %v4573_v26 = vmul.f32 0.35355338, %v9231_v8 }
0x1369   : > { %v4260_v44 = vmax.f32 %v4251_v24, 0.0 }
0x136a   : > { %4639 = vrot.lane.b32.xlu0 %v4573_v26, %s9664_s2 }
0x136b   : > { %4296 = vmatmul.f32.gmra.mxu0 %v4260_v44 }
0x1370   : > { %4765 = vrot.lane.b32.xlu2 %v9231_v8, %s9665_s13  ;;  %4701 = vrot.lane.b32.xlu1 %v4573_v26, %s9652_s12 }
0x1372   : > { %4703 = vrot.lane.b32.xlu0 %v9231_v8, %s9666_s25 }
0x137a   : > { %4763 = vrot.lane.b32.xlu0 %v4573_v26, %s9653_s16 }
0x1382   : > { %4610 = vrot.lane.b32.xlu0 %v9231_v8, %s9655_s24 }
0x13c2   : > { %v4642_v42 = vpop.permute.xlu2 %4641 }
0x13c3   : > { %5884 = vmatpush.xpose.msk.msra.mxu3 %vm979_vm15, %v4642_v42 }
0x13ca   : > { %v4766_v11 = vpop.permute.xlu2 %4765 }
0x13da   : > { %v4576_v46 = vpop.permute.xlu1 %4575 }
0x13db   : > { %5880 = vmatpush.xpose.msk.msrb.mxu0 %vm979_vm15, %v4576_v46  ;;  %v4840_v46 = vperm.slane %v9228_v10, 2 }
0x13dc   : > { %v4640_v35 = vpop.permute.xlu0 %4639 }
0x13dd   : > { %5885 = vmatmul.msk.f32.vlgmr.msra.gmra.mxu3 %vm979_vm15, %v4640_v35 }
0x13de   : > { %5881 = vmatmul.msk.f32.vlgmr.msrb.gmra.mxu0 %vm979_vm15, %v4573_v26 }
0x13e2   : > { %v4702_v1 = vpop.permute.xlu1 %4701 }
0x13e4   : > { %v4704_v19 = vpop.permute.xlu0 %4703 }
0x13e5   : > { %5888 = vmatpush.xpose.msk.msrb.mxu3 %vm979_vm15, %v4704_v19 }
0x13e8   : > { %5889 = vmatmul.msk.f32.vlgmr.msrb.gmra.mxu3 %vm979_vm15, %v4702_v1  ;;  %v4297_v55 = vpop.f32.mrf.mxu0 }
0x13e9   : > { %5892 = vmatpush.xpose.msk.msra.mxu3 %vm979_vm15, %v4766_v11 }
0x13ec   : > { %v4764_v30 = vpop.permute.xlu0 %4763 }
0x13f0   : > { %5893 = vmatmul.msk.f32.vlgmr.msra.gmra.mxu3 %vm979_vm15, %v4764_v30 }
0x13f4   : > { %v4611_v34 = vpop.permute.xlu0 %4610 }
0x13f5   : > { %5882 = vmatpush.msk.msra.mxu1 %vm4616_vm14, %v4611_v34 }
0x145b   : > { %v4599_v16 = vpop.f32.mrf.mxu0 }
0x145c   : > { %v4600_v59 = vadd.f32 %v4599_v16, %v9259_v60 }
0x145e   : > { %v4602_v39 = vmul.f32 1.442695, %v4600_v59  ;;  %v5861_v59 = vld [vmem:[%s9586_s4 + $0xb8] sm:$0xff] }
0x1460   : > { %6575 = vpow2.f32 %v4602_v39  ;;  %v4664_v6 = vpop.f32.mrf.mxu3  ;;  %v5857_v39 = vld [vmem:[%s9586_s4 + $0x98] sm:$0xff] }
0x1461   : > { %v4665_v28 = vadd.f32 %v4664_v6, %v9259_v60  ;;  %v5855_v6 = vld [vmem:[%s9586_s4 + $0x88] sm:$0xff] }
0x1463   : > { %v4667_v9 = vmul.f32 1.442695, %v4665_v28  ;;  %v5877_v28 = vld [vmem:[%s9587_s5 + $0x178] sm:$0xff] }
0x1464   : > { %4934 = vmatpush.msrb.mxu2 %v5877_v28 }
0x1465   : > { %6577 = vpow2.f32 %v4667_v9  ;;  %v5876_v9 = vld [vmem:[%s9587_s5 + $0x170] sm:$0xff] }
0x1466   : > { %v6576_v56 = vpop.eup %6575  ;;  %4935 = vmatpush.msrb.mxu2 %v5876_v9  ;;  %v4979_v9 = vperm.slane %v9228_v10, 7 }
0x1467   : > { %v4605_v37 = vsel %vm4604_vm4, %v6576_v56, 0.0 }
0x1468   : > { %4606 = vadd.xlane.f32.xlu1 %v4605_v37 }
0x146b   : > { %v6578_v29 = vpop.eup %6577  ;;  %v4726_v40 = vpop.f32.mrf.mxu3 }
0x146c   : > { %v4727_v48 = vadd.f32 %v4726_v40, %v9259_v60  ;;  %v4669_v3 = vsel %vm4604_vm4, %v6578_v29, 0.0  ;;  %v5874_v40 = vld [vmem:[%s9587_s5 + $0x160] sm:$0xff] }
0x146d   : > { %4670 = vadd.xlane.f32.xlu2 %v4669_v3  ;;  %v5873_v3 = vld [vmem:[%s9587_s5 + $0x158] sm:$0xff] }
0x146e   : > { %v4729_v12 = vmul.f32 1.442695, %v4727_v48 }
0x1470   : > { %6579 = vpow2.f32 %v4729_v12  ;;  %v5872_v12 = vld [vmem:[%s9587_s5 + $0x150] sm:$0xff] }
0x1473   : > { %v4788_v7 = vpop.f32.mrf.mxu3 }
0x1474   : > { %v4789_v0 = vadd.f32 %v4788_v7, %v9259_v60  ;;  %v5871_v7 = vld [vmem:[%s9587_s5 + $0x148] sm:$0xff] }
0x1476   : > { %v6580_v50 = vpop.eup %6579  ;;  %v4791_v13 = vmul.f32 1.442695, %v4789_v0  ;;  %v5870_v0 = vld [vmem:[%s9587_s5 + $0x140] sm:$0xff] }
0x1477   : > { %v4731_v51 = vsel %vm4604_vm4, %v6580_v50, 0.0 }
0x1478   : > { %6581 = vpow2.f32 %v4791_v13  ;;  %4732 = vadd.xlane.f32.xlu0 %v4731_v51  ;;  %v5869_v13 = vld [vmem:[%s9587_s5 + $0x138] sm:$0xff] }
0x147e   : > { %v6582_v4 = vpop.eup %6581 }
0x147f   : > { %v4793_v53 = vsel %vm4604_vm4, %v6582_v4, 0.0 }
0x1480   : > { %4794 = vadd.xlane.f32.xlu2 %v4793_v53 }
0x1481   : > { %4674 = vrot.lane.b32.xlu1 %v9231_v8, %s9654_s23 }
0x1489   : > { %6212 = vrot.lane.b32.xlu1 %v6211_v22, %s9658_s19 }
0x148c   : > { %4798 = vrot.lane.b32.xlu0 %v9231_v8, %s9657_s18 }
0x1498   : > { %4736 = vrot.lane.b32.xlu2 %v9231_v8, %s9656_s17 }
0x14a0   : > { %6217 = vrot.lane.b32.xlu2 %v6216_v21, %s9658_s19 }
0x14db   : > { %v4607_v41 = vpop.xlane.xlu1 %4606 }
0x14dc   : > { %6583 = vrcp.f32 %v4607_v41  ;;  %v5867_v41 = vld [vmem:[%s9587_s5 + $0x128] sm:$0xff] }
0x14e0   : > { %v4671_v23 = vpop.xlane.xlu2 %4670 }
0x14e1   : > { %6585 = vrcp.f32 %v4671_v23 }
0x14e2   : > { %v6584_v15 = vpop.eup %6583 }
0x14e3   : > { %v4609_v57 = vmul.f32 %v6584_v15, %v6576_v56  ;;  %v5875_v56 = vld [vmem:[%s9587_s5 + $0x168] sm:$0xff] }
0x14e4   : > { %4936 = vmatpush.msrb.mxu2 %v5875_v56 }
0x14e5   : > { %5883 = vmatmul.msk.f32.vlgmr.msra.gmra.mxu1 %vm4612_vm6, %v4609_v57  ;;  %v5866_v57 = vld [vmem:[%s9587_s5 + $0x120] sm:$0xff] }
0x14e6   : > { %4937 = vmatpush.msrb.mxu2 %v5874_v40  ;;  %v9409_v40 = vld [vmem:[%s9588_s6 + $0x18] sm:$0xff] }
0x14e7   : > { %v6586_v22 = vpop.eup %6585 }
0x14e8   : > { %v4673_v54 = vmul.f32 %v6586_v22, %v6578_v29  ;;  %4938 = vmatpush.msrb.mxu2 %v5873_v3 }
0x14ea   : > { %4939 = vmatpush.msrb.mxu2 %v5872_v12 }
0x14eb   : > { %v4733_v43 = vpop.xlane.xlu0 %4732 }
0x14ec   : > { %6587 = vrcp.f32 %v4733_v43  ;;  %4940 = vmatpush.msrb.mxu2 %v5871_v7  ;;  %v5865_v43 = vld [vmem:[%s9587_s5 + $0x118] sm:$0xff] }
0x14ee   : > { %4941 = vmatpush.msrb.mxu2 %v5870_v0 }
0x14f0   : > { %4942 = vmatpush.msrb.mxu2 %v5869_v13 }
0x14f2   : > { %v6588_v32 = vpop.eup %6587 }
0x14f3   : > { %v4795_v47 = vpop.xlane.xlu2 %4794  ;;  %v4675_v5 = vpop.permute.xlu1 %4674  ;;  %v4735_v38 = vmul.f32 %v6588_v32, %v6580_v50 }
0x14f4   : > { %5886 = vmatpush.msk.msrb.mxu1 %vm4616_vm14, %v4675_v5  ;;  %6589 = vrcp.f32 %v4795_v47  ;;  %v4906_v5 = vperm.slane %v9228_v10, 5 }
0x14f5   : > { %5887 = vmatmul.msk.f32.vlgmr.msrb.gmra.mxu1 %vm4612_vm6, %v4673_v54  ;;  %v4904_v54 = vperm.slane %v9228_v10, 4 }
0x14fa   : > { %v6590_v20 = vpop.eup %6589 }
0x14fb   : > { %v4737_v21 = vpop.permute.xlu2 %4736  ;;  %v4797_v33 = vmul.f32 %v6590_v20, %v6582_v4  ;;  %v6213_v61 = vpop.permute.xlu1 %6212  ;;  %v5868_v4 = vld [vmem:[%s9587_s5 + $0x130] sm:$0xff]  ;;  %v5863_v20 = vld [vmem:[%s9587_s5 + $0x108] sm:$0xff] }
0x14fc   : > { %5890 = vmatpush.msk.msra.mxu1 %vm4616_vm14, %v4737_v21  ;;  %v6215_v63 = vunpack.i.h.bf16 %v6213_v61  ;;  %v6214_v62 = vunpack.i.l.bf16 %v6213_v61  ;;  %4943 = vmatpush.msrb.mxu2 %v5868_v4  ;;  %v4908_v61 = vperm.slane %v9228_v10, 1 }
0x14fd   : > { %5891 = vmatmul.msk.f32.vlgmr.msra.gmra.mxu1 %vm4612_vm6, %v4735_v38 }
0x14fe   : > { %v4799_v27 = vpop.permute.xlu0 %4798  ;;  %4872 = vmatpush.msrb.mxu3 %v6214_v62  ;;  %4944 = vmatpush.msrb.mxu2 %v5867_v41 }
0x14ff   : > { %5894 = vmatpush.msk.msrb.mxu1 %vm4616_vm14, %v4799_v27  ;;  %v5864_v27 = vld [vmem:[%s9587_s5 + $0x110] sm:$0xff] }
0x1500   : > { %4873 = vmatpush.msrb.mxu3 %v6215_v63  ;;  %4945 = vmatpush.msrb.mxu2 %v5866_v57 }
0x1501   : > { %4924 = vmatpush.msra.mxu1 %v5861_v59 }
0x1502   : > { %4946 = vmatpush.msrb.mxu2 %v5865_v43 }
0x1503   : > { %v6218_v25 = vpop.permute.xlu2 %6217 }
0x1504   : > { %v6220_v36 = vunpack.i.h.bf16 %v6218_v25  ;;  %v6219_v18 = vunpack.i.l.bf16 %v6218_v25  ;;  %4947 = vmatpush.msrb.mxu2 %v5864_v27 }
0x1505   : > { %5895 = vmatmul.msk.f32.vlgmr.msrb.gmra.mxu1 %vm4612_vm6, %v4797_v33  ;;  %v5862_v33 = vld [vmem:[%s9587_s5 + $0x100] sm:$0xff] }
0x1506   : > { %4874 = vmatpush.msrb.mxu3 %v6219_v18  ;;  %4948 = vmatpush.msrb.mxu2 %v5863_v20 }
0x1508   : > { %4875 = vmatpush.msrb.mxu3 %v6220_v36  ;;  %4949 = vmatpush.msrb.mxu2 %v5862_v33 }
0x1562   : > { %v4636_v58 = vpop.f32.mrf.mxu1 }
0x1572   : > { %v4698_v17 = vpop.f32.mrf.mxu1 }
0x1573   : > { %4826 = vrot.lane.b32.xlu1 %v4698_v17, %s9659_s21  ;;  %v4933_v17 = vperm.slane %v9228_v10, 3 }
0x157a   : > { %v4760_v2 = vpop.f32.mrf.mxu1 }
0x157b   : > { %4830 = vrot.lane.b32.xlu0 %v4760_v2, %s9660_s20 }
0x1582   : > { %v4822_v49 = vpop.f32.mrf.mxu1 }
0x1583   : > { %4834 = vrot.lane.b32.xlu1 %v4822_v49, %s9661_s22 }
0x15e5   : > { %v4827_v8 = vpop.permute.xlu1 %4826 }
0x15e6   : > { %v4837_v24 = vsel %vm979_vm15, %v4636_v58, %v4827_v8 }
0x15ed   : > { %v4831_v45 = vpop.permute.xlu0 %4830 }
0x15ee   : > { %v4838_v26 = vsel %vm2061_vm2, %v4837_v24, %v4831_v45 }
0x15f5   : > { %v4835_v44 = vpop.permute.xlu1 %4834 }
0x15f6   : > { %v4839_v42 = vsel %vm2070_vm3, %v4838_v26, %v4835_v44  ;;  %v9374_v44 = vld [vmem:[%s9586_s4 + $0xf0] sm:$0xff] }
0x15f7   : > { %5896 = vmatmul.msk.f32.vlgmr.msrb.gmra.mxu3 %vm495_vm12, %v4839_v42  ;;  %v9380_v42 = vld [vmem:[%s9586_s4 + $0xe0] sm:$0xff] }
0x15f8   : > { %5025 = vmatpush.msra.mxu3 %v9374_v44 }
0x15fa   : > { %5026 = vmatpush.msra.mxu3 %v9380_v42 }
0x167a   : > { %v4877_v35 = vpop.f32.mrf.mxu3 }
0x167b   : > { %v4878_v19 = vadd.f32 %v4877_v35, %v4840_v46  ;;  %v9386_v46 = vld [vmem:[%s9586_s4 + $0xd0] sm:$0xff]  ;;  %v6221_v35 = vpack.i.bf16 %v9380_v42, %v9374_v44 }
0x167c   : > { %5027 = vmatpush.msra.mxu3 %v9386_v46 }
0x167d   : > { %v4880_v11 = vadd.f32 %v4878_v19, %v9221_v14  ;;  %v5859_v14 = vld [vmem:[%s9586_s4 + $0xa8] sm:$0xff]  ;;  %v9394_v19 = vld [vmem:[%s9586_s4 + $0xc0] sm:$0xff] }
0x167e   : > { %4925 = vmatpush.msra.mxu1 %v5859_v14  ;;  %5028 = vmatpush.msra.mxu3 %v9394_v19 }
0x167f   : > { %v4882_v1 = vsel %vm4881_vm7, %v4880_v11, 0.0 }
0x1680   : > { %4883 = vadd.xlane.f32.xlu2 %v4882_v1  ;;  %4926 = vmatpush.msra.mxu1 %v5857_v39 }
0x1682   : > { %4927 = vmatpush.msra.mxu1 %v5855_v6  ;;  %v4977_v6 = vperm.slane %v9228_v10, 6 }
0x16f3   : > { %v4884_v55 = vpop.xlane.xlu2 %4883 }
0x16f4   : > { %v4885_v30 = vmul.f32 %v4884_v55, %v6943_v31 }
0x16f6   : > { %v4886_v34 = vsub.f32 %v4880_v11, %v4885_v30  ;;  %v6226_v11 = vpack.i.bf16 %v9394_v19, %v9386_v46 }
0x16f8   : > { %v4887_v52 = vmul.f32 %v4886_v34, %v4886_v34 }
0x16fa   : > { %v4888_v16 = vsel %vm4881_vm7, %v4887_v52, 0.0 }
0x16fb   : > { %4889 = vadd.xlane.f32.xlu0 %v4888_v16 }
0x176e   : > { %v4890_v37 = vpop.xlane.xlu0 %4889 }
0x176f   : > { %v4891_v29 = vmul.f32 %v4890_v37, %v6943_v31 }
0x1771   : > { %v4892_v48 = vadd.f32 1e-05, %v4891_v29 }
0x1773   : > { %6591 = vrsqrt.f32 %v4892_v48  ;;  %vm4899_vm8 = vweird.f32 %v4892_v48 }
0x1779   : > { %v6592_v50 = vpop.eup %6591 }
0x177a   : > { %v4894_v51 = vmul.f32 %v6592_v50, %v4892_v48  ;;  %vm4900_vm0 = vweird.f32 %v6592_v50  ;;  %v5009_v48 = vperm.slane %v9409_v40, 0 }
0x177b   : > { %vm4901_vm9 = vmor %vm4899_vm8, %vm4900_vm0 }
0x177c   : > { %v4895_v53 = vmul.f32 %v6592_v50, %v4894_v51 }
0x177e   : > { %v4896_v15 = vmul.f32 0.5, %v4895_v53 }
0x1780   : > { %v4897_v23 = vsub.f32 1.5, %v4896_v15 }
0x1782   : > { %v4898_v22 = vmul.f32 %v6592_v50, %v4897_v23 }
0x1784   : > { %v4902_v47 = vsel %vm4901_vm9, %v6592_v50, %v4898_v22 }
0x1785   : > { %v4903_v32 = vmul.f32 %v4902_v47, %v4886_v34 }
0x1787   : > { %v4905_v38 = vmul.f32 %v4904_v54, %v4903_v32 }
0x1789   : > { %v4907_v21 = vadd.f32 %v4906_v5, %v4905_v38 }
0x178b   : > { %5897 = vmatmul.msk.f32.vlgmr.msra.gmra.mxu1 %vm495_vm12, %v4907_v21 }
0x1808   : > { %v4929_v63 = vpop.f32.mrf.mxu1 }
0x1809   : > { %v4930_v62 = vadd.f32 %v4929_v63, %v4908_v61 }
0x180b   : > { %v4932_v58 = vmax.f32 %v4930_v62, 0.0 }
0x180d   : > { %4950 = vmatmul.f32.vlgmr.msrb.gmra.mxu2 %v4932_v58 }
0x1890   : > { %v4951_v2 = vpop.f32.mrf.mxu2 }
0x1891   : > { %v4952_v49 = vadd.f32 %v4951_v2, %v4933_v17 }
0x1893   : > { %v4954_v25 = vadd.f32 %v4952_v49, %v4907_v21 }
0x1895   : > { %v4955_v36 = vsel %vm4881_vm7, %v4954_v25, 0.0 }
0x1896   : > { %4956 = vadd.xlane.f32.xlu1 %v4955_v36 }
0x1909   : > { %v4957_v18 = vpop.xlane.xlu1 %4956 }
0x190a   : > { %v4958_v8 = vmul.f32 %v4957_v18, %v6943_v31 }
0x190c   : > { %v4959_v45 = vsub.f32 %v4954_v25, %v4958_v8 }
0x190e   : > { %v4960_v24 = vmul.f32 %v4959_v45, %v4959_v45 }
0x1910   : > { %v4961_v26 = vsel %vm4881_vm7, %v4960_v24, 0.0 }
0x1911   : > { %4962 = vadd.xlane.f32.xlu2 %v4961_v26 }
0x1984   : > { %v4963_v1 = vpop.xlane.xlu2 %4962 }
0x1985   : > { %v4964_v55 = vmul.f32 %v4963_v1, %v6943_v31 }
0x1987   : > { %v4965_v30 = vadd.f32 1e-05, %v4964_v55 }
0x1989   : > { %6593 = vrsqrt.f32 %v4965_v30  ;;  %vm4972_vm11 = vweird.f32 %v4965_v30 }
0x198f   : > { %v6594_v34 = vpop.eup %6593 }
0x1990   : > { %v4967_v52 = vmul.f32 %v6594_v34, %v4965_v30  ;;  %vm4973_vm10 = vweird.f32 %v6594_v34 }
0x1991   : > { %vm4974_vm5 = vmor %vm4972_vm11, %vm4973_vm10 }
0x1992   : > { %v4968_v16 = vmul.f32 %v6594_v34, %v4967_v52 }
0x1994   : > { %v4969_v59 = vmul.f32 0.5, %v4968_v16 }
0x1996   : > { %v4970_v14 = vsub.f32 1.5, %v4969_v59 }
0x1998   : > { %v4971_v39 = vmul.f32 %v6594_v34, %v4970_v14 }
0x199a   : > { %v4975_v28 = vsel %vm4974_vm5, %v6594_v34, %v4971_v39 }
0x199b   : > { %v4976_v56 = vmul.f32 %v4975_v28, %v4959_v45 }
0x199d   : > { %v4978_v37 = vmul.f32 %v4977_v6, %v4976_v56 }
0x199f   : > { %v9402_v29 = vadd.f32 %v4979_v9, %v4978_v37 }
0x19a1   : > { %5923 = vmatmul.msk.f32.vlgmr.msra.gmra.mxu3 %vm495_vm12, %v9402_v29 }
0x1a24   : > { %v5030_v3 = vpop.f32.mrf.mxu3 }
0x1a25   : > { %v5031_v12 = vadd.f32 %v5030_v3, %v5009_v48 }
0x1a27   : > { %5098 = vrot.lane.b32.xlu1 %v5031_v12, %s9662_s11  ;;  %5035 = vrot.lane.b32.xlu0 %v5031_v12, %s9663_s1  ;;  %v5033_v10 = vmul.f32 0.35355338, %v5031_v12 }
0x1a29   : > { %5096 = vrot.lane.b32.xlu2 %v5033_v10, %s9664_s2 }
0x1a2f   : > { %5160 = vrot.lane.b32.xlu0 %v5031_v12, %s9666_s25  ;;  %5220 = vrot.lane.b32.xlu1 %v5033_v10, %s9653_s16 }
0x1a31   : > { %5158 = vrot.lane.b32.xlu2 %v5033_v10, %s9652_s12 }
0x1a37   : > { %5222 = vrot.lane.b32.xlu0 %v5031_v12, %s9665_s13 }
0x1a3f   : > { %5069 = vrot.lane.b32.xlu0 %v5031_v12, %s9655_s24  ;;  %s5481_s24 = sshll.u32 %s5477_s14, 4  ;;  %s5482_s24 = int_to_ptr.hbm [resolvable:$true] %s5481_s24 }
0x1a83   : > { %v5097_v50 = vpop.permute.xlu2 %5096 }
0x1a8b   : > { %v5159_v51 = vpop.permute.xlu2 %5158 }
0x1a99   : > { %v5099_v7 = vpop.permute.xlu1 %5098  ;;  %v5036_v0 = vpop.permute.xlu0 %5035 }
0x1a9a   : > { %5924 = vmatpush.xpose.msk.msrb.mxu1 %vm979_vm15, %v5036_v0  ;;  %5928 = vmatpush.xpose.msk.msrb.mxu3 %vm979_vm15, %v5099_v7 }
0x1a9d   : > { %5925 = vmatmul.msk.f32.vlgmr.msrb.gmra.mxu1 %vm979_vm15, %v5033_v10  ;;  %5929 = vmatmul.msk.f32.vlgmr.msrb.gmra.mxu3 %vm979_vm15, %v5097_v50 }
0x1aa1   : > { %v5161_v13 = vpop.permute.xlu0 %5160  ;;  %v5221_v53 = vpop.permute.xlu1 %5220 }
0x1aa2   : > { %5932 = vmatpush.xpose.msk.msra.mxu1 %vm979_vm15, %v5161_v13 }
0x1aa5   : > { %5933 = vmatmul.msk.f32.vlgmr.msra.gmra.mxu1 %vm979_vm15, %v5159_v51 }
0x1aa9   : > { %v5223_v4 = vpop.permute.xlu0 %5222 }
0x1aaa   : > { %5936 = vmatpush.xpose.msk.msra.mxu3 %vm979_vm15, %v5223_v4 }
0x1aad   : > { %5937 = vmatmul.msk.f32.vlgmr.msra.gmra.mxu3 %vm979_vm15, %v5221_v53 }
0x1ab1   : > { %v5070_v41 = vpop.permute.xlu0 %5069 }
0x1ab2   : > { %5926 = vmatpush.msk.msra.mxu2 %vm4616_vm14, %v5070_v41 }
0x1b1a   : > { %v5059_v15 = vpop.f32.mrf.mxu1 }
0x1b1b   : > { %v5060_v57 = vadd.f32 %v5059_v15, %v9259_v60  ;;  %v5905_v15 = vld [vmem:[%s9586_s4 + $0xf8] sm:$0xff] }
0x1b1d   : > { %v5062_v23 = vmul.f32 1.442695, %v5060_v57  ;;  %v5901_v57 = vld [vmem:[%s9586_s4 + $0xd8] sm:$0xff] }
0x1b1f   : > { %6595 = vpow2.f32 %v5062_v23  ;;  %v5899_v23 = vld [vmem:[%s9586_s4 + $0xc8] sm:$0xff] }
0x1b20   : > { %v5121_v43 = vpop.f32.mrf.mxu3 }
0x1b21   : > { %v5122_v22 = vadd.f32 %v5121_v43, %v9259_v60  ;;  %v5921_v43 = vld [vmem:[%s9587_s5 + $0x1f8] sm:$0xff] }
0x1b22   : > { %v5183_v54 = vpop.f32.mrf.mxu1  ;;  %5390 = vmatpush.msrb.mxu3 %v5921_v43 }
0x1b23   : > { %v5124_v47 = vmul.f32 1.442695, %v5122_v22  ;;  %v5184_v5 = vadd.f32 %v5183_v54, %v9259_v60  ;;  %v5920_v22 = vld [vmem:[%s9587_s5 + $0x1f0] sm:$0xff]  ;;  %v5919_v54 = vld [vmem:[%s9587_s5 + $0x1e8] sm:$0xff] }
0x1b24   : > { %5391 = vmatpush.msrb.mxu3 %v5920_v22 }
0x1b25   : > { %v6596_v32 = vpop.eup %6595  ;;  %6597 = vpow2.f32 %v5124_v47  ;;  %v5186_v38 = vmul.f32 1.442695, %v5184_v5 }
0x1b26   : > { %v5064_v21 = vsel %vm4604_vm4, %v6596_v32, 0.0  ;;  %5392 = vmatpush.msrb.mxu3 %v5919_v54 }
0x1b27   : > { %6599 = vpow2.f32 %v5186_v38  ;;  %5065 = vadd.xlane.f32.xlu0 %v5064_v21  ;;  %v5917_v21 = vld [vmem:[%s9587_s5 + $0x1d8] sm:$0xff] }
0x1b2b   : > { %v6598_v27 = vpop.eup %6597 }
0x1b2c   : > { %v5126_v20 = vsel %vm4604_vm4, %v6598_v27, 0.0 }
0x1b2d   : > { %v6600_v33 = vpop.eup %6599  ;;  %5127 = vadd.xlane.f32.xlu2 %v5126_v20  ;;  %v5915_v20 = vld [vmem:[%s9587_s5 + $0x1c8] sm:$0xff] }
0x1b2e   : > { %v5188_v61 = vsel %vm4604_vm4, %v6600_v33, 0.0 }
0x1b2f   : > { %5189 = vadd.xlane.f32.xlu1 %v5188_v61 }
0x1b30   : > { %v5245_v63 = vpop.f32.mrf.mxu3 }
0x1b31   : > { %v5246_v62 = vadd.f32 %v5245_v63, %v9259_v60  ;;  %v5913_v63 = vld [vmem:[%s9587_s5 + $0x1b8] sm:$0xff] }
0x1b33   : > { %v5248_v58 = vmul.f32 1.442695, %v5246_v62 }
0x1b35   : > { %6601 = vpow2.f32 %v5248_v58  ;;  %v5912_v58 = vld [vmem:[%s9587_s5 + $0x1b0] sm:$0xff] }
0x1b3b   : > { %v6602_v17 = vpop.eup %6601  ;;  %5255 = vrot.lane.b32.xlu0 %v5031_v12, %s9657_s18  ;;  %s6648_s18 = sshra.s32 %s5482_s24, 4  ;;  %s6649_s18 = int_to_ptr.hbm [resolvable:$true] %s6648_s18 }
0x1b3c   : > { %v5250_v2 = vsel %vm4604_vm4, %v6602_v17, 0.0  ;;  %p6655_p0 = scmp.lt.s32.totalorder %s6649_s18, %s9668_s10 }
0x1b3d   : > { %5251 = vadd.xlane.f32.xlu2 %v5250_v2  ;;  %v5911_v2 = vld [vmem:[%s9587_s5 + $0x1a8] sm:$0xff] }
0x1b48   : > { %5131 = vrot.lane.b32.xlu1 %v5031_v12, %s9654_s23  ;;  %s253_s23 = scalar_lea.vmem [#allocation4], %s5545_s27 }
0x1b49   : > { %s5479_s0 = sshll.u32 %s253_s23, 4  ;;  %s5480_s0 = int_to_ptr.vmem [resolvable:$true] %s5479_s0 }
0x1b50   : > { %6222 = vrot.lane.b32.xlu1 %v6221_v35, %s9658_s19 }
0x1b55   : > { %5193 = vrot.lane.b32.xlu2 %v5031_v12, %s9656_s17  ;;  %v5297_v12 = vperm.slane %v9409_v40, 2  ;;  %s5467_s17 = scalar_lea.sflag [#allocation5], %s251_s26 }
0x1b5d   : > { %6227 = vrot.lane.b32.xlu2 %v6226_v11, %s9658_s19  ;;  %s6650_s19 = scalar_lea.hbm %s6649_s18, 4 }
0x1b5e   : > { %p6651_p11 = scmp.ne.s32.totalorder %s6649_s18, %s6650_s19 }
0x1b60   : > { %p6652_p12 = pnand %p6651_p11, %p6804_p5 }
0x1b62   : > { %p6653_p13 = pneg %p6652_p12 }
0x1b9a   : > { %v5066_v60 = vpop.xlane.xlu0 %5065 }
0x1b9b   : > { %6603 = vrcp.f32 %v5066_v60 }
0x1ba0   : > { %v5128_v36 = vpop.xlane.xlu2 %5127 }
0x1ba1   : > { %v6604_v49 = vpop.eup %6603 }
0x1ba2   : > { %v5068_v25 = vmul.f32 %v6604_v49, %v6596_v32  ;;  %v5190_v18 = vpop.xlane.xlu1 %5189  ;;  %v5918_v32 = vld [vmem:[%s9587_s5 + $0x1e0] sm:$0xff] }
0x1ba3   : > { %6605 = vrcp.f32 %v5190_v18  ;;  %5393 = vmatpush.msrb.mxu3 %v5918_v32  ;;  %v5910_v49 = vld [vmem:[%s9587_s5 + $0x1a0] sm:$0xff] }
0x1ba4   : > { %5927 = vmatmul.msk.f32.vlgmr.msra.gmra.mxu2 %vm4612_vm6, %v5068_v25  ;;  %6607 = vrcp.f32 %v5128_v36  ;;  %v5909_v36 = vld [vmem:[%s9587_s5 + $0x198] sm:$0xff] }
0x1ba5   : > { %5394 = vmatpush.msrb.mxu3 %v5917_v21 }
0x1ba9   : > { %v6606_v45 = vpop.eup %6605 }
0x1baa   : > { %v6608_v24 = vpop.eup %6607  ;;  %v5192_v26 = vmul.f32 %v6606_v45, %v6600_v33  ;;  %v5914_v33 = vld [vmem:[%s9587_s5 + $0x1c0] sm:$0xff] }
0x1bab   : > { %v5130_v42 = vmul.f32 %v6608_v24, %v6598_v27  ;;  %v5916_v27 = vld [vmem:[%s9587_s5 + $0x1d0] sm:$0xff]  ;;  %v5362_v24 = vperm.slane %v9409_v40, 5 }
0x1bac   : > { %5395 = vmatpush.msrb.mxu3 %v5916_v27 }
0x1bad   : > { %v5256_v35 = vpop.permute.xlu0 %5255 }
0x1bae   : > { %5396 = vmatpush.msrb.mxu3 %v5915_v20 }
0x1bb0   : > { %v5252_v8 = vpop.xlane.xlu2 %5251  ;;  %5397 = vmatpush.msrb.mxu3 %v5914_v33 }
0x1bb1   : > { %6609 = vrcp.f32 %v5252_v8  ;;  %v5360_v8 = vperm.slane %v9409_v40, 4 }
0x1bb2   : > { %5398 = vmatpush.msrb.mxu3 %v5913_v63  ;;  %v6235_v63 = vld [vmem:[%s9585_s3 + $0x4] ss:$0 sm:$0xff] }
0x1bb4   : > { %5399 = vmatpush.msrb.mxu3 %v5912_v58  ;;  %v6236_v58 = vld [vmem:[%s9585_s3 + $0x5] ss:$0 sm:$0xff] }
0x1bb6   : > { %5400 = vmatpush.msrb.mxu3 %v5911_v2 }
0x1bb7   : > { %v6610_v19 = vpop.eup %6609 }
0x1bb8   : > { %v5194_v44 = vpop.permute.xlu2 %5193  ;;  %v5254_v11 = vmul.f32 %v6610_v19, %v6602_v17  ;;  %5401 = vmatpush.msrb.mxu3 %v5910_v49  ;;  %v5906_v19 = vld [vmem:[%s9587_s5 + $0x180] sm:$0xff] }
0x1bb9   : > { %5934 = vmatpush.msk.msrb.mxu2 %vm4616_vm14, %v5194_v44 }
0x1bba   : > { %v5132_v46 = vpop.permute.xlu1 %5131  ;;  %5935 = vmatmul.msk.f32.vlgmr.msrb.gmra.mxu2 %vm4612_vm6, %v5192_v26  ;;  %5402 = vmatpush.msrb.mxu3 %v5909_v36 }
0x1bbb   : > { %5930 = vmatpush.msk.msra.mxu0 %vm4616_vm14, %v5132_v46  ;;  %5380 = vmatpush.msra.mxu2 %v5905_v15  ;;  %v5908_v46 = vld [vmem:[%s9587_s5 + $0x190] sm:$0xff] }
0x1bbc   : > { %5931 = vmatmul.msk.f32.vlgmr.msra.gmra.mxu0 %vm4612_vm6, %v5130_v42  ;;  %5403 = vmatpush.msrb.mxu3 %v5908_v46 }
0x1bbd   : > { %5938 = vmatpush.msk.msrb.mxu0 %vm4616_vm14, %v5256_v35  ;;  %v5907_v35 = vld [vmem:[%s9587_s5 + $0x188] sm:$0xff] }
0x1bbe   : > { %5404 = vmatpush.msrb.mxu3 %v5907_v35 }
0x1bc0   : > { %v6228_v14 = vpop.permute.xlu2 %6227  ;;  %5405 = vmatpush.msrb.mxu3 %v5906_v19 }
0x1bc1   : > { %v6230_v39 = vunpack.i.h.bf16 %v6228_v14  ;;  %v6229_v6 = vunpack.i.l.bf16 %v6228_v14 }
0x1bc2   : > { %v6223_v1 = vpop.permute.xlu1 %6222 }
0x1bc3   : > { %v6225_v55 = vunpack.i.h.bf16 %v6223_v1  ;;  %v6224_v30 = vunpack.i.l.bf16 %v6223_v1 }
0x1bc4   : > { %5939 = vmatmul.msk.f32.vlgmr.msrb.gmra.mxu0 %vm4612_vm6, %v5254_v11  ;;  %v5364_v11 = vperm.slane %v9409_v40, 1 }
0x1bc5   : > { %5329 = vmatpush.msrb.mxu1 %v6224_v30 }
0x1bc7   : > { %5330 = vmatpush.msrb.mxu1 %v6225_v55 }
0x1bc9   : > { %5331 = vmatpush.msrb.mxu1 %v6229_v6 }
0x1bcb   : > { %5332 = vmatpush.msrb.mxu1 %v6230_v39 }
0x1c27   : > { %v5093_v34 = vpop.f32.mrf.mxu2 }
0x1c39   : > { %v5155_v52 = vpop.f32.mrf.mxu0 }
0x1c3a   : > { %5283 = vrot.lane.b32.xlu0 %v5155_v52, %s9659_s21 }
0x1c3d   : > { %v5217_v16 = vpop.f32.mrf.mxu2 }
0x1c3e   : > { %5287 = vrot.lane.b32.xlu1 %v5217_v16, %s9660_s20 }
0x1c41   : > { %v5279_v59 = vpop.f32.mrf.mxu0 }
0x1c42   : > { %5291 = vrot.lane.b32.xlu0 %v5279_v59, %s9661_s22  ;;  %s6654_s22 = scalar_lea.hbm %s9668_s10, 8 }
0x1c43   : > { %p6656_p1 = scmp.lt.s32.totalorder %s6654_s22, %s6650_s19 }
0x1c45   : > { %p6657_p2 = por %p6656_p1, %p6655_p0 }
0x1c47   : > { %p6658_p3 = pnand %p6657_p2, %p6653_p13 }
0x1cac   : > { %v5284_v28 = vpop.permute.xlu0 %5283 }
0x1cad   : > { %v5294_v56 = vsel %vm979_vm15, %v5093_v34, %v5284_v28  ;;  %v5389_v34 = vperm.slane %v9409_v40, 3 }
0x1cb0   : > { %v5288_v9 = vpop.permute.xlu1 %5287 }
0x1cb1   : > { %v5295_v37 = vsel %vm2061_vm2, %v5294_v56, %v5288_v9 }
0x1cb4   : > { %v5292_v48 = vpop.permute.xlu0 %5291 }
0x1cb5   : > { %v5296_v3 = vsel %vm2070_vm3, %v5295_v37, %v5292_v48 }
0x1cb6   : > { %5940 = vmatmul.msk.f32.vlgmr.msrb.gmra.mxu1 %vm495_vm12, %v5296_v3 }
0x1d33   : > { %v5334_v10 = vpop.f32.mrf.mxu1 }
0x1d34   : > { %v5335_v7 = vadd.f32 %v5334_v10, %v5297_v12 }
0x1d36   : > { %v5337_v0 = vadd.f32 %v5335_v7, %v9402_v29  ;;  %v5903_v29 = vld [vmem:[%s9586_s4 + $0xe8] sm:$0xff] }
0x1d37   : > { %5381 = vmatpush.msra.mxu2 %v5903_v29 }
0x1d38   : > { %v5338_v50 = vsel %vm4881_vm7, %v5337_v0, 0.0 }
0x1d39   : > { %5339 = vadd.xlane.f32.xlu2 %v5338_v50  ;;  %5382 = vmatpush.msra.mxu2 %v5901_v57 }
0x1d3b   : > { %5383 = vmatpush.msra.mxu2 %v5899_v23 }
0x1dac   : > { %v5340_v13 = vpop.xlane.xlu2 %5339 }
0x1dad   : > { %v5341_v51 = vmul.f32 %v5340_v13, %v6943_v31 }
0x1daf   : > { %v5342_v4 = vsub.f32 %v5337_v0, %v5341_v51  ;;  %v5433_v51 = vperm.slane %v9409_v40, 6 }
0x1db1   : > { %v5343_v53 = vmul.f32 %v5342_v4, %v5342_v4 }
0x1db3   : > { %v5344_v41 = vsel %vm4881_vm7, %v5343_v53, 0.0 }
0x1db4   : > { %5345 = vadd.xlane.f32.xlu1 %v5344_v41  ;;  %v5435_v41 = vperm.slane %v9409_v40, 7 }
0x1e27   : > { %v5346_v47 = vpop.xlane.xlu1 %5345 }
0x1e28   : > { %v5347_v5 = vmul.f32 %v5346_v47, %v6943_v31 }
0x1e2a   : > { %v5348_v38 = vadd.f32 1e-05, %v5347_v5 }
0x1e2c   : > { %6611 = vrsqrt.f32 %v5348_v38  ;;  %vm5355_vm2 = vweird.f32 %v5348_v38 }
0x1e32   : > { %v6612_v61 = vpop.eup %6611 }
0x1e33   : > { %v5350_v62 = vmul.f32 %v6612_v61, %v5348_v38  ;;  %vm5356_vm15 = vweird.f32 %v6612_v61 }
0x1e34   : > { %vm5357_vm3 = vmor %vm5355_vm2, %vm5356_vm15 }
0x1e35   : > { %v5351_v17 = vmul.f32 %v6612_v61, %v5350_v62 }
0x1e37   : > { %v5352_v60 = vmul.f32 0.5, %v5351_v17 }
0x1e39   : > { %v5353_v25 = vsub.f32 1.5, %v5352_v60 }
0x1e3b   : > { %v5354_v18 = vmul.f32 %v6612_v61, %v5353_v25 }
0x1e3d   : > { %v5358_v45 = vsel %vm5357_vm3, %v6612_v61, %v5354_v18 }
0x1e3e   : > { %v5359_v26 = vmul.f32 %v5358_v45, %v5342_v4 }
0x1e40   : > { %v5361_v44 = vmul.f32 %v5360_v8, %v5359_v26 }
0x1e42   : > { %v5363_v42 = vadd.f32 %v5362_v24, %v5361_v44 }
0x1e44   : > { %5941 = vmatmul.msk.f32.vlgmr.msra.gmra.mxu2 %vm495_vm12, %v5363_v42 }
0x1ec7   : > { %v5385_v1 = vpop.f32.mrf.mxu2 }
0x1ec8   : > { %v5386_v55 = vadd.f32 %v5385_v1, %v5364_v11 }
0x1eca   : > { %v5388_v30 = vmax.f32 %v5386_v55, 0.0 }
0x1ecc   : > { %5406 = vmatmul.f32.vlgmr.msrb.gmra.mxu3 %v5388_v30 }
0x1f4f   : > { %v5407_v52 = vpop.f32.mrf.mxu3 }
0x1f50   : > { %v5408_v16 = vadd.f32 %v5407_v52, %v5389_v34 }
0x1f52   : > { %v5410_v59 = vadd.f32 %v5408_v16, %v5363_v42 }
0x1f54   : > { %v5411_v14 = vsel %vm4881_vm7, %v5410_v59, 0.0 }
0x1f55   : > { %5412 = vadd.xlane.f32.xlu0 %v5411_v14 }
0x1fc8   : > { %v5413_v39 = vpop.xlane.xlu0 %5412 }
0x1fc9   : > { %v5414_v6 = vmul.f32 %v5413_v39, %v6943_v31 }
0x1fcb   : > { %v5415_v28 = vsub.f32 %v5410_v59, %v5414_v6 }
0x1fcd   : > { %v5416_v9 = vmul.f32 %v5415_v28, %v5415_v28 }
0x1fcf   : > { %v5417_v56 = vsel %vm4881_vm7, %v5416_v9, 0.0 }
0x1fd0   : > { %5418 = vadd.xlane.f32.xlu2 %v5417_v56 }
0x2043   : > { %v5419_v37 = vpop.xlane.xlu2 %5418 }
0x2044   : > { %v5420_v48 = vmul.f32 %v5419_v37, %v6943_v31 }
0x2046   : > { %v5421_v3 = vadd.f32 1e-05, %v5420_v48 }
0x2048   : > { %6613 = vrsqrt.f32 %v5421_v3  ;;  %vm5428_vm13 = vweird.f32 %v5421_v3 }
0x204e   : > { %v6614_v12 = vpop.eup %6613 }
0x204f   : > { %v5423_v10 = vmul.f32 %v6614_v12, %v5421_v3  ;;  %vm5429_vm12 = vweird.f32 %v6614_v12 }
0x2050   : > { %vm5430_vm14 = vmor %vm5428_vm13, %vm5429_vm12 }
0x2051   : > { %v5424_v7 = vmul.f32 %v6614_v12, %v5423_v10 }
0x2053   : > { %v5425_v0 = vmul.f32 0.5, %v5424_v7 }
0x2055   : > { %v5426_v50 = vsub.f32 1.5, %v5425_v0 }
0x2057   : > { %v5427_v13 = vmul.f32 %v6614_v12, %v5426_v50 }
0x2059   : > { %v5431_v4 = vsel %vm5430_vm14, %v6614_v12, %v5427_v13 }
0x205a   : > { %v5432_v53 = vmul.f32 %v5431_v4, %v5415_v28 }
0x205c   : > { %v5434_v15 = vmul.f32 %v5433_v51, %v5432_v53 }
0x205e   : > { %v5436_v29 = vadd.f32 %v5435_v41, %v5434_v15 }
0x2060   : > { %v5439_v57 = vsel %vm4881_vm7, %v5436_v29, 0.0 }
0x2061   : > { %5440 = vadd.xlane.f32.xlu1 %v5439_v57 }
0x20d4   : > { %v5441_v23 = vpop.xlane.xlu1 %5440 }
0x20d5   : > { %v5442_v43 = vmul.f32 %v5441_v23, %v6943_v31 }
0x20d7   : > { %v5443_v22 = vsub.f32 %v5436_v29, %v5442_v43 }
0x20d9   : > { %v5444_v54 = vmul.f32 %v5443_v22, %v5443_v22 }
0x20db   : > { %v5445_v47 = vsel %vm4881_vm7, %v5444_v54, 0.0 }
0x20dc   : > { %5446 = vadd.xlane.f32.xlu0 %v5445_v47 }
0x214f   : > { %v5447_v5 = vpop.xlane.xlu0 %5446 }
0x2150   : > { %v5448_v32 = vmul.f32 %v5447_v5, %v6943_v31 }
0x2152   : > { %v5449_v38 = vadd.f32 1e-05, %v5448_v32 }
0x2154   : > { %6615 = vrsqrt.f32 %v5449_v38  ;;  %vm5456_vm4 = vweird.f32 %v5449_v38 }
0x215a   : > { %v6616_v40 = vpop.eup %6615 }
0x215b   : > { %v5451_v21 = vmul.f32 %v6616_v40, %v5449_v38  ;;  %vm5457_vm1 = vweird.f32 %v6616_v40 }
0x215c   : > { %vm5458_vm6 = vmor %vm5456_vm4, %vm5457_vm1 }
0x215d   : > { %v5452_v27 = vmul.f32 %v6616_v40, %v5451_v21 }
0x215f   : > { %v5453_v20 = vmul.f32 0.5, %v5452_v27 }
0x2161   : > { %v5454_v33 = vsub.f32 1.5, %v5453_v20 }
0x2163   : > { %v5455_v61 = vmul.f32 %v6616_v40, %v5454_v33 }
0x2165   : > { %v5459_v31 = vsel %vm5458_vm6, %v6616_v40, %v5455_v61 }
0x2166   : > { %v5460_v62 = vmul.f32 %v5459_v31, %v5443_v22 }
0x2168   : > { %v5462_v17 = vmul.f32 %v6235_v63, %v5460_v62 }
0x216a   : > { %v5464_v2 = vadd.f32 %v6236_v58, %v5462_v17 }
0x216c   : > { %5465 = vst.msk [vmem:[%s253_s23] sm:$0xf] %vm4881_vm7, %v5464_v2 }
0x216d   : > { %6661 = shalt.err (!%p6658_p3)
}
0x216e   : > { %5951 = dma.vmem_to_hbm [thread:$0]  (%p6804_p5), %s5480_s0, 64, %s5482_s24, %s5467_s17  }
0x216f PF: > { %s9670_s2 = sld [smem:[#allocation10_spill]] }
0x2170   : > { %s9671_s13 = sld [smem:[#allocation8_spill]] }
0x2175   : > { %p5957_p4 = scmp.ge.s32.totalorder %s9670_s2, 2 }
0x2176   : > { %s5493_s26 = sand.u32 1, %s9671_s13  }
0x2177   : > { %p5954_p7 = pnand %p5957_p4, %p6808_p6  ;;  %s5494_s27 = scalar_lea.sflag [#allocation5], %s5493_s26 }
0x2179   : > { %p5955_p8 = pneg %p5954_p7 }
0x217b   : > { %6681 = dma.done.wait (%p5955_p8), %s5494_s27, 64  }
0x217c   : > { %6683 = vsyncadd (%p5955_p8), %s5494_s27, 4294967232  ;;  %s9673_s8 = sld [smem:[#allocation11_spill]]  ;;  %s9676_s28 = smov %s6690_s29 }
0x217d   : > { %s9674_s30 = sld [smem:[#allocation9_spill]] }
0x217e   : > { %s9675_s9 = sld [smem:[#allocation12_spill]] }
0x2182   : > { %p25_p9 = scmp.ge.s32.totalorder %s9673_s8, 4  }
0x2183   : > { %s9677_s29 = smov %s9674_s30 }
0x2184   : > { %s9678_s30 = smov %s9675_s9  ;;  %27 = sbr.rel (!%p25_p9) target bundleno = 11 (0xb), region = 88 }
0x2189   :  { %5500 = vsyncpa [#allocation5], 1 }
0x218a   :  { %5502 = vsyncpa [#allocation5 + $0x1], 1 }

</bundles_post_ra>
